<compile_context>
chip_gen: v5e
topology: v5e:2x2
jax: 0.10.0
libtpu: 0.0.40
codegen_flags: <defaults>
</compile_context>

<pallas_src>
from functools import partial

import jax
import jax.numpy as jnp
from jax.experimental import pallas as pl
from jax.experimental.pallas import tpu as pltpu

P = 128            # lane tile (padded feature / hidden size)
G = 4 * P          # 4 gates, each in its own lane-aligned 128-column block


def _sigmoid1(x):
    """Logistic via a single EUP tanh: sigmoid(x) = 0.5*tanh(0.5*x) + 0.5."""
    return 0.5 * jnp.tanh(0.5 * x) + 0.5


def _decoder_kernel(x_ref, wih_ref, whh_ref, b_ref, out_ref, gx_sc, h_sc, c_sc):
    """All LSTM layers fused; x_ref/out_ref are time-major (T, Bb, P) bf16."""
    T, Bb, Pl = out_ref.shape
    n_layers = wih_ref.shape[0]

    # out_ref is the resident activation buffer for every layer.
    out_ref[...] = x_ref[...]

    for layer in range(n_layers):                    # static unroll over layers
        w_ih = wih_ref[layer]                        # (P, 4P) bf16
        w_hh = whh_ref[layer]                        # (P, 4P) bf16
        bias = b_ref[layer]                          # (1, 4P) f32 (= bias_ih + bias_hh)

        # Hoisted (non-recurrent) input projection: one MXU matmul, M = T*Bb.
        xs = out_ref[...].reshape(T * Bb, Pl)        # bf16, layout-preserving reshape
        gx = jnp.dot(xs, w_ih, preferred_element_type=jnp.float32) + bias
        gx_sc[...] = gx.reshape(T, Bb, 4 * Pl).astype(gx_sc.dtype)

        h_sc[...] = jnp.zeros_like(h_sc)
        c_sc[...] = jnp.zeros_like(c_sc)

        def step(t, carry):
            # Only the recurrent h @ W_hh is on the serial critical path.
            gates = gx_sc[t].astype(jnp.float32) + jnp.dot(
                h_sc[...].astype(jnp.bfloat16), w_hh,
                preferred_element_type=jnp.float32)
            # PyTorch gate order i, f, g, o — each gate is a full 128-lane block.
            i_g = _sigmoid1(gates[:, 0 * Pl:1 * Pl])
            f_g = _sigmoid1(gates[:, 1 * Pl:2 * Pl])
            g_g = jnp.tanh(gates[:, 2 * Pl:3 * Pl])
            o_g = _sigmoid1(gates[:, 3 * Pl:4 * Pl])
            c_new = f_g * c_sc[...] + i_g * g_g
            h_new = o_g * jnp.tanh(c_new)
            c_sc[...] = c_new
            h_sc[...] = h_new
            out_ref[t] = h_new.astype(out_ref.dtype)  # next layer's input / output
            return carry

        # Cap unroll so large T doesn't bloat the instruction stream / vregs.
        jax.lax.fori_loop(0, T, step, 0, unroll=min(T, 8))


def _pad_gate_blocks(w_t, d_in, h):
    """w_t: (d_in, 4h) pre-transposed [i|f|g|o] -> (P, 4P) lane-aligned gate blocks."""
    blocks = []
    for k in range(4):
        blk = w_t[:, k * h:(k + 1) * h]
        blocks.append(jnp.pad(blk, ((0, P - d_in), (0, P - h))))
    return jnp.concatenate(blocks, axis=1)


def _pad_gate_bias(b, h):
    """b: (4h,) combined bias -> (1, 4P) lane-aligned."""
    blocks = [jnp.pad(b[k * h:(k + 1) * h], (0, P - h)) for k in range(4)]
    return jnp.concatenate(blocks).reshape(1, G)


def init_decoder_params(key, input_size, code_size, intr_size, num_layers):
    """Synthetic params matching Decoder.init_weights intent: zero biases,
    kaiming-normal W_ih, orthogonal W_hh.  Weights are stored pre-transposed
    (d_in, 4h), gate-block padded to 128 lanes, stacked over all layers, bf16.
    (Importing trained PyTorch weights would need: transpose, keep i|f|g|o
    order, and sum bias_ih + bias_hh into the single bias tensor.)"""
    dims = []
    for l in range(num_layers):                       # lstm3: code -> intr
        dims.append((code_size if l == 0 else intr_size, intr_size))
    for l in range(num_layers):                       # lstm4: intr -> input
        dims.append((intr_size if l == 0 else input_size, input_size))

    wih_l, whh_l, b_l = [], [], []
    for d_in, h in dims:
        assert d_in <= P and h <= P, "feature/hidden sizes must be <= 128"
        key, k1, k2 = jax.random.split(key, 3)
        # kaiming_normal_ on (4h, d_in), stored transposed (d_in, 4h)
        w_ih = jax.random.normal(k1, (d_in, 4 * h), jnp.float32) * jnp.sqrt(2.0 / d_in)
        # orthogonal_ on (4h, h): orthonormal columns, stored transposed (h, 4h)
        a = jax.random.normal(k2, (4 * h, h), jnp.float32)
        q, _ = jnp.linalg.qr(a)
        w_hh = q.T.astype(jnp.float32)
        b = jnp.zeros((4 * h,), jnp.float32)          # bias_ih + bias_hh = 0

        wih_l.append(_pad_gate_blocks(w_ih, d_in, h).astype(jnp.bfloat16))
        whh_l.append(_pad_gate_blocks(w_hh, h, h).astype(jnp.bfloat16))
        b_l.append(_pad_gate_bias(b, h))

    wih_all = jnp.stack(wih_l)                        # (L, P, 4P) bf16
    whh_all = jnp.stack(whh_l)                        # (L, P, 4P) bf16
    b_all = jnp.stack(b_l)                            # (L, 1, 4P) f32
    return (wih_all, whh_all, b_all), key, dims


@partial(jax.jit, static_argnums=(4,))
def decoder_forward(code_btf, wih_all, whh_all, b_all, input_size):
    """Matches Decoder.forward; input/output are batch_first (B, T, F) f32."""
    B, T, D = code_btf.shape
    Bp = max(8, ((B + 7) // 8) * 8)                   # pad batch to a sublane tile
    # One batch block at toy sizes.  On v7x with large B, use Bb = Bp // 2 so
    # the "parallel" grid axis splits the batch across the 2 TensorCores.
    Bb = Bp
    L = wih_all.shape[0]

    # Single fused XLA copy: batch_first -> time-major + pad + cast to bf16.
    x = jnp.transpose(code_btf, (1, 0, 2))            # (T, B, D)
    x = jnp.pad(x, ((0, 0), (0, Bp - B), (0, P - D))).astype(jnp.bfloat16)

    out = pl.pallas_call(
        _decoder_kernel,
        out_shape=jax.ShapeDtypeStruct((T, Bp, P), jnp.bfloat16),
        grid_spec=pltpu.PrefetchScalarGridSpec(
            num_scalar_prefetch=0,
            grid=(Bp // Bb,),                         # batch blocks (1 here)
            in_specs=[
                pl.BlockSpec((T, Bb, P), lambda b: (0, b, 0)),   # padded input seq
                pl.BlockSpec((L, P, G), lambda b: (0, 0, 0)),    # all W_ih (resident)
                pl.BlockSpec((L, P, G), lambda b: (0, 0, 0)),    # all W_hh (resident)
                pl.BlockSpec((L, 1, G), lambda b: (0, 0, 0)),    # all biases
            ],
            out_specs=pl.BlockSpec((T, Bb, P), lambda b: (0, b, 0)),
            scratch_shapes=[
                pltpu.VMEM((T, Bb, G), jnp.bfloat16),  # hoisted input-proj gates (bf16)
                pltpu.VMEM((Bb, P), jnp.float32),      # h state
                pltpu.VMEM((Bb, P), jnp.float32),      # c state
            ],
        ),
        compiler_params=pltpu.CompilerParams(
            dimension_semantics=("parallel",),         # batch blocks independent
            vmem_limit_bytes=32 * 1024 * 1024,
        ),
    )(x, wih_all, whh_all, b_all)

    # Single fused XLA copy: un-pad + back to batch_first, f32 like the module.
    return jnp.transpose(out[:, :B, :input_size], (1, 0, 2)).astype(jnp.float32)


def _decoder_ref(code_btf, wih_all, whh_all, b_all, input_size):
    """Pure-JAX f32 reference in the same padded gate-block space."""
    B, T, D = code_btf.shape
    Bp = max(8, ((B + 7) // 8) * 8)
    x = jnp.transpose(code_btf, (1, 0, 2))
    act = jnp.pad(x, ((0, 0), (0, Bp - B), (0, P - D)))
    for layer in range(wih_all.shape[0]):
        w_ih = wih_all[layer].astype(jnp.float32)
        w_hh = whh_all[layer].astype(jnp.float32)
        bias = b_all[layer].astype(jnp.float32)
        h = jnp.zeros((Bp, P), jnp.float32)
        c = jnp.zeros((Bp, P), jnp.float32)
        outs = []
        for t in range(T):
            gates = act[t] @ w_ih + bias + h @ w_hh
            i_g = jax.nn.sigmoid(gates[:, 0 * P:1 * P])
            f_g = jax.nn.sigmoid(gates[:, 1 * P:2 * P])
            g_g = jnp.tanh(gates[:, 2 * P:3 * P])
            o_g = jax.nn.sigmoid(gates[:, 3 * P:4 * P])
            c = f_g * c + i_g * g_g
            h = o_g * jnp.tanh(c)
            outs.append(h)
        act = jnp.stack(outs)
    return jnp.transpose(act[:, :B, :input_size], (1, 0, 2))


if __name__ == "__main__":
    # Small shapes consistent with the module's forward contract.
    batch, timesteps = 2, 8
    input_size, code_size, intr_size, num_layers = 16, 8, 32, 2

    key = jax.random.PRNGKey(0)
    key, kx = jax.random.split(key)
    code = jax.random.normal(kx, (batch, timesteps, code_size), jnp.float32)

    (wih_all, whh_all, b_all), key, _ = init_decoder_params(
        key, input_size, code_size, intr_size, num_layers)

    reproduced = decoder_forward(code, wih_all, whh_all, b_all, input_size)
    reproduced = jax.block_until_ready(reproduced)

    assert reproduced.shape == (batch, timesteps, input_size), reproduced.shape
    assert reproduced.dtype == jnp.float32
    assert bool(jnp.all(jnp.isfinite(reproduced)))

    # Correctness vs pure-JAX f32 reference (bf16 operands -> loose tolerance).
    ref = _decoder_ref(code, wih_all, whh_all, b_all, input_size)
    max_err = float(jnp.max(jnp.abs(reproduced - ref)))
    assert max_err < 8e-2, f"max abs err vs reference: {max_err}"

    print("KERNEL_OK")
</pallas_src>

<mosaic_0001>
module attributes {stable_mosaic.version = 11 : i64} {
  func.func @_decoder_kernel(%arg0: i32, %arg1: memref<8x8x128xbf16, #tpu.memory_space<vmem>>, %arg2: memref<4x128x512xbf16, #tpu.memory_space<vmem>>, %arg3: memref<4x128x512xbf16, #tpu.memory_space<vmem>>, %arg4: memref<4x1x512xf32, #tpu.memory_space<vmem>>, %arg5: memref<8x8x128xbf16, #tpu.memory_space<vmem>>, %arg6: memref<8x8x512xbf16, #tpu.memory_space<vmem>>, %arg7: memref<8x128xf32, #tpu.memory_space<vmem>>, %arg8: memref<8x128xf32, #tpu.memory_space<vmem>>) attributes {dimension_semantics = [#tpu.dimension_semantics<parallel>], iteration_bounds = array<i64: 1>, scalar_prefetch = 0 : i64, scratch_operands = 3 : i64, tpu.core_type = #tpu.core_type<tc>, window_params = [{transform_indices = @transform_0, window_bounds = array<i64: 8, 8, 128>}, {pipeline_mode = #tpu.pipeline_mode<synchronous>, transform_indices = @transform_1, window_bounds = array<i64: 4, 128, 512>}, {pipeline_mode = #tpu.pipeline_mode<synchronous>, transform_indices = @transform_2, window_bounds = array<i64: 4, 128, 512>}, {pipeline_mode = #tpu.pipeline_mode<synchronous>, transform_indices = @transform_3, window_bounds = array<i64: 4, 1, 512>}, {transform_indices = @transform_4, window_bounds = array<i64: 8, 8, 128>}]} {
    %c0 = arith.constant 0 : index
    %c0_0 = arith.constant 0 : index
    %c0_1 = arith.constant 0 : index
    %0 = vector.load %arg1[%c0, %c0_0, %c0_1] : memref<8x8x128xbf16, #tpu.memory_space<vmem>>, vector<8x8x128xbf16>
    %c0_2 = arith.constant 0 : index
    %c0_3 = arith.constant 0 : index
    %c0_4 = arith.constant 0 : index
    %1 = vector.load %arg5[%c0_2, %c0_3, %c0_4] : memref<8x8x128xbf16, #tpu.memory_space<vmem>>, vector<8x8x128xbf16>
    tpu.vector_store %arg5[%c0_2, %c0_3, %c0_4], %0 {strides = array<i32>} : memref<8x8x128xbf16, #tpu.memory_space<vmem>>, vector<8x8x128xbf16>,
    %c0_5 = arith.constant 0 : index
    %c0_6 = arith.constant 0 : index
    %c0_7 = arith.constant 0 : index
    %2 = vector.load %arg2[%c0_5, %c0_6, %c0_7] : memref<4x128x512xbf16, #tpu.memory_space<vmem>>, vector<1x128x512xbf16>
    %3 = vector.shape_cast %2 : vector<1x128x512xbf16> to vector<128x512xbf16>
    %c0_8 = arith.constant 0 : index
    %c0_9 = arith.constant 0 : index
    %c0_10 = arith.constant 0 : index
    %4 = vector.load %arg3[%c0_8, %c0_9, %c0_10] : memref<4x128x512xbf16, #tpu.memory_space<vmem>>, vector<1x128x512xbf16>
    %5 = vector.shape_cast %4 : vector<1x128x512xbf16> to vector<128x512xbf16>
    %c0_11 = arith.constant 0 : index
    %c0_12 = arith.constant 0 : index
    %c0_13 = arith.constant 0 : index
    %6 = vector.load %arg4[%c0_11, %c0_12, %c0_13] : memref<4x1x512xf32, #tpu.memory_space<vmem>>, vector<1x1x512xf32>
    %7 = vector.shape_cast %6 : vector<1x1x512xf32> to vector<1x512xf32>
    %c0_14 = arith.constant 0 : index
    %c0_15 = arith.constant 0 : index
    %c0_16 = arith.constant 0 : index
    %8 = vector.load %arg5[%c0_14, %c0_15, %c0_16] : memref<8x8x128xbf16, #tpu.memory_space<vmem>>, vector<8x8x128xbf16>
    %9 = vector.shape_cast %8 : vector<8x8x128xbf16> to vector<64x128xbf16>
    %cst = arith.constant dense<0.000000e+00> : vector<64x512xf32>
    %10 = tpu.matmul %9, %3, %cst {dimension_numbers = #tpu.dot_dimension_numbers<[1], [0], [0], [1], [0, 0, 1, 1], [], []>} : vector<64x128xbf16>, vector<128x512xbf16>, vector<64x512xf32> -> vector<64x512xf32>
    %11 = vector.broadcast %7 : vector<1x512xf32> to vector<64x512xf32>
    %12 = arith.addf %10, %11 : vector<64x512xf32>
    %13 = vector.shape_cast %12 : vector<64x512xf32> to vector<8x8x512xf32>
    %14 = arith.truncf %13 : vector<8x8x512xf32> to vector<8x8x512xbf16>
    %c0_17 = arith.constant 0 : index
    %c0_18 = arith.constant 0 : index
    %c0_19 = arith.constant 0 : index
    %15 = vector.load %arg6[%c0_17, %c0_18, %c0_19] : memref<8x8x512xbf16, #tpu.memory_space<vmem>>, vector<8x8x512xbf16>
    tpu.vector_store %arg6[%c0_17, %c0_18, %c0_19], %14 {strides = array<i32>} : memref<8x8x512xbf16, #tpu.memory_space<vmem>>, vector<8x8x512xbf16>,
    %cst_20 = arith.constant 0.000000e+00 : f32
    %16 = vector.broadcast %cst_20 : f32 to vector<8x128xf32>
    %c0_21 = arith.constant 0 : index
    %c0_22 = arith.constant 0 : index
    %17 = vector.load %arg7[%c0_21, %c0_22] : memref<8x128xf32, #tpu.memory_space<vmem>>, vector<8x128xf32>
    tpu.vector_store %arg7[%c0_21, %c0_22], %16 {strides = array<i32>} : memref<8x128xf32, #tpu.memory_space<vmem>>, vector<8x128xf32>,
    %cst_23 = arith.constant 0.000000e+00 : f32
    %18 = vector.broadcast %cst_23 : f32 to vector<8x128xf32>
    %c0_24 = arith.constant 0 : index
    %c0_25 = arith.constant 0 : index
    %19 = vector.load %arg8[%c0_24, %c0_25] : memref<8x128xf32, #tpu.memory_space<vmem>>, vector<8x128xf32>
    tpu.vector_store %arg8[%c0_24, %c0_25], %18 {strides = array<i32>} : memref<8x128xf32, #tpu.memory_space<vmem>>, vector<8x128xf32>,
    %c0_i32 = arith.constant 0 : i32
    %20 = arith.index_cast %c0_i32 : i32 to index
    %c0_26 = arith.constant 0 : index
    %c0_27 = arith.constant 0 : index
    %21 = vector.load %arg6[%20, %c0_26, %c0_27] : memref<8x8x512xbf16, #tpu.memory_space<vmem>>, vector<1x8x512xbf16>
    %22 = vector.shape_cast %21 : vector<1x8x512xbf16> to vector<8x512xbf16>
    %23 = arith.extf %22 : vector<8x512xbf16> to vector<8x512xf32>
    %c0_28 = arith.constant 0 : index
    %c0_29 = arith.constant 0 : index
    %24 = vector.load %arg7[%c0_28, %c0_29] : memref<8x128xf32, #tpu.memory_space<vmem>>, vector<8x128xf32>
    %25 = arith.truncf %24 : vector<8x128xf32> to vector<8x128xbf16>
    %cst_30 = arith.constant dense<0.000000e+00> : vector<8x512xf32>
    %26 = tpu.matmul %25, %5, %cst_30 {dimension_numbers = #tpu.dot_dimension_numbers<[1], [0], [0], [1], [0, 0, 1, 1], [], []>} : vector<8x128xbf16>, vector<128x512xbf16>, vector<8x512xf32> -> vector<8x512xf32>
    %27 = arith.addf %23, %26 : vector<8x512xf32>
    %28 = vector.extract_strided_slice %27 {offsets = [0, 0], sizes = [8, 128], strides = [1, 1]} : vector<8x512xf32> to vector<8x128xf32>
    %cst_31 = arith.constant 5.000000e-01 : f32
    %29 = vector.broadcast %cst_31 : f32 to vector<8x128xf32>
    %30 = arith.mulf %29, %28 : vector<8x128xf32>
    %31 = math.tanh %30 : vector<8x128xf32>
    %cst_32 = arith.constant 5.000000e-01 : f32
    %32 = vector.broadcast %cst_32 : f32 to vector<8x128xf32>
    %33 = arith.mulf %32, %31 : vector<8x128xf32>
    %cst_33 = arith.constant 5.000000e-01 : f32
    %34 = vector.broadcast %cst_33 : f32 to vector<8x128xf32>
    %35 = arith.addf %33, %34 : vector<8x128xf32>
    %36 = vector.extract_strided_slice %27 {offsets = [0, 128], sizes = [8, 128], strides = [1, 1]} : vector<8x512xf32> to vector<8x128xf32>
    %cst_34 = arith.constant 5.000000e-01 : f32
    %37 = vector.broadcast %cst_34 : f32 to vector<8x128xf32>
    %38 = arith.mulf %37, %36 : vector<8x128xf32>
    %39 = math.tanh %38 : vector<8x128xf32>
    %cst_35 = arith.constant 5.000000e-01 : f32
    %40 = vector.broadcast %cst_35 : f32 to vector<8x128xf32>
    %41 = arith.mulf %40, %39 : vector<8x128xf32>
    %cst_36 = arith.constant 5.000000e-01 : f32
    %42 = vector.broadcast %cst_36 : f32 to vector<8x128xf32>
    %43 = arith.addf %41, %42 : vector<8x128xf32>
    %44 = vector.extract_strided_slice %27 {offsets = [0, 256], sizes = [8, 128], strides = [1, 1]} : vector<8x512xf32> to vector<8x128xf32>
    %45 = math.tanh %44 : vector<8x128xf32>
    %46 = vector.extract_strided_slice %27 {offsets = [0, 384], sizes = [8, 128], strides = [1, 1]} : vector<8x512xf32> to vector<8x128xf32>
    %cst_37 = arith.constant 5.000000e-01 : f32
    %47 = vector.broadcast %cst_37 : f32 to vector<8x128xf32>
    %48 = arith.mulf %47, %46 : vector<8x128xf32>
    %49 = math.tanh %48 : vector<8x128xf32>
    %cst_38 = arith.constant 5.000000e-01 : f32
    %50 = vector.broadcast %cst_38 : f32 to vector<8x128xf32>
    %51 = arith.mulf %50, %49 : vector<8x128xf32>
    %cst_39 = arith.constant 5.000000e-01 : f32
    %52 = vector.broadcast %cst_39 : f32 to vector<8x128xf32>
    %53 = arith.addf %51, %52 : vector<8x128xf32>
    %c0_40 = arith.constant 0 : index
    %c0_41 = arith.constant 0 : index
    %54 = vector.load %arg8[%c0_40, %c0_41] : memref<8x128xf32, #tpu.memory_space<vmem>>, vector<8x128xf32>
    %55 = arith.mulf %43, %54 : vector<8x128xf32>
    %56 = arith.mulf %35, %45 : vector<8x128xf32>
    %57 = arith.addf %55, %56 : vector<8x128xf32>
    %58 = math.tanh %57 : vector<8x128xf32>
    %59 = arith.mulf %53, %58 : vector<8x128xf32>
    %c0_42 = arith.constant 0 : index
    %c0_43 = arith.constant 0 : index
    %60 = vector.load %arg8[%c0_42, %c0_43] : memref<8x128xf32, #tpu.memory_space<vmem>>, vector<8x128xf32>
    tpu.vector_store %arg8[%c0_42, %c0_43], %57 {strides = array<i32>} : memref<8x128xf32, #tpu.memory_space<vmem>>, vector<8x128xf32>,
    %c0_44 = arith.constant 0 : index
    %c0_45 = arith.constant 0 : index
    %61 = vector.load %arg7[%c0_44, %c0_45] : memref<8x128xf32, #tpu.memory_space<vmem>>, vector<8x128xf32>
    tpu.vector_store %arg7[%c0_44, %c0_45], %59 {strides = array<i32>} : memref<8x128xf32, #tpu.memory_space<vmem>>, vector<8x128xf32>,
    %62 = arith.truncf %59 : vector<8x128xf32> to vector<8x128xbf16>
    %63 = arith.index_cast %c0_i32 : i32 to index
    %c0_46 = arith.constant 0 : index
    %c0_47 = arith.constant 0 : index
    %64 = vector.load %arg5[%63, %c0_46, %c0_47] : memref<8x8x128xbf16, #tpu.memory_space<vmem>>, vector<1x8x128xbf16>
    %65 = vector.shape_cast %64 : vector<1x8x128xbf16> to vector<8x128xbf16>
    %66 = vector.shape_cast %62 : vector<8x128xbf16> to vector<1x8x128xbf16>
    tpu.vector_store %arg5[%63, %c0_46, %c0_47], %66 {strides = array<i32>} : memref<8x8x128xbf16, #tpu.memory_space<vmem>>, vector<1x8x128xbf16>,
    %c1_i32 = arith.constant 1 : i32
    %67 = arith.index_cast %c1_i32 : i32 to index
    %c0_48 = arith.constant 0 : index
    %c0_49 = arith.constant 0 : index
    %68 = vector.load %arg6[%67, %c0_48, %c0_49] : memref<8x8x512xbf16, #tpu.memory_space<vmem>>, vector<1x8x512xbf16>
    %69 = vector.shape_cast %68 : vector<1x8x512xbf16> to vector<8x512xbf16>
    %70 = arith.extf %69 : vector<8x512xbf16> to vector<8x512xf32>
    %c0_50 = arith.constant 0 : index
    %c0_51 = arith.constant 0 : index
    %71 = vector.load %arg7[%c0_50, %c0_51] : memref<8x128xf32, #tpu.memory_space<vmem>>, vector<8x128xf32>
    %72 = arith.truncf %71 : vector<8x128xf32> to vector<8x128xbf16>
    %cst_52 = arith.constant dense<0.000000e+00> : vector<8x512xf32>
    %73 = tpu.matmul %72, %5, %cst_52 {dimension_numbers = #tpu.dot_dimension_numbers<[1], [0], [0], [1], [0, 0, 1, 1], [], []>} : vector<8x128xbf16>, vector<128x512xbf16>, vector<8x512xf32> -> vector<8x512xf32>
    %74 = arith.addf %70, %73 : vector<8x512xf32>
    %75 = vector.extract_strided_slice %74 {offsets = [0, 0], sizes = [8, 128], strides = [1, 1]} : vector<8x512xf32> to vector<8x128xf32>
    %cst_53 = arith.constant 5.000000e-01 : f32
    %76 = vector.broadcast %cst_53 : f32 to vector<8x128xf32>
    %77 = arith.mulf %76, %75 : vector<8x128xf32>
    %78 = math.tanh %77 : vector<8x128xf32>
    %cst_54 = arith.constant 5.000000e-01 : f32
    %79 = vector.broadcast %cst_54 : f32 to vector<8x128xf32>
    %80 = arith.mulf %79, %78 : vector<8x128xf32>
    %cst_55 = arith.constant 5.000000e-01 : f32
    %81 = vector.broadcast %cst_55 : f32 to vector<8x128xf32>
    %82 = arith.addf %80, %81 : vector<8x128xf32>
    %83 = vector.extract_strided_slice %74 {offsets = [0, 128], sizes = [8, 128], strides = [1, 1]} : vector<8x512xf32> to vector<8x128xf32>
    %cst_56 = arith.constant 5.000000e-01 : f32
    %84 = vector.broadcast %cst_56 : f32 to vector<8x128xf32>
    %85 = arith.mulf %84, %83 : vector<8x128xf32>
    %86 = math.tanh %85 : vector<8x128xf32>
    %cst_57 = arith.constant 5.000000e-01 : f32
    %87 = vector.broadcast %cst_57 : f32 to vector<8x128xf32>
    %88 = arith.mulf %87, %86 : vector<8x128xf32>
    %cst_58 = arith.constant 5.000000e-01 : f32
    %89 = vector.broadcast %cst_58 : f32 to vector<8x128xf32>
    %90 = arith.addf %88, %89 : vector<8x128xf32>
    %91 = vector.extract_strided_slice %74 {offsets = [0, 256], sizes = [8, 128], strides = [1, 1]} : vector<8x512xf32> to vector<8x128xf32>
    %92 = math.tanh %91 : vector<8x128xf32>
    %93 = vector.extract_strided_slice %74 {offsets = [0, 384], sizes = [8, 128], strides = [1, 1]} : vector<8x512xf32> to vector<8x128xf32>
    %cst_59 = arith.constant 5.000000e-01 : f32
    %94 = vector.broadcast %cst_59 : f32 to vector<8x128xf32>
    %95 = arith.mulf %94, %93 : vector<8x128xf32>
    %96 = math.tanh %95 : vector<8x128xf32>
    %cst_60 = arith.constant 5.000000e-01 : f32
    %97 = vector.broadcast %cst_60 : f32 to vector<8x128xf32>
    %98 = arith.mulf %97, %96 : vector<8x128xf32>
    %cst_61 = arith.constant 5.000000e-01 : f32
    %99 = vector.broadcast %cst_61 : f32 to vector<8x128xf32>
    %100 = arith.addf %98, %99 : vector<8x128xf32>
    %c0_62 = arith.constant 0 : index
    %c0_63 = arith.constant 0 : index
    %101 = vector.load %arg8[%c0_62, %c0_63] : memref<8x128xf32, #tpu.memory_space<vmem>>, vector<8x128xf32>
    %102 = arith.mulf %90, %101 : vector<8x128xf32>
    %103 = arith.mulf %82, %92 : vector<8x128xf32>
    %104 = arith.addf %102, %103 : vector<8x128xf32>
    %105 = math.tanh %104 : vector<8x128xf32>
    %106 = arith.mulf %100, %105 : vector<8x128xf32>
    %c0_64 = arith.constant 0 : index
    %c0_65 = arith.constant 0 : index
    %107 = vector.load %arg8[%c0_64, %c0_65] : memref<8x128xf32, #tpu.memory_space<vmem>>, vector<8x128xf32>
    tpu.vector_store %arg8[%c0_64, %c0_65], %104 {strides = array<i32>} : memref<8x128xf32, #tpu.memory_space<vmem>>, vector<8x128xf32>,
    %c0_66 = arith.constant 0 : index
    %c0_67 = arith.constant 0 : index
    %108 = vector.load %arg7[%c0_66, %c0_67] : memref<8x128xf32, #tpu.memory_space<vmem>>, vector<8x128xf32>
    tpu.vector_store %arg7[%c0_66, %c0_67], %106 {strides = array<i32>} : memref<8x128xf32, #tpu.memory_space<vmem>>, vector<8x128xf32>,
    %109 = arith.truncf %106 : vector<8x128xf32> to vector<8x128xbf16>
    %110 = arith.index_cast %c1_i32 : i32 to index
    %c0_68 = arith.constant 0 : index
    %c0_69 = arith.constant 0 : index
    %111 = vector.load %arg5[%110, %c0_68, %c0_69] : memref<8x8x128xbf16, #tpu.memory_space<vmem>>, vector<1x8x128xbf16>
    %112 = vector.shape_cast %111 : vector<1x8x128xbf16> to vector<8x128xbf16>
    %113 = vector.shape_cast %109 : vector<8x128xbf16> to vector<1x8x128xbf16>
    tpu.vector_store %arg5[%110, %c0_68, %c0_69], %113 {strides = array<i32>} : memref<8x8x128xbf16, #tpu.memory_space<vmem>>, vector<1x8x128xbf16>,
    %c2_i32 = arith.constant 2 : i32
    %114 = arith.index_cast %c2_i32 : i32 to index
    %c0_70 = arith.constant 0 : index
    %c0_71 = arith.constant 0 : index
    %115 = vector.load %arg6[%114, %c0_70, %c0_71] : memref<8x8x512xbf16, #tpu.memory_space<vmem>>, vector<1x8x512xbf16>
    %116 = vector.shape_cast %115 : vector<1x8x512xbf16> to vector<8x512xbf16>
    %117 = arith.extf %116 : vector<8x512xbf16> to vector<8x512xf32>
    %c0_72 = arith.constant 0 : index
    %c0_73 = arith.constant 0 : index
    %118 = vector.load %arg7[%c0_72, %c0_73] : memref<8x128xf32, #tpu.memory_space<vmem>>, vector<8x128xf32>
    %119 = arith.truncf %118 : vector<8x128xf32> to vector<8x128xbf16>
    %cst_74 = arith.constant dense<0.000000e+00> : vector<8x512xf32>
    %120 = tpu.matmul %119, %5, %cst_74 {dimension_numbers = #tpu.dot_dimension_numbers<[1], [0], [0], [1], [0, 0, 1, 1], [], []>} : vector<8x128xbf16>, vector<128x512xbf16>, vector<8x512xf32> -> vector<8x512xf32>
    %121 = arith.addf %117, %120 : vector<8x512xf32>
    %122 = vector.extract_strided_slice %121 {offsets = [0, 0], sizes = [8, 128], strides = [1, 1]} : vector<8x512xf32> to vector<8x128xf32>
    %cst_75 = arith.constant 5.000000e-01 : f32
    %123 = vector.broadcast %cst_75 : f32 to vector<8x128xf32>
    %124 = arith.mulf %123, %122 : vector<8x128xf32>
    %125 = math.tanh %124 : vector<8x128xf32>
    %cst_76 = arith.constant 5.000000e-01 : f32
    %126 = vector.broadcast %cst_76 : f32 to vector<8x128xf32>
    %127 = arith.mulf %126, %125 : vector<8x128xf32>
    %cst_77 = arith.constant 5.000000e-01 : f32
    %128 = vector.broadcast %cst_77 : f32 to vector<8x128xf32>
    %129 = arith.addf %127, %128 : vector<8x128xf32>
    %130 = vector.extract_strided_slice %121 {offsets = [0, 128], sizes = [8, 128], strides = [1, 1]} : vector<8x512xf32> to vector<8x128xf32>
    %cst_78 = arith.constant 5.000000e-01 : f32
    %131 = vector.broadcast %cst_78 : f32 to vector<8x128xf32>
    %132 = arith.mulf %131, %130 : vector<8x128xf32>
    %133 = math.tanh %132 : vector<8x128xf32>
    %cst_79 = arith.constant 5.000000e-01 : f32
    %134 = vector.broadcast %cst_79 : f32 to vector<8x128xf32>
    %135 = arith.mulf %134, %133 : vector<8x128xf32>
    %cst_80 = arith.constant 5.000000e-01 : f32
    %136 = vector.broadcast %cst_80 : f32 to vector<8x128xf32>
    %137 = arith.addf %135, %136 : vector<8x128xf32>
    %138 = vector.extract_strided_slice %121 {offsets = [0, 256], sizes = [8, 128], strides = [1, 1]} : vector<8x512xf32> to vector<8x128xf32>
    %139 = math.tanh %138 : vector<8x128xf32>
    %140 = vector.extract_strided_slice %121 {offsets = [0, 384], sizes = [8, 128], strides = [1, 1]} : vector<8x512xf32> to vector<8x128xf32>
    %cst_81 = arith.constant 5.000000e-01 : f32
    %141 = vector.broadcast %cst_81 : f32 to vector<8x128xf32>
    %142 = arith.mulf %141, %140 : vector<8x128xf32>
    %143 = math.tanh %142 : vector<8x128xf32>
    %cst_82 = arith.constant 5.000000e-01 : f32
    %144 = vector.broadcast %cst_82 : f32 to vector<8x128xf32>
    %145 = arith.mulf %144, %143 : vector<8x128xf32>
    %cst_83 = arith.constant 5.000000e-01 : f32
    %146 = vector.broadcast %cst_83 : f32 to vector<8x128xf32>
    %147 = arith.addf %145, %146 : vector<8x128xf32>
    %c0_84 = arith.constant 0 : index
    %c0_85 = arith.constant 0 : index
    %148 = vector.load %arg8[%c0_84, %c0_85] : memref<8x128xf32, #tpu.memory_space<vmem>>, vector<8x128xf32>
    %149 = arith.mulf %137, %148 : vector<8x128xf32>
    %150 = arith.mulf %129, %139 : vector<8x128xf32>
    %151 = arith.addf %149, %150 : vector<8x128xf32>
    %152 = math.tanh %151 : vector<8x128xf32>
    %153 = arith.mulf %147, %152 : vector<8x128xf32>
    %c0_86 = arith.constant 0 : index
    %c0_87 = arith.constant 0 : index
    %154 = vector.load %arg8[%c0_86, %c0_87] : memref<8x128xf32, #tpu.memory_space<vmem>>, vector<8x128xf32>
    tpu.vector_store %arg8[%c0_86, %c0_87], %151 {strides = array<i32>} : memref<8x128xf32, #tpu.memory_space<vmem>>, vector<8x128xf32>,
    %c0_88 = arith.constant 0 : index
    %c0_89 = arith.constant 0 : index
    %155 = vector.load %arg7[%c0_88, %c0_89] : memref<8x128xf32, #tpu.memory_space<vmem>>, vector<8x128xf32>
    tpu.vector_store %arg7[%c0_88, %c0_89], %153 {strides = array<i32>} : memref<8x128xf32, #tpu.memory_space<vmem>>, vector<8x128xf32>,
    %156 = arith.truncf %153 : vector<8x128xf32> to vector<8x128xbf16>
    %157 = arith.index_cast %c2_i32 : i32 to index
    %c0_90 = arith.constant 0 : index
    %c0_91 = arith.constant 0 : index
    %158 = vector.load %arg5[%157, %c0_90, %c0_91] : memref<8x8x128xbf16, #tpu.memory_space<vmem>>, vector<1x8x128xbf16>
    %159 = vector.shape_cast %158 : vector<1x8x128xbf16> to vector<8x128xbf16>
    %160 = vector.shape_cast %156 : vector<8x128xbf16> to vector<1x8x128xbf16>
    tpu.vector_store %arg5[%157, %c0_90, %c0_91], %160 {strides = array<i32>} : memref<8x8x128xbf16, #tpu.memory_space<vmem>>, vector<1x8x128xbf16>,
    %c3_i32 = arith.constant 3 : i32
    %161 = arith.index_cast %c3_i32 : i32 to index
    %c0_92 = arith.constant 0 : index
    %c0_93 = arith.constant 0 : index
    %162 = vector.load %arg6[%161, %c0_92, %c0_93] : memref<8x8x512xbf16, #tpu.memory_space<vmem>>, vector<1x8x512xbf16>
    %163 = vector.shape_cast %162 : vector<1x8x512xbf16> to vector<8x512xbf16>
    %164 = arith.extf %163 : vector<8x512xbf16> to vector<8x512xf32>
    %c0_94 = arith.constant 0 : index
    %c0_95 = arith.constant 0 : index
    %165 = vector.load %arg7[%c0_94, %c0_95] : memref<8x128xf32, #tpu.memory_space<vmem>>, vector<8x128xf32>
    %166 = arith.truncf %165 : vector<8x128xf32> to vector<8x128xbf16>
    %cst_96 = arith.constant dense<0.000000e+00> : vector<8x512xf32>
    %167 = tpu.matmul %166, %5, %cst_96 {dimension_numbers = #tpu.dot_dimension_numbers<[1], [0], [0], [1], [0, 0, 1, 1], [], []>} : vector<8x128xbf16>, vector<128x512xbf16>, vector<8x512xf32> -> vector<8x512xf32>
    %168 = arith.addf %164, %167 : vector<8x512xf32>
    %169 = vector.extract_strided_slice %168 {offsets = [0, 0], sizes = [8, 128], strides = [1, 1]} : vector<8x512xf32> to vector<8x128xf32>
    %cst_97 = arith.constant 5.000000e-01 : f32
    %170 = vector.broadcast %cst_97 : f32 to vector<8x128xf32>
    %171 = arith.mulf %170, %169 : vector<8x128xf32>
    %172 = math.tanh %171 : vector<8x128xf32>
    %cst_98 = arith.constant 5.000000e-01 : f32
    %173 = vector.broadcast %cst_98 : f32 to vector<8x128xf32>
    %174 = arith.mulf %173, %172 : vector<8x128xf32>
    %cst_99 = arith.constant 5.000000e-01 : f32
    %175 = vector.broadcast %cst_99 : f32 to vector<8x128xf32>
    %176 = arith.addf %174, %175 : vector<8x128xf32>
    %177 = vector.extract_strided_slice %168 {offsets = [0, 128], sizes = [8, 128], strides = [1, 1]} : vector<8x512xf32> to vector<8x128xf32>
    %cst_100 = arith.constant 5.000000e-01 : f32
    %178 = vector.broadcast %cst_100 : f32 to vector<8x128xf32>
    %179 = arith.mulf %178, %177 : vector<8x128xf32>
    %180 = math.tanh %179 : vector<8x128xf32>
    %cst_101 = arith.constant 5.000000e-01 : f32
    %181 = vector.broadcast %cst_101 : f32 to vector<8x128xf32>
    %182 = arith.mulf %181, %180 : vector<8x128xf32>
    %cst_102 = arith.constant 5.000000e-01 : f32
    %183 = vector.broadcast %cst_102 : f32 to vector<8x128xf32>
    %184 = arith.addf %182, %183 : vector<8x128xf32>
    %185 = vector.extract_strided_slice %168 {offsets = [0, 256], sizes = [8, 128], strides = [1, 1]} : vector<8x512xf32> to vector<8x128xf32>
    %186 = math.tanh %185 : vector<8x128xf32>
    %187 = vector.extract_strided_slice %168 {offsets = [0, 384], sizes = [8, 128], strides = [1, 1]} : vector<8x512xf32> to vector<8x128xf32>
    %cst_103 = arith.constant 5.000000e-01 : f32
    %188 = vector.broadcast %cst_103 : f32 to vector<8x128xf32>
    %189 = arith.mulf %188, %187 : vector<8x128xf32>
    %190 = math.tanh %189 : vector<8x128xf32>
    %cst_104 = arith.constant 5.000000e-01 : f32
    %191 = vector.broadcast %cst_104 : f32 to vector<8x128xf32>
    %192 = arith.mulf %191, %190 : vector<8x128xf32>
    %cst_105 = arith.constant 5.000000e-01 : f32
    %193 = vector.broadcast %cst_105 : f32 to vector<8x128xf32>
    %194 = arith.addf %192, %193 : vector<8x128xf32>
    %c0_106 = arith.constant 0 : index
    %c0_107 = arith.constant 0 : index
    %195 = vector.load %arg8[%c0_106, %c0_107] : memref<8x128xf32, #tpu.memory_space<vmem>>, vector<8x128xf32>
    %196 = arith.mulf %184, %195 : vector<8x128xf32>
    %197 = arith.mulf %176, %186 : vector<8x128xf32>
    %198 = arith.addf %196, %197 : vector<8x128xf32>
    %199 = math.tanh %198 : vector<8x128xf32>
    %200 = arith.mulf %194, %199 : vector<8x128xf32>
    %c0_108 = arith.constant 0 : index
    %c0_109 = arith.constant 0 : index
    %201 = vector.load %arg8[%c0_108, %c0_109] : memref<8x128xf32, #tpu.memory_space<vmem>>, vector<8x128xf32>
    tpu.vector_store %arg8[%c0_108, %c0_109], %198 {strides = array<i32>} : memref<8x128xf32, #tpu.memory_space<vmem>>, vector<8x128xf32>,
    %c0_110 = arith.constant 0 : index
    %c0_111 = arith.constant 0 : index
    %202 = vector.load %arg7[%c0_110, %c0_111] : memref<8x128xf32, #tpu.memory_space<vmem>>, vector<8x128xf32>
    tpu.vector_store %arg7[%c0_110, %c0_111], %200 {strides = array<i32>} : memref<8x128xf32, #tpu.memory_space<vmem>>, vector<8x128xf32>,
    %203 = arith.truncf %200 : vector<8x128xf32> to vector<8x128xbf16>
    %204 = arith.index_cast %c3_i32 : i32 to index
    %c0_112 = arith.constant 0 : index
    %c0_113 = arith.constant 0 : index
    %205 = vector.load %arg5[%204, %c0_112, %c0_113] : memref<8x8x128xbf16, #tpu.memory_space<vmem>>, vector<1x8x128xbf16>
    %206 = vector.shape_cast %205 : vector<1x8x128xbf16> to vector<8x128xbf16>
    %207 = vector.shape_cast %203 : vector<8x128xbf16> to vector<1x8x128xbf16>
    tpu.vector_store %arg5[%204, %c0_112, %c0_113], %207 {strides = array<i32>} : memref<8x8x128xbf16, #tpu.memory_space<vmem>>, vector<1x8x128xbf16>,
    %c4_i32 = arith.constant 4 : i32
    %208 = arith.index_cast %c4_i32 : i32 to index
    %c0_114 = arith.constant 0 : index
    %c0_115 = arith.constant 0 : index
    %209 = vector.load %arg6[%208, %c0_114, %c0_115] : memref<8x8x512xbf16, #tpu.memory_space<vmem>>, vector<1x8x512xbf16>
    %210 = vector.shape_cast %209 : vector<1x8x512xbf16> to vector<8x512xbf16>
    %211 = arith.extf %210 : vector<8x512xbf16> to vector<8x512xf32>
    %c0_116 = arith.constant 0 : index
    %c0_117 = arith.constant 0 : index
    %212 = vector.load %arg7[%c0_116, %c0_117] : memref<8x128xf32, #tpu.memory_space<vmem>>, vector<8x128xf32>
    %213 = arith.truncf %212 : vector<8x128xf32> to vector<8x128xbf16>
    %cst_118 = arith.constant dense<0.000000e+00> : vector<8x512xf32>
    %214 = tpu.matmul %213, %5, %cst_118 {dimension_numbers = #tpu.dot_dimension_numbers<[1], [0], [0], [1], [0, 0, 1, 1], [], []>} : vector<8x128xbf16>, vector<128x512xbf16>, vector<8x512xf32> -> vector<8x512xf32>
    %215 = arith.addf %211, %214 : vector<8x512xf32>
    %216 = vector.extract_strided_slice %215 {offsets = [0, 0], sizes = [8, 128], strides = [1, 1]} : vector<8x512xf32> to vector<8x128xf32>
    %cst_119 = arith.constant 5.000000e-01 : f32
    %217 = vector.broadcast %cst_119 : f32 to vector<8x128xf32>
    %218 = arith.mulf %217, %216 : vector<8x128xf32>
    %219 = math.tanh %218 : vector<8x128xf32>
    %cst_120 = arith.constant 5.000000e-01 : f32
    %220 = vector.broadcast %cst_120 : f32 to vector<8x128xf32>
    %221 = arith.mulf %220, %219 : vector<8x128xf32>
    %cst_121 = arith.constant 5.000000e-01 : f32
    %222 = vector.broadcast %cst_121 : f32 to vector<8x128xf32>
    %223 = arith.addf %221, %222 : vector<8x128xf32>
    %224 = vector.extract_strided_slice %215 {offsets = [0, 128], sizes = [8, 128], strides = [1, 1]} : vector<8x512xf32> to vector<8x128xf32>
    %cst_122 = arith.constant 5.000000e-01 : f32
    %225 = vector.broadcast %cst_122 : f32 to vector<8x128xf32>
    %226 = arith.mulf %225, %224 : vector<8x128xf32>
    %227 = math.tanh %226 : vector<8x128xf32>
    %cst_123 = arith.constant 5.000000e-01 : f32
    %228 = vector.broadcast %cst_123 : f32 to vector<8x128xf32>
    %229 = arith.mulf %228, %227 : vector<8x128xf32>
    %cst_124 = arith.constant 5.000000e-01 : f32
    %230 = vector.broadcast %cst_124 : f32 to vector<8x128xf32>
    %231 = arith.addf %229, %230 : vector<8x128xf32>
    %232 = vector.extract_strided_slice %215 {offsets = [0, 256], sizes = [8, 128], strides = [1, 1]} : vector<8x512xf32> to vector<8x128xf32>
    %233 = math.tanh %232 : vector<8x128xf32>
    %234 = vector.extract_strided_slice %215 {offsets = [0, 384], sizes = [8, 128], strides = [1, 1]} : vector<8x512xf32> to vector<8x128xf32>
    %cst_125 = arith.constant 5.000000e-01 : f32
    %235 = vector.broadcast %cst_125 : f32 to vector<8x128xf32>
    %236 = arith.mulf %235, %234 : vector<8x128xf32>
    %237 = math.tanh %236 : vector<8x128xf32>
    %cst_126 = arith.constant 5.000000e-01 : f32
    %238 = vector.broadcast %cst_126 : f32 to vector<8x128xf32>
    %239 = arith.mulf %238, %237 : vector<8x128xf32>
    %cst_127 = arith.constant 5.000000e-01 : f32
    %240 = vector.broadcast %cst_127 : f32 to vector<8x128xf32>
    %241 = arith.addf %239, %240 : vector<8x128xf32>
    %c0_128 = arith.constant 0 : index
    %c0_129 = arith.constant 0 : index
    %242 = vector.load %arg8[%c0_128, %c0_129] : memref<8x128xf32, #tpu.memory_space<vmem>>, vector<8x128xf32>
    %243 = arith.mulf %231, %242 : vector<8x128xf32>
    %244 = arith.mulf %223, %233 : vector<8x128xf32>
    %245 = arith.addf %243, %244 : vector<8x128xf32>
    %246 = math.tanh %245 : vector<8x128xf32>
    %247 = arith.mulf %241, %246 : vector<8x128xf32>
    %c0_130 = arith.constant 0 : index
    %c0_131 = arith.constant 0 : index
    %248 = vector.load %arg8[%c0_130, %c0_131] : memref<8x128xf32, #tpu.memory_space<vmem>>, vector<8x128xf32>
    tpu.vector_store %arg8[%c0_130, %c0_131], %245 {strides = array<i32>} : memref<8x128xf32, #tpu.memory_space<vmem>>, vector<8x128xf32>,
    %c0_132 = arith.constant 0 : index
    %c0_133 = arith.constant 0 : index
    %249 = vector.load %arg7[%c0_132, %c0_133] : memref<8x128xf32, #tpu.memory_space<vmem>>, vector<8x128xf32>
    tpu.vector_store %arg7[%c0_132, %c0_133], %247 {strides = array<i32>} : memref<8x128xf32, #tpu.memory_space<vmem>>, vector<8x128xf32>,
    %250 = arith.truncf %247 : vector<8x128xf32> to vector<8x128xbf16>
    %251 = arith.index_cast %c4_i32 : i32 to index
    %c0_134 = arith.constant 0 : index
    %c0_135 = arith.constant 0 : index
    %252 = vector.load %arg5[%251, %c0_134, %c0_135] : memref<8x8x128xbf16, #tpu.memory_space<vmem>>, vector<1x8x128xbf16>
    %253 = vector.shape_cast %252 : vector<1x8x128xbf16> to vector<8x128xbf16>
    %254 = vector.shape_cast %250 : vector<8x128xbf16> to vector<1x8x128xbf16>
    tpu.vector_store %arg5[%251, %c0_134, %c0_135], %254 {strides = array<i32>} : memref<8x8x128xbf16, #tpu.memory_space<vmem>>, vector<1x8x128xbf16>,
    %c5_i32 = arith.constant 5 : i32
    %255 = arith.index_cast %c5_i32 : i32 to index
    %c0_136 = arith.constant 0 : index
    %c0_137 = arith.constant 0 : index
    %256 = vector.load %arg6[%255, %c0_136, %c0_137] : memref<8x8x512xbf16, #tpu.memory_space<vmem>>, vector<1x8x512xbf16>
    %257 = vector.shape_cast %256 : vector<1x8x512xbf16> to vector<8x512xbf16>
    %258 = arith.extf %257 : vector<8x512xbf16> to vector<8x512xf32>
    %c0_138 = arith.constant 0 : index
    %c0_139 = arith.constant 0 : index
    %259 = vector.load %arg7[%c0_138, %c0_139] : memref<8x128xf32, #tpu.memory_space<vmem>>, vector<8x128xf32>
    %260 = arith.truncf %259 : vector<8x128xf32> to vector<8x128xbf16>
    %cst_140 = arith.constant dense<0.000000e+00> : vector<8x512xf32>
    %261 = tpu.matmul %260, %5, %cst_140 {dimension_numbers = #tpu.dot_dimension_numbers<[1], [0], [0], [1], [0, 0, 1, 1], [], []>} : vector<8x128xbf16>, vector<128x512xbf16>, vector<8x512xf32> -> vector<8x512xf32>
    %262 = arith.addf %258, %261 : vector<8x512xf32>
    %263 = vector.extract_strided_slice %262 {offsets = [0, 0], sizes = [8, 128], strides = [1, 1]} : vector<8x512xf32> to vector<8x128xf32>
    %cst_141 = arith.constant 5.000000e-01 : f32
    %264 = vector.broadcast %cst_141 : f32 to vector<8x128xf32>
    %265 = arith.mulf %264, %263 : vector<8x128xf32>
    %266 = math.tanh %265 : vector<8x128xf32>
    %cst_142 = arith.constant 5.000000e-01 : f32
    %267 = vector.broadcast %cst_142 : f32 to vector<8x128xf32>
    %268 = arith.mulf %267, %266 : vector<8x128xf32>
    %cst_143 = arith.constant 5.000000e-01 : f32
    %269 = vector.broadcast %cst_143 : f32 to vector<8x128xf32>
    %270 = arith.addf %268, %269 : vector<8x128xf32>
    %271 = vector.extract_strided_slice %262 {offsets = [0, 128], sizes = [8, 128], strides = [1, 1]} : vector<8x512xf32> to vector<8x128xf32>
    %cst_144 = arith.constant 5.000000e-01 : f32
    %272 = vector.broadcast %cst_144 : f32 to vector<8x128xf32>
    %273 = arith.mulf %272, %271 : vector<8x128xf32>
    %274 = math.tanh %273 : vector<8x128xf32>
    %cst_145 = arith.constant 5.000000e-01 : f32
    %275 = vector.broadcast %cst_145 : f32 to vector<8x128xf32>
    %276 = arith.mulf %275, %274 : vector<8x128xf32>
    %cst_146 = arith.constant 5.000000e-01 : f32
    %277 = vector.broadcast %cst_146 : f32 to vector<8x128xf32>
    %278 = arith.addf %276, %277 : vector<8x128xf32>
    %279 = vector.extract_strided_slice %262 {offsets = [0, 256], sizes = [8, 128], strides = [1, 1]} : vector<8x512xf32> to vector<8x128xf32>
    %280 = math.tanh %279 : vector<8x128xf32>
    %281 = vector.extract_strided_slice %262 {offsets = [0, 384], sizes = [8, 128], strides = [1, 1]} : vector<8x512xf32> to vector<8x128xf32>
    %cst_147 = arith.constant 5.000000e-01 : f32
    %282 = vector.broadcast %cst_147 : f32 to vector<8x128xf32>
    %283 = arith.mulf %282, %281 : vector<8x128xf32>
    %284 = math.tanh %283 : vector<8x128xf32>
    %cst_148 = arith.constant 5.000000e-01 : f32
    %285 = vector.broadcast %cst_148 : f32 to vector<8x128xf32>
    %286 = arith.mulf %285, %284 : vector<8x128xf32>
    %cst_149 = arith.constant 5.000000e-01 : f32
    %287 = vector.broadcast %cst_149 : f32 to vector<8x128xf32>
    %288 = arith.addf %286, %287 : vector<8x128xf32>
    %c0_150 = arith.constant 0 : index
    %c0_151 = arith.constant 0 : index
    %289 = vector.load %arg8[%c0_150, %c0_151] : memref<8x128xf32, #tpu.memory_space<vmem>>, vector<8x128xf32>
    %290 = arith.mulf %278, %289 : vector<8x128xf32>
    %291 = arith.mulf %270, %280 : vector<8x128xf32>
    %292 = arith.addf %290, %291 : vector<8x128xf32>
    %293 = math.tanh %292 : vector<8x128xf32>
    %294 = arith.mulf %288, %293 : vector<8x128xf32>
    %c0_152 = arith.constant 0 : index
    %c0_153 = arith.constant 0 : index
    %295 = vector.load %arg8[%c0_152, %c0_153] : memref<8x128xf32, #tpu.memory_space<vmem>>, vector<8x128xf32>
    tpu.vector_store %arg8[%c0_152, %c0_153], %292 {strides = array<i32>} : memref<8x128xf32, #tpu.memory_space<vmem>>, vector<8x128xf32>,
    %c0_154 = arith.constant 0 : index
    %c0_155 = arith.constant 0 : index
    %296 = vector.load %arg7[%c0_154, %c0_155] : memref<8x128xf32, #tpu.memory_space<vmem>>, vector<8x128xf32>
    tpu.vector_store %arg7[%c0_154, %c0_155], %294 {strides = array<i32>} : memref<8x128xf32, #tpu.memory_space<vmem>>, vector<8x128xf32>,
    %297 = arith.truncf %294 : vector<8x128xf32> to vector<8x128xbf16>
    %298 = arith.index_cast %c5_i32 : i32 to index
    %c0_156 = arith.constant 0 : index
    %c0_157 = arith.constant 0 : index
    %299 = vector.load %arg5[%298, %c0_156, %c0_157] : memref<8x8x128xbf16, #tpu.memory_space<vmem>>, vector<1x8x128xbf16>
    %300 = vector.shape_cast %299 : vector<1x8x128xbf16> to vector<8x128xbf16>
    %301 = vector.shape_cast %297 : vector<8x128xbf16> to vector<1x8x128xbf16>
    tpu.vector_store %arg5[%298, %c0_156, %c0_157], %301 {strides = array<i32>} : memref<8x8x128xbf16, #tpu.memory_space<vmem>>, vector<1x8x128xbf16>,
    %c6_i32 = arith.constant 6 : i32
    %302 = arith.index_cast %c6_i32 : i32 to index
    %c0_158 = arith.constant 0 : index
    %c0_159 = arith.constant 0 : index
    %303 = vector.load %arg6[%302, %c0_158, %c0_159] : memref<8x8x512xbf16, #tpu.memory_space<vmem>>, vector<1x8x512xbf16>
    %304 = vector.shape_cast %303 : vector<1x8x512xbf16> to vector<8x512xbf16>
    %305 = arith.extf %304 : vector<8x512xbf16> to vector<8x512xf32>
    %c0_160 = arith.constant 0 : index
    %c0_161 = arith.constant 0 : index
    %306 = vector.load %arg7[%c0_160, %c0_161] : memref<8x128xf32, #tpu.memory_space<vmem>>, vector<8x128xf32>
    %307 = arith.truncf %306 : vector<8x128xf32> to vector<8x128xbf16>
    %cst_162 = arith.constant dense<0.000000e+00> : vector<8x512xf32>
    %308 = tpu.matmul %307, %5, %cst_162 {dimension_numbers = #tpu.dot_dimension_numbers<[1], [0], [0], [1], [0, 0, 1, 1], [], []>} : vector<8x128xbf16>, vector<128x512xbf16>, vector<8x512xf32> -> vector<8x512xf32>
    %309 = arith.addf %305, %308 : vector<8x512xf32>
    %310 = vector.extract_strided_slice %309 {offsets = [0, 0], sizes = [8, 128], strides = [1, 1]} : vector<8x512xf32> to vector<8x128xf32>
    %cst_163 = arith.constant 5.000000e-01 : f32
    %311 = vector.broadcast %cst_163 : f32 to vector<8x128xf32>
    %312 = arith.mulf %311, %310 : vector<8x128xf32>
    %313 = math.tanh %312 : vector<8x128xf32>
    %cst_164 = arith.constant 5.000000e-01 : f32
    %314 = vector.broadcast %cst_164 : f32 to vector<8x128xf32>
    %315 = arith.mulf %314, %313 : vector<8x128xf32>
    %cst_165 = arith.constant 5.000000e-01 : f32
    %316 = vector.broadcast %cst_165 : f32 to vector<8x128xf32>
    %317 = arith.addf %315, %316 : vector<8x128xf32>
    %318 = vector.extract_strided_slice %309 {offsets = [0, 128], sizes = [8, 128], strides = [1, 1]} : vector<8x512xf32> to vector<8x128xf32>
    %cst_166 = arith.constant 5.000000e-01 : f32
    %319 = vector.broadcast %cst_166 : f32 to vector<8x128xf32>
    %320 = arith.mulf %319, %318 : vector<8x128xf32>
    %321 = math.tanh %320 : vector<8x128xf32>
    %cst_167 = arith.constant 5.000000e-01 : f32
    %322 = vector.broadcast %cst_167 : f32 to vector<8x128xf32>
    %323 = arith.mulf %322, %321 : vector<8x128xf32>
    %cst_168 = arith.constant 5.000000e-01 : f32
    %324 = vector.broadcast %cst_168 : f32 to vector<8x128xf32>
    %325 = arith.addf %323, %324 : vector<8x128xf32>
    %326 = vector.extract_strided_slice %309 {offsets = [0, 256], sizes = [8, 128], strides = [1, 1]} : vector<8x512xf32> to vector<8x128xf32>
    %327 = math.tanh %326 : vector<8x128xf32>
    %328 = vector.extract_strided_slice %309 {offsets = [0, 384], sizes = [8, 128], strides = [1, 1]} : vector<8x512xf32> to vector<8x128xf32>
    %cst_169 = arith.constant 5.000000e-01 : f32
    %329 = vector.broadcast %cst_169 : f32 to vector<8x128xf32>
    %330 = arith.mulf %329, %328 : vector<8x128xf32>
    %331 = math.tanh %330 : vector<8x128xf32>
    %cst_170 = arith.constant 5.000000e-01 : f32
    %332 = vector.broadcast %cst_170 : f32 to vector<8x128xf32>
    %333 = arith.mulf %332, %331 : vector<8x128xf32>
    %cst_171 = arith.constant 5.000000e-01 : f32
    %334 = vector.broadcast %cst_171 : f32 to vector<8x128xf32>
    %335 = arith.addf %333, %334 : vector<8x128xf32>
    %c0_172 = arith.constant 0 : index
    %c0_173 = arith.constant 0 : index
    %336 = vector.load %arg8[%c0_172, %c0_173] : memref<8x128xf32, #tpu.memory_space<vmem>>, vector<8x128xf32>
    %337 = arith.mulf %325, %336 : vector<8x128xf32>
    %338 = arith.mulf %317, %327 : vector<8x128xf32>
    %339 = arith.addf %337, %338 : vector<8x128xf32>
    %340 = math.tanh %339 : vector<8x128xf32>
    %341 = arith.mulf %335, %340 : vector<8x128xf32>
    %c0_174 = arith.constant 0 : index
    %c0_175 = arith.constant 0 : index
    %342 = vector.load %arg8[%c0_174, %c0_175] : memref<8x128xf32, #tpu.memory_space<vmem>>, vector<8x128xf32>
    tpu.vector_store %arg8[%c0_174, %c0_175], %339 {strides = array<i32>} : memref<8x128xf32, #tpu.memory_space<vmem>>, vector<8x128xf32>,
    %c0_176 = arith.constant 0 : index
    %c0_177 = arith.constant 0 : index
    %343 = vector.load %arg7[%c0_176, %c0_177] : memref<8x128xf32, #tpu.memory_space<vmem>>, vector<8x128xf32>
    tpu.vector_store %arg7[%c0_176, %c0_177], %341 {strides = array<i32>} : memref<8x128xf32, #tpu.memory_space<vmem>>, vector<8x128xf32>,
    %344 = arith.truncf %341 : vector<8x128xf32> to vector<8x128xbf16>
    %345 = arith.index_cast %c6_i32 : i32 to index
    %c0_178 = arith.constant 0 : index
    %c0_179 = arith.constant 0 : index
    %346 = vector.load %arg5[%345, %c0_178, %c0_179] : memref<8x8x128xbf16, #tpu.memory_space<vmem>>, vector<1x8x128xbf16>
    %347 = vector.shape_cast %346 : vector<1x8x128xbf16> to vector<8x128xbf16>
    %348 = vector.shape_cast %344 : vector<8x128xbf16> to vector<1x8x128xbf16>
    tpu.vector_store %arg5[%345, %c0_178, %c0_179], %348 {strides = array<i32>} : memref<8x8x128xbf16, #tpu.memory_space<vmem>>, vector<1x8x128xbf16>,
    %c7_i32 = arith.constant 7 : i32
    %349 = arith.index_cast %c7_i32 : i32 to index
    %c0_180 = arith.constant 0 : index
    %c0_181 = arith.constant 0 : index
    %350 = vector.load %arg6[%349, %c0_180, %c0_181] : memref<8x8x512xbf16, #tpu.memory_space<vmem>>, vector<1x8x512xbf16>
    %351 = vector.shape_cast %350 : vector<1x8x512xbf16> to vector<8x512xbf16>
    %352 = arith.extf %351 : vector<8x512xbf16> to vector<8x512xf32>
    %c0_182 = arith.constant 0 : index
    %c0_183 = arith.constant 0 : index
    %353 = vector.load %arg7[%c0_182, %c0_183] : memref<8x128xf32, #tpu.memory_space<vmem>>, vector<8x128xf32>
    %354 = arith.truncf %353 : vector<8x128xf32> to vector<8x128xbf16>
    %cst_184 = arith.constant dense<0.000000e+00> : vector<8x512xf32>
    %355 = tpu.matmul %354, %5, %cst_184 {dimension_numbers = #tpu.dot_dimension_numbers<[1], [0], [0], [1], [0, 0, 1, 1], [], []>} : vector<8x128xbf16>, vector<128x512xbf16>, vector<8x512xf32> -> vector<8x512xf32>
    %356 = arith.addf %352, %355 : vector<8x512xf32>
    %357 = vector.extract_strided_slice %356 {offsets = [0, 0], sizes = [8, 128], strides = [1, 1]} : vector<8x512xf32> to vector<8x128xf32>
    %cst_185 = arith.constant 5.000000e-01 : f32
    %358 = vector.broadcast %cst_185 : f32 to vector<8x128xf32>
    %359 = arith.mulf %358, %357 : vector<8x128xf32>
    %360 = math.tanh %359 : vector<8x128xf32>
    %cst_186 = arith.constant 5.000000e-01 : f32
    %361 = vector.broadcast %cst_186 : f32 to vector<8x128xf32>
    %362 = arith.mulf %361, %360 : vector<8x128xf32>
    %cst_187 = arith.constant 5.000000e-01 : f32
    %363 = vector.broadcast %cst_187 : f32 to vector<8x128xf32>
    %364 = arith.addf %362, %363 : vector<8x128xf32>
    %365 = vector.extract_strided_slice %356 {offsets = [0, 128], sizes = [8, 128], strides = [1, 1]} : vector<8x512xf32> to vector<8x128xf32>
    %cst_188 = arith.constant 5.000000e-01 : f32
    %366 = vector.broadcast %cst_188 : f32 to vector<8x128xf32>
    %367 = arith.mulf %366, %365 : vector<8x128xf32>
    %368 = math.tanh %367 : vector<8x128xf32>
    %cst_189 = arith.constant 5.000000e-01 : f32
    %369 = vector.broadcast %cst_189 : f32 to vector<8x128xf32>
    %370 = arith.mulf %369, %368 : vector<8x128xf32>
    %cst_190 = arith.constant 5.000000e-01 : f32
    %371 = vector.broadcast %cst_190 : f32 to vector<8x128xf32>
    %372 = arith.addf %370, %371 : vector<8x128xf32>
    %373 = vector.extract_strided_slice %356 {offsets = [0, 256], sizes = [8, 128], strides = [1, 1]} : vector<8x512xf32> to vector<8x128xf32>
    %374 = math.tanh %373 : vector<8x128xf32>
    %375 = vector.extract_strided_slice %356 {offsets = [0, 384], sizes = [8, 128], strides = [1, 1]} : vector<8x512xf32> to vector<8x128xf32>
    %cst_191 = arith.constant 5.000000e-01 : f32
    %376 = vector.broadcast %cst_191 : f32 to vector<8x128xf32>
    %377 = arith.mulf %376, %375 : vector<8x128xf32>
    %378 = math.tanh %377 : vector<8x128xf32>
    %cst_192 = arith.constant 5.000000e-01 : f32
    %379 = vector.broadcast %cst_192 : f32 to vector<8x128xf32>
    %380 = arith.mulf %379, %378 : vector<8x128xf32>
    %cst_193 = arith.constant 5.000000e-01 : f32
    %381 = vector.broadcast %cst_193 : f32 to vector<8x128xf32>
    %382 = arith.addf %380, %381 : vector<8x128xf32>
    %c0_194 = arith.constant 0 : index
    %c0_195 = arith.constant 0 : index
    %383 = vector.load %arg8[%c0_194, %c0_195] : memref<8x128xf32, #tpu.memory_space<vmem>>, vector<8x128xf32>
    %384 = arith.mulf %372, %383 : vector<8x128xf32>
    %385 = arith.mulf %364, %374 : vector<8x128xf32>
    %386 = arith.addf %384, %385 : vector<8x128xf32>
    %387 = math.tanh %386 : vector<8x128xf32>
    %388 = arith.mulf %382, %387 : vector<8x128xf32>
    %c0_196 = arith.constant 0 : index
    %c0_197 = arith.constant 0 : index
    %389 = vector.load %arg8[%c0_196, %c0_197] : memref<8x128xf32, #tpu.memory_space<vmem>>, vector<8x128xf32>
    tpu.vector_store %arg8[%c0_196, %c0_197], %386 {strides = array<i32>} : memref<8x128xf32, #tpu.memory_space<vmem>>, vector<8x128xf32>,
    %c0_198 = arith.constant 0 : index
    %c0_199 = arith.constant 0 : index
    %390 = vector.load %arg7[%c0_198, %c0_199] : memref<8x128xf32, #tpu.memory_space<vmem>>, vector<8x128xf32>
    tpu.vector_store %arg7[%c0_198, %c0_199], %388 {strides = array<i32>} : memref<8x128xf32, #tpu.memory_space<vmem>>, vector<8x128xf32>,
    %391 = arith.truncf %388 : vector<8x128xf32> to vector<8x128xbf16>
    %392 = arith.index_cast %c7_i32 : i32 to index
    %c0_200 = arith.constant 0 : index
    %c0_201 = arith.constant 0 : index
    %393 = vector.load %arg5[%392, %c0_200, %c0_201] : memref<8x8x128xbf16, #tpu.memory_space<vmem>>, vector<1x8x128xbf16>
    %394 = vector.shape_cast %393 : vector<1x8x128xbf16> to vector<8x128xbf16>
    %395 = vector.shape_cast %391 : vector<8x128xbf16> to vector<1x8x128xbf16>
    tpu.vector_store %arg5[%392, %c0_200, %c0_201], %395 {strides = array<i32>} : memref<8x8x128xbf16, #tpu.memory_space<vmem>>, vector<1x8x128xbf16>,
    %c8_i32 = arith.constant 8 : i32
    %c1 = arith.constant 1 : index
    %c0_202 = arith.constant 0 : index
    %c0_203 = arith.constant 0 : index
    %396 = vector.load %arg2[%c1, %c0_202, %c0_203] : memref<4x128x512xbf16, #tpu.memory_space<vmem>>, vector<1x128x512xbf16>
    %397 = vector.shape_cast %396 : vector<1x128x512xbf16> to vector<128x512xbf16>
    %c1_204 = arith.constant 1 : index
    %c0_205 = arith.constant 0 : index
    %c0_206 = arith.constant 0 : index
    %398 = vector.load %arg3[%c1_204, %c0_205, %c0_206] : memref<4x128x512xbf16, #tpu.memory_space<vmem>>, vector<1x128x512xbf16>
    %399 = vector.shape_cast %398 : vector<1x128x512xbf16> to vector<128x512xbf16>
    %c1_207 = arith.constant 1 : index
    %c0_208 = arith.constant 0 : index
    %c0_209 = arith.constant 0 : index
    %400 = vector.load %arg4[%c1_207, %c0_208, %c0_209] : memref<4x1x512xf32, #tpu.memory_space<vmem>>, vector<1x1x512xf32>
    %401 = vector.shape_cast %400 : vector<1x1x512xf32> to vector<1x512xf32>
    %c0_210 = arith.constant 0 : index
    %c0_211 = arith.constant 0 : index
    %c0_212 = arith.constant 0 : index
    %402 = vector.load %arg5[%c0_210, %c0_211, %c0_212] : memref<8x8x128xbf16, #tpu.memory_space<vmem>>, vector<8x8x128xbf16>
    %403 = vector.shape_cast %402 : vector<8x8x128xbf16> to vector<64x128xbf16>
    %cst_213 = arith.constant dense<0.000000e+00> : vector<64x512xf32>
    %404 = tpu.matmul %403, %397, %cst_213 {dimension_numbers = #tpu.dot_dimension_numbers<[1], [0], [0], [1], [0, 0, 1, 1], [], []>} : vector<64x128xbf16>, vector<128x512xbf16>, vector<64x512xf32> -> vector<64x512xf32>
    %405 = vector.broadcast %401 : vector<1x512xf32> to vector<64x512xf32>
    %406 = arith.addf %404, %405 : vector<64x512xf32>
    %407 = vector.shape_cast %406 : vector<64x512xf32> to vector<8x8x512xf32>
    %408 = arith.truncf %407 : vector<8x8x512xf32> to vector<8x8x512xbf16>
    %c0_214 = arith.constant 0 : index
    %c0_215 = arith.constant 0 : index
    %c0_216 = arith.constant 0 : index
    %409 = vector.load %arg6[%c0_214, %c0_215, %c0_216] : memref<8x8x512xbf16, #tpu.memory_space<vmem>>, vector<8x8x512xbf16>
    tpu.vector_store %arg6[%c0_214, %c0_215, %c0_216], %408 {strides = array<i32>} : memref<8x8x512xbf16, #tpu.memory_space<vmem>>, vector<8x8x512xbf16>,
    %cst_217 = arith.constant 0.000000e+00 : f32
    %410 = vector.broadcast %cst_217 : f32 to vector<8x128xf32>
    %c0_218 = arith.constant 0 : index
    %c0_219 = arith.constant 0 : index
    %411 = vector.load %arg7[%c0_218, %c0_219] : memref<8x128xf32, #tpu.memory_space<vmem>>, vector<8x128xf32>
    tpu.vector_store %arg7[%c0_218, %c0_219], %410 {strides = array<i32>} : memref<8x128xf32, #tpu.memory_space<vmem>>, vector<8x128xf32>,
    %cst_220 = arith.constant 0.000000e+00 : f32
    %412 = vector.broadcast %cst_220 : f32 to vector<8x128xf32>
    %c0_221 = arith.constant 0 : index
    %c0_222 = arith.constant 0 : index
    %413 = vector.load %arg8[%c0_221, %c0_222] : memref<8x128xf32, #tpu.memory_space<vmem>>, vector<8x128xf32>
    tpu.vector_store %arg8[%c0_221, %c0_222], %412 {strides = array<i32>} : memref<8x128xf32, #tpu.memory_space<vmem>>, vector<8x128xf32>,
    %c0_i32_223 = arith.constant 0 : i32
    %414 = arith.index_cast %c0_i32_223 : i32 to index
    %c0_224 = arith.constant 0 : index
    %c0_225 = arith.constant 0 : index
    %415 = vector.load %arg6[%414, %c0_224, %c0_225] : memref<8x8x512xbf16, #tpu.memory_space<vmem>>, vector<1x8x512xbf16>
    %416 = vector.shape_cast %415 : vector<1x8x512xbf16> to vector<8x512xbf16>
    %417 = arith.extf %416 : vector<8x512xbf16> to vector<8x512xf32>
    %c0_226 = arith.constant 0 : index
    %c0_227 = arith.constant 0 : index
    %418 = vector.load %arg7[%c0_226, %c0_227] : memref<8x128xf32, #tpu.memory_space<vmem>>, vector<8x128xf32>
    %419 = arith.truncf %418 : vector<8x128xf32> to vector<8x128xbf16>
    %cst_228 = arith.constant dense<0.000000e+00> : vector<8x512xf32>
    %420 = tpu.matmul %419, %399, %cst_228 {dimension_numbers = #tpu.dot_dimension_numbers<[1], [0], [0], [1], [0, 0, 1, 1], [], []>} : vector<8x128xbf16>, vector<128x512xbf16>, vector<8x512xf32> -> vector<8x512xf32>
    %421 = arith.addf %417, %420 : vector<8x512xf32>
    %422 = vector.extract_strided_slice %421 {offsets = [0, 0], sizes = [8, 128], strides = [1, 1]} : vector<8x512xf32> to vector<8x128xf32>
    %cst_229 = arith.constant 5.000000e-01 : f32
    %423 = vector.broadcast %cst_229 : f32 to vector<8x128xf32>
    %424 = arith.mulf %423, %422 : vector<8x128xf32>
    %425 = math.tanh %424 : vector<8x128xf32>
    %cst_230 = arith.constant 5.000000e-01 : f32
    %426 = vector.broadcast %cst_230 : f32 to vector<8x128xf32>
    %427 = arith.mulf %426, %425 : vector<8x128xf32>
    %cst_231 = arith.constant 5.000000e-01 : f32
    %428 = vector.broadcast %cst_231 : f32 to vector<8x128xf32>
    %429 = arith.addf %427, %428 : vector<8x128xf32>
    %430 = vector.extract_strided_slice %421 {offsets = [0, 128], sizes = [8, 128], strides = [1, 1]} : vector<8x512xf32> to vector<8x128xf32>
    %cst_232 = arith.constant 5.000000e-01 : f32
    %431 = vector.broadcast %cst_232 : f32 to vector<8x128xf32>
    %432 = arith.mulf %431, %430 : vector<8x128xf32>
    %433 = math.tanh %432 : vector<8x128xf32>
    %cst_233 = arith.constant 5.000000e-01 : f32
    %434 = vector.broadcast %cst_233 : f32 to vector<8x128xf32>
    %435 = arith.mulf %434, %433 : vector<8x128xf32>
    %cst_234 = arith.constant 5.000000e-01 : f32
    %436 = vector.broadcast %cst_234 : f32 to vector<8x128xf32>
    %437 = arith.addf %435, %436 : vector<8x128xf32>
    %438 = vector.extract_strided_slice %421 {offsets = [0, 256], sizes = [8, 128], strides = [1, 1]} : vector<8x512xf32> to vector<8x128xf32>
    %439 = math.tanh %438 : vector<8x128xf32>
    %440 = vector.extract_strided_slice %421 {offsets = [0, 384], sizes = [8, 128], strides = [1, 1]} : vector<8x512xf32> to vector<8x128xf32>
    %cst_235 = arith.constant 5.000000e-01 : f32
    %441 = vector.broadcast %cst_235 : f32 to vector<8x128xf32>
    %442 = arith.mulf %441, %440 : vector<8x128xf32>
    %443 = math.tanh %442 : vector<8x128xf32>
    %cst_236 = arith.constant 5.000000e-01 : f32
    %444 = vector.broadcast %cst_236 : f32 to vector<8x128xf32>
    %445 = arith.mulf %444, %443 : vector<8x128xf32>
    %cst_237 = arith.constant 5.000000e-01 : f32
    %446 = vector.broadcast %cst_237 : f32 to vector<8x128xf32>
    %447 = arith.addf %445, %446 : vector<8x128xf32>
    %c0_238 = arith.constant 0 : index
    %c0_239 = arith.constant 0 : index
    %448 = vector.load %arg8[%c0_238, %c0_239] : memref<8x128xf32, #tpu.memory_space<vmem>>, vector<8x128xf32>
    %449 = arith.mulf %437, %448 : vector<8x128xf32>
    %450 = arith.mulf %429, %439 : vector<8x128xf32>
    %451 = arith.addf %449, %450 : vector<8x128xf32>
    %452 = math.tanh %451 : vector<8x128xf32>
    %453 = arith.mulf %447, %452 : vector<8x128xf32>
    %c0_240 = arith.constant 0 : index
    %c0_241 = arith.constant 0 : index
    %454 = vector.load %arg8[%c0_240, %c0_241] : memref<8x128xf32, #tpu.memory_space<vmem>>, vector<8x128xf32>
    tpu.vector_store %arg8[%c0_240, %c0_241], %451 {strides = array<i32>} : memref<8x128xf32, #tpu.memory_space<vmem>>, vector<8x128xf32>,
    %c0_242 = arith.constant 0 : index
    %c0_243 = arith.constant 0 : index
    %455 = vector.load %arg7[%c0_242, %c0_243] : memref<8x128xf32, #tpu.memory_space<vmem>>, vector<8x128xf32>
    tpu.vector_store %arg7[%c0_242, %c0_243], %453 {strides = array<i32>} : memref<8x128xf32, #tpu.memory_space<vmem>>, vector<8x128xf32>,
    %456 = arith.truncf %453 : vector<8x128xf32> to vector<8x128xbf16>
    %457 = arith.index_cast %c0_i32_223 : i32 to index
    %c0_244 = arith.constant 0 : index
    %c0_245 = arith.constant 0 : index
    %458 = vector.load %arg5[%457, %c0_244, %c0_245] : memref<8x8x128xbf16, #tpu.memory_space<vmem>>, vector<1x8x128xbf16>
    %459 = vector.shape_cast %458 : vector<1x8x128xbf16> to vector<8x128xbf16>
    %460 = vector.shape_cast %456 : vector<8x128xbf16> to vector<1x8x128xbf16>
    tpu.vector_store %arg5[%457, %c0_244, %c0_245], %460 {strides = array<i32>} : memref<8x8x128xbf16, #tpu.memory_space<vmem>>, vector<1x8x128xbf16>,
    %c1_i32_246 = arith.constant 1 : i32
    %461 = arith.index_cast %c1_i32_246 : i32 to index
    %c0_247 = arith.constant 0 : index
    %c0_248 = arith.constant 0 : index
    %462 = vector.load %arg6[%461, %c0_247, %c0_248] : memref<8x8x512xbf16, #tpu.memory_space<vmem>>, vector<1x8x512xbf16>
    %463 = vector.shape_cast %462 : vector<1x8x512xbf16> to vector<8x512xbf16>
    %464 = arith.extf %463 : vector<8x512xbf16> to vector<8x512xf32>
    %c0_249 = arith.constant 0 : index
    %c0_250 = arith.constant 0 : index
    %465 = vector.load %arg7[%c0_249, %c0_250] : memref<8x128xf32, #tpu.memory_space<vmem>>, vector<8x128xf32>
    %466 = arith.truncf %465 : vector<8x128xf32> to vector<8x128xbf16>
    %cst_251 = arith.constant dense<0.000000e+00> : vector<8x512xf32>
    %467 = tpu.matmul %466, %399, %cst_251 {dimension_numbers = #tpu.dot_dimension_numbers<[1], [0], [0], [1], [0, 0, 1, 1], [], []>} : vector<8x128xbf16>, vector<128x512xbf16>, vector<8x512xf32> -> vector<8x512xf32>
    %468 = arith.addf %464, %467 : vector<8x512xf32>
    %469 = vector.extract_strided_slice %468 {offsets = [0, 0], sizes = [8, 128], strides = [1, 1]} : vector<8x512xf32> to vector<8x128xf32>
    %cst_252 = arith.constant 5.000000e-01 : f32
    %470 = vector.broadcast %cst_252 : f32 to vector<8x128xf32>
    %471 = arith.mulf %470, %469 : vector<8x128xf32>
    %472 = math.tanh %471 : vector<8x128xf32>
    %cst_253 = arith.constant 5.000000e-01 : f32
    %473 = vector.broadcast %cst_253 : f32 to vector<8x128xf32>
    %474 = arith.mulf %473, %472 : vector<8x128xf32>
    %cst_254 = arith.constant 5.000000e-01 : f32
    %475 = vector.broadcast %cst_254 : f32 to vector<8x128xf32>
    %476 = arith.addf %474, %475 : vector<8x128xf32>
    %477 = vector.extract_strided_slice %468 {offsets = [0, 128], sizes = [8, 128], strides = [1, 1]} : vector<8x512xf32> to vector<8x128xf32>
    %cst_255 = arith.constant 5.000000e-01 : f32
    %478 = vector.broadcast %cst_255 : f32 to vector<8x128xf32>
    %479 = arith.mulf %478, %477 : vector<8x128xf32>
    %480 = math.tanh %479 : vector<8x128xf32>
    %cst_256 = arith.constant 5.000000e-01 : f32
    %481 = vector.broadcast %cst_256 : f32 to vector<8x128xf32>
    %482 = arith.mulf %481, %480 : vector<8x128xf32>
    %cst_257 = arith.constant 5.000000e-01 : f32
    %483 = vector.broadcast %cst_257 : f32 to vector<8x128xf32>
    %484 = arith.addf %482, %483 : vector<8x128xf32>
    %485 = vector.extract_strided_slice %468 {offsets = [0, 256], sizes = [8, 128], strides = [1, 1]} : vector<8x512xf32> to vector<8x128xf32>
    %486 = math.tanh %485 : vector<8x128xf32>
    %487 = vector.extract_strided_slice %468 {offsets = [0, 384], sizes = [8, 128], strides = [1, 1]} : vector<8x512xf32> to vector<8x128xf32>
    %cst_258 = arith.constant 5.000000e-01 : f32
    %488 = vector.broadcast %cst_258 : f32 to vector<8x128xf32>
    %489 = arith.mulf %488, %487 : vector<8x128xf32>
    %490 = math.tanh %489 : vector<8x128xf32>
    %cst_259 = arith.constant 5.000000e-01 : f32
    %491 = vector.broadcast %cst_259 : f32 to vector<8x128xf32>
    %492 = arith.mulf %491, %490 : vector<8x128xf32>
    %cst_260 = arith.constant 5.000000e-01 : f32
    %493 = vector.broadcast %cst_260 : f32 to vector<8x128xf32>
    %494 = arith.addf %492, %493 : vector<8x128xf32>
    %c0_261 = arith.constant 0 : index
    %c0_262 = arith.constant 0 : index
    %495 = vector.load %arg8[%c0_261, %c0_262] : memref<8x128xf32, #tpu.memory_space<vmem>>, vector<8x128xf32>
    %496 = arith.mulf %484, %495 : vector<8x128xf32>
    %497 = arith.mulf %476, %486 : vector<8x128xf32>
    %498 = arith.addf %496, %497 : vector<8x128xf32>
    %499 = math.tanh %498 : vector<8x128xf32>
    %500 = arith.mulf %494, %499 : vector<8x128xf32>
    %c0_263 = arith.constant 0 : index
    %c0_264 = arith.constant 0 : index
    %501 = vector.load %arg8[%c0_263, %c0_264] : memref<8x128xf32, #tpu.memory_space<vmem>>, vector<8x128xf32>
    tpu.vector_store %arg8[%c0_263, %c0_264], %498 {strides = array<i32>} : memref<8x128xf32, #tpu.memory_space<vmem>>, vector<8x128xf32>,
    %c0_265 = arith.constant 0 : index
    %c0_266 = arith.constant 0 : index
    %502 = vector.load %arg7[%c0_265, %c0_266] : memref<8x128xf32, #tpu.memory_space<vmem>>, vector<8x128xf32>
    tpu.vector_store %arg7[%c0_265, %c0_266], %500 {strides = array<i32>} : memref<8x128xf32, #tpu.memory_space<vmem>>, vector<8x128xf32>,
    %503 = arith.truncf %500 : vector<8x128xf32> to vector<8x128xbf16>
    %504 = arith.index_cast %c1_i32_246 : i32 to index
    %c0_267 = arith.constant 0 : index
    %c0_268 = arith.constant 0 : index
    %505 = vector.load %arg5[%504, %c0_267, %c0_268] : memref<8x8x128xbf16, #tpu.memory_space<vmem>>, vector<1x8x128xbf16>
    %506 = vector.shape_cast %505 : vector<1x8x128xbf16> to vector<8x128xbf16>
    %507 = vector.shape_cast %503 : vector<8x128xbf16> to vector<1x8x128xbf16>
    tpu.vector_store %arg5[%504, %c0_267, %c0_268], %507 {strides = array<i32>} : memref<8x8x128xbf16, #tpu.memory_space<vmem>>, vector<1x8x128xbf16>,
    %c2_i32_269 = arith.constant 2 : i32
    %508 = arith.index_cast %c2_i32_269 : i32 to index
    %c0_270 = arith.constant 0 : index
    %c0_271 = arith.constant 0 : index
    %509 = vector.load %arg6[%508, %c0_270, %c0_271] : memref<8x8x512xbf16, #tpu.memory_space<vmem>>, vector<1x8x512xbf16>
    %510 = vector.shape_cast %509 : vector<1x8x512xbf16> to vector<8x512xbf16>
    %511 = arith.extf %510 : vector<8x512xbf16> to vector<8x512xf32>
    %c0_272 = arith.constant 0 : index
    %c0_273 = arith.constant 0 : index
    %512 = vector.load %arg7[%c0_272, %c0_273] : memref<8x128xf32, #tpu.memory_space<vmem>>, vector<8x128xf32>
    %513 = arith.truncf %512 : vector<8x128xf32> to vector<8x128xbf16>
    %cst_274 = arith.constant dense<0.000000e+00> : vector<8x512xf32>
    %514 = tpu.matmul %513, %399, %cst_274 {dimension_numbers = #tpu.dot_dimension_numbers<[1], [0], [0], [1], [0, 0, 1, 1], [], []>} : vector<8x128xbf16>, vector<128x512xbf16>, vector<8x512xf32> -> vector<8x512xf32>
    %515 = arith.addf %511, %514 : vector<8x512xf32>
    %516 = vector.extract_strided_slice %515 {offsets = [0, 0], sizes = [8, 128], strides = [1, 1]} : vector<8x512xf32> to vector<8x128xf32>
    %cst_275 = arith.constant 5.000000e-01 : f32
    %517 = vector.broadcast %cst_275 : f32 to vector<8x128xf32>
    %518 = arith.mulf %517, %516 : vector<8x128xf32>
    %519 = math.tanh %518 : vector<8x128xf32>
    %cst_276 = arith.constant 5.000000e-01 : f32
    %520 = vector.broadcast %cst_276 : f32 to vector<8x128xf32>
    %521 = arith.mulf %520, %519 : vector<8x128xf32>
    %cst_277 = arith.constant 5.000000e-01 : f32
    %522 = vector.broadcast %cst_277 : f32 to vector<8x128xf32>
    %523 = arith.addf %521, %522 : vector<8x128xf32>
    %524 = vector.extract_strided_slice %515 {offsets = [0, 128], sizes = [8, 128], strides = [1, 1]} : vector<8x512xf32> to vector<8x128xf32>
    %cst_278 = arith.constant 5.000000e-01 : f32
    %525 = vector.broadcast %cst_278 : f32 to vector<8x128xf32>
    %526 = arith.mulf %525, %524 : vector<8x128xf32>
    %527 = math.tanh %526 : vector<8x128xf32>
    %cst_279 = arith.constant 5.000000e-01 : f32
    %528 = vector.broadcast %cst_279 : f32 to vector<8x128xf32>
    %529 = arith.mulf %528, %527 : vector<8x128xf32>
    %cst_280 = arith.constant 5.000000e-01 : f32
    %530 = vector.broadcast %cst_280 : f32 to vector<8x128xf32>
    %531 = arith.addf %529, %530 : vector<8x128xf32>
    %532 = vector.extract_strided_slice %515 {offsets = [0, 256], sizes = [8, 128], strides = [1, 1]} : vector<8x512xf32> to vector<8x128xf32>
    %533 = math.tanh %532 : vector<8x128xf32>
    %534 = vector.extract_strided_slice %515 {offsets = [0, 384], sizes = [8, 128], strides = [1, 1]} : vector<8x512xf32> to vector<8x128xf32>
    %cst_281 = arith.constant 5.000000e-01 : f32
    %535 = vector.broadcast %cst_281 : f32 to vector<8x128xf32>
    %536 = arith.mulf %535, %534 : vector<8x128xf32>
    %537 = math.tanh %536 : vector<8x128xf32>
    %cst_282 = arith.constant 5.000000e-01 : f32
    %538 = vector.broadcast %cst_282 : f32 to vector<8x128xf32>
    %539 = arith.mulf %538, %537 : vector<8x128xf32>
    %cst_283 = arith.constant 5.000000e-01 : f32
    %540 = vector.broadcast %cst_283 : f32 to vector<8x128xf32>
    %541 = arith.addf %539, %540 : vector<8x128xf32>
    %c0_284 = arith.constant 0 : index
    %c0_285 = arith.constant 0 : index
    %542 = vector.load %arg8[%c0_284, %c0_285] : memref<8x128xf32, #tpu.memory_space<vmem>>, vector<8x128xf32>
    %543 = arith.mulf %531, %542 : vector<8x128xf32>
    %544 = arith.mulf %523, %533 : vector<8x128xf32>
    %545 = arith.addf %543, %544 : vector<8x128xf32>
    %546 = math.tanh %545 : vector<8x128xf32>
    %547 = arith.mulf %541, %546 : vector<8x128xf32>
    %c0_286 = arith.constant 0 : index
    %c0_287 = arith.constant 0 : index
    %548 = vector.load %arg8[%c0_286, %c0_287] : memref<8x128xf32, #tpu.memory_space<vmem>>, vector<8x128xf32>
    tpu.vector_store %arg8[%c0_286, %c0_287], %545 {strides = array<i32>} : memref<8x128xf32, #tpu.memory_space<vmem>>, vector<8x128xf32>,
    %c0_288 = arith.constant 0 : index
    %c0_289 = arith.constant 0 : index
    %549 = vector.load %arg7[%c0_288, %c0_289] : memref<8x128xf32, #tpu.memory_space<vmem>>, vector<8x128xf32>
    tpu.vector_store %arg7[%c0_288, %c0_289], %547 {strides = array<i32>} : memref<8x128xf32, #tpu.memory_space<vmem>>, vector<8x128xf32>,
    %550 = arith.truncf %547 : vector<8x128xf32> to vector<8x128xbf16>
    %551 = arith.index_cast %c2_i32_269 : i32 to index
    %c0_290 = arith.constant 0 : index
    %c0_291 = arith.constant 0 : index
    %552 = vector.load %arg5[%551, %c0_290, %c0_291] : memref<8x8x128xbf16, #tpu.memory_space<vmem>>, vector<1x8x128xbf16>
    %553 = vector.shape_cast %552 : vector<1x8x128xbf16> to vector<8x128xbf16>
    %554 = vector.shape_cast %550 : vector<8x128xbf16> to vector<1x8x128xbf16>
    tpu.vector_store %arg5[%551, %c0_290, %c0_291], %554 {strides = array<i32>} : memref<8x8x128xbf16, #tpu.memory_space<vmem>>, vector<1x8x128xbf16>,
    %c3_i32_292 = arith.constant 3 : i32
    %555 = arith.index_cast %c3_i32_292 : i32 to index
    %c0_293 = arith.constant 0 : index
    %c0_294 = arith.constant 0 : index
    %556 = vector.load %arg6[%555, %c0_293, %c0_294] : memref<8x8x512xbf16, #tpu.memory_space<vmem>>, vector<1x8x512xbf16>
    %557 = vector.shape_cast %556 : vector<1x8x512xbf16> to vector<8x512xbf16>
    %558 = arith.extf %557 : vector<8x512xbf16> to vector<8x512xf32>
    %c0_295 = arith.constant 0 : index
    %c0_296 = arith.constant 0 : index
    %559 = vector.load %arg7[%c0_295, %c0_296] : memref<8x128xf32, #tpu.memory_space<vmem>>, vector<8x128xf32>
    %560 = arith.truncf %559 : vector<8x128xf32> to vector<8x128xbf16>
    %cst_297 = arith.constant dense<0.000000e+00> : vector<8x512xf32>
    %561 = tpu.matmul %560, %399, %cst_297 {dimension_numbers = #tpu.dot_dimension_numbers<[1], [0], [0], [1], [0, 0, 1, 1], [], []>} : vector<8x128xbf16>, vector<128x512xbf16>, vector<8x512xf32> -> vector<8x512xf32>
    %562 = arith.addf %558, %561 : vector<8x512xf32>
    %563 = vector.extract_strided_slice %562 {offsets = [0, 0], sizes = [8, 128], strides = [1, 1]} : vector<8x512xf32> to vector<8x128xf32>
    %cst_298 = arith.constant 5.000000e-01 : f32
    %564 = vector.broadcast %cst_298 : f32 to vector<8x128xf32>
    %565 = arith.mulf %564, %563 : vector<8x128xf32>
    %566 = math.tanh %565 : vector<8x128xf32>
    %cst_299 = arith.constant 5.000000e-01 : f32
    %567 = vector.broadcast %cst_299 : f32 to vector<8x128xf32>
    %568 = arith.mulf %567, %566 : vector<8x128xf32>
    %cst_300 = arith.constant 5.000000e-01 : f32
    %569 = vector.broadcast %cst_300 : f32 to vector<8x128xf32>
    %570 = arith.addf %568, %569 : vector<8x128xf32>
    %571 = vector.extract_strided_slice %562 {offsets = [0, 128], sizes = [8, 128], strides = [1, 1]} : vector<8x512xf32> to vector<8x128xf32>
    %cst_301 = arith.constant 5.000000e-01 : f32
    %572 = vector.broadcast %cst_301 : f32 to vector<8x128xf32>
    %573 = arith.mulf %572, %571 : vector<8x128xf32>
    %574 = math.tanh %573 : vector<8x128xf32>
    %cst_302 = arith.constant 5.000000e-01 : f32
    %575 = vector.broadcast %cst_302 : f32 to vector<8x128xf32>
    %576 = arith.mulf %575, %574 : vector<8x128xf32>
    %cst_303 = arith.constant 5.000000e-01 : f32
    %577 = vector.broadcast %cst_303 : f32 to vector<8x128xf32>
    %578 = arith.addf %576, %577 : vector<8x128xf32>
    %579 = vector.extract_strided_slice %562 {offsets = [0, 256], sizes = [8, 128], strides = [1, 1]} : vector<8x512xf32> to vector<8x128xf32>
    %580 = math.tanh %579 : vector<8x128xf32>
    %581 = vector.extract_strided_slice %562 {offsets = [0, 384], sizes = [8, 128], strides = [1, 1]} : vector<8x512xf32> to vector<8x128xf32>
    %cst_304 = arith.constant 5.000000e-01 : f32
    %582 = vector.broadcast %cst_304 : f32 to vector<8x128xf32>
    %583 = arith.mulf %582, %581 : vector<8x128xf32>
    %584 = math.tanh %583 : vector<8x128xf32>
    %cst_305 = arith.constant 5.000000e-01 : f32
    %585 = vector.broadcast %cst_305 : f32 to vector<8x128xf32>
    %586 = arith.mulf %585, %584 : vector<8x128xf32>
    %cst_306 = arith.constant 5.000000e-01 : f32
    %587 = vector.broadcast %cst_306 : f32 to vector<8x128xf32>
    %588 = arith.addf %586, %587 : vector<8x128xf32>
    %c0_307 = arith.constant 0 : index
    %c0_308 = arith.constant 0 : index
    %589 = vector.load %arg8[%c0_307, %c0_308] : memref<8x128xf32, #tpu.memory_space<vmem>>, vector<8x128xf32>
    %590 = arith.mulf %578, %589 : vector<8x128xf32>
    %591 = arith.mulf %570, %580 : vector<8x128xf32>
    %592 = arith.addf %590, %591 : vector<8x128xf32>
    %593 = math.tanh %592 : vector<8x128xf32>
    %594 = arith.mulf %588, %593 : vector<8x128xf32>
    %c0_309 = arith.constant 0 : index
    %c0_310 = arith.constant 0 : index
    %595 = vector.load %arg8[%c0_309, %c0_310] : memref<8x128xf32, #tpu.memory_space<vmem>>, vector<8x128xf32>
    tpu.vector_store %arg8[%c0_309, %c0_310], %592 {strides = array<i32>} : memref<8x128xf32, #tpu.memory_space<vmem>>, vector<8x128xf32>,
    %c0_311 = arith.constant 0 : index
    %c0_312 = arith.constant 0 : index
    %596 = vector.load %arg7[%c0_311, %c0_312] : memref<8x128xf32, #tpu.memory_space<vmem>>, vector<8x128xf32>
    tpu.vector_store %arg7[%c0_311, %c0_312], %594 {strides = array<i32>} : memref<8x128xf32, #tpu.memory_space<vmem>>, vector<8x128xf32>,
    %597 = arith.truncf %594 : vector<8x128xf32> to vector<8x128xbf16>
    %598 = arith.index_cast %c3_i32_292 : i32 to index
    %c0_313 = arith.constant 0 : index
    %c0_314 = arith.constant 0 : index
    %599 = vector.load %arg5[%598, %c0_313, %c0_314] : memref<8x8x128xbf16, #tpu.memory_space<vmem>>, vector<1x8x128xbf16>
    %600 = vector.shape_cast %599 : vector<1x8x128xbf16> to vector<8x128xbf16>
    %601 = vector.shape_cast %597 : vector<8x128xbf16> to vector<1x8x128xbf16>
    tpu.vector_store %arg5[%598, %c0_313, %c0_314], %601 {strides = array<i32>} : memref<8x8x128xbf16, #tpu.memory_space<vmem>>, vector<1x8x128xbf16>,
    %c4_i32_315 = arith.constant 4 : i32
    %602 = arith.index_cast %c4_i32_315 : i32 to index
    %c0_316 = arith.constant 0 : index
    %c0_317 = arith.constant 0 : index
    %603 = vector.load %arg6[%602, %c0_316, %c0_317] : memref<8x8x512xbf16, #tpu.memory_space<vmem>>, vector<1x8x512xbf16>
    %604 = vector.shape_cast %603 : vector<1x8x512xbf16> to vector<8x512xbf16>
    %605 = arith.extf %604 : vector<8x512xbf16> to vector<8x512xf32>
    %c0_318 = arith.constant 0 : index
    %c0_319 = arith.constant 0 : index
    %606 = vector.load %arg7[%c0_318, %c0_319] : memref<8x128xf32, #tpu.memory_space<vmem>>, vector<8x128xf32>
    %607 = arith.truncf %606 : vector<8x128xf32> to vector<8x128xbf16>
    %cst_320 = arith.constant dense<0.000000e+00> : vector<8x512xf32>
    %608 = tpu.matmul %607, %399, %cst_320 {dimension_numbers = #tpu.dot_dimension_numbers<[1], [0], [0], [1], [0, 0, 1, 1], [], []>} : vector<8x128xbf16>, vector<128x512xbf16>, vector<8x512xf32> -> vector<8x512xf32>
    %609 = arith.addf %605, %608 : vector<8x512xf32>
    %610 = vector.extract_strided_slice %609 {offsets = [0, 0], sizes = [8, 128], strides = [1, 1]} : vector<8x512xf32> to vector<8x128xf32>
    %cst_321 = arith.constant 5.000000e-01 : f32
    %611 = vector.broadcast %cst_321 : f32 to vector<8x128xf32>
    %612 = arith.mulf %611, %610 : vector<8x128xf32>
    %613 = math.tanh %612 : vector<8x128xf32>
    %cst_322 = arith.constant 5.000000e-01 : f32
    %614 = vector.broadcast %cst_322 : f32 to vector<8x128xf32>
    %615 = arith.mulf %614, %613 : vector<8x128xf32>
    %cst_323 = arith.constant 5.000000e-01 : f32
    %616 = vector.broadcast %cst_323 : f32 to vector<8x128xf32>
    %617 = arith.addf %615, %616 : vector<8x128xf32>
    %618 = vector.extract_strided_slice %609 {offsets = [0, 128], sizes = [8, 128], strides = [1, 1]} : vector<8x512xf32> to vector<8x128xf32>
    %cst_324 = arith.constant 5.000000e-01 : f32
    %619 = vector.broadcast %cst_324 : f32 to vector<8x128xf32>
    %620 = arith.mulf %619, %618 : vector<8x128xf32>
    %621 = math.tanh %620 : vector<8x128xf32>
    %cst_325 = arith.constant 5.000000e-01 : f32
    %622 = vector.broadcast %cst_325 : f32 to vector<8x128xf32>
    %623 = arith.mulf %622, %621 : vector<8x128xf32>
    %cst_326 = arith.constant 5.000000e-01 : f32
    %624 = vector.broadcast %cst_326 : f32 to vector<8x128xf32>
    %625 = arith.addf %623, %624 : vector<8x128xf32>
    %626 = vector.extract_strided_slice %609 {offsets = [0, 256], sizes = [8, 128], strides = [1, 1]} : vector<8x512xf32> to vector<8x128xf32>
    %627 = math.tanh %626 : vector<8x128xf32>
    %628 = vector.extract_strided_slice %609 {offsets = [0, 384], sizes = [8, 128], strides = [1, 1]} : vector<8x512xf32> to vector<8x128xf32>
    %cst_327 = arith.constant 5.000000e-01 : f32
    %629 = vector.broadcast %cst_327 : f32 to vector<8x128xf32>
    %630 = arith.mulf %629, %628 : vector<8x128xf32>
    %631 = math.tanh %630 : vector<8x128xf32>
    %cst_328 = arith.constant 5.000000e-01 : f32
    %632 = vector.broadcast %cst_328 : f32 to vector<8x128xf32>
    %633 = arith.mulf %632, %631 : vector<8x128xf32>
    %cst_329 = arith.constant 5.000000e-01 : f32
    %634 = vector.broadcast %cst_329 : f32 to vector<8x128xf32>
    %635 = arith.addf %633, %634 : vector<8x128xf32>
    %c0_330 = arith.constant 0 : index
    %c0_331 = arith.constant 0 : index
    %636 = vector.load %arg8[%c0_330, %c0_331] : memref<8x128xf32, #tpu.memory_space<vmem>>, vector<8x128xf32>
    %637 = arith.mulf %625, %636 : vector<8x128xf32>
    %638 = arith.mulf %617, %627 : vector<8x128xf32>
    %639 = arith.addf %637, %638 : vector<8x128xf32>
    %640 = math.tanh %639 : vector<8x128xf32>
    %641 = arith.mulf %635, %640 : vector<8x128xf32>
    %c0_332 = arith.constant 0 : index
    %c0_333 = arith.constant 0 : index
    %642 = vector.load %arg8[%c0_332, %c0_333] : memref<8x128xf32, #tpu.memory_space<vmem>>, vector<8x128xf32>
    tpu.vector_store %arg8[%c0_332, %c0_333], %639 {strides = array<i32>} : memref<8x128xf32, #tpu.memory_space<vmem>>, vector<8x128xf32>,
    %c0_334 = arith.constant 0 : index
    %c0_335 = arith.constant 0 : index
    %643 = vector.load %arg7[%c0_334, %c0_335] : memref<8x128xf32, #tpu.memory_space<vmem>>, vector<8x128xf32>
    tpu.vector_store %arg7[%c0_334, %c0_335], %641 {strides = array<i32>} : memref<8x128xf32, #tpu.memory_space<vmem>>, vector<8x128xf32>,
    %644 = arith.truncf %641 : vector<8x128xf32> to vector<8x128xbf16>
    %645 = arith.index_cast %c4_i32_315 : i32 to index
    %c0_336 = arith.constant 0 : index
    %c0_337 = arith.constant 0 : index
    %646 = vector.load %arg5[%645, %c0_336, %c0_337] : memref<8x8x128xbf16, #tpu.memory_space<vmem>>, vector<1x8x128xbf16>
    %647 = vector.shape_cast %646 : vector<1x8x128xbf16> to vector<8x128xbf16>
    %648 = vector.shape_cast %644 : vector<8x128xbf16> to vector<1x8x128xbf16>
    tpu.vector_store %arg5[%645, %c0_336, %c0_337], %648 {strides = array<i32>} : memref<8x8x128xbf16, #tpu.memory_space<vmem>>, vector<1x8x128xbf16>,
    %c5_i32_338 = arith.constant 5 : i32
    %649 = arith.index_cast %c5_i32_338 : i32 to index
    %c0_339 = arith.constant 0 : index
    %c0_340 = arith.constant 0 : index
    %650 = vector.load %arg6[%649, %c0_339, %c0_340] : memref<8x8x512xbf16, #tpu.memory_space<vmem>>, vector<1x8x512xbf16>
    %651 = vector.shape_cast %650 : vector<1x8x512xbf16> to vector<8x512xbf16>
    %652 = arith.extf %651 : vector<8x512xbf16> to vector<8x512xf32>
    %c0_341 = arith.constant 0 : index
    %c0_342 = arith.constant 0 : index
    %653 = vector.load %arg7[%c0_341, %c0_342] : memref<8x128xf32, #tpu.memory_space<vmem>>, vector<8x128xf32>
    %654 = arith.truncf %653 : vector<8x128xf32> to vector<8x128xbf16>
    %cst_343 = arith.constant dense<0.000000e+00> : vector<8x512xf32>
    %655 = tpu.matmul %654, %399, %cst_343 {dimension_numbers = #tpu.dot_dimension_numbers<[1], [0], [0], [1], [0, 0, 1, 1], [], []>} : vector<8x128xbf16>, vector<128x512xbf16>, vector<8x512xf32> -> vector<8x512xf32>
    %656 = arith.addf %652, %655 : vector<8x512xf32>
    %657 = vector.extract_strided_slice %656 {offsets = [0, 0], sizes = [8, 128], strides = [1, 1]} : vector<8x512xf32> to vector<8x128xf32>
    %cst_344 = arith.constant 5.000000e-01 : f32
    %658 = vector.broadcast %cst_344 : f32 to vector<8x128xf32>
    %659 = arith.mulf %658, %657 : vector<8x128xf32>
    %660 = math.tanh %659 : vector<8x128xf32>
    %cst_345 = arith.constant 5.000000e-01 : f32
    %661 = vector.broadcast %cst_345 : f32 to vector<8x128xf32>
    %662 = arith.mulf %661, %660 : vector<8x128xf32>
    %cst_346 = arith.constant 5.000000e-01 : f32
    %663 = vector.broadcast %cst_346 : f32 to vector<8x128xf32>
    %664 = arith.addf %662, %663 : vector<8x128xf32>
    %665 = vector.extract_strided_slice %656 {offsets = [0, 128], sizes = [8, 128], strides = [1, 1]} : vector<8x512xf32> to vector<8x128xf32>
    %cst_347 = arith.constant 5.000000e-01 : f32
    %666 = vector.broadcast %cst_347 : f32 to vector<8x128xf32>
    %667 = arith.mulf %666, %665 : vector<8x128xf32>
    %668 = math.tanh %667 : vector<8x128xf32>
    %cst_348 = arith.constant 5.000000e-01 : f32
    %669 = vector.broadcast %cst_348 : f32 to vector<8x128xf32>
    %670 = arith.mulf %669, %668 : vector<8x128xf32>
    %cst_349 = arith.constant 5.000000e-01 : f32
    %671 = vector.broadcast %cst_349 : f32 to vector<8x128xf32>
    %672 = arith.addf %670, %671 : vector<8x128xf32>
    %673 = vector.extract_strided_slice %656 {offsets = [0, 256], sizes = [8, 128], strides = [1, 1]} : vector<8x512xf32> to vector<8x128xf32>
    %674 = math.tanh %673 : vector<8x128xf32>
    %675 = vector.extract_strided_slice %656 {offsets = [0, 384], sizes = [8, 128], strides = [1, 1]} : vector<8x512xf32> to vector<8x128xf32>
    %cst_350 = arith.constant 5.000000e-01 : f32
    %676 = vector.broadcast %cst_350 : f32 to vector<8x128xf32>
    %677 = arith.mulf %676, %675 : vector<8x128xf32>
    %678 = math.tanh %677 : vector<8x128xf32>
    %cst_351 = arith.constant 5.000000e-01 : f32
    %679 = vector.broadcast %cst_351 : f32 to vector<8x128xf32>
    %680 = arith.mulf %679, %678 : vector<8x128xf32>
    %cst_352 = arith.constant 5.000000e-01 : f32
    %681 = vector.broadcast %cst_352 : f32 to vector<8x128xf32>
    %682 = arith.addf %680, %681 : vector<8x128xf32>
    %c0_353 = arith.constant 0 : index
    %c0_354 = arith.constant 0 : index
    %683 = vector.load %arg8[%c0_353, %c0_354] : memref<8x128xf32, #tpu.memory_space<vmem>>, vector<8x128xf32>
    %684 = arith.mulf %672, %683 : vector<8x128xf32>
    %685 = arith.mulf %664, %674 : vector<8x128xf32>
    %686 = arith.addf %684, %685 : vector<8x128xf32>
    %687 = math.tanh %686 : vector<8x128xf32>
    %688 = arith.mulf %682, %687 : vector<8x128xf32>
    %c0_355 = arith.constant 0 : index
    %c0_356 = arith.constant 0 : index
    %689 = vector.load %arg8[%c0_355, %c0_356] : memref<8x128xf32, #tpu.memory_space<vmem>>, vector<8x128xf32>
    tpu.vector_store %arg8[%c0_355, %c0_356], %686 {strides = array<i32>} : memref<8x128xf32, #tpu.memory_space<vmem>>, vector<8x128xf32>,
    %c0_357 = arith.constant 0 : index
    %c0_358 = arith.constant 0 : index
    %690 = vector.load %arg7[%c0_357, %c0_358] : memref<8x128xf32, #tpu.memory_space<vmem>>, vector<8x128xf32>
    tpu.vector_store %arg7[%c0_357, %c0_358], %688 {strides = array<i32>} : memref<8x128xf32, #tpu.memory_space<vmem>>, vector<8x128xf32>,
    %691 = arith.truncf %688 : vector<8x128xf32> to vector<8x128xbf16>
    %692 = arith.index_cast %c5_i32_338 : i32 to index
    %c0_359 = arith.constant 0 : index
    %c0_360 = arith.constant 0 : index
    %693 = vector.load %arg5[%692, %c0_359, %c0_360] : memref<8x8x128xbf16, #tpu.memory_space<vmem>>, vector<1x8x128xbf16>
    %694 = vector.shape_cast %693 : vector<1x8x128xbf16> to vector<8x128xbf16>
    %695 = vector.shape_cast %691 : vector<8x128xbf16> to vector<1x8x128xbf16>
    tpu.vector_store %arg5[%692, %c0_359, %c0_360], %695 {strides = array<i32>} : memref<8x8x128xbf16, #tpu.memory_space<vmem>>, vector<1x8x128xbf16>,
    %c6_i32_361 = arith.constant 6 : i32
    %696 = arith.index_cast %c6_i32_361 : i32 to index
    %c0_362 = arith.constant 0 : index
    %c0_363 = arith.constant 0 : index
    %697 = vector.load %arg6[%696, %c0_362, %c0_363] : memref<8x8x512xbf16, #tpu.memory_space<vmem>>, vector<1x8x512xbf16>
    %698 = vector.shape_cast %697 : vector<1x8x512xbf16> to vector<8x512xbf16>
    %699 = arith.extf %698 : vector<8x512xbf16> to vector<8x512xf32>
    %c0_364 = arith.constant 0 : index
    %c0_365 = arith.constant 0 : index
    %700 = vector.load %arg7[%c0_364, %c0_365] : memref<8x128xf32, #tpu.memory_space<vmem>>, vector<8x128xf32>
    %701 = arith.truncf %700 : vector<8x128xf32> to vector<8x128xbf16>
    %cst_366 = arith.constant dense<0.000000e+00> : vector<8x512xf32>
    %702 = tpu.matmul %701, %399, %cst_366 {dimension_numbers = #tpu.dot_dimension_numbers<[1], [0], [0], [1], [0, 0, 1, 1], [], []>} : vector<8x128xbf16>, vector<128x512xbf16>, vector<8x512xf32> -> vector<8x512xf32>
    %703 = arith.addf %699, %702 : vector<8x512xf32>
    %704 = vector.extract_strided_slice %703 {offsets = [0, 0], sizes = [8, 128], strides = [1, 1]} : vector<8x512xf32> to vector<8x128xf32>
    %cst_367 = arith.constant 5.000000e-01 : f32
    %705 = vector.broadcast %cst_367 : f32 to vector<8x128xf32>
    %706 = arith.mulf %705, %704 : vector<8x128xf32>
    %707 = math.tanh %706 : vector<8x128xf32>
    %cst_368 = arith.constant 5.000000e-01 : f32
    %708 = vector.broadcast %cst_368 : f32 to vector<8x128xf32>
    %709 = arith.mulf %708, %707 : vector<8x128xf32>
    %cst_369 = arith.constant 5.000000e-01 : f32
    %710 = vector.broadcast %cst_369 : f32 to vector<8x128xf32>
    %711 = arith.addf %709, %710 : vector<8x128xf32>
    %712 = vector.extract_strided_slice %703 {offsets = [0, 128], sizes = [8, 128], strides = [1, 1]} : vector<8x512xf32> to vector<8x128xf32>
    %cst_370 = arith.constant 5.000000e-01 : f32
    %713 = vector.broadcast %cst_370 : f32 to vector<8x128xf32>
    %714 = arith.mulf %713, %712 : vector<8x128xf32>
    %715 = math.tanh %714 : vector<8x128xf32>
    %cst_371 = arith.constant 5.000000e-01 : f32
    %716 = vector.broadcast %cst_371 : f32 to vector<8x128xf32>
    %717 = arith.mulf %716, %715 : vector<8x128xf32>
    %cst_372 = arith.constant 5.000000e-01 : f32
    %718 = vector.broadcast %cst_372 : f32 to vector<8x128xf32>
    %719 = arith.addf %717, %718 : vector<8x128xf32>
    %720 = vector.extract_strided_slice %703 {offsets = [0, 256], sizes = [8, 128], strides = [1, 1]} : vector<8x512xf32> to vector<8x128xf32>
    %721 = math.tanh %720 : vector<8x128xf32>
    %722 = vector.extract_strided_slice %703 {offsets = [0, 384], sizes = [8, 128], strides = [1, 1]} : vector<8x512xf32> to vector<8x128xf32>
    %cst_373 = arith.constant 5.000000e-01 : f32
    %723 = vector.broadcast %cst_373 : f32 to vector<8x128xf32>
    %724 = arith.mulf %723, %722 : vector<8x128xf32>
    %725 = math.tanh %724 : vector<8x128xf32>
    %cst_374 = arith.constant 5.000000e-01 : f32
    %726 = vector.broadcast %cst_374 : f32 to vector<8x128xf32>
    %727 = arith.mulf %726, %725 : vector<8x128xf32>
    %cst_375 = arith.constant 5.000000e-01 : f32
    %728 = vector.broadcast %cst_375 : f32 to vector<8x128xf32>
    %729 = arith.addf %727, %728 : vector<8x128xf32>
    %c0_376 = arith.constant 0 : index
    %c0_377 = arith.constant 0 : index
    %730 = vector.load %arg8[%c0_376, %c0_377] : memref<8x128xf32, #tpu.memory_space<vmem>>, vector<8x128xf32>
    %731 = arith.mulf %719, %730 : vector<8x128xf32>
    %732 = arith.mulf %711, %721 : vector<8x128xf32>
    %733 = arith.addf %731, %732 : vector<8x128xf32>
    %734 = math.tanh %733 : vector<8x128xf32>
    %735 = arith.mulf %729, %734 : vector<8x128xf32>
    %c0_378 = arith.constant 0 : index
    %c0_379 = arith.constant 0 : index
    %736 = vector.load %arg8[%c0_378, %c0_379] : memref<8x128xf32, #tpu.memory_space<vmem>>, vector<8x128xf32>
    tpu.vector_store %arg8[%c0_378, %c0_379], %733 {strides = array<i32>} : memref<8x128xf32, #tpu.memory_space<vmem>>, vector<8x128xf32>,
    %c0_380 = arith.constant 0 : index
    %c0_381 = arith.constant 0 : index
    %737 = vector.load %arg7[%c0_380, %c0_381] : memref<8x128xf32, #tpu.memory_space<vmem>>, vector<8x128xf32>
    tpu.vector_store %arg7[%c0_380, %c0_381], %735 {strides = array<i32>} : memref<8x128xf32, #tpu.memory_space<vmem>>, vector<8x128xf32>,
    %738 = arith.truncf %735 : vector<8x128xf32> to vector<8x128xbf16>
    %739 = arith.index_cast %c6_i32_361 : i32 to index
    %c0_382 = arith.constant 0 : index
    %c0_383 = arith.constant 0 : index
    %740 = vector.load %arg5[%739, %c0_382, %c0_383] : memref<8x8x128xbf16, #tpu.memory_space<vmem>>, vector<1x8x128xbf16>
    %741 = vector.shape_cast %740 : vector<1x8x128xbf16> to vector<8x128xbf16>
    %742 = vector.shape_cast %738 : vector<8x128xbf16> to vector<1x8x128xbf16>
    tpu.vector_store %arg5[%739, %c0_382, %c0_383], %742 {strides = array<i32>} : memref<8x8x128xbf16, #tpu.memory_space<vmem>>, vector<1x8x128xbf16>,
    %c7_i32_384 = arith.constant 7 : i32
    %743 = arith.index_cast %c7_i32_384 : i32 to index
    %c0_385 = arith.constant 0 : index
    %c0_386 = arith.constant 0 : index
    %744 = vector.load %arg6[%743, %c0_385, %c0_386] : memref<8x8x512xbf16, #tpu.memory_space<vmem>>, vector<1x8x512xbf16>
    %745 = vector.shape_cast %744 : vector<1x8x512xbf16> to vector<8x512xbf16>
    %746 = arith.extf %745 : vector<8x512xbf16> to vector<8x512xf32>
    %c0_387 = arith.constant 0 : index
    %c0_388 = arith.constant 0 : index
    %747 = vector.load %arg7[%c0_387, %c0_388] : memref<8x128xf32, #tpu.memory_space<vmem>>, vector<8x128xf32>
    %748 = arith.truncf %747 : vector<8x128xf32> to vector<8x128xbf16>
    %cst_389 = arith.constant dense<0.000000e+00> : vector<8x512xf32>
    %749 = tpu.matmul %748, %399, %cst_389 {dimension_numbers = #tpu.dot_dimension_numbers<[1], [0], [0], [1], [0, 0, 1, 1], [], []>} : vector<8x128xbf16>, vector<128x512xbf16>, vector<8x512xf32> -> vector<8x512xf32>
    %750 = arith.addf %746, %749 : vector<8x512xf32>
    %751 = vector.extract_strided_slice %750 {offsets = [0, 0], sizes = [8, 128], strides = [1, 1]} : vector<8x512xf32> to vector<8x128xf32>
    %cst_390 = arith.constant 5.000000e-01 : f32
    %752 = vector.broadcast %cst_390 : f32 to vector<8x128xf32>
    %753 = arith.mulf %752, %751 : vector<8x128xf32>
    %754 = math.tanh %753 : vector<8x128xf32>
    %cst_391 = arith.constant 5.000000e-01 : f32
    %755 = vector.broadcast %cst_391 : f32 to vector<8x128xf32>
    %756 = arith.mulf %755, %754 : vector<8x128xf32>
    %cst_392 = arith.constant 5.000000e-01 : f32
    %757 = vector.broadcast %cst_392 : f32 to vector<8x128xf32>
    %758 = arith.addf %756, %757 : vector<8x128xf32>
    %759 = vector.extract_strided_slice %750 {offsets = [0, 128], sizes = [8, 128], strides = [1, 1]} : vector<8x512xf32> to vector<8x128xf32>
    %cst_393 = arith.constant 5.000000e-01 : f32
    %760 = vector.broadcast %cst_393 : f32 to vector<8x128xf32>
    %761 = arith.mulf %760, %759 : vector<8x128xf32>
    %762 = math.tanh %761 : vector<8x128xf32>
    %cst_394 = arith.constant 5.000000e-01 : f32
    %763 = vector.broadcast %cst_394 : f32 to vector<8x128xf32>
    %764 = arith.mulf %763, %762 : vector<8x128xf32>
    %cst_395 = arith.constant 5.000000e-01 : f32
    %765 = vector.broadcast %cst_395 : f32 to vector<8x128xf32>
    %766 = arith.addf %764, %765 : vector<8x128xf32>
    %767 = vector.extract_strided_slice %750 {offsets = [0, 256], sizes = [8, 128], strides = [1, 1]} : vector<8x512xf32> to vector<8x128xf32>
    %768 = math.tanh %767 : vector<8x128xf32>
    %769 = vector.extract_strided_slice %750 {offsets = [0, 384], sizes = [8, 128], strides = [1, 1]} : vector<8x512xf32> to vector<8x128xf32>
    %cst_396 = arith.constant 5.000000e-01 : f32
    %770 = vector.broadcast %cst_396 : f32 to vector<8x128xf32>
    %771 = arith.mulf %770, %769 : vector<8x128xf32>
    %772 = math.tanh %771 : vector<8x128xf32>
    %cst_397 = arith.constant 5.000000e-01 : f32
    %773 = vector.broadcast %cst_397 : f32 to vector<8x128xf32>
    %774 = arith.mulf %773, %772 : vector<8x128xf32>
    %cst_398 = arith.constant 5.000000e-01 : f32
    %775 = vector.broadcast %cst_398 : f32 to vector<8x128xf32>
    %776 = arith.addf %774, %775 : vector<8x128xf32>
    %c0_399 = arith.constant 0 : index
    %c0_400 = arith.constant 0 : index
    %777 = vector.load %arg8[%c0_399, %c0_400] : memref<8x128xf32, #tpu.memory_space<vmem>>, vector<8x128xf32>
    %778 = arith.mulf %766, %777 : vector<8x128xf32>
    %779 = arith.mulf %758, %768 : vector<8x128xf32>
    %780 = arith.addf %778, %779 : vector<8x128xf32>
    %781 = math.tanh %780 : vector<8x128xf32>
    %782 = arith.mulf %776, %781 : vector<8x128xf32>
    %c0_401 = arith.constant 0 : index
    %c0_402 = arith.constant 0 : index
    %783 = vector.load %arg8[%c0_401, %c0_402] : memref<8x128xf32, #tpu.memory_space<vmem>>, vector<8x128xf32>
    tpu.vector_store %arg8[%c0_401, %c0_402], %780 {strides = array<i32>} : memref<8x128xf32, #tpu.memory_space<vmem>>, vector<8x128xf32>,
    %c0_403 = arith.constant 0 : index
    %c0_404 = arith.constant 0 : index
    %784 = vector.load %arg7[%c0_403, %c0_404] : memref<8x128xf32, #tpu.memory_space<vmem>>, vector<8x128xf32>
    tpu.vector_store %arg7[%c0_403, %c0_404], %782 {strides = array<i32>} : memref<8x128xf32, #tpu.memory_space<vmem>>, vector<8x128xf32>,
    %785 = arith.truncf %782 : vector<8x128xf32> to vector<8x128xbf16>
    %786 = arith.index_cast %c7_i32_384 : i32 to index
    %c0_405 = arith.constant 0 : index
    %c0_406 = arith.constant 0 : index
    %787 = vector.load %arg5[%786, %c0_405, %c0_406] : memref<8x8x128xbf16, #tpu.memory_space<vmem>>, vector<1x8x128xbf16>
    %788 = vector.shape_cast %787 : vector<1x8x128xbf16> to vector<8x128xbf16>
    %789 = vector.shape_cast %785 : vector<8x128xbf16> to vector<1x8x128xbf16>
    tpu.vector_store %arg5[%786, %c0_405, %c0_406], %789 {strides = array<i32>} : memref<8x8x128xbf16, #tpu.memory_space<vmem>>, vector<1x8x128xbf16>,
    %c8_i32_407 = arith.constant 8 : i32
    %c2 = arith.constant 2 : index
    %c0_408 = arith.constant 0 : index
    %c0_409 = arith.constant 0 : index
    %790 = vector.load %arg2[%c2, %c0_408, %c0_409] : memref<4x128x512xbf16, #tpu.memory_space<vmem>>, vector<1x128x512xbf16>
    %791 = vector.shape_cast %790 : vector<1x128x512xbf16> to vector<128x512xbf16>
    %c2_410 = arith.constant 2 : index
    %c0_411 = arith.constant 0 : index
    %c0_412 = arith.constant 0 : index
    %792 = vector.load %arg3[%c2_410, %c0_411, %c0_412] : memref<4x128x512xbf16, #tpu.memory_space<vmem>>, vector<1x128x512xbf16>
    %793 = vector.shape_cast %792 : vector<1x128x512xbf16> to vector<128x512xbf16>
    %c2_413 = arith.constant 2 : index
    %c0_414 = arith.constant 0 : index
    %c0_415 = arith.constant 0 : index
    %794 = vector.load %arg4[%c2_413, %c0_414, %c0_415] : memref<4x1x512xf32, #tpu.memory_space<vmem>>, vector<1x1x512xf32>
    %795 = vector.shape_cast %794 : vector<1x1x512xf32> to vector<1x512xf32>
    %c0_416 = arith.constant 0 : index
    %c0_417 = arith.constant 0 : index
    %c0_418 = arith.constant 0 : index
    %796 = vector.load %arg5[%c0_416, %c0_417, %c0_418] : memref<8x8x128xbf16, #tpu.memory_space<vmem>>, vector<8x8x128xbf16>
    %797 = vector.shape_cast %796 : vector<8x8x128xbf16> to vector<64x128xbf16>
    %cst_419 = arith.constant dense<0.000000e+00> : vector<64x512xf32>
    %798 = tpu.matmul %797, %791, %cst_419 {dimension_numbers = #tpu.dot_dimension_numbers<[1], [0], [0], [1], [0, 0, 1, 1], [], []>} : vector<64x128xbf16>, vector<128x512xbf16>, vector<64x512xf32> -> vector<64x512xf32>
    %799 = vector.broadcast %795 : vector<1x512xf32> to vector<64x512xf32>
    %800 = arith.addf %798, %799 : vector<64x512xf32>
    %801 = vector.shape_cast %800 : vector<64x512xf32> to vector<8x8x512xf32>
    %802 = arith.truncf %801 : vector<8x8x512xf32> to vector<8x8x512xbf16>
    %c0_420 = arith.constant 0 : index
    %c0_421 = arith.constant 0 : index
    %c0_422 = arith.constant 0 : index
    %803 = vector.load %arg6[%c0_420, %c0_421, %c0_422] : memref<8x8x512xbf16, #tpu.memory_space<vmem>>, vector<8x8x512xbf16>
    tpu.vector_store %arg6[%c0_420, %c0_421, %c0_422], %802 {strides = array<i32>} : memref<8x8x512xbf16, #tpu.memory_space<vmem>>, vector<8x8x512xbf16>,
    %cst_423 = arith.constant 0.000000e+00 : f32
    %804 = vector.broadcast %cst_423 : f32 to vector<8x128xf32>
    %c0_424 = arith.constant 0 : index
    %c0_425 = arith.constant 0 : index
    %805 = vector.load %arg7[%c0_424, %c0_425] : memref<8x128xf32, #tpu.memory_space<vmem>>, vector<8x128xf32>
    tpu.vector_store %arg7[%c0_424, %c0_425], %804 {strides = array<i32>} : memref<8x128xf32, #tpu.memory_space<vmem>>, vector<8x128xf32>,
    %cst_426 = arith.constant 0.000000e+00 : f32
    %806 = vector.broadcast %cst_426 : f32 to vector<8x128xf32>
    %c0_427 = arith.constant 0 : index
    %c0_428 = arith.constant 0 : index
    %807 = vector.load %arg8[%c0_427, %c0_428] : memref<8x128xf32, #tpu.memory_space<vmem>>, vector<8x128xf32>
    tpu.vector_store %arg8[%c0_427, %c0_428], %806 {strides = array<i32>} : memref<8x128xf32, #tpu.memory_space<vmem>>, vector<8x128xf32>,
    %c0_i32_429 = arith.constant 0 : i32
    %808 = arith.index_cast %c0_i32_429 : i32 to index
    %c0_430 = arith.constant 0 : index
    %c0_431 = arith.constant 0 : index
    %809 = vector.load %arg6[%808, %c0_430, %c0_431] : memref<8x8x512xbf16, #tpu.memory_space<vmem>>, vector<1x8x512xbf16>
    %810 = vector.shape_cast %809 : vector<1x8x512xbf16> to vector<8x512xbf16>
    %811 = arith.extf %810 : vector<8x512xbf16> to vector<8x512xf32>
    %c0_432 = arith.constant 0 : index
    %c0_433 = arith.constant 0 : index
    %812 = vector.load %arg7[%c0_432, %c0_433] : memref<8x128xf32, #tpu.memory_space<vmem>>, vector<8x128xf32>
    %813 = arith.truncf %812 : vector<8x128xf32> to vector<8x128xbf16>
    %cst_434 = arith.constant dense<0.000000e+00> : vector<8x512xf32>
    %814 = tpu.matmul %813, %793, %cst_434 {dimension_numbers = #tpu.dot_dimension_numbers<[1], [0], [0], [1], [0, 0, 1, 1], [], []>} : vector<8x128xbf16>, vector<128x512xbf16>, vector<8x512xf32> -> vector<8x512xf32>
    %815 = arith.addf %811, %814 : vector<8x512xf32>
    %816 = vector.extract_strided_slice %815 {offsets = [0, 0], sizes = [8, 128], strides = [1, 1]} : vector<8x512xf32> to vector<8x128xf32>
    %cst_435 = arith.constant 5.000000e-01 : f32
    %817 = vector.broadcast %cst_435 : f32 to vector<8x128xf32>
    %818 = arith.mulf %817, %816 : vector<8x128xf32>
    %819 = math.tanh %818 : vector<8x128xf32>
    %cst_436 = arith.constant 5.000000e-01 : f32
    %820 = vector.broadcast %cst_436 : f32 to vector<8x128xf32>
    %821 = arith.mulf %820, %819 : vector<8x128xf32>
    %cst_437 = arith.constant 5.000000e-01 : f32
    %822 = vector.broadcast %cst_437 : f32 to vector<8x128xf32>
    %823 = arith.addf %821, %822 : vector<8x128xf32>
    %824 = vector.extract_strided_slice %815 {offsets = [0, 128], sizes = [8, 128], strides = [1, 1]} : vector<8x512xf32> to vector<8x128xf32>
    %cst_438 = arith.constant 5.000000e-01 : f32
    %825 = vector.broadcast %cst_438 : f32 to vector<8x128xf32>
    %826 = arith.mulf %825, %824 : vector<8x128xf32>
    %827 = math.tanh %826 : vector<8x128xf32>
    %cst_439 = arith.constant 5.000000e-01 : f32
    %828 = vector.broadcast %cst_439 : f32 to vector<8x128xf32>
    %829 = arith.mulf %828, %827 : vector<8x128xf32>
    %cst_440 = arith.constant 5.000000e-01 : f32
    %830 = vector.broadcast %cst_440 : f32 to vector<8x128xf32>
    %831 = arith.addf %829, %830 : vector<8x128xf32>
    %832 = vector.extract_strided_slice %815 {offsets = [0, 256], sizes = [8, 128], strides = [1, 1]} : vector<8x512xf32> to vector<8x128xf32>
    %833 = math.tanh %832 : vector<8x128xf32>
    %834 = vector.extract_strided_slice %815 {offsets = [0, 384], sizes = [8, 128], strides = [1, 1]} : vector<8x512xf32> to vector<8x128xf32>
    %cst_441 = arith.constant 5.000000e-01 : f32
    %835 = vector.broadcast %cst_441 : f32 to vector<8x128xf32>
    %836 = arith.mulf %835, %834 : vector<8x128xf32>
    %837 = math.tanh %836 : vector<8x128xf32>
    %cst_442 = arith.constant 5.000000e-01 : f32
    %838 = vector.broadcast %cst_442 : f32 to vector<8x128xf32>
    %839 = arith.mulf %838, %837 : vector<8x128xf32>
    %cst_443 = arith.constant 5.000000e-01 : f32
    %840 = vector.broadcast %cst_443 : f32 to vector<8x128xf32>
    %841 = arith.addf %839, %840 : vector<8x128xf32>
    %c0_444 = arith.constant 0 : index
    %c0_445 = arith.constant 0 : index
    %842 = vector.load %arg8[%c0_444, %c0_445] : memref<8x128xf32, #tpu.memory_space<vmem>>, vector<8x128xf32>
    %843 = arith.mulf %831, %842 : vector<8x128xf32>
    %844 = arith.mulf %823, %833 : vector<8x128xf32>
    %845 = arith.addf %843, %844 : vector<8x128xf32>
    %846 = math.tanh %845 : vector<8x128xf32>
    %847 = arith.mulf %841, %846 : vector<8x128xf32>
    %c0_446 = arith.constant 0 : index
    %c0_447 = arith.constant 0 : index
    %848 = vector.load %arg8[%c0_446, %c0_447] : memref<8x128xf32, #tpu.memory_space<vmem>>, vector<8x128xf32>
    tpu.vector_store %arg8[%c0_446, %c0_447], %845 {strides = array<i32>} : memref<8x128xf32, #tpu.memory_space<vmem>>, vector<8x128xf32>,
    %c0_448 = arith.constant 0 : index
    %c0_449 = arith.constant 0 : index
    %849 = vector.load %arg7[%c0_448, %c0_449] : memref<8x128xf32, #tpu.memory_space<vmem>>, vector<8x128xf32>
    tpu.vector_store %arg7[%c0_448, %c0_449], %847 {strides = array<i32>} : memref<8x128xf32, #tpu.memory_space<vmem>>, vector<8x128xf32>,
    %850 = arith.truncf %847 : vector<8x128xf32> to vector<8x128xbf16>
    %851 = arith.index_cast %c0_i32_429 : i32 to index
    %c0_450 = arith.constant 0 : index
    %c0_451 = arith.constant 0 : index
    %852 = vector.load %arg5[%851, %c0_450, %c0_451] : memref<8x8x128xbf16, #tpu.memory_space<vmem>>, vector<1x8x128xbf16>
    %853 = vector.shape_cast %852 : vector<1x8x128xbf16> to vector<8x128xbf16>
    %854 = vector.shape_cast %850 : vector<8x128xbf16> to vector<1x8x128xbf16>
    tpu.vector_store %arg5[%851, %c0_450, %c0_451], %854 {strides = array<i32>} : memref<8x8x128xbf16, #tpu.memory_space<vmem>>, vector<1x8x128xbf16>,
    %c1_i32_452 = arith.constant 1 : i32
    %855 = arith.index_cast %c1_i32_452 : i32 to index
    %c0_453 = arith.constant 0 : index
    %c0_454 = arith.constant 0 : index
    %856 = vector.load %arg6[%855, %c0_453, %c0_454] : memref<8x8x512xbf16, #tpu.memory_space<vmem>>, vector<1x8x512xbf16>
    %857 = vector.shape_cast %856 : vector<1x8x512xbf16> to vector<8x512xbf16>
    %858 = arith.extf %857 : vector<8x512xbf16> to vector<8x512xf32>
    %c0_455 = arith.constant 0 : index
    %c0_456 = arith.constant 0 : index
    %859 = vector.load %arg7[%c0_455, %c0_456] : memref<8x128xf32, #tpu.memory_space<vmem>>, vector<8x128xf32>
    %860 = arith.truncf %859 : vector<8x128xf32> to vector<8x128xbf16>
    %cst_457 = arith.constant dense<0.000000e+00> : vector<8x512xf32>
    %861 = tpu.matmul %860, %793, %cst_457 {dimension_numbers = #tpu.dot_dimension_numbers<[1], [0], [0], [1], [0, 0, 1, 1], [], []>} : vector<8x128xbf16>, vector<128x512xbf16>, vector<8x512xf32> -> vector<8x512xf32>
    %862 = arith.addf %858, %861 : vector<8x512xf32>
    %863 = vector.extract_strided_slice %862 {offsets = [0, 0], sizes = [8, 128], strides = [1, 1]} : vector<8x512xf32> to vector<8x128xf32>
    %cst_458 = arith.constant 5.000000e-01 : f32
    %864 = vector.broadcast %cst_458 : f32 to vector<8x128xf32>
    %865 = arith.mulf %864, %863 : vector<8x128xf32>
    %866 = math.tanh %865 : vector<8x128xf32>
    %cst_459 = arith.constant 5.000000e-01 : f32
    %867 = vector.broadcast %cst_459 : f32 to vector<8x128xf32>
    %868 = arith.mulf %867, %866 : vector<8x128xf32>
    %cst_460 = arith.constant 5.000000e-01 : f32
    %869 = vector.broadcast %cst_460 : f32 to vector<8x128xf32>
    %870 = arith.addf %868, %869 : vector<8x128xf32>
    %871 = vector.extract_strided_slice %862 {offsets = [0, 128], sizes = [8, 128], strides = [1, 1]} : vector<8x512xf32> to vector<8x128xf32>
    %cst_461 = arith.constant 5.000000e-01 : f32
    %872 = vector.broadcast %cst_461 : f32 to vector<8x128xf32>
    %873 = arith.mulf %872, %871 : vector<8x128xf32>
    %874 = math.tanh %873 : vector<8x128xf32>
    %cst_462 = arith.constant 5.000000e-01 : f32
    %875 = vector.broadcast %cst_462 : f32 to vector<8x128xf32>
    %876 = arith.mulf %875, %874 : vector<8x128xf32>
    %cst_463 = arith.constant 5.000000e-01 : f32
    %877 = vector.broadcast %cst_463 : f32 to vector<8x128xf32>
    %878 = arith.addf %876, %877 : vector<8x128xf32>
    %879 = vector.extract_strided_slice %862 {offsets = [0, 256], sizes = [8, 128], strides = [1, 1]} : vector<8x512xf32> to vector<8x128xf32>
    %880 = math.tanh %879 : vector<8x128xf32>
    %881 = vector.extract_strided_slice %862 {offsets = [0, 384], sizes = [8, 128], strides = [1, 1]} : vector<8x512xf32> to vector<8x128xf32>
    %cst_464 = arith.constant 5.000000e-01 : f32
    %882 = vector.broadcast %cst_464 : f32 to vector<8x128xf32>
    %883 = arith.mulf %882, %881 : vector<8x128xf32>
    %884 = math.tanh %883 : vector<8x128xf32>
    %cst_465 = arith.constant 5.000000e-01 : f32
    %885 = vector.broadcast %cst_465 : f32 to vector<8x128xf32>
    %886 = arith.mulf %885, %884 : vector<8x128xf32>
    %cst_466 = arith.constant 5.000000e-01 : f32
    %887 = vector.broadcast %cst_466 : f32 to vector<8x128xf32>
    %888 = arith.addf %886, %887 : vector<8x128xf32>
    %c0_467 = arith.constant 0 : index
    %c0_468 = arith.constant 0 : index
    %889 = vector.load %arg8[%c0_467, %c0_468] : memref<8x128xf32, #tpu.memory_space<vmem>>, vector<8x128xf32>
    %890 = arith.mulf %878, %889 : vector<8x128xf32>
    %891 = arith.mulf %870, %880 : vector<8x128xf32>
    %892 = arith.addf %890, %891 : vector<8x128xf32>
    %893 = math.tanh %892 : vector<8x128xf32>
    %894 = arith.mulf %888, %893 : vector<8x128xf32>
    %c0_469 = arith.constant 0 : index
    %c0_470 = arith.constant 0 : index
    %895 = vector.load %arg8[%c0_469, %c0_470] : memref<8x128xf32, #tpu.memory_space<vmem>>, vector<8x128xf32>
    tpu.vector_store %arg8[%c0_469, %c0_470], %892 {strides = array<i32>} : memref<8x128xf32, #tpu.memory_space<vmem>>, vector<8x128xf32>,
    %c0_471 = arith.constant 0 : index
    %c0_472 = arith.constant 0 : index
    %896 = vector.load %arg7[%c0_471, %c0_472] : memref<8x128xf32, #tpu.memory_space<vmem>>, vector<8x128xf32>
    tpu.vector_store %arg7[%c0_471, %c0_472], %894 {strides = array<i32>} : memref<8x128xf32, #tpu.memory_space<vmem>>, vector<8x128xf32>,
    %897 = arith.truncf %894 : vector<8x128xf32> to vector<8x128xbf16>
    %898 = arith.index_cast %c1_i32_452 : i32 to index
    %c0_473 = arith.constant 0 : index
    %c0_474 = arith.constant 0 : index
    %899 = vector.load %arg5[%898, %c0_473, %c0_474] : memref<8x8x128xbf16, #tpu.memory_space<vmem>>, vector<1x8x128xbf16>
    %900 = vector.shape_cast %899 : vector<1x8x128xbf16> to vector<8x128xbf16>
    %901 = vector.shape_cast %897 : vector<8x128xbf16> to vector<1x8x128xbf16>
    tpu.vector_store %arg5[%898, %c0_473, %c0_474], %901 {strides = array<i32>} : memref<8x8x128xbf16, #tpu.memory_space<vmem>>, vector<1x8x128xbf16>,
    %c2_i32_475 = arith.constant 2 : i32
    %902 = arith.index_cast %c2_i32_475 : i32 to index
    %c0_476 = arith.constant 0 : index
    %c0_477 = arith.constant 0 : index
    %903 = vector.load %arg6[%902, %c0_476, %c0_477] : memref<8x8x512xbf16, #tpu.memory_space<vmem>>, vector<1x8x512xbf16>
    %904 = vector.shape_cast %903 : vector<1x8x512xbf16> to vector<8x512xbf16>
    %905 = arith.extf %904 : vector<8x512xbf16> to vector<8x512xf32>
    %c0_478 = arith.constant 0 : index
    %c0_479 = arith.constant 0 : index
    %906 = vector.load %arg7[%c0_478, %c0_479] : memref<8x128xf32, #tpu.memory_space<vmem>>, vector<8x128xf32>
    %907 = arith.truncf %906 : vector<8x128xf32> to vector<8x128xbf16>
    %cst_480 = arith.constant dense<0.000000e+00> : vector<8x512xf32>
    %908 = tpu.matmul %907, %793, %cst_480 {dimension_numbers = #tpu.dot_dimension_numbers<[1], [0], [0], [1], [0, 0, 1, 1], [], []>} : vector<8x128xbf16>, vector<128x512xbf16>, vector<8x512xf32> -> vector<8x512xf32>
    %909 = arith.addf %905, %908 : vector<8x512xf32>
    %910 = vector.extract_strided_slice %909 {offsets = [0, 0], sizes = [8, 128], strides = [1, 1]} : vector<8x512xf32> to vector<8x128xf32>
    %cst_481 = arith.constant 5.000000e-01 : f32
    %911 = vector.broadcast %cst_481 : f32 to vector<8x128xf32>
    %912 = arith.mulf %911, %910 : vector<8x128xf32>
    %913 = math.tanh %912 : vector<8x128xf32>
    %cst_482 = arith.constant 5.000000e-01 : f32
    %914 = vector.broadcast %cst_482 : f32 to vector<8x128xf32>
    %915 = arith.mulf %914, %913 : vector<8x128xf32>
    %cst_483 = arith.constant 5.000000e-01 : f32
    %916 = vector.broadcast %cst_483 : f32 to vector<8x128xf32>
    %917 = arith.addf %915, %916 : vector<8x128xf32>
    %918 = vector.extract_strided_slice %909 {offsets = [0, 128], sizes = [8, 128], strides = [1, 1]} : vector<8x512xf32> to vector<8x128xf32>
    %cst_484 = arith.constant 5.000000e-01 : f32
    %919 = vector.broadcast %cst_484 : f32 to vector<8x128xf32>
    %920 = arith.mulf %919, %918 : vector<8x128xf32>
    %921 = math.tanh %920 : vector<8x128xf32>
    %cst_485 = arith.constant 5.000000e-01 : f32
    %922 = vector.broadcast %cst_485 : f32 to vector<8x128xf32>
    %923 = arith.mulf %922, %921 : vector<8x128xf32>
    %cst_486 = arith.constant 5.000000e-01 : f32
    %924 = vector.broadcast %cst_486 : f32 to vector<8x128xf32>
    %925 = arith.addf %923, %924 : vector<8x128xf32>
    %926 = vector.extract_strided_slice %909 {offsets = [0, 256], sizes = [8, 128], strides = [1, 1]} : vector<8x512xf32> to vector<8x128xf32>
    %927 = math.tanh %926 : vector<8x128xf32>
    %928 = vector.extract_strided_slice %909 {offsets = [0, 384], sizes = [8, 128], strides = [1, 1]} : vector<8x512xf32> to vector<8x128xf32>
    %cst_487 = arith.constant 5.000000e-01 : f32
    %929 = vector.broadcast %cst_487 : f32 to vector<8x128xf32>
    %930 = arith.mulf %929, %928 : vector<8x128xf32>
    %931 = math.tanh %930 : vector<8x128xf32>
    %cst_488 = arith.constant 5.000000e-01 : f32
    %932 = vector.broadcast %cst_488 : f32 to vector<8x128xf32>
    %933 = arith.mulf %932, %931 : vector<8x128xf32>
    %cst_489 = arith.constant 5.000000e-01 : f32
    %934 = vector.broadcast %cst_489 : f32 to vector<8x128xf32>
    %935 = arith.addf %933, %934 : vector<8x128xf32>
    %c0_490 = arith.constant 0 : index
    %c0_491 = arith.constant 0 : index
    %936 = vector.load %arg8[%c0_490, %c0_491] : memref<8x128xf32, #tpu.memory_space<vmem>>, vector<8x128xf32>
    %937 = arith.mulf %925, %936 : vector<8x128xf32>
    %938 = arith.mulf %917, %927 : vector<8x128xf32>
    %939 = arith.addf %937, %938 : vector<8x128xf32>
    %940 = math.tanh %939 : vector<8x128xf32>
    %941 = arith.mulf %935, %940 : vector<8x128xf32>
    %c0_492 = arith.constant 0 : index
    %c0_493 = arith.constant 0 : index
    %942 = vector.load %arg8[%c0_492, %c0_493] : memref<8x128xf32, #tpu.memory_space<vmem>>, vector<8x128xf32>
    tpu.vector_store %arg8[%c0_492, %c0_493], %939 {strides = array<i32>} : memref<8x128xf32, #tpu.memory_space<vmem>>, vector<8x128xf32>,
    %c0_494 = arith.constant 0 : index
    %c0_495 = arith.constant 0 : index
    %943 = vector.load %arg7[%c0_494, %c0_495] : memref<8x128xf32, #tpu.memory_space<vmem>>, vector<8x128xf32>
    tpu.vector_store %arg7[%c0_494, %c0_495], %941 {strides = array<i32>} : memref<8x128xf32, #tpu.memory_space<vmem>>, vector<8x128xf32>,
    %944 = arith.truncf %941 : vector<8x128xf32> to vector<8x128xbf16>
    %945 = arith.index_cast %c2_i32_475 : i32 to index
    %c0_496 = arith.constant 0 : index
    %c0_497 = arith.constant 0 : index
    %946 = vector.load %arg5[%945, %c0_496, %c0_497] : memref<8x8x128xbf16, #tpu.memory_space<vmem>>, vector<1x8x128xbf16>
    %947 = vector.shape_cast %946 : vector<1x8x128xbf16> to vector<8x128xbf16>
    %948 = vector.shape_cast %944 : vector<8x128xbf16> to vector<1x8x128xbf16>
    tpu.vector_store %arg5[%945, %c0_496, %c0_497], %948 {strides = array<i32>} : memref<8x8x128xbf16, #tpu.memory_space<vmem>>, vector<1x8x128xbf16>,
    %c3_i32_498 = arith.constant 3 : i32
    %949 = arith.index_cast %c3_i32_498 : i32 to index
    %c0_499 = arith.constant 0 : index
    %c0_500 = arith.constant 0 : index
    %950 = vector.load %arg6[%949, %c0_499, %c0_500] : memref<8x8x512xbf16, #tpu.memory_space<vmem>>, vector<1x8x512xbf16>
    %951 = vector.shape_cast %950 : vector<1x8x512xbf16> to vector<8x512xbf16>
    %952 = arith.extf %951 : vector<8x512xbf16> to vector<8x512xf32>
    %c0_501 = arith.constant 0 : index
    %c0_502 = arith.constant 0 : index
    %953 = vector.load %arg7[%c0_501, %c0_502] : memref<8x128xf32, #tpu.memory_space<vmem>>, vector<8x128xf32>
    %954 = arith.truncf %953 : vector<8x128xf32> to vector<8x128xbf16>
    %cst_503 = arith.constant dense<0.000000e+00> : vector<8x512xf32>
    %955 = tpu.matmul %954, %793, %cst_503 {dimension_numbers = #tpu.dot_dimension_numbers<[1], [0], [0], [1], [0, 0, 1, 1], [], []>} : vector<8x128xbf16>, vector<128x512xbf16>, vector<8x512xf32> -> vector<8x512xf32>
    %956 = arith.addf %952, %955 : vector<8x512xf32>
    %957 = vector.extract_strided_slice %956 {offsets = [0, 0], sizes = [8, 128], strides = [1, 1]} : vector<8x512xf32> to vector<8x128xf32>
    %cst_504 = arith.constant 5.000000e-01 : f32
    %958 = vector.broadcast %cst_504 : f32 to vector<8x128xf32>
    %959 = arith.mulf %958, %957 : vector<8x128xf32>
    %960 = math.tanh %959 : vector<8x128xf32>
    %cst_505 = arith.constant 5.000000e-01 : f32
    %961 = vector.broadcast %cst_505 : f32 to vector<8x128xf32>
    %962 = arith.mulf %961, %960 : vector<8x128xf32>
    %cst_506 = arith.constant 5.000000e-01 : f32
    %963 = vector.broadcast %cst_506 : f32 to vector<8x128xf32>
    %964 = arith.addf %962, %963 : vector<8x128xf32>
    %965 = vector.extract_strided_slice %956 {offsets = [0, 128], sizes = [8, 128], strides = [1, 1]} : vector<8x512xf32> to vector<8x128xf32>
    %cst_507 = arith.constant 5.000000e-01 : f32
    %966 = vector.broadcast %cst_507 : f32 to vector<8x128xf32>
    %967 = arith.mulf %966, %965 : vector<8x128xf32>
    %968 = math.tanh %967 : vector<8x128xf32>
    %cst_508 = arith.constant 5.000000e-01 : f32
    %969 = vector.broadcast %cst_508 : f32 to vector<8x128xf32>
    %970 = arith.mulf %969, %968 : vector<8x128xf32>
    %cst_509 = arith.constant 5.000000e-01 : f32
    %971 = vector.broadcast %cst_509 : f32 to vector<8x128xf32>
    %972 = arith.addf %970, %971 : vector<8x128xf32>
    %973 = vector.extract_strided_slice %956 {offsets = [0, 256], sizes = [8, 128], strides = [1, 1]} : vector<8x512xf32> to vector<8x128xf32>
    %974 = math.tanh %973 : vector<8x128xf32>
    %975 = vector.extract_strided_slice %956 {offsets = [0, 384], sizes = [8, 128], strides = [1, 1]} : vector<8x512xf32> to vector<8x128xf32>
    %cst_510 = arith.constant 5.000000e-01 : f32
    %976 = vector.broadcast %cst_510 : f32 to vector<8x128xf32>
    %977 = arith.mulf %976, %975 : vector<8x128xf32>
    %978 = math.tanh %977 : vector<8x128xf32>
    %cst_511 = arith.constant 5.000000e-01 : f32
    %979 = vector.broadcast %cst_511 : f32 to vector<8x128xf32>
    %980 = arith.mulf %979, %978 : vector<8x128xf32>
    %cst_512 = arith.constant 5.000000e-01 : f32
    %981 = vector.broadcast %cst_512 : f32 to vector<8x128xf32>
    %982 = arith.addf %980, %981 : vector<8x128xf32>
    %c0_513 = arith.constant 0 : index
    %c0_514 = arith.constant 0 : index
    %983 = vector.load %arg8[%c0_513, %c0_514] : memref<8x128xf32, #tpu.memory_space<vmem>>, vector<8x128xf32>
    %984 = arith.mulf %972, %983 : vector<8x128xf32>
    %985 = arith.mulf %964, %974 : vector<8x128xf32>
    %986 = arith.addf %984, %985 : vector<8x128xf32>
    %987 = math.tanh %986 : vector<8x128xf32>
    %988 = arith.mulf %982, %987 : vector<8x128xf32>
    %c0_515 = arith.constant 0 : index
    %c0_516 = arith.constant 0 : index
    %989 = vector.load %arg8[%c0_515, %c0_516] : memref<8x128xf32, #tpu.memory_space<vmem>>, vector<8x128xf32>
    tpu.vector_store %arg8[%c0_515, %c0_516], %986 {strides = array<i32>} : memref<8x128xf32, #tpu.memory_space<vmem>>, vector<8x128xf32>,
    %c0_517 = arith.constant 0 : index
    %c0_518 = arith.constant 0 : index
    %990 = vector.load %arg7[%c0_517, %c0_518] : memref<8x128xf32, #tpu.memory_space<vmem>>, vector<8x128xf32>
    tpu.vector_store %arg7[%c0_517, %c0_518], %988 {strides = array<i32>} : memref<8x128xf32, #tpu.memory_space<vmem>>, vector<8x128xf32>,
    %991 = arith.truncf %988 : vector<8x128xf32> to vector<8x128xbf16>
    %992 = arith.index_cast %c3_i32_498 : i32 to index
    %c0_519 = arith.constant 0 : index
    %c0_520 = arith.constant 0 : index
    %993 = vector.load %arg5[%992, %c0_519, %c0_520] : memref<8x8x128xbf16, #tpu.memory_space<vmem>>, vector<1x8x128xbf16>
    %994 = vector.shape_cast %993 : vector<1x8x128xbf16> to vector<8x128xbf16>
    %995 = vector.shape_cast %991 : vector<8x128xbf16> to vector<1x8x128xbf16>
    tpu.vector_store %arg5[%992, %c0_519, %c0_520], %995 {strides = array<i32>} : memref<8x8x128xbf16, #tpu.memory_space<vmem>>, vector<1x8x128xbf16>,
    %c4_i32_521 = arith.constant 4 : i32
    %996 = arith.index_cast %c4_i32_521 : i32 to index
    %c0_522 = arith.constant 0 : index
    %c0_523 = arith.constant 0 : index
    %997 = vector.load %arg6[%996, %c0_522, %c0_523] : memref<8x8x512xbf16, #tpu.memory_space<vmem>>, vector<1x8x512xbf16>
    %998 = vector.shape_cast %997 : vector<1x8x512xbf16> to vector<8x512xbf16>
    %999 = arith.extf %998 : vector<8x512xbf16> to vector<8x512xf32>
    %c0_524 = arith.constant 0 : index
    %c0_525 = arith.constant 0 : index
    %1000 = vector.load %arg7[%c0_524, %c0_525] : memref<8x128xf32, #tpu.memory_space<vmem>>, vector<8x128xf32>
    %1001 = arith.truncf %1000 : vector<8x128xf32> to vector<8x128xbf16>
    %cst_526 = arith.constant dense<0.000000e+00> : vector<8x512xf32>
    %1002 = tpu.matmul %1001, %793, %cst_526 {dimension_numbers = #tpu.dot_dimension_numbers<[1], [0], [0], [1], [0, 0, 1, 1], [], []>} : vector<8x128xbf16>, vector<128x512xbf16>, vector<8x512xf32> -> vector<8x512xf32>
    %1003 = arith.addf %999, %1002 : vector<8x512xf32>
    %1004 = vector.extract_strided_slice %1003 {offsets = [0, 0], sizes = [8, 128], strides = [1, 1]} : vector<8x512xf32> to vector<8x128xf32>
    %cst_527 = arith.constant 5.000000e-01 : f32
    %1005 = vector.broadcast %cst_527 : f32 to vector<8x128xf32>
    %1006 = arith.mulf %1005, %1004 : vector<8x128xf32>
    %1007 = math.tanh %1006 : vector<8x128xf32>
    %cst_528 = arith.constant 5.000000e-01 : f32
    %1008 = vector.broadcast %cst_528 : f32 to vector<8x128xf32>
    %1009 = arith.mulf %1008, %1007 : vector<8x128xf32>
    %cst_529 = arith.constant 5.000000e-01 : f32
    %1010 = vector.broadcast %cst_529 : f32 to vector<8x128xf32>
    %1011 = arith.addf %1009, %1010 : vector<8x128xf32>
    %1012 = vector.extract_strided_slice %1003 {offsets = [0, 128], sizes = [8, 128], strides = [1, 1]} : vector<8x512xf32> to vector<8x128xf32>
    %cst_530 = arith.constant 5.000000e-01 : f32
    %1013 = vector.broadcast %cst_530 : f32 to vector<8x128xf32>
    %1014 = arith.mulf %1013, %1012 : vector<8x128xf32>
    %1015 = math.tanh %1014 : vector<8x128xf32>
    %cst_531 = arith.constant 5.000000e-01 : f32
    %1016 = vector.broadcast %cst_531 : f32 to vector<8x128xf32>
    %1017 = arith.mulf %1016, %1015 : vector<8x128xf32>
    %cst_532 = arith.constant 5.000000e-01 : f32
    %1018 = vector.broadcast %cst_532 : f32 to vector<8x128xf32>
    %1019 = arith.addf %1017, %1018 : vector<8x128xf32>
    %1020 = vector.extract_strided_slice %1003 {offsets = [0, 256], sizes = [8, 128], strides = [1, 1]} : vector<8x512xf32> to vector<8x128xf32>
    %1021 = math.tanh %1020 : vector<8x128xf32>
    %1022 = vector.extract_strided_slice %1003 {offsets = [0, 384], sizes = [8, 128], strides = [1, 1]} : vector<8x512xf32> to vector<8x128xf32>
    %cst_533 = arith.constant 5.000000e-01 : f32
    %1023 = vector.broadcast %cst_533 : f32 to vector<8x128xf32>
    %1024 = arith.mulf %1023, %1022 : vector<8x128xf32>
    %1025 = math.tanh %1024 : vector<8x128xf32>
    %cst_534 = arith.constant 5.000000e-01 : f32
    %1026 = vector.broadcast %cst_534 : f32 to vector<8x128xf32>
    %1027 = arith.mulf %1026, %1025 : vector<8x128xf32>
    %cst_535 = arith.constant 5.000000e-01 : f32
    %1028 = vector.broadcast %cst_535 : f32 to vector<8x128xf32>
    %1029 = arith.addf %1027, %1028 : vector<8x128xf32>
    %c0_536 = arith.constant 0 : index
    %c0_537 = arith.constant 0 : index
    %1030 = vector.load %arg8[%c0_536, %c0_537] : memref<8x128xf32, #tpu.memory_space<vmem>>, vector<8x128xf32>
    %1031 = arith.mulf %1019, %1030 : vector<8x128xf32>
    %1032 = arith.mulf %1011, %1021 : vector<8x128xf32>
    %1033 = arith.addf %1031, %1032 : vector<8x128xf32>
    %1034 = math.tanh %1033 : vector<8x128xf32>
    %1035 = arith.mulf %1029, %1034 : vector<8x128xf32>
    %c0_538 = arith.constant 0 : index
    %c0_539 = arith.constant 0 : index
    %1036 = vector.load %arg8[%c0_538, %c0_539] : memref<8x128xf32, #tpu.memory_space<vmem>>, vector<8x128xf32>
    tpu.vector_store %arg8[%c0_538, %c0_539], %1033 {strides = array<i32>} : memref<8x128xf32, #tpu.memory_space<vmem>>, vector<8x128xf32>,
    %c0_540 = arith.constant 0 : index
    %c0_541 = arith.constant 0 : index
    %1037 = vector.load %arg7[%c0_540, %c0_541] : memref<8x128xf32, #tpu.memory_space<vmem>>, vector<8x128xf32>
    tpu.vector_store %arg7[%c0_540, %c0_541], %1035 {strides = array<i32>} : memref<8x128xf32, #tpu.memory_space<vmem>>, vector<8x128xf32>,
    %1038 = arith.truncf %1035 : vector<8x128xf32> to vector<8x128xbf16>
    %1039 = arith.index_cast %c4_i32_521 : i32 to index
    %c0_542 = arith.constant 0 : index
    %c0_543 = arith.constant 0 : index
    %1040 = vector.load %arg5[%1039, %c0_542, %c0_543] : memref<8x8x128xbf16, #tpu.memory_space<vmem>>, vector<1x8x128xbf16>
    %1041 = vector.shape_cast %1040 : vector<1x8x128xbf16> to vector<8x128xbf16>
    %1042 = vector.shape_cast %1038 : vector<8x128xbf16> to vector<1x8x128xbf16>
    tpu.vector_store %arg5[%1039, %c0_542, %c0_543], %1042 {strides = array<i32>} : memref<8x8x128xbf16, #tpu.memory_space<vmem>>, vector<1x8x128xbf16>,
    %c5_i32_544 = arith.constant 5 : i32
    %1043 = arith.index_cast %c5_i32_544 : i32 to index
    %c0_545 = arith.constant 0 : index
    %c0_546 = arith.constant 0 : index
    %1044 = vector.load %arg6[%1043, %c0_545, %c0_546] : memref<8x8x512xbf16, #tpu.memory_space<vmem>>, vector<1x8x512xbf16>
    %1045 = vector.shape_cast %1044 : vector<1x8x512xbf16> to vector<8x512xbf16>
    %1046 = arith.extf %1045 : vector<8x512xbf16> to vector<8x512xf32>
    %c0_547 = arith.constant 0 : index
    %c0_548 = arith.constant 0 : index
    %1047 = vector.load %arg7[%c0_547, %c0_548] : memref<8x128xf32, #tpu.memory_space<vmem>>, vector<8x128xf32>
    %1048 = arith.truncf %1047 : vector<8x128xf32> to vector<8x128xbf16>
    %cst_549 = arith.constant dense<0.000000e+00> : vector<8x512xf32>
    %1049 = tpu.matmul %1048, %793, %cst_549 {dimension_numbers = #tpu.dot_dimension_numbers<[1], [0], [0], [1], [0, 0, 1, 1], [], []>} : vector<8x128xbf16>, vector<128x512xbf16>, vector<8x512xf32> -> vector<8x512xf32>
    %1050 = arith.addf %1046, %1049 : vector<8x512xf32>
    %1051 = vector.extract_strided_slice %1050 {offsets = [0, 0], sizes = [8, 128], strides = [1, 1]} : vector<8x512xf32> to vector<8x128xf32>
    %cst_550 = arith.constant 5.000000e-01 : f32
    %1052 = vector.broadcast %cst_550 : f32 to vector<8x128xf32>
    %1053 = arith.mulf %1052, %1051 : vector<8x128xf32>
    %1054 = math.tanh %1053 : vector<8x128xf32>
    %cst_551 = arith.constant 5.000000e-01 : f32
    %1055 = vector.broadcast %cst_551 : f32 to vector<8x128xf32>
    %1056 = arith.mulf %1055, %1054 : vector<8x128xf32>
    %cst_552 = arith.constant 5.000000e-01 : f32
    %1057 = vector.broadcast %cst_552 : f32 to vector<8x128xf32>
    %1058 = arith.addf %1056, %1057 : vector<8x128xf32>
    %1059 = vector.extract_strided_slice %1050 {offsets = [0, 128], sizes = [8, 128], strides = [1, 1]} : vector<8x512xf32> to vector<8x128xf32>
    %cst_553 = arith.constant 5.000000e-01 : f32
    %1060 = vector.broadcast %cst_553 : f32 to vector<8x128xf32>
    %1061 = arith.mulf %1060, %1059 : vector<8x128xf32>
    %1062 = math.tanh %1061 : vector<8x128xf32>
    %cst_554 = arith.constant 5.000000e-01 : f32
    %1063 = vector.broadcast %cst_554 : f32 to vector<8x128xf32>
    %1064 = arith.mulf %1063, %1062 : vector<8x128xf32>
    %cst_555 = arith.constant 5.000000e-01 : f32
    %1065 = vector.broadcast %cst_555 : f32 to vector<8x128xf32>
    %1066 = arith.addf %1064, %1065 : vector<8x128xf32>
    %1067 = vector.extract_strided_slice %1050 {offsets = [0, 256], sizes = [8, 128], strides = [1, 1]} : vector<8x512xf32> to vector<8x128xf32>
    %1068 = math.tanh %1067 : vector<8x128xf32>
    %1069 = vector.extract_strided_slice %1050 {offsets = [0, 384], sizes = [8, 128], strides = [1, 1]} : vector<8x512xf32> to vector<8x128xf32>
    %cst_556 = arith.constant 5.000000e-01 : f32
    %1070 = vector.broadcast %cst_556 : f32 to vector<8x128xf32>
    %1071 = arith.mulf %1070, %1069 : vector<8x128xf32>
    %1072 = math.tanh %1071 : vector<8x128xf32>
    %cst_557 = arith.constant 5.000000e-01 : f32
    %1073 = vector.broadcast %cst_557 : f32 to vector<8x128xf32>
    %1074 = arith.mulf %1073, %1072 : vector<8x128xf32>
    %cst_558 = arith.constant 5.000000e-01 : f32
    %1075 = vector.broadcast %cst_558 : f32 to vector<8x128xf32>
    %1076 = arith.addf %1074, %1075 : vector<8x128xf32>
    %c0_559 = arith.constant 0 : index
    %c0_560 = arith.constant 0 : index
    %1077 = vector.load %arg8[%c0_559, %c0_560] : memref<8x128xf32, #tpu.memory_space<vmem>>, vector<8x128xf32>
    %1078 = arith.mulf %1066, %1077 : vector<8x128xf32>
    %1079 = arith.mulf %1058, %1068 : vector<8x128xf32>
    %1080 = arith.addf %1078, %1079 : vector<8x128xf32>
    %1081 = math.tanh %1080 : vector<8x128xf32>
    %1082 = arith.mulf %1076, %1081 : vector<8x128xf32>
    %c0_561 = arith.constant 0 : index
    %c0_562 = arith.constant 0 : index
    %1083 = vector.load %arg8[%c0_561, %c0_562] : memref<8x128xf32, #tpu.memory_space<vmem>>, vector<8x128xf32>
    tpu.vector_store %arg8[%c0_561, %c0_562], %1080 {strides = array<i32>} : memref<8x128xf32, #tpu.memory_space<vmem>>, vector<8x128xf32>,
    %c0_563 = arith.constant 0 : index
    %c0_564 = arith.constant 0 : index
    %1084 = vector.load %arg7[%c0_563, %c0_564] : memref<8x128xf32, #tpu.memory_space<vmem>>, vector<8x128xf32>
    tpu.vector_store %arg7[%c0_563, %c0_564], %1082 {strides = array<i32>} : memref<8x128xf32, #tpu.memory_space<vmem>>, vector<8x128xf32>,
    %1085 = arith.truncf %1082 : vector<8x128xf32> to vector<8x128xbf16>
    %1086 = arith.index_cast %c5_i32_544 : i32 to index
    %c0_565 = arith.constant 0 : index
    %c0_566 = arith.constant 0 : index
    %1087 = vector.load %arg5[%1086, %c0_565, %c0_566] : memref<8x8x128xbf16, #tpu.memory_space<vmem>>, vector<1x8x128xbf16>
    %1088 = vector.shape_cast %1087 : vector<1x8x128xbf16> to vector<8x128xbf16>
    %1089 = vector.shape_cast %1085 : vector<8x128xbf16> to vector<1x8x128xbf16>
    tpu.vector_store %arg5[%1086, %c0_565, %c0_566], %1089 {strides = array<i32>} : memref<8x8x128xbf16, #tpu.memory_space<vmem>>, vector<1x8x128xbf16>,
    %c6_i32_567 = arith.constant 6 : i32
    %1090 = arith.index_cast %c6_i32_567 : i32 to index
    %c0_568 = arith.constant 0 : index
    %c0_569 = arith.constant 0 : index
    %1091 = vector.load %arg6[%1090, %c0_568, %c0_569] : memref<8x8x512xbf16, #tpu.memory_space<vmem>>, vector<1x8x512xbf16>
    %1092 = vector.shape_cast %1091 : vector<1x8x512xbf16> to vector<8x512xbf16>
    %1093 = arith.extf %1092 : vector<8x512xbf16> to vector<8x512xf32>
    %c0_570 = arith.constant 0 : index
    %c0_571 = arith.constant 0 : index
    %1094 = vector.load %arg7[%c0_570, %c0_571] : memref<8x128xf32, #tpu.memory_space<vmem>>, vector<8x128xf32>
    %1095 = arith.truncf %1094 : vector<8x128xf32> to vector<8x128xbf16>
    %cst_572 = arith.constant dense<0.000000e+00> : vector<8x512xf32>
    %1096 = tpu.matmul %1095, %793, %cst_572 {dimension_numbers = #tpu.dot_dimension_numbers<[1], [0], [0], [1], [0, 0, 1, 1], [], []>} : vector<8x128xbf16>, vector<128x512xbf16>, vector<8x512xf32> -> vector<8x512xf32>
    %1097 = arith.addf %1093, %1096 : vector<8x512xf32>
    %1098 = vector.extract_strided_slice %1097 {offsets = [0, 0], sizes = [8, 128], strides = [1, 1]} : vector<8x512xf32> to vector<8x128xf32>
    %cst_573 = arith.constant 5.000000e-01 : f32
    %1099 = vector.broadcast %cst_573 : f32 to vector<8x128xf32>
    %1100 = arith.mulf %1099, %1098 : vector<8x128xf32>
    %1101 = math.tanh %1100 : vector<8x128xf32>
    %cst_574 = arith.constant 5.000000e-01 : f32
    %1102 = vector.broadcast %cst_574 : f32 to vector<8x128xf32>
    %1103 = arith.mulf %1102, %1101 : vector<8x128xf32>
    %cst_575 = arith.constant 5.000000e-01 : f32
    %1104 = vector.broadcast %cst_575 : f32 to vector<8x128xf32>
    %1105 = arith.addf %1103, %1104 : vector<8x128xf32>
    %1106 = vector.extract_strided_slice %1097 {offsets = [0, 128], sizes = [8, 128], strides = [1, 1]} : vector<8x512xf32> to vector<8x128xf32>
    %cst_576 = arith.constant 5.000000e-01 : f32
    %1107 = vector.broadcast %cst_576 : f32 to vector<8x128xf32>
    %1108 = arith.mulf %1107, %1106 : vector<8x128xf32>
    %1109 = math.tanh %1108 : vector<8x128xf32>
    %cst_577 = arith.constant 5.000000e-01 : f32
    %1110 = vector.broadcast %cst_577 : f32 to vector<8x128xf32>
    %1111 = arith.mulf %1110, %1109 : vector<8x128xf32>
    %cst_578 = arith.constant 5.000000e-01 : f32
    %1112 = vector.broadcast %cst_578 : f32 to vector<8x128xf32>
    %1113 = arith.addf %1111, %1112 : vector<8x128xf32>
    %1114 = vector.extract_strided_slice %1097 {offsets = [0, 256], sizes = [8, 128], strides = [1, 1]} : vector<8x512xf32> to vector<8x128xf32>
    %1115 = math.tanh %1114 : vector<8x128xf32>
    %1116 = vector.extract_strided_slice %1097 {offsets = [0, 384], sizes = [8, 128], strides = [1, 1]} : vector<8x512xf32> to vector<8x128xf32>
    %cst_579 = arith.constant 5.000000e-01 : f32
    %1117 = vector.broadcast %cst_579 : f32 to vector<8x128xf32>
    %1118 = arith.mulf %1117, %1116 : vector<8x128xf32>
    %1119 = math.tanh %1118 : vector<8x128xf32>
    %cst_580 = arith.constant 5.000000e-01 : f32
    %1120 = vector.broadcast %cst_580 : f32 to vector<8x128xf32>
    %1121 = arith.mulf %1120, %1119 : vector<8x128xf32>
    %cst_581 = arith.constant 5.000000e-01 : f32
    %1122 = vector.broadcast %cst_581 : f32 to vector<8x128xf32>
    %1123 = arith.addf %1121, %1122 : vector<8x128xf32>
    %c0_582 = arith.constant 0 : index
    %c0_583 = arith.constant 0 : index
    %1124 = vector.load %arg8[%c0_582, %c0_583] : memref<8x128xf32, #tpu.memory_space<vmem>>, vector<8x128xf32>
    %1125 = arith.mulf %1113, %1124 : vector<8x128xf32>
    %1126 = arith.mulf %1105, %1115 : vector<8x128xf32>
    %1127 = arith.addf %1125, %1126 : vector<8x128xf32>
    %1128 = math.tanh %1127 : vector<8x128xf32>
    %1129 = arith.mulf %1123, %1128 : vector<8x128xf32>
    %c0_584 = arith.constant 0 : index
    %c0_585 = arith.constant 0 : index
    %1130 = vector.load %arg8[%c0_584, %c0_585] : memref<8x128xf32, #tpu.memory_space<vmem>>, vector<8x128xf32>
    tpu.vector_store %arg8[%c0_584, %c0_585], %1127 {strides = array<i32>} : memref<8x128xf32, #tpu.memory_space<vmem>>, vector<8x128xf32>,
    %c0_586 = arith.constant 0 : index
    %c0_587 = arith.constant 0 : index
    %1131 = vector.load %arg7[%c0_586, %c0_587] : memref<8x128xf32, #tpu.memory_space<vmem>>, vector<8x128xf32>
    tpu.vector_store %arg7[%c0_586, %c0_587], %1129 {strides = array<i32>} : memref<8x128xf32, #tpu.memory_space<vmem>>, vector<8x128xf32>,
    %1132 = arith.truncf %1129 : vector<8x128xf32> to vector<8x128xbf16>
    %1133 = arith.index_cast %c6_i32_567 : i32 to index
    %c0_588 = arith.constant 0 : index
    %c0_589 = arith.constant 0 : index
    %1134 = vector.load %arg5[%1133, %c0_588, %c0_589] : memref<8x8x128xbf16, #tpu.memory_space<vmem>>, vector<1x8x128xbf16>
    %1135 = vector.shape_cast %1134 : vector<1x8x128xbf16> to vector<8x128xbf16>
    %1136 = vector.shape_cast %1132 : vector<8x128xbf16> to vector<1x8x128xbf16>
    tpu.vector_store %arg5[%1133, %c0_588, %c0_589], %1136 {strides = array<i32>} : memref<8x8x128xbf16, #tpu.memory_space<vmem>>, vector<1x8x128xbf16>,
    %c7_i32_590 = arith.constant 7 : i32
    %1137 = arith.index_cast %c7_i32_590 : i32 to index
    %c0_591 = arith.constant 0 : index
    %c0_592 = arith.constant 0 : index
    %1138 = vector.load %arg6[%1137, %c0_591, %c0_592] : memref<8x8x512xbf16, #tpu.memory_space<vmem>>, vector<1x8x512xbf16>
    %1139 = vector.shape_cast %1138 : vector<1x8x512xbf16> to vector<8x512xbf16>
    %1140 = arith.extf %1139 : vector<8x512xbf16> to vector<8x512xf32>
    %c0_593 = arith.constant 0 : index
    %c0_594 = arith.constant 0 : index
    %1141 = vector.load %arg7[%c0_593, %c0_594] : memref<8x128xf32, #tpu.memory_space<vmem>>, vector<8x128xf32>
    %1142 = arith.truncf %1141 : vector<8x128xf32> to vector<8x128xbf16>
    %cst_595 = arith.constant dense<0.000000e+00> : vector<8x512xf32>
    %1143 = tpu.matmul %1142, %793, %cst_595 {dimension_numbers = #tpu.dot_dimension_numbers<[1], [0], [0], [1], [0, 0, 1, 1], [], []>} : vector<8x128xbf16>, vector<128x512xbf16>, vector<8x512xf32> -> vector<8x512xf32>
    %1144 = arith.addf %1140, %1143 : vector<8x512xf32>
    %1145 = vector.extract_strided_slice %1144 {offsets = [0, 0], sizes = [8, 128], strides = [1, 1]} : vector<8x512xf32> to vector<8x128xf32>
    %cst_596 = arith.constant 5.000000e-01 : f32
    %1146 = vector.broadcast %cst_596 : f32 to vector<8x128xf32>
    %1147 = arith.mulf %1146, %1145 : vector<8x128xf32>
    %1148 = math.tanh %1147 : vector<8x128xf32>
    %cst_597 = arith.constant 5.000000e-01 : f32
    %1149 = vector.broadcast %cst_597 : f32 to vector<8x128xf32>
    %1150 = arith.mulf %1149, %1148 : vector<8x128xf32>
    %cst_598 = arith.constant 5.000000e-01 : f32
    %1151 = vector.broadcast %cst_598 : f32 to vector<8x128xf32>
    %1152 = arith.addf %1150, %1151 : vector<8x128xf32>
    %1153 = vector.extract_strided_slice %1144 {offsets = [0, 128], sizes = [8, 128], strides = [1, 1]} : vector<8x512xf32> to vector<8x128xf32>
    %cst_599 = arith.constant 5.000000e-01 : f32
    %1154 = vector.broadcast %cst_599 : f32 to vector<8x128xf32>
    %1155 = arith.mulf %1154, %1153 : vector<8x128xf32>
    %1156 = math.tanh %1155 : vector<8x128xf32>
    %cst_600 = arith.constant 5.000000e-01 : f32
    %1157 = vector.broadcast %cst_600 : f32 to vector<8x128xf32>
    %1158 = arith.mulf %1157, %1156 : vector<8x128xf32>
    %cst_601 = arith.constant 5.000000e-01 : f32
    %1159 = vector.broadcast %cst_601 : f32 to vector<8x128xf32>
    %1160 = arith.addf %1158, %1159 : vector<8x128xf32>
    %1161 = vector.extract_strided_slice %1144 {offsets = [0, 256], sizes = [8, 128], strides = [1, 1]} : vector<8x512xf32> to vector<8x128xf32>
    %1162 = math.tanh %1161 : vector<8x128xf32>
    %1163 = vector.extract_strided_slice %1144 {offsets = [0, 384], sizes = [8, 128], strides = [1, 1]} : vector<8x512xf32> to vector<8x128xf32>
    %cst_602 = arith.constant 5.000000e-01 : f32
    %1164 = vector.broadcast %cst_602 : f32 to vector<8x128xf32>
    %1165 = arith.mulf %1164, %1163 : vector<8x128xf32>
    %1166 = math.tanh %1165 : vector<8x128xf32>
    %cst_603 = arith.constant 5.000000e-01 : f32
    %1167 = vector.broadcast %cst_603 : f32 to vector<8x128xf32>
    %1168 = arith.mulf %1167, %1166 : vector<8x128xf32>
    %cst_604 = arith.constant 5.000000e-01 : f32
    %1169 = vector.broadcast %cst_604 : f32 to vector<8x128xf32>
    %1170 = arith.addf %1168, %1169 : vector<8x128xf32>
    %c0_605 = arith.constant 0 : index
    %c0_606 = arith.constant 0 : index
    %1171 = vector.load %arg8[%c0_605, %c0_606] : memref<8x128xf32, #tpu.memory_space<vmem>>, vector<8x128xf32>
    %1172 = arith.mulf %1160, %1171 : vector<8x128xf32>
    %1173 = arith.mulf %1152, %1162 : vector<8x128xf32>
    %1174 = arith.addf %1172, %1173 : vector<8x128xf32>
    %1175 = math.tanh %1174 : vector<8x128xf32>
    %1176 = arith.mulf %1170, %1175 : vector<8x128xf32>
    %c0_607 = arith.constant 0 : index
    %c0_608 = arith.constant 0 : index
    %1177 = vector.load %arg8[%c0_607, %c0_608] : memref<8x128xf32, #tpu.memory_space<vmem>>, vector<8x128xf32>
    tpu.vector_store %arg8[%c0_607, %c0_608], %1174 {strides = array<i32>} : memref<8x128xf32, #tpu.memory_space<vmem>>, vector<8x128xf32>,
    %c0_609 = arith.constant 0 : index
    %c0_610 = arith.constant 0 : index
    %1178 = vector.load %arg7[%c0_609, %c0_610] : memref<8x128xf32, #tpu.memory_space<vmem>>, vector<8x128xf32>
    tpu.vector_store %arg7[%c0_609, %c0_610], %1176 {strides = array<i32>} : memref<8x128xf32, #tpu.memory_space<vmem>>, vector<8x128xf32>,
    %1179 = arith.truncf %1176 : vector<8x128xf32> to vector<8x128xbf16>
    %1180 = arith.index_cast %c7_i32_590 : i32 to index
    %c0_611 = arith.constant 0 : index
    %c0_612 = arith.constant 0 : index
    %1181 = vector.load %arg5[%1180, %c0_611, %c0_612] : memref<8x8x128xbf16, #tpu.memory_space<vmem>>, vector<1x8x128xbf16>
    %1182 = vector.shape_cast %1181 : vector<1x8x128xbf16> to vector<8x128xbf16>
    %1183 = vector.shape_cast %1179 : vector<8x128xbf16> to vector<1x8x128xbf16>
    tpu.vector_store %arg5[%1180, %c0_611, %c0_612], %1183 {strides = array<i32>} : memref<8x8x128xbf16, #tpu.memory_space<vmem>>, vector<1x8x128xbf16>,
    %c8_i32_613 = arith.constant 8 : i32
    %c3 = arith.constant 3 : index
    %c0_614 = arith.constant 0 : index
    %c0_615 = arith.constant 0 : index
    %1184 = vector.load %arg2[%c3, %c0_614, %c0_615] : memref<4x128x512xbf16, #tpu.memory_space<vmem>>, vector<1x128x512xbf16>
    %1185 = vector.shape_cast %1184 : vector<1x128x512xbf16> to vector<128x512xbf16>
    %c3_616 = arith.constant 3 : index
    %c0_617 = arith.constant 0 : index
    %c0_618 = arith.constant 0 : index
    %1186 = vector.load %arg3[%c3_616, %c0_617, %c0_618] : memref<4x128x512xbf16, #tpu.memory_space<vmem>>, vector<1x128x512xbf16>
    %1187 = vector.shape_cast %1186 : vector<1x128x512xbf16> to vector<128x512xbf16>
    %c3_619 = arith.constant 3 : index
    %c0_620 = arith.constant 0 : index
    %c0_621 = arith.constant 0 : index
    %1188 = vector.load %arg4[%c3_619, %c0_620, %c0_621] : memref<4x1x512xf32, #tpu.memory_space<vmem>>, vector<1x1x512xf32>
    %1189 = vector.shape_cast %1188 : vector<1x1x512xf32> to vector<1x512xf32>
    %c0_622 = arith.constant 0 : index
    %c0_623 = arith.constant 0 : index
    %c0_624 = arith.constant 0 : index
    %1190 = vector.load %arg5[%c0_622, %c0_623, %c0_624] : memref<8x8x128xbf16, #tpu.memory_space<vmem>>, vector<8x8x128xbf16>
    %1191 = vector.shape_cast %1190 : vector<8x8x128xbf16> to vector<64x128xbf16>
    %cst_625 = arith.constant dense<0.000000e+00> : vector<64x512xf32>
    %1192 = tpu.matmul %1191, %1185, %cst_625 {dimension_numbers = #tpu.dot_dimension_numbers<[1], [0], [0], [1], [0, 0, 1, 1], [], []>} : vector<64x128xbf16>, vector<128x512xbf16>, vector<64x512xf32> -> vector<64x512xf32>
    %1193 = vector.broadcast %1189 : vector<1x512xf32> to vector<64x512xf32>
    %1194 = arith.addf %1192, %1193 : vector<64x512xf32>
    %1195 = vector.shape_cast %1194 : vector<64x512xf32> to vector<8x8x512xf32>
    %1196 = arith.truncf %1195 : vector<8x8x512xf32> to vector<8x8x512xbf16>
    %c0_626 = arith.constant 0 : index
    %c0_627 = arith.constant 0 : index
    %c0_628 = arith.constant 0 : index
    %1197 = vector.load %arg6[%c0_626, %c0_627, %c0_628] : memref<8x8x512xbf16, #tpu.memory_space<vmem>>, vector<8x8x512xbf16>
    tpu.vector_store %arg6[%c0_626, %c0_627, %c0_628], %1196 {strides = array<i32>} : memref<8x8x512xbf16, #tpu.memory_space<vmem>>, vector<8x8x512xbf16>,
    %cst_629 = arith.constant 0.000000e+00 : f32
    %1198 = vector.broadcast %cst_629 : f32 to vector<8x128xf32>
    %c0_630 = arith.constant 0 : index
    %c0_631 = arith.constant 0 : index
    %1199 = vector.load %arg7[%c0_630, %c0_631] : memref<8x128xf32, #tpu.memory_space<vmem>>, vector<8x128xf32>
    tpu.vector_store %arg7[%c0_630, %c0_631], %1198 {strides = array<i32>} : memref<8x128xf32, #tpu.memory_space<vmem>>, vector<8x128xf32>,
    %cst_632 = arith.constant 0.000000e+00 : f32
    %1200 = vector.broadcast %cst_632 : f32 to vector<8x128xf32>
    %c0_633 = arith.constant 0 : index
    %c0_634 = arith.constant 0 : index
    %1201 = vector.load %arg8[%c0_633, %c0_634] : memref<8x128xf32, #tpu.memory_space<vmem>>, vector<8x128xf32>
    tpu.vector_store %arg8[%c0_633, %c0_634], %1200 {strides = array<i32>} : memref<8x128xf32, #tpu.memory_space<vmem>>, vector<8x128xf32>,
    %c0_i32_635 = arith.constant 0 : i32
    %1202 = arith.index_cast %c0_i32_635 : i32 to index
    %c0_636 = arith.constant 0 : index
    %c0_637 = arith.constant 0 : index
    %1203 = vector.load %arg6[%1202, %c0_636, %c0_637] : memref<8x8x512xbf16, #tpu.memory_space<vmem>>, vector<1x8x512xbf16>
    %1204 = vector.shape_cast %1203 : vector<1x8x512xbf16> to vector<8x512xbf16>
    %1205 = arith.extf %1204 : vector<8x512xbf16> to vector<8x512xf32>
    %c0_638 = arith.constant 0 : index
    %c0_639 = arith.constant 0 : index
    %1206 = vector.load %arg7[%c0_638, %c0_639] : memref<8x128xf32, #tpu.memory_space<vmem>>, vector<8x128xf32>
    %1207 = arith.truncf %1206 : vector<8x128xf32> to vector<8x128xbf16>
    %cst_640 = arith.constant dense<0.000000e+00> : vector<8x512xf32>
    %1208 = tpu.matmul %1207, %1187, %cst_640 {dimension_numbers = #tpu.dot_dimension_numbers<[1], [0], [0], [1], [0, 0, 1, 1], [], []>} : vector<8x128xbf16>, vector<128x512xbf16>, vector<8x512xf32> -> vector<8x512xf32>
    %1209 = arith.addf %1205, %1208 : vector<8x512xf32>
    %1210 = vector.extract_strided_slice %1209 {offsets = [0, 0], sizes = [8, 128], strides = [1, 1]} : vector<8x512xf32> to vector<8x128xf32>
    %cst_641 = arith.constant 5.000000e-01 : f32
    %1211 = vector.broadcast %cst_641 : f32 to vector<8x128xf32>
    %1212 = arith.mulf %1211, %1210 : vector<8x128xf32>
    %1213 = math.tanh %1212 : vector<8x128xf32>
    %cst_642 = arith.constant 5.000000e-01 : f32
    %1214 = vector.broadcast %cst_642 : f32 to vector<8x128xf32>
    %1215 = arith.mulf %1214, %1213 : vector<8x128xf32>
    %cst_643 = arith.constant 5.000000e-01 : f32
    %1216 = vector.broadcast %cst_643 : f32 to vector<8x128xf32>
    %1217 = arith.addf %1215, %1216 : vector<8x128xf32>
    %1218 = vector.extract_strided_slice %1209 {offsets = [0, 128], sizes = [8, 128], strides = [1, 1]} : vector<8x512xf32> to vector<8x128xf32>
    %cst_644 = arith.constant 5.000000e-01 : f32
    %1219 = vector.broadcast %cst_644 : f32 to vector<8x128xf32>
    %1220 = arith.mulf %1219, %1218 : vector<8x128xf32>
    %1221 = math.tanh %1220 : vector<8x128xf32>
    %cst_645 = arith.constant 5.000000e-01 : f32
    %1222 = vector.broadcast %cst_645 : f32 to vector<8x128xf32>
    %1223 = arith.mulf %1222, %1221 : vector<8x128xf32>
    %cst_646 = arith.constant 5.000000e-01 : f32
    %1224 = vector.broadcast %cst_646 : f32 to vector<8x128xf32>
    %1225 = arith.addf %1223, %1224 : vector<8x128xf32>
    %1226 = vector.extract_strided_slice %1209 {offsets = [0, 256], sizes = [8, 128], strides = [1, 1]} : vector<8x512xf32> to vector<8x128xf32>
    %1227 = math.tanh %1226 : vector<8x128xf32>
    %1228 = vector.extract_strided_slice %1209 {offsets = [0, 384], sizes = [8, 128], strides = [1, 1]} : vector<8x512xf32> to vector<8x128xf32>
    %cst_647 = arith.constant 5.000000e-01 : f32
    %1229 = vector.broadcast %cst_647 : f32 to vector<8x128xf32>
    %1230 = arith.mulf %1229, %1228 : vector<8x128xf32>
    %1231 = math.tanh %1230 : vector<8x128xf32>
    %cst_648 = arith.constant 5.000000e-01 : f32
    %1232 = vector.broadcast %cst_648 : f32 to vector<8x128xf32>
    %1233 = arith.mulf %1232, %1231 : vector<8x128xf32>
    %cst_649 = arith.constant 5.000000e-01 : f32
    %1234 = vector.broadcast %cst_649 : f32 to vector<8x128xf32>
    %1235 = arith.addf %1233, %1234 : vector<8x128xf32>
    %c0_650 = arith.constant 0 : index
    %c0_651 = arith.constant 0 : index
    %1236 = vector.load %arg8[%c0_650, %c0_651] : memref<8x128xf32, #tpu.memory_space<vmem>>, vector<8x128xf32>
    %1237 = arith.mulf %1225, %1236 : vector<8x128xf32>
    %1238 = arith.mulf %1217, %1227 : vector<8x128xf32>
    %1239 = arith.addf %1237, %1238 : vector<8x128xf32>
    %1240 = math.tanh %1239 : vector<8x128xf32>
    %1241 = arith.mulf %1235, %1240 : vector<8x128xf32>
    %c0_652 = arith.constant 0 : index
    %c0_653 = arith.constant 0 : index
    %1242 = vector.load %arg8[%c0_652, %c0_653] : memref<8x128xf32, #tpu.memory_space<vmem>>, vector<8x128xf32>
    tpu.vector_store %arg8[%c0_652, %c0_653], %1239 {strides = array<i32>} : memref<8x128xf32, #tpu.memory_space<vmem>>, vector<8x128xf32>,
    %c0_654 = arith.constant 0 : index
    %c0_655 = arith.constant 0 : index
    %1243 = vector.load %arg7[%c0_654, %c0_655] : memref<8x128xf32, #tpu.memory_space<vmem>>, vector<8x128xf32>
    tpu.vector_store %arg7[%c0_654, %c0_655], %1241 {strides = array<i32>} : memref<8x128xf32, #tpu.memory_space<vmem>>, vector<8x128xf32>,
    %1244 = arith.truncf %1241 : vector<8x128xf32> to vector<8x128xbf16>
    %1245 = arith.index_cast %c0_i32_635 : i32 to index
    %c0_656 = arith.constant 0 : index
    %c0_657 = arith.constant 0 : index
    %1246 = vector.load %arg5[%1245, %c0_656, %c0_657] : memref<8x8x128xbf16, #tpu.memory_space<vmem>>, vector<1x8x128xbf16>
    %1247 = vector.shape_cast %1246 : vector<1x8x128xbf16> to vector<8x128xbf16>
    %1248 = vector.shape_cast %1244 : vector<8x128xbf16> to vector<1x8x128xbf16>
    tpu.vector_store %arg5[%1245, %c0_656, %c0_657], %1248 {strides = array<i32>} : memref<8x8x128xbf16, #tpu.memory_space<vmem>>, vector<1x8x128xbf16>,
    %c1_i32_658 = arith.constant 1 : i32
    %1249 = arith.index_cast %c1_i32_658 : i32 to index
    %c0_659 = arith.constant 0 : index
    %c0_660 = arith.constant 0 : index
    %1250 = vector.load %arg6[%1249, %c0_659, %c0_660] : memref<8x8x512xbf16, #tpu.memory_space<vmem>>, vector<1x8x512xbf16>
    %1251 = vector.shape_cast %1250 : vector<1x8x512xbf16> to vector<8x512xbf16>
    %1252 = arith.extf %1251 : vector<8x512xbf16> to vector<8x512xf32>
    %c0_661 = arith.constant 0 : index
    %c0_662 = arith.constant 0 : index
    %1253 = vector.load %arg7[%c0_661, %c0_662] : memref<8x128xf32, #tpu.memory_space<vmem>>, vector<8x128xf32>
    %1254 = arith.truncf %1253 : vector<8x128xf32> to vector<8x128xbf16>
    %cst_663 = arith.constant dense<0.000000e+00> : vector<8x512xf32>
    %1255 = tpu.matmul %1254, %1187, %cst_663 {dimension_numbers = #tpu.dot_dimension_numbers<[1], [0], [0], [1], [0, 0, 1, 1], [], []>} : vector<8x128xbf16>, vector<128x512xbf16>, vector<8x512xf32> -> vector<8x512xf32>
    %1256 = arith.addf %1252, %1255 : vector<8x512xf32>
    %1257 = vector.extract_strided_slice %1256 {offsets = [0, 0], sizes = [8, 128], strides = [1, 1]} : vector<8x512xf32> to vector<8x128xf32>
    %cst_664 = arith.constant 5.000000e-01 : f32
    %1258 = vector.broadcast %cst_664 : f32 to vector<8x128xf32>
    %1259 = arith.mulf %1258, %1257 : vector<8x128xf32>
    %1260 = math.tanh %1259 : vector<8x128xf32>
    %cst_665 = arith.constant 5.000000e-01 : f32
    %1261 = vector.broadcast %cst_665 : f32 to vector<8x128xf32>
    %1262 = arith.mulf %1261, %1260 : vector<8x128xf32>
    %cst_666 = arith.constant 5.000000e-01 : f32
    %1263 = vector.broadcast %cst_666 : f32 to vector<8x128xf32>
    %1264 = arith.addf %1262, %1263 : vector<8x128xf32>
    %1265 = vector.extract_strided_slice %1256 {offsets = [0, 128], sizes = [8, 128], strides = [1, 1]} : vector<8x512xf32> to vector<8x128xf32>
    %cst_667 = arith.constant 5.000000e-01 : f32
    %1266 = vector.broadcast %cst_667 : f32 to vector<8x128xf32>
    %1267 = arith.mulf %1266, %1265 : vector<8x128xf32>
    %1268 = math.tanh %1267 : vector<8x128xf32>
    %cst_668 = arith.constant 5.000000e-01 : f32
    %1269 = vector.broadcast %cst_668 : f32 to vector<8x128xf32>
    %1270 = arith.mulf %1269, %1268 : vector<8x128xf32>
    %cst_669 = arith.constant 5.000000e-01 : f32
    %1271 = vector.broadcast %cst_669 : f32 to vector<8x128xf32>
    %1272 = arith.addf %1270, %1271 : vector<8x128xf32>
    %1273 = vector.extract_strided_slice %1256 {offsets = [0, 256], sizes = [8, 128], strides = [1, 1]} : vector<8x512xf32> to vector<8x128xf32>
    %1274 = math.tanh %1273 : vector<8x128xf32>
    %1275 = vector.extract_strided_slice %1256 {offsets = [0, 384], sizes = [8, 128], strides = [1, 1]} : vector<8x512xf32> to vector<8x128xf32>
    %cst_670 = arith.constant 5.000000e-01 : f32
    %1276 = vector.broadcast %cst_670 : f32 to vector<8x128xf32>
    %1277 = arith.mulf %1276, %1275 : vector<8x128xf32>
    %1278 = math.tanh %1277 : vector<8x128xf32>
    %cst_671 = arith.constant 5.000000e-01 : f32
    %1279 = vector.broadcast %cst_671 : f32 to vector<8x128xf32>
    %1280 = arith.mulf %1279, %1278 : vector<8x128xf32>
    %cst_672 = arith.constant 5.000000e-01 : f32
    %1281 = vector.broadcast %cst_672 : f32 to vector<8x128xf32>
    %1282 = arith.addf %1280, %1281 : vector<8x128xf32>
    %c0_673 = arith.constant 0 : index
    %c0_674 = arith.constant 0 : index
    %1283 = vector.load %arg8[%c0_673, %c0_674] : memref<8x128xf32, #tpu.memory_space<vmem>>, vector<8x128xf32>
    %1284 = arith.mulf %1272, %1283 : vector<8x128xf32>
    %1285 = arith.mulf %1264, %1274 : vector<8x128xf32>
    %1286 = arith.addf %1284, %1285 : vector<8x128xf32>
    %1287 = math.tanh %1286 : vector<8x128xf32>
    %1288 = arith.mulf %1282, %1287 : vector<8x128xf32>
    %c0_675 = arith.constant 0 : index
    %c0_676 = arith.constant 0 : index
    %1289 = vector.load %arg8[%c0_675, %c0_676] : memref<8x128xf32, #tpu.memory_space<vmem>>, vector<8x128xf32>
    tpu.vector_store %arg8[%c0_675, %c0_676], %1286 {strides = array<i32>} : memref<8x128xf32, #tpu.memory_space<vmem>>, vector<8x128xf32>,
    %c0_677 = arith.constant 0 : index
    %c0_678 = arith.constant 0 : index
    %1290 = vector.load %arg7[%c0_677, %c0_678] : memref<8x128xf32, #tpu.memory_space<vmem>>, vector<8x128xf32>
    tpu.vector_store %arg7[%c0_677, %c0_678], %1288 {strides = array<i32>} : memref<8x128xf32, #tpu.memory_space<vmem>>, vector<8x128xf32>,
    %1291 = arith.truncf %1288 : vector<8x128xf32> to vector<8x128xbf16>
    %1292 = arith.index_cast %c1_i32_658 : i32 to index
    %c0_679 = arith.constant 0 : index
    %c0_680 = arith.constant 0 : index
    %1293 = vector.load %arg5[%1292, %c0_679, %c0_680] : memref<8x8x128xbf16, #tpu.memory_space<vmem>>, vector<1x8x128xbf16>
    %1294 = vector.shape_cast %1293 : vector<1x8x128xbf16> to vector<8x128xbf16>
    %1295 = vector.shape_cast %1291 : vector<8x128xbf16> to vector<1x8x128xbf16>
    tpu.vector_store %arg5[%1292, %c0_679, %c0_680], %1295 {strides = array<i32>} : memref<8x8x128xbf16, #tpu.memory_space<vmem>>, vector<1x8x128xbf16>,
    %c2_i32_681 = arith.constant 2 : i32
    %1296 = arith.index_cast %c2_i32_681 : i32 to index
    %c0_682 = arith.constant 0 : index
    %c0_683 = arith.constant 0 : index
    %1297 = vector.load %arg6[%1296, %c0_682, %c0_683] : memref<8x8x512xbf16, #tpu.memory_space<vmem>>, vector<1x8x512xbf16>
    %1298 = vector.shape_cast %1297 : vector<1x8x512xbf16> to vector<8x512xbf16>
    %1299 = arith.extf %1298 : vector<8x512xbf16> to vector<8x512xf32>
    %c0_684 = arith.constant 0 : index
    %c0_685 = arith.constant 0 : index
    %1300 = vector.load %arg7[%c0_684, %c0_685] : memref<8x128xf32, #tpu.memory_space<vmem>>, vector<8x128xf32>
    %1301 = arith.truncf %1300 : vector<8x128xf32> to vector<8x128xbf16>
    %cst_686 = arith.constant dense<0.000000e+00> : vector<8x512xf32>
    %1302 = tpu.matmul %1301, %1187, %cst_686 {dimension_numbers = #tpu.dot_dimension_numbers<[1], [0], [0], [1], [0, 0, 1, 1], [], []>} : vector<8x128xbf16>, vector<128x512xbf16>, vector<8x512xf32> -> vector<8x512xf32>
    %1303 = arith.addf %1299, %1302 : vector<8x512xf32>
    %1304 = vector.extract_strided_slice %1303 {offsets = [0, 0], sizes = [8, 128], strides = [1, 1]} : vector<8x512xf32> to vector<8x128xf32>
    %cst_687 = arith.constant 5.000000e-01 : f32
    %1305 = vector.broadcast %cst_687 : f32 to vector<8x128xf32>
    %1306 = arith.mulf %1305, %1304 : vector<8x128xf32>
    %1307 = math.tanh %1306 : vector<8x128xf32>
    %cst_688 = arith.constant 5.000000e-01 : f32
    %1308 = vector.broadcast %cst_688 : f32 to vector<8x128xf32>
    %1309 = arith.mulf %1308, %1307 : vector<8x128xf32>
    %cst_689 = arith.constant 5.000000e-01 : f32
    %1310 = vector.broadcast %cst_689 : f32 to vector<8x128xf32>
    %1311 = arith.addf %1309, %1310 : vector<8x128xf32>
    %1312 = vector.extract_strided_slice %1303 {offsets = [0, 128], sizes = [8, 128], strides = [1, 1]} : vector<8x512xf32> to vector<8x128xf32>
    %cst_690 = arith.constant 5.000000e-01 : f32
    %1313 = vector.broadcast %cst_690 : f32 to vector<8x128xf32>
    %1314 = arith.mulf %1313, %1312 : vector<8x128xf32>
    %1315 = math.tanh %1314 : vector<8x128xf32>
    %cst_691 = arith.constant 5.000000e-01 : f32
    %1316 = vector.broadcast %cst_691 : f32 to vector<8x128xf32>
    %1317 = arith.mulf %1316, %1315 : vector<8x128xf32>
    %cst_692 = arith.constant 5.000000e-01 : f32
    %1318 = vector.broadcast %cst_692 : f32 to vector<8x128xf32>
    %1319 = arith.addf %1317, %1318 : vector<8x128xf32>
    %1320 = vector.extract_strided_slice %1303 {offsets = [0, 256], sizes = [8, 128], strides = [1, 1]} : vector<8x512xf32> to vector<8x128xf32>
    %1321 = math.tanh %1320 : vector<8x128xf32>
    %1322 = vector.extract_strided_slice %1303 {offsets = [0, 384], sizes = [8, 128], strides = [1, 1]} : vector<8x512xf32> to vector<8x128xf32>
    %cst_693 = arith.constant 5.000000e-01 : f32
    %1323 = vector.broadcast %cst_693 : f32 to vector<8x128xf32>
    %1324 = arith.mulf %1323, %1322 : vector<8x128xf32>
    %1325 = math.tanh %1324 : vector<8x128xf32>
    %cst_694 = arith.constant 5.000000e-01 : f32
    %1326 = vector.broadcast %cst_694 : f32 to vector<8x128xf32>
    %1327 = arith.mulf %1326, %1325 : vector<8x128xf32>
    %cst_695 = arith.constant 5.000000e-01 : f32
    %1328 = vector.broadcast %cst_695 : f32 to vector<8x128xf32>
    %1329 = arith.addf %1327, %1328 : vector<8x128xf32>
    %c0_696 = arith.constant 0 : index
    %c0_697 = arith.constant 0 : index
    %1330 = vector.load %arg8[%c0_696, %c0_697] : memref<8x128xf32, #tpu.memory_space<vmem>>, vector<8x128xf32>
    %1331 = arith.mulf %1319, %1330 : vector<8x128xf32>
    %1332 = arith.mulf %1311, %1321 : vector<8x128xf32>
    %1333 = arith.addf %1331, %1332 : vector<8x128xf32>
    %1334 = math.tanh %1333 : vector<8x128xf32>
    %1335 = arith.mulf %1329, %1334 : vector<8x128xf32>
    %c0_698 = arith.constant 0 : index
    %c0_699 = arith.constant 0 : index
    %1336 = vector.load %arg8[%c0_698, %c0_699] : memref<8x128xf32, #tpu.memory_space<vmem>>, vector<8x128xf32>
    tpu.vector_store %arg8[%c0_698, %c0_699], %1333 {strides = array<i32>} : memref<8x128xf32, #tpu.memory_space<vmem>>, vector<8x128xf32>,
    %c0_700 = arith.constant 0 : index
    %c0_701 = arith.constant 0 : index
    %1337 = vector.load %arg7[%c0_700, %c0_701] : memref<8x128xf32, #tpu.memory_space<vmem>>, vector<8x128xf32>
    tpu.vector_store %arg7[%c0_700, %c0_701], %1335 {strides = array<i32>} : memref<8x128xf32, #tpu.memory_space<vmem>>, vector<8x128xf32>,
    %1338 = arith.truncf %1335 : vector<8x128xf32> to vector<8x128xbf16>
    %1339 = arith.index_cast %c2_i32_681 : i32 to index
    %c0_702 = arith.constant 0 : index
    %c0_703 = arith.constant 0 : index
    %1340 = vector.load %arg5[%1339, %c0_702, %c0_703] : memref<8x8x128xbf16, #tpu.memory_space<vmem>>, vector<1x8x128xbf16>
    %1341 = vector.shape_cast %1340 : vector<1x8x128xbf16> to vector<8x128xbf16>
    %1342 = vector.shape_cast %1338 : vector<8x128xbf16> to vector<1x8x128xbf16>
    tpu.vector_store %arg5[%1339, %c0_702, %c0_703], %1342 {strides = array<i32>} : memref<8x8x128xbf16, #tpu.memory_space<vmem>>, vector<1x8x128xbf16>,
    %c3_i32_704 = arith.constant 3 : i32
    %1343 = arith.index_cast %c3_i32_704 : i32 to index
    %c0_705 = arith.constant 0 : index
    %c0_706 = arith.constant 0 : index
    %1344 = vector.load %arg6[%1343, %c0_705, %c0_706] : memref<8x8x512xbf16, #tpu.memory_space<vmem>>, vector<1x8x512xbf16>
    %1345 = vector.shape_cast %1344 : vector<1x8x512xbf16> to vector<8x512xbf16>
    %1346 = arith.extf %1345 : vector<8x512xbf16> to vector<8x512xf32>
    %c0_707 = arith.constant 0 : index
    %c0_708 = arith.constant 0 : index
    %1347 = vector.load %arg7[%c0_707, %c0_708] : memref<8x128xf32, #tpu.memory_space<vmem>>, vector<8x128xf32>
    %1348 = arith.truncf %1347 : vector<8x128xf32> to vector<8x128xbf16>
    %cst_709 = arith.constant dense<0.000000e+00> : vector<8x512xf32>
    %1349 = tpu.matmul %1348, %1187, %cst_709 {dimension_numbers = #tpu.dot_dimension_numbers<[1], [0], [0], [1], [0, 0, 1, 1], [], []>} : vector<8x128xbf16>, vector<128x512xbf16>, vector<8x512xf32> -> vector<8x512xf32>
    %1350 = arith.addf %1346, %1349 : vector<8x512xf32>
    %1351 = vector.extract_strided_slice %1350 {offsets = [0, 0], sizes = [8, 128], strides = [1, 1]} : vector<8x512xf32> to vector<8x128xf32>
    %cst_710 = arith.constant 5.000000e-01 : f32
    %1352 = vector.broadcast %cst_710 : f32 to vector<8x128xf32>
    %1353 = arith.mulf %1352, %1351 : vector<8x128xf32>
    %1354 = math.tanh %1353 : vector<8x128xf32>
    %cst_711 = arith.constant 5.000000e-01 : f32
    %1355 = vector.broadcast %cst_711 : f32 to vector<8x128xf32>
    %1356 = arith.mulf %1355, %1354 : vector<8x128xf32>
    %cst_712 = arith.constant 5.000000e-01 : f32
    %1357 = vector.broadcast %cst_712 : f32 to vector<8x128xf32>
    %1358 = arith.addf %1356, %1357 : vector<8x128xf32>
    %1359 = vector.extract_strided_slice %1350 {offsets = [0, 128], sizes = [8, 128], strides = [1, 1]} : vector<8x512xf32> to vector<8x128xf32>
    %cst_713 = arith.constant 5.000000e-01 : f32
    %1360 = vector.broadcast %cst_713 : f32 to vector<8x128xf32>
    %1361 = arith.mulf %1360, %1359 : vector<8x128xf32>
    %1362 = math.tanh %1361 : vector<8x128xf32>
    %cst_714 = arith.constant 5.000000e-01 : f32
    %1363 = vector.broadcast %cst_714 : f32 to vector<8x128xf32>
    %1364 = arith.mulf %1363, %1362 : vector<8x128xf32>
    %cst_715 = arith.constant 5.000000e-01 : f32
    %1365 = vector.broadcast %cst_715 : f32 to vector<8x128xf32>
    %1366 = arith.addf %1364, %1365 : vector<8x128xf32>
    %1367 = vector.extract_strided_slice %1350 {offsets = [0, 256], sizes = [8, 128], strides = [1, 1]} : vector<8x512xf32> to vector<8x128xf32>
    %1368 = math.tanh %1367 : vector<8x128xf32>
    %1369 = vector.extract_strided_slice %1350 {offsets = [0, 384], sizes = [8, 128], strides = [1, 1]} : vector<8x512xf32> to vector<8x128xf32>
    %cst_716 = arith.constant 5.000000e-01 : f32
    %1370 = vector.broadcast %cst_716 : f32 to vector<8x128xf32>
    %1371 = arith.mulf %1370, %1369 : vector<8x128xf32>
    %1372 = math.tanh %1371 : vector<8x128xf32>
    %cst_717 = arith.constant 5.000000e-01 : f32
    %1373 = vector.broadcast %cst_717 : f32 to vector<8x128xf32>
    %1374 = arith.mulf %1373, %1372 : vector<8x128xf32>
    %cst_718 = arith.constant 5.000000e-01 : f32
    %1375 = vector.broadcast %cst_718 : f32 to vector<8x128xf32>
    %1376 = arith.addf %1374, %1375 : vector<8x128xf32>
    %c0_719 = arith.constant 0 : index
    %c0_720 = arith.constant 0 : index
    %1377 = vector.load %arg8[%c0_719, %c0_720] : memref<8x128xf32, #tpu.memory_space<vmem>>, vector<8x128xf32>
    %1378 = arith.mulf %1366, %1377 : vector<8x128xf32>
    %1379 = arith.mulf %1358, %1368 : vector<8x128xf32>
    %1380 = arith.addf %1378, %1379 : vector<8x128xf32>
    %1381 = math.tanh %1380 : vector<8x128xf32>
    %1382 = arith.mulf %1376, %1381 : vector<8x128xf32>
    %c0_721 = arith.constant 0 : index
    %c0_722 = arith.constant 0 : index
    %1383 = vector.load %arg8[%c0_721, %c0_722] : memref<8x128xf32, #tpu.memory_space<vmem>>, vector<8x128xf32>
    tpu.vector_store %arg8[%c0_721, %c0_722], %1380 {strides = array<i32>} : memref<8x128xf32, #tpu.memory_space<vmem>>, vector<8x128xf32>,
    %c0_723 = arith.constant 0 : index
    %c0_724 = arith.constant 0 : index
    %1384 = vector.load %arg7[%c0_723, %c0_724] : memref<8x128xf32, #tpu.memory_space<vmem>>, vector<8x128xf32>
    tpu.vector_store %arg7[%c0_723, %c0_724], %1382 {strides = array<i32>} : memref<8x128xf32, #tpu.memory_space<vmem>>, vector<8x128xf32>,
    %1385 = arith.truncf %1382 : vector<8x128xf32> to vector<8x128xbf16>
    %1386 = arith.index_cast %c3_i32_704 : i32 to index
    %c0_725 = arith.constant 0 : index
    %c0_726 = arith.constant 0 : index
    %1387 = vector.load %arg5[%1386, %c0_725, %c0_726] : memref<8x8x128xbf16, #tpu.memory_space<vmem>>, vector<1x8x128xbf16>
    %1388 = vector.shape_cast %1387 : vector<1x8x128xbf16> to vector<8x128xbf16>
    %1389 = vector.shape_cast %1385 : vector<8x128xbf16> to vector<1x8x128xbf16>
    tpu.vector_store %arg5[%1386, %c0_725, %c0_726], %1389 {strides = array<i32>} : memref<8x8x128xbf16, #tpu.memory_space<vmem>>, vector<1x8x128xbf16>,
    %c4_i32_727 = arith.constant 4 : i32
    %1390 = arith.index_cast %c4_i32_727 : i32 to index
    %c0_728 = arith.constant 0 : index
    %c0_729 = arith.constant 0 : index
    %1391 = vector.load %arg6[%1390, %c0_728, %c0_729] : memref<8x8x512xbf16, #tpu.memory_space<vmem>>, vector<1x8x512xbf16>
    %1392 = vector.shape_cast %1391 : vector<1x8x512xbf16> to vector<8x512xbf16>
    %1393 = arith.extf %1392 : vector<8x512xbf16> to vector<8x512xf32>
    %c0_730 = arith.constant 0 : index
    %c0_731 = arith.constant 0 : index
    %1394 = vector.load %arg7[%c0_730, %c0_731] : memref<8x128xf32, #tpu.memory_space<vmem>>, vector<8x128xf32>
    %1395 = arith.truncf %1394 : vector<8x128xf32> to vector<8x128xbf16>
    %cst_732 = arith.constant dense<0.000000e+00> : vector<8x512xf32>
    %1396 = tpu.matmul %1395, %1187, %cst_732 {dimension_numbers = #tpu.dot_dimension_numbers<[1], [0], [0], [1], [0, 0, 1, 1], [], []>} : vector<8x128xbf16>, vector<128x512xbf16>, vector<8x512xf32> -> vector<8x512xf32>
    %1397 = arith.addf %1393, %1396 : vector<8x512xf32>
    %1398 = vector.extract_strided_slice %1397 {offsets = [0, 0], sizes = [8, 128], strides = [1, 1]} : vector<8x512xf32> to vector<8x128xf32>
    %cst_733 = arith.constant 5.000000e-01 : f32
    %1399 = vector.broadcast %cst_733 : f32 to vector<8x128xf32>
    %1400 = arith.mulf %1399, %1398 : vector<8x128xf32>
    %1401 = math.tanh %1400 : vector<8x128xf32>
    %cst_734 = arith.constant 5.000000e-01 : f32
    %1402 = vector.broadcast %cst_734 : f32 to vector<8x128xf32>
    %1403 = arith.mulf %1402, %1401 : vector<8x128xf32>
    %cst_735 = arith.constant 5.000000e-01 : f32
    %1404 = vector.broadcast %cst_735 : f32 to vector<8x128xf32>
    %1405 = arith.addf %1403, %1404 : vector<8x128xf32>
    %1406 = vector.extract_strided_slice %1397 {offsets = [0, 128], sizes = [8, 128], strides = [1, 1]} : vector<8x512xf32> to vector<8x128xf32>
    %cst_736 = arith.constant 5.000000e-01 : f32
    %1407 = vector.broadcast %cst_736 : f32 to vector<8x128xf32>
    %1408 = arith.mulf %1407, %1406 : vector<8x128xf32>
    %1409 = math.tanh %1408 : vector<8x128xf32>
    %cst_737 = arith.constant 5.000000e-01 : f32
    %1410 = vector.broadcast %cst_737 : f32 to vector<8x128xf32>
    %1411 = arith.mulf %1410, %1409 : vector<8x128xf32>
    %cst_738 = arith.constant 5.000000e-01 : f32
    %1412 = vector.broadcast %cst_738 : f32 to vector<8x128xf32>
    %1413 = arith.addf %1411, %1412 : vector<8x128xf32>
    %1414 = vector.extract_strided_slice %1397 {offsets = [0, 256], sizes = [8, 128], strides = [1, 1]} : vector<8x512xf32> to vector<8x128xf32>
    %1415 = math.tanh %1414 : vector<8x128xf32>
    %1416 = vector.extract_strided_slice %1397 {offsets = [0, 384], sizes = [8, 128], strides = [1, 1]} : vector<8x512xf32> to vector<8x128xf32>
    %cst_739 = arith.constant 5.000000e-01 : f32
    %1417 = vector.broadcast %cst_739 : f32 to vector<8x128xf32>
    %1418 = arith.mulf %1417, %1416 : vector<8x128xf32>
    %1419 = math.tanh %1418 : vector<8x128xf32>
    %cst_740 = arith.constant 5.000000e-01 : f32
    %1420 = vector.broadcast %cst_740 : f32 to vector<8x128xf32>
    %1421 = arith.mulf %1420, %1419 : vector<8x128xf32>
    %cst_741 = arith.constant 5.000000e-01 : f32
    %1422 = vector.broadcast %cst_741 : f32 to vector<8x128xf32>
    %1423 = arith.addf %1421, %1422 : vector<8x128xf32>
    %c0_742 = arith.constant 0 : index
    %c0_743 = arith.constant 0 : index
    %1424 = vector.load %arg8[%c0_742, %c0_743] : memref<8x128xf32, #tpu.memory_space<vmem>>, vector<8x128xf32>
    %1425 = arith.mulf %1413, %1424 : vector<8x128xf32>
    %1426 = arith.mulf %1405, %1415 : vector<8x128xf32>
    %1427 = arith.addf %1425, %1426 : vector<8x128xf32>
    %1428 = math.tanh %1427 : vector<8x128xf32>
    %1429 = arith.mulf %1423, %1428 : vector<8x128xf32>
    %c0_744 = arith.constant 0 : index
    %c0_745 = arith.constant 0 : index
    %1430 = vector.load %arg8[%c0_744, %c0_745] : memref<8x128xf32, #tpu.memory_space<vmem>>, vector<8x128xf32>
    tpu.vector_store %arg8[%c0_744, %c0_745], %1427 {strides = array<i32>} : memref<8x128xf32, #tpu.memory_space<vmem>>, vector<8x128xf32>,
    %c0_746 = arith.constant 0 : index
    %c0_747 = arith.constant 0 : index
    %1431 = vector.load %arg7[%c0_746, %c0_747] : memref<8x128xf32, #tpu.memory_space<vmem>>, vector<8x128xf32>
    tpu.vector_store %arg7[%c0_746, %c0_747], %1429 {strides = array<i32>} : memref<8x128xf32, #tpu.memory_space<vmem>>, vector<8x128xf32>,
    %1432 = arith.truncf %1429 : vector<8x128xf32> to vector<8x128xbf16>
    %1433 = arith.index_cast %c4_i32_727 : i32 to index
    %c0_748 = arith.constant 0 : index
    %c0_749 = arith.constant 0 : index
    %1434 = vector.load %arg5[%1433, %c0_748, %c0_749] : memref<8x8x128xbf16, #tpu.memory_space<vmem>>, vector<1x8x128xbf16>
    %1435 = vector.shape_cast %1434 : vector<1x8x128xbf16> to vector<8x128xbf16>
    %1436 = vector.shape_cast %1432 : vector<8x128xbf16> to vector<1x8x128xbf16>
    tpu.vector_store %arg5[%1433, %c0_748, %c0_749], %1436 {strides = array<i32>} : memref<8x8x128xbf16, #tpu.memory_space<vmem>>, vector<1x8x128xbf16>,
    %c5_i32_750 = arith.constant 5 : i32
    %1437 = arith.index_cast %c5_i32_750 : i32 to index
    %c0_751 = arith.constant 0 : index
    %c0_752 = arith.constant 0 : index
    %1438 = vector.load %arg6[%1437, %c0_751, %c0_752] : memref<8x8x512xbf16, #tpu.memory_space<vmem>>, vector<1x8x512xbf16>
    %1439 = vector.shape_cast %1438 : vector<1x8x512xbf16> to vector<8x512xbf16>
    %1440 = arith.extf %1439 : vector<8x512xbf16> to vector<8x512xf32>
    %c0_753 = arith.constant 0 : index
    %c0_754 = arith.constant 0 : index
    %1441 = vector.load %arg7[%c0_753, %c0_754] : memref<8x128xf32, #tpu.memory_space<vmem>>, vector<8x128xf32>
    %1442 = arith.truncf %1441 : vector<8x128xf32> to vector<8x128xbf16>
    %cst_755 = arith.constant dense<0.000000e+00> : vector<8x512xf32>
    %1443 = tpu.matmul %1442, %1187, %cst_755 {dimension_numbers = #tpu.dot_dimension_numbers<[1], [0], [0], [1], [0, 0, 1, 1], [], []>} : vector<8x128xbf16>, vector<128x512xbf16>, vector<8x512xf32> -> vector<8x512xf32>
    %1444 = arith.addf %1440, %1443 : vector<8x512xf32>
    %1445 = vector.extract_strided_slice %1444 {offsets = [0, 0], sizes = [8, 128], strides = [1, 1]} : vector<8x512xf32> to vector<8x128xf32>
    %cst_756 = arith.constant 5.000000e-01 : f32
    %1446 = vector.broadcast %cst_756 : f32 to vector<8x128xf32>
    %1447 = arith.mulf %1446, %1445 : vector<8x128xf32>
    %1448 = math.tanh %1447 : vector<8x128xf32>
    %cst_757 = arith.constant 5.000000e-01 : f32
    %1449 = vector.broadcast %cst_757 : f32 to vector<8x128xf32>
    %1450 = arith.mulf %1449, %1448 : vector<8x128xf32>
    %cst_758 = arith.constant 5.000000e-01 : f32
    %1451 = vector.broadcast %cst_758 : f32 to vector<8x128xf32>
    %1452 = arith.addf %1450, %1451 : vector<8x128xf32>
    %1453 = vector.extract_strided_slice %1444 {offsets = [0, 128], sizes = [8, 128], strides = [1, 1]} : vector<8x512xf32> to vector<8x128xf32>
    %cst_759 = arith.constant 5.000000e-01 : f32
    %1454 = vector.broadcast %cst_759 : f32 to vector<8x128xf32>
    %1455 = arith.mulf %1454, %1453 : vector<8x128xf32>
    %1456 = math.tanh %1455 : vector<8x128xf32>
    %cst_760 = arith.constant 5.000000e-01 : f32
    %1457 = vector.broadcast %cst_760 : f32 to vector<8x128xf32>
    %1458 = arith.mulf %1457, %1456 : vector<8x128xf32>
    %cst_761 = arith.constant 5.000000e-01 : f32
    %1459 = vector.broadcast %cst_761 : f32 to vector<8x128xf32>
    %1460 = arith.addf %1458, %1459 : vector<8x128xf32>
    %1461 = vector.extract_strided_slice %1444 {offsets = [0, 256], sizes = [8, 128], strides = [1, 1]} : vector<8x512xf32> to vector<8x128xf32>
    %1462 = math.tanh %1461 : vector<8x128xf32>
    %1463 = vector.extract_strided_slice %1444 {offsets = [0, 384], sizes = [8, 128], strides = [1, 1]} : vector<8x512xf32> to vector<8x128xf32>
    %cst_762 = arith.constant 5.000000e-01 : f32
    %1464 = vector.broadcast %cst_762 : f32 to vector<8x128xf32>
    %1465 = arith.mulf %1464, %1463 : vector<8x128xf32>
    %1466 = math.tanh %1465 : vector<8x128xf32>
    %cst_763 = arith.constant 5.000000e-01 : f32
    %1467 = vector.broadcast %cst_763 : f32 to vector<8x128xf32>
    %1468 = arith.mulf %1467, %1466 : vector<8x128xf32>
    %cst_764 = arith.constant 5.000000e-01 : f32
    %1469 = vector.broadcast %cst_764 : f32 to vector<8x128xf32>
    %1470 = arith.addf %1468, %1469 : vector<8x128xf32>
    %c0_765 = arith.constant 0 : index
    %c0_766 = arith.constant 0 : index
    %1471 = vector.load %arg8[%c0_765, %c0_766] : memref<8x128xf32, #tpu.memory_space<vmem>>, vector<8x128xf32>
    %1472 = arith.mulf %1460, %1471 : vector<8x128xf32>
    %1473 = arith.mulf %1452, %1462 : vector<8x128xf32>
    %1474 = arith.addf %1472, %1473 : vector<8x128xf32>
    %1475 = math.tanh %1474 : vector<8x128xf32>
    %1476 = arith.mulf %1470, %1475 : vector<8x128xf32>
    %c0_767 = arith.constant 0 : index
    %c0_768 = arith.constant 0 : index
    %1477 = vector.load %arg8[%c0_767, %c0_768] : memref<8x128xf32, #tpu.memory_space<vmem>>, vector<8x128xf32>
    tpu.vector_store %arg8[%c0_767, %c0_768], %1474 {strides = array<i32>} : memref<8x128xf32, #tpu.memory_space<vmem>>, vector<8x128xf32>,
    %c0_769 = arith.constant 0 : index
    %c0_770 = arith.constant 0 : index
    %1478 = vector.load %arg7[%c0_769, %c0_770] : memref<8x128xf32, #tpu.memory_space<vmem>>, vector<8x128xf32>
    tpu.vector_store %arg7[%c0_769, %c0_770], %1476 {strides = array<i32>} : memref<8x128xf32, #tpu.memory_space<vmem>>, vector<8x128xf32>,
    %1479 = arith.truncf %1476 : vector<8x128xf32> to vector<8x128xbf16>
    %1480 = arith.index_cast %c5_i32_750 : i32 to index
    %c0_771 = arith.constant 0 : index
    %c0_772 = arith.constant 0 : index
    %1481 = vector.load %arg5[%1480, %c0_771, %c0_772] : memref<8x8x128xbf16, #tpu.memory_space<vmem>>, vector<1x8x128xbf16>
    %1482 = vector.shape_cast %1481 : vector<1x8x128xbf16> to vector<8x128xbf16>
    %1483 = vector.shape_cast %1479 : vector<8x128xbf16> to vector<1x8x128xbf16>
    tpu.vector_store %arg5[%1480, %c0_771, %c0_772], %1483 {strides = array<i32>} : memref<8x8x128xbf16, #tpu.memory_space<vmem>>, vector<1x8x128xbf16>,
    %c6_i32_773 = arith.constant 6 : i32
    %1484 = arith.index_cast %c6_i32_773 : i32 to index
    %c0_774 = arith.constant 0 : index
    %c0_775 = arith.constant 0 : index
    %1485 = vector.load %arg6[%1484, %c0_774, %c0_775] : memref<8x8x512xbf16, #tpu.memory_space<vmem>>, vector<1x8x512xbf16>
    %1486 = vector.shape_cast %1485 : vector<1x8x512xbf16> to vector<8x512xbf16>
    %1487 = arith.extf %1486 : vector<8x512xbf16> to vector<8x512xf32>
    %c0_776 = arith.constant 0 : index
    %c0_777 = arith.constant 0 : index
    %1488 = vector.load %arg7[%c0_776, %c0_777] : memref<8x128xf32, #tpu.memory_space<vmem>>, vector<8x128xf32>
    %1489 = arith.truncf %1488 : vector<8x128xf32> to vector<8x128xbf16>
    %cst_778 = arith.constant dense<0.000000e+00> : vector<8x512xf32>
    %1490 = tpu.matmul %1489, %1187, %cst_778 {dimension_numbers = #tpu.dot_dimension_numbers<[1], [0], [0], [1], [0, 0, 1, 1], [], []>} : vector<8x128xbf16>, vector<128x512xbf16>, vector<8x512xf32> -> vector<8x512xf32>
    %1491 = arith.addf %1487, %1490 : vector<8x512xf32>
    %1492 = vector.extract_strided_slice %1491 {offsets = [0, 0], sizes = [8, 128], strides = [1, 1]} : vector<8x512xf32> to vector<8x128xf32>
    %cst_779 = arith.constant 5.000000e-01 : f32
    %1493 = vector.broadcast %cst_779 : f32 to vector<8x128xf32>
    %1494 = arith.mulf %1493, %1492 : vector<8x128xf32>
    %1495 = math.tanh %1494 : vector<8x128xf32>
    %cst_780 = arith.constant 5.000000e-01 : f32
    %1496 = vector.broadcast %cst_780 : f32 to vector<8x128xf32>
    %1497 = arith.mulf %1496, %1495 : vector<8x128xf32>
    %cst_781 = arith.constant 5.000000e-01 : f32
    %1498 = vector.broadcast %cst_781 : f32 to vector<8x128xf32>
    %1499 = arith.addf %1497, %1498 : vector<8x128xf32>
    %1500 = vector.extract_strided_slice %1491 {offsets = [0, 128], sizes = [8, 128], strides = [1, 1]} : vector<8x512xf32> to vector<8x128xf32>
    %cst_782 = arith.constant 5.000000e-01 : f32
    %1501 = vector.broadcast %cst_782 : f32 to vector<8x128xf32>
    %1502 = arith.mulf %1501, %1500 : vector<8x128xf32>
    %1503 = math.tanh %1502 : vector<8x128xf32>
    %cst_783 = arith.constant 5.000000e-01 : f32
    %1504 = vector.broadcast %cst_783 : f32 to vector<8x128xf32>
    %1505 = arith.mulf %1504, %1503 : vector<8x128xf32>
    %cst_784 = arith.constant 5.000000e-01 : f32
    %1506 = vector.broadcast %cst_784 : f32 to vector<8x128xf32>
    %1507 = arith.addf %1505, %1506 : vector<8x128xf32>
    %1508 = vector.extract_strided_slice %1491 {offsets = [0, 256], sizes = [8, 128], strides = [1, 1]} : vector<8x512xf32> to vector<8x128xf32>
    %1509 = math.tanh %1508 : vector<8x128xf32>
    %1510 = vector.extract_strided_slice %1491 {offsets = [0, 384], sizes = [8, 128], strides = [1, 1]} : vector<8x512xf32> to vector<8x128xf32>
    %cst_785 = arith.constant 5.000000e-01 : f32
    %1511 = vector.broadcast %cst_785 : f32 to vector<8x128xf32>
    %1512 = arith.mulf %1511, %1510 : vector<8x128xf32>
    %1513 = math.tanh %1512 : vector<8x128xf32>
    %cst_786 = arith.constant 5.000000e-01 : f32
    %1514 = vector.broadcast %cst_786 : f32 to vector<8x128xf32>
    %1515 = arith.mulf %1514, %1513 : vector<8x128xf32>
    %cst_787 = arith.constant 5.000000e-01 : f32
    %1516 = vector.broadcast %cst_787 : f32 to vector<8x128xf32>
    %1517 = arith.addf %1515, %1516 : vector<8x128xf32>
    %c0_788 = arith.constant 0 : index
    %c0_789 = arith.constant 0 : index
    %1518 = vector.load %arg8[%c0_788, %c0_789] : memref<8x128xf32, #tpu.memory_space<vmem>>, vector<8x128xf32>
    %1519 = arith.mulf %1507, %1518 : vector<8x128xf32>
    %1520 = arith.mulf %1499, %1509 : vector<8x128xf32>
    %1521 = arith.addf %1519, %1520 : vector<8x128xf32>
    %1522 = math.tanh %1521 : vector<8x128xf32>
    %1523 = arith.mulf %1517, %1522 : vector<8x128xf32>
    %c0_790 = arith.constant 0 : index
    %c0_791 = arith.constant 0 : index
    %1524 = vector.load %arg8[%c0_790, %c0_791] : memref<8x128xf32, #tpu.memory_space<vmem>>, vector<8x128xf32>
    tpu.vector_store %arg8[%c0_790, %c0_791], %1521 {strides = array<i32>} : memref<8x128xf32, #tpu.memory_space<vmem>>, vector<8x128xf32>,
    %c0_792 = arith.constant 0 : index
    %c0_793 = arith.constant 0 : index
    %1525 = vector.load %arg7[%c0_792, %c0_793] : memref<8x128xf32, #tpu.memory_space<vmem>>, vector<8x128xf32>
    tpu.vector_store %arg7[%c0_792, %c0_793], %1523 {strides = array<i32>} : memref<8x128xf32, #tpu.memory_space<vmem>>, vector<8x128xf32>,
    %1526 = arith.truncf %1523 : vector<8x128xf32> to vector<8x128xbf16>
    %1527 = arith.index_cast %c6_i32_773 : i32 to index
    %c0_794 = arith.constant 0 : index
    %c0_795 = arith.constant 0 : index
    %1528 = vector.load %arg5[%1527, %c0_794, %c0_795] : memref<8x8x128xbf16, #tpu.memory_space<vmem>>, vector<1x8x128xbf16>
    %1529 = vector.shape_cast %1528 : vector<1x8x128xbf16> to vector<8x128xbf16>
    %1530 = vector.shape_cast %1526 : vector<8x128xbf16> to vector<1x8x128xbf16>
    tpu.vector_store %arg5[%1527, %c0_794, %c0_795], %1530 {strides = array<i32>} : memref<8x8x128xbf16, #tpu.memory_space<vmem>>, vector<1x8x128xbf16>,
    %c7_i32_796 = arith.constant 7 : i32
    %1531 = arith.index_cast %c7_i32_796 : i32 to index
    %c0_797 = arith.constant 0 : index
    %c0_798 = arith.constant 0 : index
    %1532 = vector.load %arg6[%1531, %c0_797, %c0_798] : memref<8x8x512xbf16, #tpu.memory_space<vmem>>, vector<1x8x512xbf16>
    %1533 = vector.shape_cast %1532 : vector<1x8x512xbf16> to vector<8x512xbf16>
    %1534 = arith.extf %1533 : vector<8x512xbf16> to vector<8x512xf32>
    %c0_799 = arith.constant 0 : index
    %c0_800 = arith.constant 0 : index
    %1535 = vector.load %arg7[%c0_799, %c0_800] : memref<8x128xf32, #tpu.memory_space<vmem>>, vector<8x128xf32>
    %1536 = arith.truncf %1535 : vector<8x128xf32> to vector<8x128xbf16>
    %cst_801 = arith.constant dense<0.000000e+00> : vector<8x512xf32>
    %1537 = tpu.matmul %1536, %1187, %cst_801 {dimension_numbers = #tpu.dot_dimension_numbers<[1], [0], [0], [1], [0, 0, 1, 1], [], []>} : vector<8x128xbf16>, vector<128x512xbf16>, vector<8x512xf32> -> vector<8x512xf32>
    %1538 = arith.addf %1534, %1537 : vector<8x512xf32>
    %1539 = vector.extract_strided_slice %1538 {offsets = [0, 0], sizes = [8, 128], strides = [1, 1]} : vector<8x512xf32> to vector<8x128xf32>
    %cst_802 = arith.constant 5.000000e-01 : f32
    %1540 = vector.broadcast %cst_802 : f32 to vector<8x128xf32>
    %1541 = arith.mulf %1540, %1539 : vector<8x128xf32>
    %1542 = math.tanh %1541 : vector<8x128xf32>
    %cst_803 = arith.constant 5.000000e-01 : f32
    %1543 = vector.broadcast %cst_803 : f32 to vector<8x128xf32>
    %1544 = arith.mulf %1543, %1542 : vector<8x128xf32>
    %cst_804 = arith.constant 5.000000e-01 : f32
    %1545 = vector.broadcast %cst_804 : f32 to vector<8x128xf32>
    %1546 = arith.addf %1544, %1545 : vector<8x128xf32>
    %1547 = vector.extract_strided_slice %1538 {offsets = [0, 128], sizes = [8, 128], strides = [1, 1]} : vector<8x512xf32> to vector<8x128xf32>
    %cst_805 = arith.constant 5.000000e-01 : f32
    %1548 = vector.broadcast %cst_805 : f32 to vector<8x128xf32>
    %1549 = arith.mulf %1548, %1547 : vector<8x128xf32>
    %1550 = math.tanh %1549 : vector<8x128xf32>
    %cst_806 = arith.constant 5.000000e-01 : f32
    %1551 = vector.broadcast %cst_806 : f32 to vector<8x128xf32>
    %1552 = arith.mulf %1551, %1550 : vector<8x128xf32>
    %cst_807 = arith.constant 5.000000e-01 : f32
    %1553 = vector.broadcast %cst_807 : f32 to vector<8x128xf32>
    %1554 = arith.addf %1552, %1553 : vector<8x128xf32>
    %1555 = vector.extract_strided_slice %1538 {offsets = [0, 256], sizes = [8, 128], strides = [1, 1]} : vector<8x512xf32> to vector<8x128xf32>
    %1556 = math.tanh %1555 : vector<8x128xf32>
    %1557 = vector.extract_strided_slice %1538 {offsets = [0, 384], sizes = [8, 128], strides = [1, 1]} : vector<8x512xf32> to vector<8x128xf32>
    %cst_808 = arith.constant 5.000000e-01 : f32
    %1558 = vector.broadcast %cst_808 : f32 to vector<8x128xf32>
    %1559 = arith.mulf %1558, %1557 : vector<8x128xf32>
    %1560 = math.tanh %1559 : vector<8x128xf32>
    %cst_809 = arith.constant 5.000000e-01 : f32
    %1561 = vector.broadcast %cst_809 : f32 to vector<8x128xf32>
    %1562 = arith.mulf %1561, %1560 : vector<8x128xf32>
    %cst_810 = arith.constant 5.000000e-01 : f32
    %1563 = vector.broadcast %cst_810 : f32 to vector<8x128xf32>
    %1564 = arith.addf %1562, %1563 : vector<8x128xf32>
    %c0_811 = arith.constant 0 : index
    %c0_812 = arith.constant 0 : index
    %1565 = vector.load %arg8[%c0_811, %c0_812] : memref<8x128xf32, #tpu.memory_space<vmem>>, vector<8x128xf32>
    %1566 = arith.mulf %1554, %1565 : vector<8x128xf32>
    %1567 = arith.mulf %1546, %1556 : vector<8x128xf32>
    %1568 = arith.addf %1566, %1567 : vector<8x128xf32>
    %1569 = math.tanh %1568 : vector<8x128xf32>
    %1570 = arith.mulf %1564, %1569 : vector<8x128xf32>
    %c0_813 = arith.constant 0 : index
    %c0_814 = arith.constant 0 : index
    %1571 = vector.load %arg8[%c0_813, %c0_814] : memref<8x128xf32, #tpu.memory_space<vmem>>, vector<8x128xf32>
    tpu.vector_store %arg8[%c0_813, %c0_814], %1568 {strides = array<i32>} : memref<8x128xf32, #tpu.memory_space<vmem>>, vector<8x128xf32>,
    %c0_815 = arith.constant 0 : index
    %c0_816 = arith.constant 0 : index
    %1572 = vector.load %arg7[%c0_815, %c0_816] : memref<8x128xf32, #tpu.memory_space<vmem>>, vector<8x128xf32>
    tpu.vector_store %arg7[%c0_815, %c0_816], %1570 {strides = array<i32>} : memref<8x128xf32, #tpu.memory_space<vmem>>, vector<8x128xf32>,
    %1573 = arith.truncf %1570 : vector<8x128xf32> to vector<8x128xbf16>
    %1574 = arith.index_cast %c7_i32_796 : i32 to index
    %c0_817 = arith.constant 0 : index
    %c0_818 = arith.constant 0 : index
    %1575 = vector.load %arg5[%1574, %c0_817, %c0_818] : memref<8x8x128xbf16, #tpu.memory_space<vmem>>, vector<1x8x128xbf16>
    %1576 = vector.shape_cast %1575 : vector<1x8x128xbf16> to vector<8x128xbf16>
    %1577 = vector.shape_cast %1573 : vector<8x128xbf16> to vector<1x8x128xbf16>
    tpu.vector_store %arg5[%1574, %c0_817, %c0_818], %1577 {strides = array<i32>} : memref<8x8x128xbf16, #tpu.memory_space<vmem>>, vector<1x8x128xbf16>,
    %c8_i32_819 = arith.constant 8 : i32
    return
  }
  func.func @transform_0(%arg0: i32) -> (i32, i32, i32) {
    %c0_i32 = arith.constant 0 : i32
    %c0_i32_0 = arith.constant 0 : i32
    %c0_i32_1 = arith.constant 0 : i32
    return %c0_i32, %arg0, %c0_i32_0 : i32, i32, i32
  }
  func.func @transform_1(%arg0: i32) -> (i32, i32, i32) {
    %c0_i32 = arith.constant 0 : i32
    %c0_i32_0 = arith.constant 0 : i32
    %c0_i32_1 = arith.constant 0 : i32
    %c0_i32_2 = arith.constant 0 : i32
    return %c0_i32, %c0_i32_0, %c0_i32_1 : i32, i32, i32
  }
  func.func @transform_2(%arg0: i32) -> (i32, i32, i32) {
    %c0_i32 = arith.constant 0 : i32
    %c0_i32_0 = arith.constant 0 : i32
    %c0_i32_1 = arith.constant 0 : i32
    %c0_i32_2 = arith.constant 0 : i32
    return %c0_i32, %c0_i32_0, %c0_i32_1 : i32, i32, i32
  }
  func.func @transform_3(%arg0: i32) -> (i32, i32, i32) {
    %c0_i32 = arith.constant 0 : i32
    %c0_i32_0 = arith.constant 0 : i32
    %c0_i32_1 = arith.constant 0 : i32
    %c0_i32_2 = arith.constant 0 : i32
    return %c0_i32, %c0_i32_0, %c0_i32_1 : i32, i32, i32
  }
  func.func @transform_4(%arg0: i32) -> (i32, i32, i32) {
    %c0_i32 = arith.constant 0 : i32
    %c0_i32_0 = arith.constant 0 : i32
    %c0_i32_1 = arith.constant 0 : i32
    return %c0_i32, %arg0, %c0_i32_0 : i32, i32, i32
  }
}

</mosaic_0001>

<bundles_post_ra>
// kernel: decoder_forward.1
= control target key start
LH: loop header
LB: loop body
LE: loop exit
PB: predicated region body
PF: predicated region fallthrough
CT: control target
= control target key end

     0   :  { %9 = vsyncpa [#allocation6], 0  ;;  %s9034_s0 = inlined_call_operand.vmem [shape: bf16[8,8,128], index: 0, kind: input, shape index: {}]   ;;  %s9035_s1 = inlined_call_operand.hbm [shape: bf16[4,128,512], index: 1, kind: input, shape index: {}]   ;;  %s9036_s2 = inlined_call_operand.hbm [shape: bf16[4,128,512], index: 2, kind: input, shape index: {}]   ;;  %s9037_s3 = inlined_call_operand.vmem [shape: f32[4,1,512], index: 3, kind: input, shape index: {}]   ;;  %s9038_s4 = inlined_call_operand.vmem [shape: bf16[8,8,128], index: 4, kind: output, shape index: {}]  }
   0x1   :  { %s17_s17 = sshll.u32 %s9035_s1, 4  ;;  %s18_s17 = int_to_ptr.hbm [resolvable:$true] %s17_s17 }
   0x2   :  { %10 = vsyncpa [#allocation8], 0  ;;  %s6950_s18 = smov [#allocation5]   ;;  %s30_s22 = sshll.u32 %s9036_s2, 4  ;;  %s31_s22 = int_to_ptr.hbm [resolvable:$true] %s30_s22 }
   0x3   :  { %s19_s19 = sshll.u32 %s6950_s18, 4  ;;  %s6951_s23 = smov 256   ;;  %s20_s19 = int_to_ptr.vmem [resolvable:$true] %s19_s19 }
   0x4   :  { %s6952_s24 = smov 16   ;;  %s6953_s25 = smov [#allocation7]  }
   0x5   :  { %25 = dma.hbm_to_vmem [thread:$0]  %s18_s17, 16384, %s20_s19, [#allocation6], %s6951_s23, %s6951_s23, %s6952_s24  }
   0x6   :  { %s32_s26 = sshll.u32 %s6953_s25, 4  ;;  %s33_s26 = int_to_ptr.vmem [resolvable:$true] %s32_s26 }
   0x7   :  { %38 = dma.hbm_to_vmem [thread:$0]  %s31_s22, 16384, %s33_s26, [#allocation8], %s6951_s23, %s6951_s23, %s6952_s24  }
   0x8   :  { %6946 = dma.done.wait [#allocation6], 16384  }
   0x9   :  { %6947 = vsyncadd [#allocation6], 4294950912 }
   0xa   :  { %6948 = dma.done.wait [#allocation8], 16384  }
   0xb   :  { %6949 = vsyncadd [#allocation8], 4294950912  ;;  %v5312_v0 = vld [vmem:[#allocation5 + $0xe0] sm:$0xf]  ;;  %v6331_v1 = vld [vmem:[#allocation5 + $0xec] sm:$0xf0] }
   0xc   :  { %v6329_v2 = vld [vmem:[#allocation5 + $0xe4] sm:$0xf]  ;;  %v5313_v3 = vor.u32 %v6331_v1, %v5312_v0  ;;  %v5314_v4 = vld [vmem:[#allocation5 + $0xf0] sm:$0xf0]  ;;  %v5320_v5 = vld [vmem:[#allocation5 + $0xe8] sm:$0xf] }
   0xd   :  { %v6332_v6 = vld [vmem:[#allocation5 + $0xf4] sm:$0xf0]  ;;  %v5317_v7 = vor.u32 %v6329_v2, %v5314_v4  ;;  %v6330_v9 = vld [vmem:[#allocation5 + $0xec] sm:$0xf]  ;;  %v5322_v10 = vld [vmem:[#allocation5 + $0xf8] sm:$0xf0] }
   0xe   :  { %v5321_v8 = vor.u32 %v6332_v6, %v5320_v5  ;;  %v5296_v11 = vld [vmem:[#allocation5 + $0xc0] sm:$0xf]  ;;  %331 = vmatpush.bf16.msra.mxu0 %v5313_v3  ;;  %v5325_v12 = vor.u32 %v6330_v9, %v5322_v10  ;;  %v6327_v13 = vld [vmem:[#allocation5 + $0xcc] sm:$0xf0]  ;;  %v6325_v14 = vld [vmem:[#allocation5 + $0xc4] sm:$0xf] }
   0xf   :  { %v5298_v15 = vld [vmem:[#allocation5 + $0xd0] sm:$0xf0]  ;;  %360 = vmatpush.bf16.msra.mxu1 %v5317_v7  ;;  %v5297_v16 = vor.u32 %v6327_v13, %v5296_v11  ;;  %v5304_v18 = vld [vmem:[#allocation5 + $0xc8] sm:$0xf]  ;;  %v6328_v19 = vld [vmem:[#allocation5 + $0xd4] sm:$0xf0] }
  0x10   :  { %389 = vmatpush.bf16.msra.mxu2 %v5321_v8  ;;  %v5301_v17 = vor.u32 %v6325_v14, %v5298_v15  ;;  %v6326_v20 = vld [vmem:[#allocation5 + $0xcc] sm:$0xf]  ;;  %418 = vmatpush.bf16.msra.mxu3 %v5325_v12  ;;  %v5305_v21 = vor.u32 %v6328_v19, %v5304_v18  ;;  %v5306_v22 = vld [vmem:[#allocation5 + $0xd8] sm:$0xf0]  ;;  %v5280_v23 = vld [vmem:[#allocation5 + $0xa0] sm:$0xf] }
  0x11   :  { %v6323_v24 = vld [vmem:[#allocation5 + $0xac] sm:$0xf0]  ;;  %v5309_v25 = vor.u32 %v6326_v20, %v5306_v22  ;;  %v6321_v26 = vld [vmem:[#allocation5 + $0xa4] sm:$0xf]  ;;  %v5282_v27 = vld [vmem:[#allocation5 + $0xb0] sm:$0xf0] }
  0x12   :  { %v5288_v28 = vld [vmem:[#allocation5 + $0xa8] sm:$0xf]  ;;  %332 = vmatpush.bf16.msra.mxu0 %v5297_v16  ;;  %v5281_v29 = vor.u32 %v6323_v24, %v5280_v23  ;;  %v6324_v30 = vld [vmem:[#allocation5 + $0xb4] sm:$0xf0]  ;;  %v6322_v31 = vld [vmem:[#allocation5 + $0xac] sm:$0xf]  ;;  %v5285_v33 = vor.u32 %v6321_v26, %v5282_v27 }
  0x13   :  { %v5290_v32 = vld [vmem:[#allocation5 + $0xb8] sm:$0xf0]  ;;  %361 = vmatpush.bf16.msra.mxu1 %v5301_v17  ;;  %v5289_v34 = vor.u32 %v6324_v30, %v5288_v28  ;;  %v5264_v35 = vld [vmem:[#allocation5 + $0x80] sm:$0xf]  ;;  %v6319_v36 = vld [vmem:[#allocation5 + $0x8c] sm:$0xf0] }
  0x14   :  { %390 = vmatpush.bf16.msra.mxu2 %v5305_v21  ;;  %v6317_v37 = vld [vmem:[#allocation5 + $0x84] sm:$0xf]  ;;  %419 = vmatpush.bf16.msra.mxu3 %v5309_v25  ;;  %v5293_v38 = vor.u32 %v6322_v31, %v5290_v32  ;;  %v5266_v39 = vld [vmem:[#allocation5 + $0x90] sm:$0xf0]  ;;  %v5272_v40 = vld [vmem:[#allocation5 + $0x88] sm:$0xf]  ;;  %v5265_v44 = vor.u32 %v6319_v36, %v5264_v35 }
  0x15   :  { %v6320_v41 = vld [vmem:[#allocation5 + $0x94] sm:$0xf0]  ;;  %v6318_v42 = vld [vmem:[#allocation5 + $0x8c] sm:$0xf]  ;;  %v5274_v43 = vld [vmem:[#allocation5 + $0x98] sm:$0xf0]  ;;  %v5269_v45 = vor.u32 %v6317_v37, %v5266_v39 }
  0x16   :  { %333 = vmatpush.bf16.msra.mxu0 %v5281_v29  ;;  %v5273_v46 = vor.u32 %v6320_v41, %v5272_v40  ;;  %v5248_v47 = vld [vmem:[#allocation5 + $0x60] sm:$0xf]  ;;  %v6315_v48 = vld [vmem:[#allocation5 + $0x6c] sm:$0xf0]  ;;  %v6313_v49 = vld [vmem:[#allocation5 + $0x64] sm:$0xf]  ;;  %v5277_v50 = vor.u32 %v6318_v42, %v5274_v43 }
  0x17   :  { %362 = vmatpush.bf16.msra.mxu1 %v5285_v33  ;;  %v5250_v51 = vld [vmem:[#allocation5 + $0x70] sm:$0xf0]  ;;  %v5256_v52 = vld [vmem:[#allocation5 + $0x68] sm:$0xf]  ;;  %v6316_v53 = vld [vmem:[#allocation5 + $0x74] sm:$0xf0]  ;;  %v5249_v56 = vor.u32 %v6315_v48, %v5248_v47 }
  0x18   :  { %391 = vmatpush.bf16.msra.mxu2 %v5289_v34  ;;  %420 = vmatpush.bf16.msra.mxu3 %v5293_v38  ;;  %v6314_v54 = vld [vmem:[#allocation5 + $0x6c] sm:$0xf]  ;;  %v5258_v55 = vld [vmem:[#allocation5 + $0x78] sm:$0xf0]  ;;  %v5253_v57 = vor.u32 %v6313_v49, %v5250_v51  ;;  %v5257_v58 = vor.u32 %v6316_v53, %v5256_v52  ;;  %v5232_v59 = vld [vmem:[#allocation5 + $0x40] sm:$0xf] }
  0x19   :  { %v6311_v60 = vld [vmem:[#allocation5 + $0x4c] sm:$0xf0]  ;;  %v6309_v61 = vld [vmem:[#allocation5 + $0x44] sm:$0xf]  ;;  %v5261_v62 = vor.u32 %v6314_v54, %v5258_v55  ;;  %v5234_v63 = vld [vmem:[#allocation5 + $0x50] sm:$0xf0] }
  0x1a   :  { %334 = vmatpush.bf16.msra.mxu0 %v5265_v44  ;;  %v5240_v0 = vld [vmem:[#allocation5 + $0x48] sm:$0xf]  ;;  %v6312_v1 = vld [vmem:[#allocation5 + $0x54] sm:$0xf0]  ;;  %v6310_v2 = vld [vmem:[#allocation5 + $0x4c] sm:$0xf]  ;;  %v5233_v4 = vor.u32 %v6311_v60, %v5232_v59  ;;  %v5237_v6 = vor.u32 %v6309_v61, %v5234_v63 }
  0x1b   :  { %363 = vmatpush.bf16.msra.mxu1 %v5269_v45  ;;  %v5242_v3 = vld [vmem:[#allocation5 + $0x58] sm:$0xf0]  ;;  %v5216_v5 = vld [vmem:[#allocation5 + $0x20] sm:$0xf]  ;;  %v5241_v7 = vor.u32 %v6312_v1, %v5240_v0  ;;  %v6307_v8 = vld [vmem:[#allocation5 + $0x2c] sm:$0xf0] }
  0x1c   :  { %392 = vmatpush.bf16.msra.mxu2 %v5273_v46  ;;  %421 = vmatpush.bf16.msra.mxu3 %v5277_v50  ;;  %v6305_v9 = vld [vmem:[#allocation5 + $0x24] sm:$0xf]  ;;  %v5218_v10 = vld [vmem:[#allocation5 + $0x30] sm:$0xf0]  ;;  %v5245_v11 = vor.u32 %v6310_v2, %v5242_v3  ;;  %v5224_v12 = vld [vmem:[#allocation5 + $0x28] sm:$0xf]  ;;  %v5217_v17 = vor.u32 %v6307_v8, %v5216_v5 }
  0x1d   :  { %v6308_v13 = vld [vmem:[#allocation5 + $0x34] sm:$0xf0]  ;;  %v49_v14 = vld [vmem:[%s9034_s0] sm:$0xff]   ;;  %v6306_v15 = vld [vmem:[#allocation5 + $0x2c] sm:$0xf]  ;;  %v5221_v19 = vor.u32 %v6305_v9, %v5218_v10 }
  0x1e   :  { %335 = vmatpush.bf16.msra.mxu0 %v5249_v56  ;;  %v5226_v16 = vld [vmem:[#allocation5 + $0x38] sm:$0xf0]  ;;  %57 = vst [vmem:[%s9038_s4] sm:$0xff] %v49_v14   ;;  %v5200_v18 = vld [vmem:[#allocation5] sm:$0xf]  ;;  %v5225_v20 = vor.u32 %v6308_v13, %v5224_v12  ;;  %v6303_v21 = vld [vmem:[#allocation5 + $0xc] sm:$0xf0] }
  0x1f   :  { %364 = vmatpush.bf16.msra.mxu1 %v5253_v57  ;;  %v6301_v22 = vld [vmem:[#allocation5 + $0x4] sm:$0xf]  ;;  %v5202_v23 = vld [vmem:[#allocation5 + $0x10] sm:$0xf0]  ;;  %v5229_v24 = vor.u32 %v6306_v15, %v5226_v16  ;;  %v5208_v25 = vld [vmem:[#allocation5 + $0x8] sm:$0xf]  ;;  %v5201_v31 = vor.u32 %v6303_v21, %v5200_v18 }
  0x20   :  { %393 = vmatpush.bf16.msra.mxu2 %v5257_v58  ;;  %422 = vmatpush.bf16.msra.mxu3 %v5261_v62  ;;  %v6304_v26 = vld [vmem:[#allocation5 + $0x14] sm:$0xf0]  ;;  %v6302_v27 = vld [vmem:[#allocation5 + $0xc] sm:$0xf]  ;;  %v5210_v28 = vld [vmem:[#allocation5 + $0x18] sm:$0xf0]  ;;  %v5205_v35 = vor.u32 %v6301_v22, %v5202_v23 }
  0x21   :  { %v5440_v29 = vld [vmem:[#allocation7 + $0xe0] sm:$0xf]  ;;  %v6363_v30 = vld [vmem:[#allocation7 + $0xec] sm:$0xf0]  ;;  %v6361_v32 = vld [vmem:[#allocation7 + $0xe4] sm:$0xf]  ;;  %v5209_v36 = vor.u32 %v6304_v26, %v5208_v25  ;;  %v5213_v40 = vor.u32 %v6302_v27, %v5210_v28 }
  0x22   :  { %336 = vmatpush.bf16.msra.mxu0 %v5233_v4  ;;  %v5442_v33 = vld [vmem:[#allocation7 + $0xf0] sm:$0xf0]  ;;  %v51_v34 = vld [vmem:[%s9034_s0 + $0x8] sm:$0xff]   ;;  %v6364_v38 = vld [vmem:[#allocation7 + $0xf4] sm:$0xf0]  ;;  %v7001_v41 = vor.u32 %v6363_v30, %v5440_v29 }
  0x23   :  { %365 = vmatpush.bf16.msra.mxu1 %v5237_v6  ;;  %v5448_v37 = vld [vmem:[#allocation7 + $0xe8] sm:$0xf]  ;;  %59 = vst [vmem:[%s9038_s4 + $0x8] sm:$0xff] %v51_v34   ;;  %v53_v39 = vld [vmem:[%s9034_s0 + $0x10] sm:$0xff]   ;;  %v6362_v42 = vld [vmem:[#allocation7 + $0xec] sm:$0xf]  ;;  %v7009_v45 = vor.u32 %v6361_v32, %v5442_v33 }
  0x24   :  { %394 = vmatpush.bf16.msra.mxu2 %v5241_v7  ;;  %423 = vmatpush.bf16.msra.mxu3 %v5245_v11  ;;  %v5450_v43 = vld [vmem:[#allocation7 + $0xf8] sm:$0xf0]  ;;  %61 = vst [vmem:[%s9038_s4 + $0x10] sm:$0xff] %v53_v39   ;;  %v5424_v46 = vld [vmem:[#allocation7 + $0xc0] sm:$0xf]  ;;  %v7011_v50 = vor.u32 %v6364_v38, %v5448_v37 }
  0x25   :  { %v6365_v44 = vld [vmem:[%s9038_s4] sm:$0xff]  ;;  %v6359_v47 = vld [vmem:[#allocation7 + $0xcc] sm:$0xf0]  ;;  %v5426_v49 = vld [vmem:[#allocation7 + $0xd0] sm:$0xf0]  ;;  %v7014_v51 = vor.u32 %v6362_v42, %v5450_v43 }
  0x26   :  { %337 = vmatpush.bf16.msra.mxu0 %v5217_v17  ;;  %v6357_v48 = vld [vmem:[#allocation7 + $0xc4] sm:$0xf]  ;;  %v7016_v52 = vor.u32 %v6359_v47, %v5424_v46  ;;  %v5432_v53 = vld [vmem:[#allocation7 + $0xc8] sm:$0xf]  ;;  %v6360_v54 = vld [vmem:[#allocation7 + $0xd4] sm:$0xf0] }
  0x27   :  { %366 = vmatpush.bf16.msra.mxu1 %v5221_v19  ;;  %v6358_v55 = vld [vmem:[#allocation7 + $0xcc] sm:$0xf]  ;;  %v7019_v56 = vor.u32 %v6357_v48, %v5426_v49  ;;  %v5434_v57 = vld [vmem:[#allocation7 + $0xd8] sm:$0xf0]  ;;  %v5408_v58 = vld [vmem:[#allocation7 + $0xa0] sm:$0xf]  ;;  %v7022_v62 = vor.u32 %v6360_v54, %v5432_v53 }
  0x28   :  { %395 = vmatpush.bf16.msra.mxu2 %v5225_v20  ;;  %424 = vmatpush.bf16.msra.mxu3 %v5229_v24  ;;  %v6355_v59 = vld [vmem:[#allocation7 + $0xac] sm:$0xf0]  ;;  %v6353_v60 = vld [vmem:[#allocation7 + $0xa4] sm:$0xf]  ;;  %v5410_v61 = vld [vmem:[#allocation7 + $0xb0] sm:$0xf0]  ;;  %v7026_v63 = vor.u32 %v6358_v55, %v5434_v57 }
  0x29   :  { %v7028_v0 = vor.u32 %v6355_v59, %v5408_v58  ;;  %v5416_v1 = vld [vmem:[#allocation7 + $0xa8] sm:$0xf]  ;;  %v6356_v2 = vld [vmem:[#allocation7 + $0xb4] sm:$0xf0]  ;;  %v6354_v3 = vld [vmem:[#allocation7 + $0xac] sm:$0xf]  ;;  %v7031_v4 = vor.u32 %v6353_v60, %v5410_v61 }
  0x2a   :  { %338 = vmatpush.bf16.msra.mxu0 %v5201_v31  ;;  %v5418_v5 = vld [vmem:[#allocation7 + $0xb8] sm:$0xf0]  ;;  %v5392_v6 = vld [vmem:[#allocation7 + $0x80] sm:$0xf]  ;;  %v6351_v7 = vld [vmem:[#allocation7 + $0x8c] sm:$0xf0]  ;;  %v7034_v10 = vor.u32 %v6356_v2, %v5416_v1 }
  0x2b   :  { %367 = vmatpush.bf16.msra.mxu1 %v5205_v35  ;;  %v6349_v8 = vld [vmem:[#allocation7 + $0x84] sm:$0xf]  ;;  %v5394_v9 = vld [vmem:[#allocation7 + $0x90] sm:$0xf0]  ;;  %v5400_v11 = vld [vmem:[#allocation7 + $0x88] sm:$0xf]  ;;  %v7038_v13 = vor.u32 %v6354_v3, %v5418_v5  ;;  %v7040_v14 = vor.u32 %v6351_v7, %v5392_v6 }
  0x2c   :  { %396 = vmatpush.bf16.msra.mxu2 %v5209_v36  ;;  %425 = vmatpush.bf16.msra.mxu3 %v5213_v40  ;;  %v6352_v12 = vld [vmem:[#allocation7 + $0x94] sm:$0xf0]  ;;  %v6350_v15 = vld [vmem:[#allocation7 + $0x8c] sm:$0xf]  ;;  %v5402_v16 = vld [vmem:[#allocation7 + $0x98] sm:$0xf0]  ;;  %v7046_v18 = vor.u32 %v6349_v8, %v5394_v9 }
  0x2d   :  { %339 = vmatmul.bf16.vlgmr.msra.gmra.mxu0 %v6365_v44  ;;  %v55_v17 = vld [vmem:[%s9034_s0 + $0x18] sm:$0xff]   ;;  %v5376_v19 = vld [vmem:[#allocation7 + $0x60] sm:$0xf]  ;;  %v6347_v20 = vld [vmem:[#allocation7 + $0x6c] sm:$0xf0]  ;;  %v7055_v24 = vor.u32 %v6352_v12, %v5400_v11  ;;  %v7059_v25 = vor.u32 %v6350_v15, %v5402_v16 }
  0x2e   :  { %649 = vmatpush.bf16.msrb.mxu0 %v7001_v41  ;;  %368 = vmatmul.bf16.vlgmr.msra.gmra.mxu1 %v6365_v44  ;;  %63 = vst [vmem:[%s9038_s4 + $0x18] sm:$0xff] %v55_v17   ;;  %v6345_v21 = vld [vmem:[#allocation7 + $0x64] sm:$0xf]  ;;  %v5378_v22 = vld [vmem:[#allocation7 + $0x70] sm:$0xf0]  ;;  %v6366_v23 = vld [vmem:[%s9038_s4 + $0x8] sm:$0xff]  ;;  %v7061_v26 = vor.u32 %v6347_v20, %v5376_v19 }
  0x2f   :  { %662 = vmatpush.bf16.msrb.mxu1 %v7009_v45  ;;  %397 = vmatmul.bf16.vlgmr.msra.gmra.mxu2 %v6365_v44  ;;  %v5384_v27 = vld [vmem:[#allocation7 + $0x68] sm:$0xf]  ;;  %v6348_v28 = vld [vmem:[#allocation7 + $0x74] sm:$0xf0]  ;;  %v6346_v29 = vld [vmem:[#allocation7 + $0x6c] sm:$0xf]  ;;  %v7064_v30 = vor.u32 %v6345_v21, %v5378_v22 }
  0x30   :  { %426 = vmatmul.bf16.vlgmr.msra.gmra.mxu3 %v6365_v44  ;;  %675 = vmatpush.bf16.msrb.mxu2 %v7011_v50  ;;  %v5386_v31 = vld [vmem:[#allocation7 + $0x78] sm:$0xf0]  ;;  %v5360_v32 = vld [vmem:[#allocation7 + $0x40] sm:$0xf]  ;;  %v6343_v33 = vld [vmem:[#allocation7 + $0x4c] sm:$0xf0]  ;;  %v7067_v36 = vor.u32 %v6348_v28, %v5384_v27 }
  0x31   :  { %688 = vmatpush.bf16.msrb.mxu3 %v7014_v51  ;;  %v6341_v34 = vld [vmem:[#allocation7 + $0x44] sm:$0xf]  ;;  %v5362_v35 = vld [vmem:[#allocation7 + $0x50] sm:$0xf0]  ;;  %v7071_v37 = vor.u32 %v6346_v29, %v5386_v31  ;;  %v7073_v38 = vor.u32 %v6343_v33, %v5360_v32  ;;  %v5368_v39 = vld [vmem:[#allocation7 + $0x48] sm:$0xf] }
  0x32   :  { %650 = vmatpush.bf16.msrb.mxu0 %v7016_v52  ;;  %v6344_v40 = vld [vmem:[#allocation7 + $0x54] sm:$0xf0]  ;;  %v7076_v42 = vor.u32 %v6341_v34, %v5362_v35  ;;  %v6342_v43 = vld [vmem:[#allocation7 + $0x4c] sm:$0xf]  ;;  %v5370_v44 = vld [vmem:[#allocation7 + $0x58] sm:$0xf0] }
  0x33   :  { %663 = vmatpush.bf16.msrb.mxu1 %v7019_v56  ;;  %v7079_v46 = vor.u32 %v6344_v40, %v5368_v39  ;;  %v5344_v47 = vld [vmem:[#allocation7 + $0x20] sm:$0xf]  ;;  %v6339_v48 = vld [vmem:[#allocation7 + $0x2c] sm:$0xf0]  ;;  %v6337_v49 = vld [vmem:[#allocation7 + $0x24] sm:$0xf]  ;;  %v7083_v53 = vor.u32 %v6342_v43, %v5370_v44 }
  0x34   :  { %676 = vmatpush.bf16.msrb.mxu2 %v7022_v62  ;;  %v7085_v54 = vor.u32 %v6339_v48, %v5344_v47  ;;  %v5346_v55 = vld [vmem:[#allocation7 + $0x30] sm:$0xf0]  ;;  %v5352_v57 = vld [vmem:[#allocation7 + $0x28] sm:$0xf]  ;;  %v6340_v58 = vld [vmem:[#allocation7 + $0x34] sm:$0xf0] }
  0x35   :  { %689 = vmatpush.bf16.msrb.mxu3 %v7026_v63  ;;  %v7088_v59 = vor.u32 %v6337_v49, %v5346_v55  ;;  %v6338_v60 = vld [vmem:[#allocation7 + $0x2c] sm:$0xf]  ;;  %v5354_v61 = vld [vmem:[#allocation7 + $0x38] sm:$0xf0]  ;;  %v5328_v1 = vld [vmem:[#allocation7] sm:$0xf]  ;;  %v7091_v6 = vor.u32 %v6340_v58, %v5352_v57 }
  0x36   :  { %651 = vmatpush.bf16.msrb.mxu0 %v7028_v0  ;;  %v6335_v2 = vld [vmem:[#allocation7 + $0xc] sm:$0xf0]  ;;  %v6333_v3 = vld [vmem:[#allocation7 + $0x4] sm:$0xf]  ;;  %v5330_v5 = vld [vmem:[#allocation7 + $0x10] sm:$0xf0]  ;;  %v7095_v7 = vor.u32 %v6338_v60, %v5354_v61 }
  0x37   :  { %664 = vmatpush.bf16.msrb.mxu1 %v7031_v4  ;;  %v7097_v8 = vor.u32 %v6335_v2, %v5328_v1  ;;  %v5336_v9 = vld [vmem:[#allocation7 + $0x8] sm:$0xf]  ;;  %v6336_v11 = vld [vmem:[#allocation7 + $0x14] sm:$0xf0]  ;;  %v7100_v12 = vor.u32 %v6333_v3, %v5330_v5  ;;  %v6334_v15 = vld [vmem:[#allocation7 + $0xc] sm:$0xf] }
  0x38   :  { %677 = vmatpush.bf16.msrb.mxu2 %v7034_v10  ;;  %v5338_v16 = vld [vmem:[#allocation7 + $0x18] sm:$0xf0]  ;;  %v7103_v17 = vor.u32 %v6336_v11, %v5336_v9  ;;  %v6367_v20 = vld [vmem:[%s9038_s4 + $0x10] sm:$0xff]  ;;  %v9039_v22 = vmov 0.0|0.0   ;;  %v129_v28 = vld [vmem:[%s9037_s3] sm:$0xf] }
  0x39   :  { %690 = vmatpush.bf16.msrb.mxu3 %v7038_v13  ;;  %v7107_v19 = vor.u32 %v6334_v15, %v5338_v16  ;;  %v6368_v21 = vld [vmem:[%s9038_s4 + $0x18] sm:$0xff]  ;;  %v7193_v29 = vperm.slane %v129_v28, 0  ;;  %v7197_v32 = vperm.slane %v129_v28, 1  ;;  %v7205_v44 = vperm.slane %v129_v28, 2 }
  0x3a   :  { %652 = vmatpush.bf16.msrb.mxu0 %v7040_v14  ;;  %v7207_v47 = vperm.slane %v129_v28, 3 }
  0x3b   :  { %665 = vmatpush.bf16.msrb.mxu1 %v7046_v18 }
  0x3c   :  { %678 = vmatpush.bf16.msrb.mxu2 %v7055_v24 }
  0x3d   :  { %691 = vmatpush.bf16.msrb.mxu3 %v7059_v25  ;;  %344 = vmatmul.bf16.gmra.mxu0 %v6366_v23 }
  0x3e   :  { %653 = vmatpush.bf16.msrb.mxu0 %v7061_v26  ;;  %373 = vmatmul.bf16.gmra.mxu1 %v6366_v23 }
  0x3f   :  { %666 = vmatpush.bf16.msrb.mxu1 %v7064_v30  ;;  %402 = vmatmul.bf16.gmra.mxu2 %v6366_v23 }
  0x40   :  { %431 = vmatmul.bf16.gmra.mxu3 %v6366_v23  ;;  %679 = vmatpush.bf16.msrb.mxu2 %v7067_v36 }
  0x41   :  { %692 = vmatpush.bf16.msrb.mxu3 %v7071_v37 }
  0x42   :  { %654 = vmatpush.bf16.msrb.mxu0 %v7073_v38 }
  0x43   :  { %667 = vmatpush.bf16.msrb.mxu1 %v7076_v42 }
  0x44   :  { %680 = vmatpush.bf16.msrb.mxu2 %v7079_v46 }
  0x45   :  { %693 = vmatpush.bf16.msrb.mxu3 %v7083_v53 }
  0x46   :  { %655 = vmatpush.bf16.msrb.mxu0 %v7085_v54 }
  0x47   :  { %668 = vmatpush.bf16.msrb.mxu1 %v7088_v59 }
  0x48   :  { %681 = vmatpush.bf16.msrb.mxu2 %v7091_v6 }
  0x49   :  { %694 = vmatpush.bf16.msrb.mxu3 %v7095_v7 }
  0x4a   :  { %656 = vmatpush.bf16.msrb.mxu0 %v7097_v8 }
  0x4b   :  { %669 = vmatpush.bf16.msrb.mxu1 %v7100_v12 }
  0x4c   :  { %682 = vmatpush.bf16.msrb.mxu2 %v7103_v17 }
  0x4d   :  { %695 = vmatpush.bf16.msrb.mxu3 %v7107_v19  ;;  %349 = vmatmul.bf16.gmra.mxu0 %v6367_v20 }
  0x4e   :  { %737 = vmatpush.bf16.msra.mxu0 %v7001_v41  ;;  %378 = vmatmul.bf16.gmra.mxu1 %v6367_v20 }
  0x4f   :  { %750 = vmatpush.bf16.msra.mxu1 %v7009_v45  ;;  %407 = vmatmul.bf16.gmra.mxu2 %v6367_v20 }
  0x50   :  { %763 = vmatpush.bf16.msra.mxu2 %v7011_v50  ;;  %436 = vmatmul.bf16.gmra.mxu3 %v6367_v20 }
  0x51   :  { %776 = vmatpush.bf16.msra.mxu3 %v7014_v51 }
  0x52   :  { %738 = vmatpush.bf16.msra.mxu0 %v7016_v52 }
  0x53   :  { %751 = vmatpush.bf16.msra.mxu1 %v7019_v56 }
  0x54   :  { %764 = vmatpush.bf16.msra.mxu2 %v7022_v62 }
  0x55   :  { %777 = vmatpush.bf16.msra.mxu3 %v7026_v63 }
  0x56   :  { %739 = vmatpush.bf16.msra.mxu0 %v7028_v0 }
  0x57   :  { %752 = vmatpush.bf16.msra.mxu1 %v7031_v4 }
  0x58   :  { %765 = vmatpush.bf16.msra.mxu2 %v7034_v10 }
  0x59   :  { %778 = vmatpush.bf16.msra.mxu3 %v7038_v13 }
  0x5a   :  { %740 = vmatpush.bf16.msra.mxu0 %v7040_v14 }
  0x5b   :  { %753 = vmatpush.bf16.msra.mxu1 %v7046_v18 }
  0x5c   :  { %766 = vmatpush.bf16.msra.mxu2 %v7055_v24 }
  0x5d   :  { %779 = vmatpush.bf16.msra.mxu3 %v7059_v25  ;;  %354 = vmatmul.bf16.gmra.mxu0 %v6368_v21 }
  0x5e   :  { %741 = vmatpush.bf16.msra.mxu0 %v7061_v26  ;;  %383 = vmatmul.bf16.gmra.mxu1 %v6368_v21 }
  0x5f   :  { %754 = vmatpush.bf16.msra.mxu1 %v7064_v30  ;;  %412 = vmatmul.bf16.gmra.mxu2 %v6368_v21 }
  0x60   :  { %767 = vmatpush.bf16.msra.mxu2 %v7067_v36  ;;  %441 = vmatmul.bf16.gmra.mxu3 %v6368_v21 }
  0x61   :  { %780 = vmatpush.bf16.msra.mxu3 %v7071_v37 }
  0x62   :  { %742 = vmatpush.bf16.msra.mxu0 %v7073_v38 }
  0x63   :  { %755 = vmatpush.bf16.msra.mxu1 %v7076_v42 }
  0x64   :  { %768 = vmatpush.bf16.msra.mxu2 %v7079_v46 }
  0x65   :  { %781 = vmatpush.bf16.msra.mxu3 %v7083_v53 }
  0x66   :  { %743 = vmatpush.bf16.msra.mxu0 %v7085_v54 }
  0x67   :  { %756 = vmatpush.bf16.msra.mxu1 %v7088_v59 }
  0x68   :  { %769 = vmatpush.bf16.msra.mxu2 %v7091_v6 }
  0x69   :  { %782 = vmatpush.bf16.msra.mxu3 %v7095_v7 }
  0x6a   :  { %744 = vmatpush.bf16.msra.mxu0 %v7097_v8 }
  0x6b   :  { %757 = vmatpush.bf16.msra.mxu1 %v7100_v12 }
  0x6c   :  { %770 = vmatpush.bf16.msra.mxu2 %v7103_v17 }
  0x6d   :  { %783 = vmatpush.bf16.msra.mxu3 %v7107_v19  ;;  %657 = vmatmul.bf16.vlgmr.msrb.gmra.mxu0 %v9039_v22 }
  0x6e   :  { %670 = vmatmul.bf16.vlgmr.msrb.gmra.mxu1 %v9039_v22  ;;  %826 = vmatpush.bf16.msrb.mxu0 %v7001_v41 }
  0x6f   :  { %683 = vmatmul.bf16.vlgmr.msrb.gmra.mxu2 %v9039_v22  ;;  %839 = vmatpush.bf16.msrb.mxu1 %v7009_v45 }
  0x70   :  { %696 = vmatmul.bf16.vlgmr.msrb.gmra.mxu3 %v9039_v22  ;;  %852 = vmatpush.bf16.msrb.mxu2 %v7011_v50 }
  0x71   :  { %865 = vmatpush.bf16.msrb.mxu3 %v7014_v51 }
  0x72   :  { %827 = vmatpush.bf16.msrb.mxu0 %v7016_v52 }
  0x73   :  { %840 = vmatpush.bf16.msrb.mxu1 %v7019_v56 }
  0x74   :  { %853 = vmatpush.bf16.msrb.mxu2 %v7022_v62 }
  0x75   :  { %866 = vmatpush.bf16.msrb.mxu3 %v7026_v63 }
  0x76   :  { %828 = vmatpush.bf16.msrb.mxu0 %v7028_v0 }
  0x77   :  { %841 = vmatpush.bf16.msrb.mxu1 %v7031_v4 }
  0x78   :  { %854 = vmatpush.bf16.msrb.mxu2 %v7034_v10 }
  0x79   :  { %867 = vmatpush.bf16.msrb.mxu3 %v7038_v13 }
  0x7a   :  { %829 = vmatpush.bf16.msrb.mxu0 %v7040_v14 }
  0x7b   :  { %842 = vmatpush.bf16.msrb.mxu1 %v7046_v18 }
  0x7c   :  { %855 = vmatpush.bf16.msrb.mxu2 %v7055_v24 }
  0x7d   :  { %868 = vmatpush.bf16.msrb.mxu3 %v7059_v25 }
  0x7e   :  { %830 = vmatpush.bf16.msrb.mxu0 %v7061_v26 }
  0x7f   :  { %843 = vmatpush.bf16.msrb.mxu1 %v7064_v30 }
  0x80   :  { %856 = vmatpush.bf16.msrb.mxu2 %v7067_v36 }
  0x81   :  { %869 = vmatpush.bf16.msrb.mxu3 %v7071_v37 }
  0x82   :  { %831 = vmatpush.bf16.msrb.mxu0 %v7073_v38 }
  0x83   :  { %844 = vmatpush.bf16.msrb.mxu1 %v7076_v42 }
  0x84   :  { %857 = vmatpush.bf16.msrb.mxu2 %v7079_v46 }
  0x85   :  { %870 = vmatpush.bf16.msrb.mxu3 %v7083_v53 }
  0x86   :  { %832 = vmatpush.bf16.msrb.mxu0 %v7085_v54 }
  0x87   :  { %845 = vmatpush.bf16.msrb.mxu1 %v7088_v59 }
  0x88   :  { %858 = vmatpush.bf16.msrb.mxu2 %v7091_v6 }
  0x89   :  { %871 = vmatpush.bf16.msrb.mxu3 %v7095_v7 }
  0x8a   :  { %833 = vmatpush.bf16.msrb.mxu0 %v7097_v8 }
  0x8b   :  { %846 = vmatpush.bf16.msrb.mxu1 %v7100_v12 }
  0x8c   :  { %859 = vmatpush.bf16.msrb.mxu2 %v7103_v17 }
  0x8d   :  { %872 = vmatpush.bf16.msrb.mxu3 %v7107_v19 }
  0xaa   :  { %v7186_v23 = vpop.f32.mrf.mxu0 }
  0xab   :  { %v7188_v27 = vpop.f32.mrf.mxu1 }
  0xb2   :  { %v7195_v31 = vpop.f32.mrf.mxu2  ;;  %v342_v34 = vpop.f32.mrf.mxu0 }
  0xb3   :  { %v7199_v33 = vpop.f32.mrf.mxu3  ;;  %v343_v35 = vadd.f32 %v342_v34, %v7193_v29  ;;  %v371_v39 = vpop.f32.mrf.mxu1 }
  0xb4   :  { %v372_v40 = vadd.f32 %v371_v39, %v7197_v32 }
  0xb6   :  { %v7203_v43 = vpack.c.bf16 %v372_v40, %v343_v35 }
  0xba   :  { %v400_v48 = vpop.f32.mrf.mxu2  ;;  %v345_v57 = vpop.f32.mrf.mxu0 }
  0xbb   :  { %v401_v49 = vadd.f32 %v400_v48, %v7205_v44  ;;  %v429_v55 = vpop.f32.mrf.mxu3  ;;  %v346_v60 = vadd.f32 %v345_v57, %v7193_v29  ;;  %v374_v61 = vpop.f32.mrf.mxu1 }
  0xbc   :  { %v430_v58 = vadd.f32 %v429_v55, %v7207_v47  ;;  %v375_v1 = vadd.f32 %v374_v61, %v7197_v32 }
  0xbe   :  { %v7213_v2 = vpack.c.bf16 %v430_v58, %v401_v49  ;;  %v7215_v3 = vpack.c.bf16 %v375_v1, %v346_v60 }
  0xc2   :  { %v403_v5 = vpop.f32.mrf.mxu2  ;;  %v347_v15 = vpop.f32.mrf.mxu0 }
  0xc3   :  { %v404_v9 = vadd.f32 %v403_v5, %v7205_v44  ;;  %v432_v11 = vpop.f32.mrf.mxu3  ;;  %v348_v20 = vadd.f32 %v347_v15, %v7193_v29  ;;  %v376_v21 = vpop.f32.mrf.mxu1 }
  0xc4   :  { %v433_v16 = vadd.f32 %v432_v11, %v7207_v47  ;;  %v377_v28 = vadd.f32 %v376_v21, %v7197_v32 }
  0xc6   :  { %v7221_v34 = vpack.c.bf16 %v433_v16, %v404_v9  ;;  %v7223_v35 = vpack.c.bf16 %v377_v28, %v348_v20 }
  0xca   :  { %v405_v39 = vpop.f32.mrf.mxu2  ;;  %v350_v49 = vpop.f32.mrf.mxu0 }
  0xcb   :  { %v406_v40 = vadd.f32 %v405_v39, %v7205_v44  ;;  %v434_v48 = vpop.f32.mrf.mxu3  ;;  %v351_v57 = vadd.f32 %v350_v49, %v7193_v29  ;;  %v379_v58 = vpop.f32.mrf.mxu1 }
  0xcc   :  { %v435_v55 = vadd.f32 %v434_v48, %v7207_v47  ;;  %v380_v60 = vadd.f32 %v379_v58, %v7197_v32 }
  0xce   :  { %v7229_v61 = vpack.c.bf16 %v435_v55, %v406_v40  ;;  %v7231_v1 = vpack.c.bf16 %v380_v60, %v351_v57 }
  0xd2   :  { %v408_v5 = vpop.f32.mrf.mxu2  ;;  %v352_v15 = vpop.f32.mrf.mxu0 }
  0xd3   :  { %v409_v9 = vadd.f32 %v408_v5, %v7205_v44  ;;  %v437_v11 = vpop.f32.mrf.mxu3  ;;  %v353_v20 = vadd.f32 %v352_v15, %v7193_v29  ;;  %v381_v21 = vpop.f32.mrf.mxu1 }
  0xd4   :  { %v438_v16 = vadd.f32 %v437_v11, %v7207_v47  ;;  %v382_v28 = vadd.f32 %v381_v21, %v7197_v32 }
  0xd6   :  { %v7237_v39 = vpack.c.bf16 %v438_v16, %v409_v9  ;;  %v7239_v48 = vpack.c.bf16 %v382_v28, %v353_v20  ;;  %v341_v9 = vadd.f32 %v7186_v23, %v7193_v29  ;;  %v370_v16 = vadd.f32 %v7188_v27, %v7197_v32 }
  0xd7   :  { %v399_v23 = vadd.f32 %v7195_v31, %v7205_v44  ;;  %v428_v27 = vadd.f32 %v7199_v33, %v7207_v47 }
  0xd8   :  { %9065 = vst [vmem:[#allocation11_spill] sm:$0xff] %v7239_v48 }
  0xda   :  { %v410_v40 = vpop.f32.mrf.mxu2  ;;  %v355_v57 = vpop.f32.mrf.mxu0 }
  0xdb   :  { %v411_v49 = vadd.f32 %v410_v40, %v7205_v44  ;;  %v439_v55 = vpop.f32.mrf.mxu3  ;;  %v356_v60 = vadd.f32 %v355_v57, %v7193_v29  ;;  %v384_v5 = vpop.f32.mrf.mxu1 }
  0xdc   :  { %v440_v58 = vadd.f32 %v439_v55, %v7207_v47  ;;  %v385_v11 = vadd.f32 %v384_v5, %v7197_v32 }
  0xde   :  { %v7245_v15 = vpack.c.bf16 %v440_v58, %v411_v49  ;;  %v7247_v22 = vpack.c.bf16 %v385_v11, %v356_v60  ;;  %v447_v58 = vpack.c.bf16 %v370_v16, %v341_v9 }
  0xe0   :  { %9066 = vst [vmem:[#allocation12_spill] sm:$0xff] %v7245_v15 }
  0xe1   :  { %9067 = vst [vmem:[#allocation13_spill] sm:$0xff] %v7247_v22  ;;  %v483_v22 = vunpack.c.l.bf16 %v447_v58 }
  0xe2   :  { %v413_v20 = vpop.f32.mrf.mxu2  ;;  %v357_v40 = vpop.f32.mrf.mxu0 }
  0xe3   :  { %v414_v21 = vadd.f32 %v413_v20, %v7205_v44  ;;  %v442_v28 = vpop.f32.mrf.mxu3  ;;  %v358_v57 = vadd.f32 %v357_v40, %v7193_v29  ;;  %v386_v5 = vpop.f32.mrf.mxu1  ;;  %v484_v40 = vunpack.c.h.bf16 %v447_v58 }
  0xe4   :  { %v443_v55 = vadd.f32 %v442_v28, %v7207_v47  ;;  %v387_v49 = vadd.f32 %v386_v5, %v7197_v32 }
  0xe6   :  { %v7257_v60 = vpack.c.bf16 %v443_v55, %v414_v21  ;;  %v7259_v11 = vpack.c.bf16 %v387_v49, %v358_v57  ;;  %v448_v21 = vpack.c.bf16 %v428_v27, %v399_v23 }
  0xe8   :  { %9068 = vst [vmem:[#allocation14_spill] sm:$0xff] %v7257_v60  ;;  %v485_v33 = vunpack.c.l.bf16 %v448_v21 }
  0xe9   :  { %9069 = vst [vmem:[#allocation15_spill] sm:$0xff] %v7259_v11  ;;  %v486_v11 = vunpack.c.h.bf16 %v448_v21 }
  0xea   :  { %v415_v20 = vpop.f32.mrf.mxu2  ;;  %v658_v29 = vpop.f32.mrf.mxu0 }
  0xeb   :  { %v416_v28 = vadd.f32 %v415_v20, %v7205_v44  ;;  %v444_v15 = vpop.f32.mrf.mxu3  ;;  %v701_v9 = vadd.f32 %v658_v29, %v483_v22  ;;  %v671_v16 = vpop.f32.mrf.mxu1 }
  0xec   :  { %v445_v32 = vadd.f32 %v444_v15, %v7207_v47  ;;  %v702_v55 = vadd.f32 %v671_v16, %v484_v40 }
  0xed   :  { %v705_v5 = vmul.f32 0.5, %v701_v9 }
  0xee   :  { %v7267_v57 = vpack.c.bf16 %v445_v32, %v416_v28  ;;  %v709_v31 = vmul.f32 0.5, %v702_v55 }
  0xef   :  { %6578 = vtanh.f32 %v705_v5 }
  0xf0   :  { %6580 = vtanh.f32 %v709_v31 }
  0xf2   :  { %v684_v49 = vpop.f32.mrf.mxu2  ;;  %v660_v20 = vpop.f32.mrf.mxu0 }
  0xf3   :  { %v703_v60 = vadd.f32 %v684_v49, %v485_v33  ;;  %v697_v44 = vpop.f32.mrf.mxu3  ;;  %v673_v58 = vpop.f32.mrf.mxu1  ;;  %v731_v49 = vunpack.c.l.bf16 %v7203_v43 }
  0xf4   :  { %v704_v48 = vadd.f32 %v697_v44, %v486_v11  ;;  %v732_v44 = vunpack.c.h.bf16 %v7203_v43 }
  0xf5   :  { %6582 = vtanh.f32 %v703_v60  ;;  %v6579_v47 = vpop.eup %6578 }
  0xf6   :  { %v714_v22 = vmul.f32 0.5, %v704_v48  ;;  %v6581_v15 = vpop.eup %6580  ;;  %v707_v23 = vmul.f32 0.5, %v6579_v47 }
  0xf7   :  { %v711_v27 = vmul.f32 0.5, %v6581_v15 }
  0xf8   :  { %6584 = vtanh.f32 %v714_v22  ;;  %v708_v28 = vadd.f32 0.5, %v707_v23 }
  0xf9   :  { %v712_v29 = vadd.f32 0.5, %v711_v27  ;;  %v733_v27 = vunpack.c.l.bf16 %v7213_v2 }
  0xfa   :  { %v686_v40 = vpop.f32.mrf.mxu2 }
  0xfb   :  { %v6583_v32 = vpop.eup %6582  ;;  %v699_v9 = vpop.f32.mrf.mxu3  ;;  %v719_v16 = vmul.f32 0.0, %v712_v29 }
  0xfc   :  { %v720_v55 = vmul.f32 %v6583_v32, %v708_v28  ;;  %v734_v28 = vunpack.c.h.bf16 %v7213_v2 }
  0xfe   :  { %v6585_v21 = vpop.eup %6584  ;;  %v7269_v5 = vadd.f32 %v720_v55, %v719_v16 }
  0xff   :  { %v716_v11 = vmul.f32 0.5, %v6585_v21 }
 0x100   :  { %6586 = vtanh.f32 %v7269_v5 }
 0x101   :  { %v717_v60 = vadd.f32 0.5, %v716_v11 }
 0x106   :  { %v6587_v31 = vpop.eup %6586 }
 0x107   :  { %v723_v48 = vmul.f32 %v6587_v31, %v717_v60 }
 0x109   :  { %v726_v33 = vpack.c.bf16 %v723_v48, %v723_v48 }
 0x10b   :  { %727 = vst [vmem:[%s9038_s4] sm:$0xf] %v726_v33  ;;  %745 = vmatmul.bf16.vlgmr.msra.gmra.mxu0 %v726_v33  ;;  %758 = vmatmul.bf16.vlgmr.msra.gmra.mxu1 %v726_v33 }
 0x10c   :  { %771 = vmatmul.bf16.vlgmr.msra.gmra.mxu2 %v726_v33  ;;  %784 = vmatmul.bf16.vlgmr.msra.gmra.mxu3 %v726_v33 }
 0x10d   :  { %915 = vmatpush.bf16.msra.mxu0 %v7001_v41  ;;  %928 = vmatpush.bf16.msra.mxu1 %v7009_v45 }
 0x10e   :  { %941 = vmatpush.bf16.msra.mxu2 %v7011_v50  ;;  %954 = vmatpush.bf16.msra.mxu3 %v7014_v51 }
 0x111   :  { %916 = vmatpush.bf16.msra.mxu0 %v7016_v52  ;;  %929 = vmatpush.bf16.msra.mxu1 %v7019_v56 }
 0x112   :  { %942 = vmatpush.bf16.msra.mxu2 %v7022_v62  ;;  %955 = vmatpush.bf16.msra.mxu3 %v7026_v63 }
 0x115   :  { %917 = vmatpush.bf16.msra.mxu0 %v7028_v0  ;;  %930 = vmatpush.bf16.msra.mxu1 %v7031_v4 }
 0x116   :  { %943 = vmatpush.bf16.msra.mxu2 %v7034_v10  ;;  %956 = vmatpush.bf16.msra.mxu3 %v7038_v13 }
 0x119   :  { %918 = vmatpush.bf16.msra.mxu0 %v7040_v14  ;;  %931 = vmatpush.bf16.msra.mxu1 %v7046_v18 }
 0x11a   :  { %944 = vmatpush.bf16.msra.mxu2 %v7055_v24  ;;  %957 = vmatpush.bf16.msra.mxu3 %v7059_v25 }
 0x11d   :  { %919 = vmatpush.bf16.msra.mxu0 %v7061_v26  ;;  %932 = vmatpush.bf16.msra.mxu1 %v7064_v30 }
 0x11e   :  { %945 = vmatpush.bf16.msra.mxu2 %v7067_v36  ;;  %958 = vmatpush.bf16.msra.mxu3 %v7071_v37 }
 0x121   :  { %920 = vmatpush.bf16.msra.mxu0 %v7073_v38  ;;  %933 = vmatpush.bf16.msra.mxu1 %v7076_v42 }
 0x122   :  { %946 = vmatpush.bf16.msra.mxu2 %v7079_v46  ;;  %959 = vmatpush.bf16.msra.mxu3 %v7083_v53 }
 0x125   :  { %921 = vmatpush.bf16.msra.mxu0 %v7085_v54  ;;  %934 = vmatpush.bf16.msra.mxu1 %v7088_v59 }
 0x126   :  { %947 = vmatpush.bf16.msra.mxu2 %v7091_v6  ;;  %960 = vmatpush.bf16.msra.mxu3 %v7095_v7 }
 0x129   :  { %922 = vmatpush.bf16.msra.mxu0 %v7097_v8  ;;  %935 = vmatpush.bf16.msra.mxu1 %v7100_v12 }
 0x12a   :  { %948 = vmatpush.bf16.msra.mxu2 %v7103_v17  ;;  %961 = vmatpush.bf16.msra.mxu3 %v7107_v19 }
 0x188   :  { %v746_v20 = vpop.f32.mrf.mxu0  ;;  %v759_v58 = vpop.f32.mrf.mxu1 }
 0x189   :  { %v789_v47 = vadd.f32 %v746_v20, %v731_v49  ;;  %v790_v22 = vadd.f32 %v759_v58, %v732_v44 }
 0x18b   :  { %v793_v15 = vmul.f32 0.5, %v789_v47  ;;  %v797_v23 = vmul.f32 0.5, %v790_v22 }
 0x18d   :  { %6588 = vtanh.f32 %v793_v15 }
 0x18e   :  { %6590 = vtanh.f32 %v797_v23 }
 0x18f   :  { %v772_v29 = vpop.f32.mrf.mxu2  ;;  %v785_v40 = vpop.f32.mrf.mxu3 }
 0x190   :  { %v791_v32 = vadd.f32 %v772_v29, %v733_v27  ;;  %v792_v9 = vadd.f32 %v785_v40, %v734_v28  ;;  %v748_v16 = vpop.f32.mrf.mxu0  ;;  %v761_v55 = vpop.f32.mrf.mxu1  ;;  %v821_v40 = vunpack.c.h.bf16 %v7215_v3 }
 0x192   :  { %6592 = vtanh.f32 %v791_v32  ;;  %v802_v43 = vmul.f32 0.5, %v792_v9 }
 0x193   :  { %v6589_v21 = vpop.eup %6588 }
 0x194   :  { %v6591_v11 = vpop.eup %6590  ;;  %v795_v60 = vmul.f32 0.5, %v6589_v21  ;;  %6594 = vtanh.f32 %v802_v43 }
 0x195   :  { %v799_v31 = vmul.f32 0.5, %v6591_v11  ;;  %v822_v11 = vunpack.c.l.bf16 %v7221_v34 }
 0x196   :  { %v796_v48 = vadd.f32 0.5, %v795_v60  ;;  %v823_v60 = vunpack.c.h.bf16 %v7221_v34 }
 0x197   :  { %v800_v33 = vadd.f32 0.5, %v799_v31  ;;  %v774_v49 = vpop.f32.mrf.mxu2  ;;  %v787_v44 = vpop.f32.mrf.mxu3 }
 0x198   :  { %v6593_v20 = vpop.eup %6592 }
 0x199   :  { %v807_v2 = vmul.f32 %v800_v33, %v7269_v5  ;;  %v808_v58 = vmul.f32 %v6593_v20, %v796_v48  ;;  %v820_v5 = vunpack.c.l.bf16 %v7215_v3 }
 0x19a   :  { %v6595_v47 = vpop.eup %6594 }
 0x19b   :  { %v7312_v22 = vadd.f32 %v808_v58, %v807_v2  ;;  %v804_v15 = vmul.f32 0.5, %v6595_v47 }
 0x19d   :  { %6596 = vtanh.f32 %v7312_v22  ;;  %v805_v23 = vadd.f32 0.5, %v804_v15 }
 0x1a3   :  { %v6597_v27 = vpop.eup %6596 }
 0x1a4   :  { %v811_v28 = vmul.f32 %v6597_v27, %v805_v23 }
 0x1a6   :  { %v814_v29 = vpack.c.bf16 %v811_v28, %v811_v28 }
 0x1a8   :  { %5454 = vst [vmem:[%s9038_s4 + $0x4] sm:$0xf] %v814_v29  ;;  %834 = vmatmul.bf16.vlgmr.msrb.gmra.mxu0 %v814_v29  ;;  %847 = vmatmul.bf16.vlgmr.msrb.gmra.mxu1 %v814_v29 }
 0x1a9   :  { %860 = vmatmul.bf16.vlgmr.msrb.gmra.mxu2 %v814_v29  ;;  %873 = vmatmul.bf16.vlgmr.msrb.gmra.mxu3 %v814_v29 }
 0x1aa   :  { %1004 = vmatpush.bf16.msrb.mxu0 %v7001_v41  ;;  %1017 = vmatpush.bf16.msrb.mxu1 %v7009_v45 }
 0x1ab   :  { %1030 = vmatpush.bf16.msrb.mxu2 %v7011_v50  ;;  %1043 = vmatpush.bf16.msrb.mxu3 %v7014_v51 }
 0x1ae   :  { %1005 = vmatpush.bf16.msrb.mxu0 %v7016_v52  ;;  %1018 = vmatpush.bf16.msrb.mxu1 %v7019_v56 }
 0x1af   :  { %1031 = vmatpush.bf16.msrb.mxu2 %v7022_v62  ;;  %1044 = vmatpush.bf16.msrb.mxu3 %v7026_v63 }
 0x1b2   :  { %1006 = vmatpush.bf16.msrb.mxu0 %v7028_v0  ;;  %1019 = vmatpush.bf16.msrb.mxu1 %v7031_v4 }
 0x1b3   :  { %1032 = vmatpush.bf16.msrb.mxu2 %v7034_v10  ;;  %1045 = vmatpush.bf16.msrb.mxu3 %v7038_v13 }
 0x1b6   :  { %1007 = vmatpush.bf16.msrb.mxu0 %v7040_v14  ;;  %1020 = vmatpush.bf16.msrb.mxu1 %v7046_v18 }
 0x1b7   :  { %1033 = vmatpush.bf16.msrb.mxu2 %v7055_v24  ;;  %1046 = vmatpush.bf16.msrb.mxu3 %v7059_v25 }
 0x1ba   :  { %1008 = vmatpush.bf16.msrb.mxu0 %v7061_v26  ;;  %1021 = vmatpush.bf16.msrb.mxu1 %v7064_v30 }
 0x1bb   :  { %1034 = vmatpush.bf16.msrb.mxu2 %v7067_v36  ;;  %1047 = vmatpush.bf16.msrb.mxu3 %v7071_v37 }
 0x1be   :  { %1009 = vmatpush.bf16.msrb.mxu0 %v7073_v38  ;;  %1022 = vmatpush.bf16.msrb.mxu1 %v7076_v42 }
 0x1bf   :  { %1035 = vmatpush.bf16.msrb.mxu2 %v7079_v46  ;;  %1048 = vmatpush.bf16.msrb.mxu3 %v7083_v53 }
 0x1c2   :  { %1010 = vmatpush.bf16.msrb.mxu0 %v7085_v54  ;;  %1023 = vmatpush.bf16.msrb.mxu1 %v7088_v59 }
 0x1c3   :  { %1036 = vmatpush.bf16.msrb.mxu2 %v7091_v6  ;;  %1049 = vmatpush.bf16.msrb.mxu3 %v7095_v7 }
 0x1c6   :  { %1011 = vmatpush.bf16.msrb.mxu0 %v7097_v8  ;;  %1024 = vmatpush.bf16.msrb.mxu1 %v7100_v12 }
 0x1c7   :  { %1037 = vmatpush.bf16.msrb.mxu2 %v7103_v17  ;;  %1050 = vmatpush.bf16.msrb.mxu3 %v7107_v19 }
 0x225   :  { %v835_v32 = vpop.f32.mrf.mxu0  ;;  %v848_v9 = vpop.f32.mrf.mxu1 }
 0x226   :  { %v878_v16 = vadd.f32 %v835_v32, %v820_v5  ;;  %v879_v55 = vadd.f32 %v848_v9, %v821_v40 }
 0x228   :  { %v882_v43 = vmul.f32 0.5, %v878_v16  ;;  %v886_v21 = vmul.f32 0.5, %v879_v55 }
 0x22a   :  { %6598 = vtanh.f32 %v882_v43 }
 0x22b   :  { %6600 = vtanh.f32 %v886_v21 }
 0x22c   :  { %v861_v31 = vpop.f32.mrf.mxu2  ;;  %v874_v48 = vpop.f32.mrf.mxu3 }
 0x22d   :  { %v880_v33 = vadd.f32 %v861_v31, %v822_v11  ;;  %v881_v49 = vadd.f32 %v874_v48, %v823_v60  ;;  %v837_v44 = vpop.f32.mrf.mxu0  ;;  %v850_v20 = vpop.f32.mrf.mxu1  ;;  %v910_v60 = vunpack.c.h.bf16 %v7223_v35 }
 0x22f   :  { %6602 = vtanh.f32 %v880_v33  ;;  %v891_v3 = vmul.f32 0.5, %v881_v49 }
 0x230   :  { %v6599_v2 = vpop.eup %6598 }
 0x231   :  { %v6601_v58 = vpop.eup %6600  ;;  %v884_v47 = vmul.f32 0.5, %v6599_v2  ;;  %6604 = vtanh.f32 %v891_v3  ;;  %v911_v3 = vunpack.c.l.bf16 %v7229_v61  ;;  %v912_v2 = vunpack.c.h.bf16 %v7229_v61 }
 0x232   :  { %v888_v15 = vmul.f32 0.5, %v6601_v58 }
 0x233   :  { %v885_v23 = vadd.f32 0.5, %v884_v47 }
 0x234   :  { %v889_v27 = vadd.f32 0.5, %v888_v15  ;;  %v863_v28 = vpop.f32.mrf.mxu2  ;;  %v876_v29 = vpop.f32.mrf.mxu3 }
 0x235   :  { %v6603_v5 = vpop.eup %6602 }
 0x236   :  { %v896_v34 = vmul.f32 %v889_v27, %v7312_v22  ;;  %v897_v40 = vmul.f32 %v6603_v5, %v885_v23  ;;  %v909_v22 = vunpack.c.l.bf16 %v7223_v35 }
 0x237   :  { %v6605_v32 = vpop.eup %6604 }
 0x238   :  { %v7355_v9 = vadd.f32 %v897_v40, %v896_v34  ;;  %v893_v16 = vmul.f32 0.5, %v6605_v32 }
 0x23a   :  { %6606 = vtanh.f32 %v7355_v9  ;;  %v894_v55 = vadd.f32 0.5, %v893_v16 }
 0x240   :  { %v6607_v43 = vpop.eup %6606 }
 0x241   :  { %v900_v21 = vmul.f32 %v6607_v43, %v894_v55 }
 0x243   :  { %v903_v11 = vpack.c.bf16 %v900_v21, %v900_v21 }
 0x245   :  { %5455 = vst [vmem:[%s9038_s4 + $0x8] sm:$0xf] %v903_v11  ;;  %923 = vmatmul.bf16.vlgmr.msra.gmra.mxu0 %v903_v11  ;;  %936 = vmatmul.bf16.vlgmr.msra.gmra.mxu1 %v903_v11 }
 0x246   :  { %949 = vmatmul.bf16.vlgmr.msra.gmra.mxu2 %v903_v11  ;;  %962 = vmatmul.bf16.vlgmr.msra.gmra.mxu3 %v903_v11 }
 0x247   :  { %1093 = vmatpush.bf16.msra.mxu0 %v7001_v41  ;;  %1106 = vmatpush.bf16.msra.mxu1 %v7009_v45 }
 0x248   :  { %1119 = vmatpush.bf16.msra.mxu2 %v7011_v50  ;;  %1132 = vmatpush.bf16.msra.mxu3 %v7014_v51 }
 0x24b   :  { %1094 = vmatpush.bf16.msra.mxu0 %v7016_v52  ;;  %1107 = vmatpush.bf16.msra.mxu1 %v7019_v56 }
 0x24c   :  { %1120 = vmatpush.bf16.msra.mxu2 %v7022_v62  ;;  %1133 = vmatpush.bf16.msra.mxu3 %v7026_v63 }
 0x24f   :  { %1095 = vmatpush.bf16.msra.mxu0 %v7028_v0  ;;  %1108 = vmatpush.bf16.msra.mxu1 %v7031_v4 }
 0x250   :  { %1121 = vmatpush.bf16.msra.mxu2 %v7034_v10  ;;  %1134 = vmatpush.bf16.msra.mxu3 %v7038_v13 }
 0x253   :  { %1096 = vmatpush.bf16.msra.mxu0 %v7040_v14  ;;  %1109 = vmatpush.bf16.msra.mxu1 %v7046_v18 }
 0x254   :  { %1122 = vmatpush.bf16.msra.mxu2 %v7055_v24  ;;  %1135 = vmatpush.bf16.msra.mxu3 %v7059_v25 }
 0x257   :  { %1097 = vmatpush.bf16.msra.mxu0 %v7061_v26  ;;  %1110 = vmatpush.bf16.msra.mxu1 %v7064_v30 }
 0x258   :  { %1123 = vmatpush.bf16.msra.mxu2 %v7067_v36  ;;  %1136 = vmatpush.bf16.msra.mxu3 %v7071_v37 }
 0x25b   :  { %1098 = vmatpush.bf16.msra.mxu0 %v7073_v38  ;;  %1111 = vmatpush.bf16.msra.mxu1 %v7076_v42 }
 0x25c   :  { %1124 = vmatpush.bf16.msra.mxu2 %v7079_v46  ;;  %1137 = vmatpush.bf16.msra.mxu3 %v7083_v53 }
 0x25f   :  { %1099 = vmatpush.bf16.msra.mxu0 %v7085_v54  ;;  %1112 = vmatpush.bf16.msra.mxu1 %v7088_v59 }
 0x260   :  { %1125 = vmatpush.bf16.msra.mxu2 %v7091_v6  ;;  %1138 = vmatpush.bf16.msra.mxu3 %v7095_v7 }
 0x263   :  { %1100 = vmatpush.bf16.msra.mxu0 %v7097_v8  ;;  %1113 = vmatpush.bf16.msra.mxu1 %v7100_v12 }
 0x264   :  { %1126 = vmatpush.bf16.msra.mxu2 %v7103_v17  ;;  %1139 = vmatpush.bf16.msra.mxu3 %v7107_v19 }
 0x2c2   :  { %v924_v31 = vpop.f32.mrf.mxu0  ;;  %v937_v48 = vpop.f32.mrf.mxu1 }
 0x2c3   :  { %v967_v33 = vadd.f32 %v924_v31, %v909_v22  ;;  %v968_v49 = vadd.f32 %v937_v48, %v910_v60 }
 0x2c5   :  { %v971_v44 = vmul.f32 0.5, %v967_v33  ;;  %v975_v20 = vmul.f32 0.5, %v968_v49 }
 0x2c7   :  { %6608 = vtanh.f32 %v971_v44 }
 0x2c8   :  { %6610 = vtanh.f32 %v975_v20  ;;  %v999_v20 = vunpack.c.h.bf16 %v7231_v1 }
 0x2c9   :  { %v950_v58 = vpop.f32.mrf.mxu2  ;;  %v963_v47 = vpop.f32.mrf.mxu3 }
 0x2ca   :  { %v969_v15 = vadd.f32 %v950_v58, %v911_v3  ;;  %v970_v23 = vadd.f32 %v963_v47, %v912_v2  ;;  %v926_v27 = vpop.f32.mrf.mxu0  ;;  %v939_v28 = vpop.f32.mrf.mxu1 }
 0x2cb   :  { %v1000_v27 = vunpack.c.l.bf16 %v7237_v39  ;;  %v1001_v28 = vunpack.c.h.bf16 %v7237_v39 }
 0x2cc   :  { %6612 = vtanh.f32 %v969_v15  ;;  %v980_v35 = vmul.f32 0.5, %v970_v23 }
 0x2cd   :  { %v6609_v29 = vpop.eup %6608 }
 0x2ce   :  { %v6611_v5 = vpop.eup %6610  ;;  %v973_v34 = vmul.f32 0.5, %v6609_v29  ;;  %6614 = vtanh.f32 %v980_v35 }
 0x2cf   :  { %v977_v40 = vmul.f32 0.5, %v6611_v5 }
 0x2d0   :  { %v974_v32 = vadd.f32 0.5, %v973_v34 }
 0x2d1   :  { %v978_v16 = vadd.f32 0.5, %v977_v40  ;;  %v952_v55 = vpop.f32.mrf.mxu2  ;;  %v965_v43 = vpop.f32.mrf.mxu3 }
 0x2d2   :  { %v6613_v21 = vpop.eup %6612 }
 0x2d3   :  { %v985_v61 = vmul.f32 %v978_v16, %v7355_v9  ;;  %v986_v11 = vmul.f32 %v6613_v21, %v974_v32  ;;  %v998_v9 = vunpack.c.l.bf16 %v7231_v1 }
 0x2d4   :  { %v6615_v22 = vpop.eup %6614 }
 0x2d5   :  { %v7398_v60 = vadd.f32 %v986_v11, %v985_v61  ;;  %v982_v31 = vmul.f32 0.5, %v6615_v22 }
 0x2d7   :  { %6616 = vtanh.f32 %v7398_v60  ;;  %v983_v48 = vadd.f32 0.5, %v982_v31 }
 0x2dd   :  { %v6617_v33 = vpop.eup %6616 }
 0x2de   :  { %v989_v49 = vmul.f32 %v6617_v33, %v983_v48 }
 0x2e0   :  { %v992_v44 = vpack.c.bf16 %v989_v49, %v989_v49 }
 0x2e2   :  { %5456 = vst [vmem:[%s9038_s4 + $0xc] sm:$0xf] %v992_v44  ;;  %1012 = vmatmul.bf16.vlgmr.msrb.gmra.mxu0 %v992_v44  ;;  %1025 = vmatmul.bf16.vlgmr.msrb.gmra.mxu1 %v992_v44 }
 0x2e3   :  { %1038 = vmatmul.bf16.vlgmr.msrb.gmra.mxu2 %v992_v44  ;;  %1051 = vmatmul.bf16.vlgmr.msrb.gmra.mxu3 %v992_v44 }
 0x2e4   :  { %1182 = vmatpush.bf16.msrb.mxu0 %v7001_v41  ;;  %1195 = vmatpush.bf16.msrb.mxu1 %v7009_v45 }
 0x2e5   :  { %1208 = vmatpush.bf16.msrb.mxu2 %v7011_v50  ;;  %1221 = vmatpush.bf16.msrb.mxu3 %v7014_v51 }
 0x2e8   :  { %1183 = vmatpush.bf16.msrb.mxu0 %v7016_v52  ;;  %1196 = vmatpush.bf16.msrb.mxu1 %v7019_v56 }
 0x2e9   :  { %1209 = vmatpush.bf16.msrb.mxu2 %v7022_v62  ;;  %1222 = vmatpush.bf16.msrb.mxu3 %v7026_v63 }
 0x2ec   :  { %1184 = vmatpush.bf16.msrb.mxu0 %v7028_v0  ;;  %1197 = vmatpush.bf16.msrb.mxu1 %v7031_v4 }
 0x2ed   :  { %1210 = vmatpush.bf16.msrb.mxu2 %v7034_v10  ;;  %1223 = vmatpush.bf16.msrb.mxu3 %v7038_v13 }
 0x2f0   :  { %1185 = vmatpush.bf16.msrb.mxu0 %v7040_v14  ;;  %1198 = vmatpush.bf16.msrb.mxu1 %v7046_v18 }
 0x2f1   :  { %1211 = vmatpush.bf16.msrb.mxu2 %v7055_v24  ;;  %1224 = vmatpush.bf16.msrb.mxu3 %v7059_v25 }
 0x2f4   :  { %1186 = vmatpush.bf16.msrb.mxu0 %v7061_v26  ;;  %1199 = vmatpush.bf16.msrb.mxu1 %v7064_v30 }
 0x2f5   :  { %1212 = vmatpush.bf16.msrb.mxu2 %v7067_v36  ;;  %1225 = vmatpush.bf16.msrb.mxu3 %v7071_v37 }
 0x2f8   :  { %1187 = vmatpush.bf16.msrb.mxu0 %v7073_v38  ;;  %1200 = vmatpush.bf16.msrb.mxu1 %v7076_v42 }
 0x2f9   :  { %1213 = vmatpush.bf16.msrb.mxu2 %v7079_v46  ;;  %1226 = vmatpush.bf16.msrb.mxu3 %v7083_v53 }
 0x2fc   :  { %1188 = vmatpush.bf16.msrb.mxu0 %v7085_v54  ;;  %1201 = vmatpush.bf16.msrb.mxu1 %v7088_v59 }
 0x2fd   :  { %1214 = vmatpush.bf16.msrb.mxu2 %v7091_v6  ;;  %1227 = vmatpush.bf16.msrb.mxu3 %v7095_v7 }
 0x300   :  { %1189 = vmatpush.bf16.msrb.mxu0 %v7097_v8  ;;  %1202 = vmatpush.bf16.msrb.mxu1 %v7100_v12 }
 0x301   :  { %1215 = vmatpush.bf16.msrb.mxu2 %v7103_v17  ;;  %1228 = vmatpush.bf16.msrb.mxu3 %v7107_v19 }
 0x35f   :  { %v1013_v3 = vpop.f32.mrf.mxu0  ;;  %v1026_v2 = vpop.f32.mrf.mxu1 }
 0x360   :  { %v1056_v58 = vadd.f32 %v1013_v3, %v998_v9  ;;  %v1057_v47 = vadd.f32 %v1026_v2, %v999_v20 }
 0x362   :  { %v1060_v15 = vmul.f32 0.5, %v1056_v58  ;;  %v1064_v23 = vmul.f32 0.5, %v1057_v47 }
 0x364   :  { %6618 = vtanh.f32 %v1060_v15 }
 0x365   :  { %6620 = vtanh.f32 %v1064_v23 }
 0x366   :  { %v1039_v35 = vpop.f32.mrf.mxu2  ;;  %v1052_v29 = vpop.f32.mrf.mxu3 }
 0x367   :  { %v1058_v5 = vadd.f32 %v1039_v35, %v1000_v27  ;;  %v1059_v34 = vadd.f32 %v1052_v29, %v1001_v28  ;;  %v1015_v40 = vpop.f32.mrf.mxu0  ;;  %v1028_v32 = vpop.f32.mrf.mxu1  ;;  %v5592_v28 = vld [vmem:[#allocation5 + $0x1e0] sm:$0xf]  ;;  %v6399_v35 = vld [vmem:[#allocation5 + $0x1ec] sm:$0xf0]  ;;  %v6397_v29 = vld [vmem:[#allocation5 + $0x1e4] sm:$0xf] }
 0x368   :  { %v5600_v40 = vld [vmem:[#allocation5 + $0x1e8] sm:$0xf]  ;;  %v6400_v32 = vld [vmem:[#allocation5 + $0x1f4] sm:$0xf0] }
 0x369   :  { %6622 = vtanh.f32 %v1058_v5  ;;  %v1069_v1 = vmul.f32 0.5, %v1059_v34  ;;  %v5593_v5 = vor.u32 %v6399_v35, %v5592_v28  ;;  %v5594_v34 = vld [vmem:[#allocation5 + $0x1f0] sm:$0xf0] }
 0x36a   :  { %v6619_v16 = vpop.eup %6618 }
 0x36b   :  { %v6621_v55 = vpop.eup %6620  ;;  %v1062_v43 = vmul.f32 0.5, %v6619_v16  ;;  %6624 = vtanh.f32 %v1069_v1  ;;  %v5597_v1 = vor.u32 %v6397_v29, %v5594_v34  ;;  %v5601_v16 = vor.u32 %v6400_v32, %v5600_v40  ;;  %v6382_v29 = vld [vmem:[#allocation5 + $0x16c] sm:$0xf]  ;;  %v5512_v34 = vld [vmem:[#allocation5 + $0x140] sm:$0xf] }
 0x36c   :  { %v1066_v21 = vmul.f32 0.5, %v6621_v55  ;;  %v6398_v55 = vld [vmem:[#allocation5 + $0x1ec] sm:$0xf]  ;;  %v6379_v32 = vld [vmem:[#allocation5 + $0x14c] sm:$0xf0] }
 0x36d   :  { %v1063_v61 = vadd.f32 0.5, %v1062_v43  ;;  %v5602_v43 = vld [vmem:[#allocation5 + $0x1f8] sm:$0xf0] }
 0x36e   :  { %v1067_v11 = vadd.f32 0.5, %v1066_v21  ;;  %v1041_v22 = vpop.f32.mrf.mxu2  ;;  %v1054_v31 = vpop.f32.mrf.mxu3  ;;  %v5605_v21 = vor.u32 %v6398_v55, %v5602_v43 }
 0x36f   :  { %v6623_v48 = vpop.eup %6622  ;;  %v6393_v22 = vld [vmem:[#allocation5 + $0x1c4] sm:$0xf] }
 0x370   :  { %v1074_v39 = vmul.f32 %v1067_v11, %v7398_v60  ;;  %v1075_v33 = vmul.f32 %v6623_v48, %v1063_v61  ;;  %v5576_v61 = vld [vmem:[#allocation5 + $0x1c0] sm:$0xf]  ;;  %v6395_v11 = vld [vmem:[#allocation5 + $0x1cc] sm:$0xf0]  ;;  %v5578_v48 = vld [vmem:[#allocation5 + $0x1d0] sm:$0xf0] }
 0x371   :  { %v6625_v49 = vpop.eup %6624  ;;  %v5577_v31 = vor.u32 %v6395_v11, %v5576_v61  ;;  %v5520_v11 = vld [vmem:[#allocation5 + $0x148] sm:$0xf] }
 0x372   :  { %v7441_v44 = vadd.f32 %v1075_v33, %v1074_v39  ;;  %v1071_v9 = vmul.f32 0.5, %v6625_v49  ;;  %v5584_v39 = vld [vmem:[#allocation5 + $0x1c8] sm:$0xf]  ;;  %v6396_v33 = vld [vmem:[#allocation5 + $0x1d4] sm:$0xf0]  ;;  %v5581_v49 = vor.u32 %v6393_v22, %v5578_v48 }
 0x373   :  { %v6380_v22 = vld [vmem:[#allocation5 + $0x154] sm:$0xf0]  ;;  %v6378_v48 = vld [vmem:[#allocation5 + $0x14c] sm:$0xf] }
 0x374   :  { %6626 = vtanh.f32 %v7441_v44  ;;  %v1072_v20 = vadd.f32 0.5, %v1071_v9  ;;  %v6394_v9 = vld [vmem:[#allocation5 + $0x1cc] sm:$0xf] }
 0x37a   :  { %v6627_v3 = vpop.eup %6626 }
 0x37b   :  { %v1078_v2 = vmul.f32 %v6627_v3, %v1072_v20  ;;  %v5586_v20 = vld [vmem:[#allocation5 + $0x1d8] sm:$0xf0] }
 0x37c   :  { %v5589_v3 = vor.u32 %v6394_v9, %v5586_v20  ;;  %v6373_v9 = vld [vmem:[#allocation5 + $0x124] sm:$0xf]  ;;  %v5498_v20 = vld [vmem:[#allocation5 + $0x130] sm:$0xf0] }
 0x37d   :  { %v1081_v58 = vpack.c.bf16 %v1078_v2, %v1078_v2  ;;  %v5560_v2 = vld [vmem:[#allocation5 + $0x1a0] sm:$0xf] }
 0x37f   :  { %5457 = vst [vmem:[%s9038_s4 + $0x10] sm:$0xf] %v1081_v58  ;;  %1101 = vmatmul.bf16.vlgmr.msra.gmra.mxu0 %v1081_v58  ;;  %1114 = vmatmul.bf16.vlgmr.msra.gmra.mxu1 %v1081_v58 }
 0x380   :  { %1127 = vmatmul.bf16.vlgmr.msra.gmra.mxu2 %v1081_v58  ;;  %1140 = vmatmul.bf16.vlgmr.msra.gmra.mxu3 %v1081_v58  ;;  %v6391_v58 = vld [vmem:[#allocation5 + $0x1ac] sm:$0xf0] }
 0x381   :  { %1271 = vmatpush.bf16.msra.mxu0 %v7001_v41  ;;  %1284 = vmatpush.bf16.msra.mxu1 %v7009_v45  ;;  %v9070_v41 = vld [vmem:[#allocation11_spill] sm:$0xff] }
 0x382   :  { %1297 = vmatpush.bf16.msra.mxu2 %v7011_v50  ;;  %1310 = vmatpush.bf16.msra.mxu3 %v7014_v51  ;;  %v1087_v45 = vunpack.c.l.bf16 %v9070_v41  ;;  %v1088_v50 = vunpack.c.h.bf16 %v9070_v41  ;;  %v6389_v41 = vld [vmem:[#allocation5 + $0x1a4] sm:$0xf] }
 0x385   :  { %1272 = vmatpush.bf16.msra.mxu0 %v7016_v52  ;;  %1285 = vmatpush.bf16.msra.mxu1 %v7019_v56 }
 0x386   :  { %1298 = vmatpush.bf16.msra.mxu2 %v7022_v62  ;;  %1311 = vmatpush.bf16.msra.mxu3 %v7026_v63 }
 0x389   :  { %1273 = vmatpush.bf16.msra.mxu0 %v7028_v0  ;;  %1286 = vmatpush.bf16.msra.mxu1 %v7031_v4  ;;  %v9071_v4 = vld [vmem:[#allocation12_spill] sm:$0xff] }
 0x38a   :  { %1299 = vmatpush.bf16.msra.mxu2 %v7034_v10  ;;  %1312 = vmatpush.bf16.msra.mxu3 %v7038_v13  ;;  %v1089_v10 = vunpack.c.l.bf16 %v9071_v4  ;;  %v1090_v13 = vunpack.c.h.bf16 %v9071_v4 }
 0x38d   :  { %1274 = vmatpush.bf16.msra.mxu0 %v7040_v14  ;;  %1287 = vmatpush.bf16.msra.mxu1 %v7046_v18 }
 0x38e   :  { %1300 = vmatpush.bf16.msra.mxu2 %v7055_v24  ;;  %1313 = vmatpush.bf16.msra.mxu3 %v7059_v25 }
 0x391   :  { %1275 = vmatpush.bf16.msra.mxu0 %v7061_v26  ;;  %1288 = vmatpush.bf16.msra.mxu1 %v7064_v30 }
 0x392   :  { %1301 = vmatpush.bf16.msra.mxu2 %v7067_v36  ;;  %1314 = vmatpush.bf16.msra.mxu3 %v7071_v37 }
 0x395   :  { %1276 = vmatpush.bf16.msra.mxu0 %v7073_v38  ;;  %1289 = vmatpush.bf16.msra.mxu1 %v7076_v42 }
 0x396   :  { %1302 = vmatpush.bf16.msra.mxu2 %v7079_v46  ;;  %1315 = vmatpush.bf16.msra.mxu3 %v7083_v53 }
 0x399   :  { %1277 = vmatpush.bf16.msra.mxu0 %v7085_v54  ;;  %1290 = vmatpush.bf16.msra.mxu1 %v7088_v59 }
 0x39a   :  { %1303 = vmatpush.bf16.msra.mxu2 %v7091_v6  ;;  %1316 = vmatpush.bf16.msra.mxu3 %v7095_v7 }
 0x39d   :  { %1278 = vmatpush.bf16.msra.mxu0 %v7097_v8  ;;  %1291 = vmatpush.bf16.msra.mxu1 %v7100_v12 }
 0x39e   :  { %1304 = vmatpush.bf16.msra.mxu2 %v7103_v17  ;;  %1317 = vmatpush.bf16.msra.mxu3 %v7107_v19 }
 0x3fc   :  { %v1102_v51 = vpop.f32.mrf.mxu0  ;;  %v1115_v52 = vpop.f32.mrf.mxu1 }
 0x3fd   :  { %v1145_v56 = vadd.f32 %v1102_v51, %v1087_v45  ;;  %v1146_v62 = vadd.f32 %v1115_v52, %v1088_v50  ;;  %v5561_v45 = vor.u32 %v6391_v58, %v5560_v2  ;;  %v5562_v50 = vld [vmem:[#allocation5 + $0x1b0] sm:$0xf0]  ;;  %v5568_v51 = vld [vmem:[#allocation5 + $0x1a8] sm:$0xf]  ;;  %v6392_v52 = vld [vmem:[#allocation5 + $0x1b4] sm:$0xf0] }
 0x3ff   :  { %v1149_v63 = vmul.f32 0.5, %v1145_v56  ;;  %v1153_v0 = vmul.f32 0.5, %v1146_v62  ;;  %v5565_v56 = vor.u32 %v6389_v41, %v5562_v50  ;;  %v5569_v62 = vor.u32 %v6392_v52, %v5568_v51  ;;  %v6376_v50 = vld [vmem:[#allocation5 + $0x134] sm:$0xf0]  ;;  %v6374_v51 = vld [vmem:[#allocation5 + $0x12c] sm:$0xf] }
 0x401   :  { %6628 = vtanh.f32 %v1149_v63  ;;  %v6390_v63 = vld [vmem:[#allocation5 + $0x1ac] sm:$0xf] }
 0x402   :  { %6630 = vtanh.f32 %v1153_v0  ;;  %v5570_v0 = vld [vmem:[#allocation5 + $0x1b8] sm:$0xf0] }
 0x403   :  { %v1128_v14 = vpop.f32.mrf.mxu2  ;;  %v1141_v18 = vpop.f32.mrf.mxu3  ;;  %v5573_v4 = vor.u32 %v6390_v63, %v5570_v0  ;;  %v5506_v0 = vld [vmem:[#allocation5 + $0x138] sm:$0xf0] }
 0x404   :  { %v1147_v24 = vadd.f32 %v1128_v14, %v1089_v10  ;;  %v1148_v25 = vadd.f32 %v1141_v18, %v1090_v13  ;;  %v1104_v26 = vpop.f32.mrf.mxu0  ;;  %v1117_v30 = vpop.f32.mrf.mxu1  ;;  %v5544_v10 = vld [vmem:[#allocation5 + $0x180] sm:$0xf]  ;;  %v6387_v13 = vld [vmem:[#allocation5 + $0x18c] sm:$0xf0]  ;;  %v6385_v14 = vld [vmem:[#allocation5 + $0x184] sm:$0xf] }
 0x405   :  { %v5545_v18 = vor.u32 %v6387_v13, %v5544_v10  ;;  %v6388_v26 = vld [vmem:[#allocation5 + $0x194] sm:$0xf0]  ;;  %v6371_v10 = vld [vmem:[#allocation5 + $0x10c] sm:$0xf0] }
 0x406   :  { %6632 = vtanh.f32 %v1147_v24  ;;  %v1158_v36 = vmul.f32 0.5, %v1148_v25  ;;  %v5546_v24 = vld [vmem:[#allocation5 + $0x190] sm:$0xf0]  ;;  %v5552_v25 = vld [vmem:[#allocation5 + $0x188] sm:$0xf] }
 0x407   :  { %v6629_v37 = vpop.eup %6628  ;;  %v5549_v30 = vor.u32 %v6385_v14, %v5546_v24 }
 0x408   :  { %v6631_v38 = vpop.eup %6630  ;;  %v1151_v42 = vmul.f32 0.5, %v6629_v37  ;;  %6634 = vtanh.f32 %v1158_v36  ;;  %v5553_v36 = vor.u32 %v6388_v26, %v5552_v25  ;;  %v6386_v37 = vld [vmem:[#allocation5 + $0x18c] sm:$0xf]  ;;  %v5509_v25 = vor.u32 %v6374_v51, %v5506_v0  ;;  %v6369_v26 = vld [vmem:[#allocation5 + $0x104] sm:$0xf] }
 0x409   :  { %v1155_v46 = vmul.f32 0.5, %v6631_v38  ;;  %v5554_v38 = vld [vmem:[#allocation5 + $0x198] sm:$0xf0]  ;;  %v6428_v51 = vld [vmem:[#allocation7 + $0x1d4] sm:$0xf0] }
 0x40a   :  { %v1152_v53 = vadd.f32 0.5, %v1151_v42  ;;  %v5557_v42 = vor.u32 %v6386_v37, %v5554_v38  ;;  %v6372_v37 = vld [vmem:[#allocation5 + $0x114] sm:$0xf0]  ;;  %v6370_v38 = vld [vmem:[#allocation5 + $0x10c] sm:$0xf] }
 0x40b   :  { %v1156_v54 = vadd.f32 0.5, %v1155_v46  ;;  %v1130_v59 = vpop.f32.mrf.mxu2  ;;  %v1143_v6 = vpop.f32.mrf.mxu3  ;;  %v9072_v46 = vld [vmem:[#allocation13_spill] sm:$0xff] }
 0x40c   :  { %v6633_v7 = vpop.eup %6632  ;;  %v5528_v59 = vld [vmem:[#allocation5 + $0x160] sm:$0xf]  ;;  %v6383_v6 = vld [vmem:[#allocation5 + $0x16c] sm:$0xf0] }
 0x40d   :  { %v1163_v8 = vmul.f32 %v1156_v54, %v7441_v44  ;;  %v1164_v12 = vmul.f32 %v6633_v7, %v1152_v53  ;;  %v5585_v44 = vor.u32 %v6396_v33, %v5584_v39  ;;  %v1176_v53 = vunpack.c.l.bf16 %v9072_v46  ;;  %v6381_v7 = vld [vmem:[#allocation5 + $0x164] sm:$0xf]  ;;  %v5522_v39 = vld [vmem:[#allocation5 + $0x158] sm:$0xf0]  ;;  %v5496_v33 = vld [vmem:[#allocation5 + $0x120] sm:$0xf] }
 0x40e   :  { %v6635_v17 = vpop.eup %6634  ;;  %v1177_v54 = vunpack.c.h.bf16 %v9072_v46 }
 0x40f   :  { %v7484_v19 = vadd.f32 %v1164_v12, %v1163_v8  ;;  %v1160_v60 = vmul.f32 0.5, %v6635_v17  ;;  %v5529_v17 = vor.u32 %v6383_v6, %v5528_v59 }
 0x411   :  { %6636 = vtanh.f32 %v7484_v19  ;;  %v1161_v47 = vadd.f32 0.5, %v1160_v60  ;;  %v5530_v60 = vld [vmem:[#allocation5 + $0x170] sm:$0xf0] }
 0x412   :  { %v5533_v28 = vor.u32 %v6381_v7, %v5530_v60 }
 0x417   :  { %v6637_v15 = vpop.eup %6636 }
 0x418   :  { %v1167_v23 = vmul.f32 %v6637_v15, %v1161_v47  ;;  %v5536_v47 = vld [vmem:[#allocation5 + $0x168] sm:$0xf]  ;;  %v6384_v15 = vld [vmem:[#allocation5 + $0x174] sm:$0xf0] }
 0x419   :  { %v5537_v35 = vor.u32 %v6384_v15, %v5536_v47 }
 0x41a   :  { %v1170_v27 = vpack.c.bf16 %v1167_v23, %v1167_v23 }
 0x41c   :  { %5458 = vst [vmem:[%s9038_s4 + $0x14] sm:$0xf] %v1170_v27  ;;  %1190 = vmatmul.bf16.vlgmr.msrb.gmra.mxu0 %v1170_v27  ;;  %1203 = vmatmul.bf16.vlgmr.msrb.gmra.mxu1 %v1170_v27 }
 0x41d   :  { %1216 = vmatmul.bf16.vlgmr.msrb.gmra.mxu2 %v1170_v27  ;;  %1229 = vmatmul.bf16.vlgmr.msrb.gmra.mxu3 %v1170_v27 }
 0x41e   :  { %1620 = vmatpush.bf16.msrb.mxu0 %v5593_v5  ;;  %1649 = vmatpush.bf16.msrb.mxu1 %v5597_v1  ;;  %v5538_v5 = vld [vmem:[#allocation5 + $0x178] sm:$0xf0]  ;;  %v6377_v1 = vld [vmem:[#allocation5 + $0x144] sm:$0xf] }
 0x41f   :  { %1678 = vmatpush.bf16.msrb.mxu2 %v5601_v16  ;;  %1707 = vmatpush.bf16.msrb.mxu3 %v5605_v21  ;;  %v5541_v40 = vor.u32 %v6382_v29, %v5538_v5  ;;  %v5514_v16 = vld [vmem:[#allocation5 + $0x150] sm:$0xf0]  ;;  %v5513_v21 = vor.u32 %v6379_v32, %v5512_v34 }
 0x420   :  { %v5517_v61 = vor.u32 %v6377_v1, %v5514_v16 }
 0x422   :  { %1621 = vmatpush.bf16.msrb.mxu0 %v5577_v31  ;;  %1650 = vmatpush.bf16.msrb.mxu1 %v5581_v49  ;;  %v5521_v31 = vor.u32 %v6380_v22, %v5520_v11  ;;  %v5525_v49 = vor.u32 %v6378_v48, %v5522_v39  ;;  %v5722_v11 = vld [vmem:[#allocation7 + $0x1f0] sm:$0xf0]  ;;  %v5728_v22 = vld [vmem:[#allocation7 + $0x1e8] sm:$0xf] }
 0x423   :  { %1679 = vmatpush.bf16.msrb.mxu2 %v5585_v44  ;;  %1708 = vmatpush.bf16.msrb.mxu3 %v5589_v3  ;;  %v6375_v44 = vld [vmem:[#allocation5 + $0x12c] sm:$0xf0]  ;;  %v9073_v3 = vld [vmem:[#allocation14_spill] sm:$0xff] }
 0x424   :  { %v1178_v2 = vunpack.c.l.bf16 %v9073_v3  ;;  %v1179_v58 = vunpack.c.h.bf16 %v9073_v3  ;;  %v5497_v41 = vor.u32 %v6375_v44, %v5496_v33  ;;  %v6430_v33 = vld [vmem:[#allocation7 + $0x1ec] sm:$0xf]  ;;  %v5704_v3 = vld [vmem:[#allocation7 + $0x1c0] sm:$0xf] }
 0x426   :  { %1622 = vmatpush.bf16.msrb.mxu0 %v5561_v45  ;;  %1651 = vmatpush.bf16.msrb.mxu1 %v5565_v56  ;;  %v5504_v45 = vld [vmem:[#allocation5 + $0x128] sm:$0xf] }
 0x427   :  { %1680 = vmatpush.bf16.msrb.mxu2 %v5569_v62  ;;  %1709 = vmatpush.bf16.msrb.mxu3 %v5573_v4  ;;  %v5501_v62 = vor.u32 %v6373_v9, %v5498_v20  ;;  %v5505_v63 = vor.u32 %v6376_v50, %v5504_v45  ;;  %v5480_v4 = vld [vmem:[#allocation5 + $0x100] sm:$0xf]  ;;  %v6434_v9 = vld [vmem:[%s9038_s4 + $0x8] sm:$0xff]  ;;  %v6435_v20 = vld [vmem:[%s9038_s4 + $0x10] sm:$0xff] }
 0x428   :  { %v5706_v45 = vld [vmem:[#allocation7 + $0x1d0] sm:$0xf0]  ;;  %v5712_v50 = vld [vmem:[#allocation7 + $0x1c8] sm:$0xf] }
 0x42a   :  { %1623 = vmatpush.bf16.msrb.mxu0 %v5545_v18  ;;  %1652 = vmatpush.bf16.msrb.mxu1 %v5549_v30  ;;  %v5482_v30 = vld [vmem:[#allocation5 + $0x110] sm:$0xf0] }
 0x42b   :  { %1681 = vmatpush.bf16.msrb.mxu2 %v5553_v36  ;;  %1710 = vmatpush.bf16.msrb.mxu3 %v5557_v42  ;;  %v5488_v36 = vld [vmem:[#allocation5 + $0x108] sm:$0xf]  ;;  %v5490_v42 = vld [vmem:[#allocation5 + $0x118] sm:$0xf0]  ;;  %v5485_v59 = vor.u32 %v6369_v26, %v5482_v30 }
 0x42c   :  { %v5489_v6 = vor.u32 %v6372_v37, %v5488_v36  ;;  %v5690_v36 = vld [vmem:[#allocation7 + $0x1b0] sm:$0xf0]  ;;  %v5696_v37 = vld [vmem:[#allocation7 + $0x1a8] sm:$0xf] }
 0x42e   :  { %1624 = vmatpush.bf16.msrb.mxu0 %v5529_v17  ;;  %1653 = vmatpush.bf16.msrb.mxu1 %v5533_v28 }
 0x42f   :  { %1682 = vmatpush.bf16.msrb.mxu2 %v5537_v35  ;;  %1711 = vmatpush.bf16.msrb.mxu3 %v5541_v40 }
 0x432   :  { %1625 = vmatpush.bf16.msrb.mxu0 %v5513_v21  ;;  %1654 = vmatpush.bf16.msrb.mxu1 %v5517_v61  ;;  %v6429_v21 = vld [vmem:[#allocation7 + $0x1e4] sm:$0xf] }
 0x433   :  { %1683 = vmatpush.bf16.msrb.mxu2 %v5521_v31  ;;  %1712 = vmatpush.bf16.msrb.mxu3 %v5525_v49  ;;  %v6432_v31 = vld [vmem:[#allocation7 + $0x1f4] sm:$0xf0]  ;;  %v7506_v48 = vor.u32 %v6429_v21, %v5722_v11  ;;  %v5730_v49 = vld [vmem:[#allocation7 + $0x1f8] sm:$0xf0]  ;;  %v1268_v21 = vunpack.c.h.bf16 %v7267_v57 }
 0x434   :  { %v7508_v39 = vor.u32 %v6432_v31, %v5728_v22  ;;  %v7511_v44 = vor.u32 %v6430_v33, %v5730_v49  ;;  %v5664_v22 = vld [vmem:[#allocation7 + $0x168] sm:$0xf]  ;;  %v6416_v31 = vld [vmem:[#allocation7 + $0x174] sm:$0xf0]  ;;  %v6414_v33 = vld [vmem:[#allocation7 + $0x16c] sm:$0xf] }
 0x436   :  { %1626 = vmatpush.bf16.msrb.mxu0 %v5497_v41  ;;  %1655 = vmatpush.bf16.msrb.mxu1 %v5501_v62  ;;  %v6426_v62 = vld [vmem:[#allocation7 + $0x1cc] sm:$0xf] }
 0x437   :  { %1684 = vmatpush.bf16.msrb.mxu2 %v5505_v63  ;;  %1713 = vmatpush.bf16.msrb.mxu3 %v5509_v25  ;;  %v5714_v63 = vld [vmem:[#allocation7 + $0x1d8] sm:$0xf0] }
 0x438   :  { %v7531_v0 = vor.u32 %v6426_v62, %v5714_v63 }
 0x43a   :  { %1656 = vmatpush.bf16.msrb.mxu1 %v5485_v59  ;;  %v6422_v59 = vld [vmem:[#allocation7 + $0x1ac] sm:$0xf] }
 0x43b   :  { %1685 = vmatpush.bf16.msrb.mxu2 %v5489_v6  ;;  %v5698_v6 = vld [vmem:[#allocation7 + $0x1b8] sm:$0xf0] }
 0x499   :  { %v1191_v8 = vpop.f32.mrf.mxu0  ;;  %v1204_v12 = vpop.f32.mrf.mxu1 }
 0x49a   :  { %v1234_v23 = vadd.f32 %v1191_v8, %v1176_v53  ;;  %v1235_v27 = vadd.f32 %v1204_v12, %v1177_v54  ;;  %v5481_v53 = vor.u32 %v6371_v10, %v5480_v4  ;;  %v5493_v12 = vor.u32 %v6370_v38, %v5490_v42  ;;  %v9074_v4 = vld [vmem:[#allocation15_spill] sm:$0xff]  ;;  %v6424_v38 = vld [vmem:[#allocation7 + $0x1b4] sm:$0xf0] }
 0x49b   :  { %v1265_v10 = vunpack.c.l.bf16 %v9074_v4 }
 0x49c   :  { %v1238_v55 = vmul.f32 0.5, %v1234_v23  ;;  %v1242_v43 = vmul.f32 0.5, %v1235_v27  ;;  %1627 = vmatpush.bf16.msrb.mxu0 %v5481_v53  ;;  %1714 = vmatpush.bf16.msrb.mxu3 %v5493_v12  ;;  %v6419_v12 = vld [vmem:[#allocation7 + $0x18c] sm:$0xf0] }
 0x49e   :  { %6638 = vtanh.f32 %v1238_v55  ;;  %v5720_v55 = vld [vmem:[#allocation7 + $0x1e0] sm:$0xf] }
 0x49f   :  { %6640 = vtanh.f32 %v1242_v43  ;;  %v6431_v43 = vld [vmem:[#allocation7 + $0x1ec] sm:$0xf0] }
 0x4a0   :  { %v1217_v52 = vpop.f32.mrf.mxu2  ;;  %v1230_v56 = vpop.f32.mrf.mxu3  ;;  %v7504_v61 = vor.u32 %v6431_v43, %v5720_v55  ;;  %v5658_v55 = vld [vmem:[#allocation7 + $0x170] sm:$0xf0]  ;;  %v1267_v43 = vunpack.c.l.bf16 %v7267_v57  ;;  %v6411_v57 = vld [vmem:[#allocation7 + $0x14c] sm:$0xf0] }
 0x4a1   :  { %v1236_v13 = vadd.f32 %v1217_v52, %v1178_v2  ;;  %v1237_v14 = vadd.f32 %v1230_v56, %v1179_v58  ;;  %v1193_v18 = vpop.f32.mrf.mxu0  ;;  %v1206_v24 = vpop.f32.mrf.mxu1  ;;  %v6427_v2 = vld [vmem:[#allocation7 + $0x1cc] sm:$0xf0]  ;;  %v6425_v58 = vld [vmem:[#allocation7 + $0x1c4] sm:$0xf]  ;;  %v7526_v56 = vor.u32 %v6428_v51, %v5712_v50 }
 0x4a2   :  { %v7522_v41 = vor.u32 %v6427_v2, %v5704_v3  ;;  %v7524_v52 = vor.u32 %v6425_v58, %v5706_v45  ;;  %v6423_v18 = vld [vmem:[#allocation7 + $0x1ac] sm:$0xf0]  ;;  %v6421_v24 = vld [vmem:[#allocation7 + $0x1a4] sm:$0xf]  ;;  %v7565_v3 = vor.u32 %v6416_v31, %v5664_v22  ;;  %v5666_v2 = vld [vmem:[#allocation7 + $0x178] sm:$0xf0] }
 0x4a3   :  { %6642 = vtanh.f32 %v1236_v13  ;;  %v1247_v46 = vmul.f32 0.5, %v1237_v14  ;;  %v1266_v13 = vunpack.c.h.bf16 %v9074_v4  ;;  %v5688_v14 = vld [vmem:[#allocation7 + $0x1a0] sm:$0xf]  ;;  %v7538_v53 = vor.u32 %v6421_v24, %v5690_v36  ;;  %v6409_v4 = vld [vmem:[#allocation7 + $0x144] sm:$0xf] }
 0x4a4   :  { %v6639_v54 = vpop.eup %6638  ;;  %v7536_v30 = vor.u32 %v6423_v18, %v5688_v14  ;;  %v5640_v58 = vld [vmem:[#allocation7 + $0x140] sm:$0xf]  ;;  %v7568_v63 = vor.u32 %v6414_v33, %v5666_v2  ;;  %v6412_v14 = vld [vmem:[#allocation7 + $0x154] sm:$0xf0]  ;;  %v6406_v22 = vld [vmem:[#allocation7 + $0x12c] sm:$0xf] }
 0x4a5   :  { %v6641_v7 = vpop.eup %6640  ;;  %v1240_v8 = vmul.f32 0.5, %v6639_v54  ;;  %6644 = vtanh.f32 %v1247_v46  ;;  %v7540_v54 = vor.u32 %v6424_v38, %v5696_v37  ;;  %v7571_v24 = vor.u32 %v6411_v57, %v5640_v58  ;;  %v5634_v31 = vld [vmem:[#allocation7 + $0x138] sm:$0xf0]  ;;  %v5608_v57 = vld [vmem:[#allocation7 + $0x100] sm:$0xf] }
 0x4a6   :  { %v1244_v17 = vmul.f32 0.5, %v6641_v7  ;;  %v5672_v7 = vld [vmem:[#allocation7 + $0x180] sm:$0xf] }
 0x4a7   :  { %v1241_v60 = vadd.f32 0.5, %v1240_v8  ;;  %v7543_v8 = vor.u32 %v6422_v59, %v5698_v6  ;;  %v6405_v59 = vld [vmem:[#allocation7 + $0x124] sm:$0xf] }
 0x4a8   :  { %v1245_v47 = vadd.f32 0.5, %v1244_v17  ;;  %v1219_v15 = vpop.f32.mrf.mxu2  ;;  %v1232_v23 = vpop.f32.mrf.mxu3  ;;  %v6417_v17 = vld [vmem:[#allocation7 + $0x184] sm:$0xf] }
 0x4a9   :  { %v6643_v27 = vpop.eup %6642  ;;  %v7547_v23 = vor.u32 %v6419_v12, %v5672_v7 }
 0x4aa   :  { %v1252_v28 = vmul.f32 %v1245_v47, %v7484_v19  ;;  %v1253_v35 = vmul.f32 %v6643_v27, %v1241_v60  ;;  %v6433_v19 = vld [vmem:[%s9038_s4] sm:$0xff]  ;;  %v5674_v60 = vld [vmem:[#allocation7 + $0x190] sm:$0xf0] }
 0x4ab   :  { %v6645_v29 = vpop.eup %6644  ;;  %v7549_v27 = vor.u32 %v6417_v17, %v5674_v60  ;;  %v5626_v17 = vld [vmem:[#allocation7 + $0x130] sm:$0xf0]  ;;  %v5632_v60 = vld [vmem:[#allocation7 + $0x128] sm:$0xf] }
 0x4ac   :  { %v7495_v5 = vadd.f32 %v1253_v35, %v1252_v28  ;;  %v1249_v34 = vmul.f32 0.5, %v6645_v29  ;;  %v5680_v28 = vld [vmem:[#allocation7 + $0x188] sm:$0xf]  ;;  %v6420_v35 = vld [vmem:[#allocation7 + $0x194] sm:$0xf0] }
 0x4ad   :  { %v7552_v29 = vor.u32 %v6420_v35, %v5680_v28 }
 0x4ae   :  { %6646 = vtanh.f32 %v7495_v5  ;;  %v1250_v40 = vadd.f32 0.5, %v1249_v34  ;;  %v6418_v34 = vld [vmem:[#allocation7 + $0x18c] sm:$0xf] }
 0x4b4   :  { %v6647_v32 = vpop.eup %6646 }
 0x4b5   :  { %v1256_v1 = vmul.f32 %v6647_v32, %v1250_v40  ;;  %v5682_v40 = vld [vmem:[#allocation7 + $0x198] sm:$0xf0]  ;;  %v5656_v32 = vld [vmem:[#allocation7 + $0x160] sm:$0xf] }
 0x4b7   :  { %v1259_v16 = vpack.c.bf16 %v1256_v1, %v1256_v1  ;;  %v7554_v1 = vor.u32 %v6418_v34, %v5682_v40 }
 0x4b9   :  { %5459 = vst [vmem:[%s9038_s4 + $0x18] sm:$0xf] %v1259_v16  ;;  %1279 = vmatmul.bf16.vlgmr.msra.gmra.mxu0 %v1259_v16  ;;  %1292 = vmatmul.bf16.vlgmr.msra.gmra.mxu1 %v1259_v16 }
 0x4ba   :  { %1305 = vmatmul.bf16.vlgmr.msra.gmra.mxu2 %v1259_v16  ;;  %1318 = vmatmul.bf16.vlgmr.msra.gmra.mxu3 %v1259_v16  ;;  %v6415_v16 = vld [vmem:[#allocation7 + $0x16c] sm:$0xf0] }
 0x4bb   :  { %1938 = vmatpush.bf16.msra.mxu0 %v7504_v61  ;;  %1951 = vmatpush.bf16.msra.mxu1 %v7506_v48  ;;  %v7559_v11 = vor.u32 %v6415_v16, %v5656_v32  ;;  %v7587_v16 = vor.u32 %v6405_v59, %v5626_v17 }
 0x4bc   :  { %1964 = vmatpush.bf16.msra.mxu2 %v7508_v39  ;;  %1977 = vmatpush.bf16.msra.mxu3 %v7511_v44 }
 0x4bf   :  { %1939 = vmatpush.bf16.msra.mxu0 %v7522_v41  ;;  %1952 = vmatpush.bf16.msra.mxu1 %v7524_v52 }
 0x4c0   :  { %1965 = vmatpush.bf16.msra.mxu2 %v7526_v56  ;;  %1978 = vmatpush.bf16.msra.mxu3 %v7531_v0 }
 0x4c3   :  { %1940 = vmatpush.bf16.msra.mxu0 %v7536_v30  ;;  %1953 = vmatpush.bf16.msra.mxu1 %v7538_v53 }
 0x4c4   :  { %1966 = vmatpush.bf16.msra.mxu2 %v7540_v54  ;;  %1979 = vmatpush.bf16.msra.mxu3 %v7543_v8 }
 0x4c7   :  { %1941 = vmatpush.bf16.msra.mxu0 %v7547_v23  ;;  %1954 = vmatpush.bf16.msra.mxu1 %v7549_v27 }
 0x4c8   :  { %1967 = vmatpush.bf16.msra.mxu2 %v7552_v29  ;;  %1980 = vmatpush.bf16.msra.mxu3 %v7554_v1 }
 0x4c9   :  { %1628 = vmatmul.bf16.vlgmr.msrb.gmra.mxu0 %v6433_v19  ;;  %1657 = vmatmul.bf16.vlgmr.msrb.gmra.mxu1 %v6433_v19 }
 0x4ca   :  { %1686 = vmatmul.bf16.vlgmr.msrb.gmra.mxu2 %v6433_v19  ;;  %1715 = vmatmul.bf16.vlgmr.msrb.gmra.mxu3 %v6433_v19  ;;  %v6413_v19 = vld [vmem:[#allocation7 + $0x164] sm:$0xf] }
 0x4cb   :  { %1942 = vmatpush.bf16.msra.mxu0 %v7559_v11 }
 0x4cc   :  { %1968 = vmatpush.bf16.msra.mxu2 %v7565_v3  ;;  %1981 = vmatpush.bf16.msra.mxu3 %v7568_v63 }
 0x4cf   :  { %1943 = vmatpush.bf16.msra.mxu0 %v7571_v24 }
 0x4d9   :  { %1633 = vmatmul.bf16.gmra.mxu0 %v6434_v9  ;;  %1662 = vmatmul.bf16.gmra.mxu1 %v6434_v9 }
 0x4da   :  { %1691 = vmatmul.bf16.gmra.mxu2 %v6434_v9  ;;  %1720 = vmatmul.bf16.gmra.mxu3 %v6434_v9 }
 0x4e9   :  { %1638 = vmatmul.bf16.gmra.mxu0 %v6435_v20  ;;  %1667 = vmatmul.bf16.gmra.mxu1 %v6435_v20 }
 0x4ea   :  { %1696 = vmatmul.bf16.gmra.mxu2 %v6435_v20  ;;  %1725 = vmatmul.bf16.gmra.mxu3 %v6435_v20  ;;  %v7563_v20 = vor.u32 %v6413_v19, %v5658_v55 }
 0x4ec   :  { %1955 = vmatpush.bf16.msra.mxu1 %v7563_v20 }
 0x536   :  { %v1280_v25 = vpop.f32.mrf.mxu0  ;;  %v1293_v26 = vpop.f32.mrf.mxu1 }
 0x537   :  { %v1323_v42 = vadd.f32 %v1280_v25, %v1265_v10  ;;  %v1324_v46 = vadd.f32 %v1293_v26, %v1266_v13  ;;  %v5642_v10 = vld [vmem:[#allocation7 + $0x150] sm:$0xf0]  ;;  %v5648_v13 = vld [vmem:[#allocation7 + $0x148] sm:$0xf]  ;;  %v6410_v25 = vld [vmem:[#allocation7 + $0x14c] sm:$0xf] }
 0x538   :  { %v5650_v26 = vld [vmem:[#allocation7 + $0x158] sm:$0xf0]  ;;  %v7575_v37 = vor.u32 %v6409_v4, %v5642_v10  ;;  %v7577_v38 = vor.u32 %v6412_v14, %v5648_v13  ;;  %v6404_v10 = vld [vmem:[#allocation7 + $0x114] sm:$0xf0]  ;;  %v6402_v13 = vld [vmem:[#allocation7 + $0x10c] sm:$0xf] }
 0x539   :  { %v1327_v47 = vmul.f32 0.5, %v1323_v42  ;;  %v1331_v15 = vmul.f32 0.5, %v1324_v46  ;;  %v5624_v42 = vld [vmem:[#allocation7 + $0x120] sm:$0xf]  ;;  %v6407_v46 = vld [vmem:[#allocation7 + $0x12c] sm:$0xf0]  ;;  %v7580_v12 = vor.u32 %v6410_v25, %v5650_v26 }
 0x53a   :  { %v7583_v35 = vor.u32 %v6407_v46, %v5624_v42  ;;  %1956 = vmatpush.bf16.msra.mxu1 %v7575_v37  ;;  %1969 = vmatpush.bf16.msra.mxu2 %v7577_v38  ;;  %v5618_v25 = vld [vmem:[#allocation7 + $0x118] sm:$0xf0] }
 0x53b   :  { %6648 = vtanh.f32 %v1327_v47  ;;  %1982 = vmatpush.bf16.msra.mxu3 %v7580_v12  ;;  %v7615_v42 = vor.u32 %v6402_v13, %v5618_v25 }
 0x53c   :  { %6650 = vtanh.f32 %v1331_v15  ;;  %v6408_v15 = vld [vmem:[#allocation7 + $0x134] sm:$0xf0]  ;;  %1944 = vmatpush.bf16.msra.mxu0 %v7583_v35 }
 0x53d   :  { %v1306_v49 = vpop.f32.mrf.mxu2  ;;  %v1319_v9 = vpop.f32.mrf.mxu3  ;;  %v7589_v19 = vor.u32 %v6408_v15, %v5632_v60  ;;  %v5461_v60 = vld [vmem:[%s9037_s3 + $0x4] sm:$0xf] }
 0x53e   :  { %v1325_v45 = vadd.f32 %v1306_v49, %v1267_v43  ;;  %v1326_v50 = vadd.f32 %v1319_v9, %v1268_v21  ;;  %v1282_v51 = vpop.f32.mrf.mxu0  ;;  %v1295_v62 = vpop.f32.mrf.mxu1  ;;  %v7598_v9 = vor.u32 %v6406_v22, %v5634_v31  ;;  %1957 = vmatpush.bf16.msra.mxu1 %v7587_v16  ;;  %v7634_v15 = vperm.slane %v5461_v60, 0 }
 0x53f   :  { %1970 = vmatpush.bf16.msra.mxu2 %v7589_v19  ;;  %v6401_v51 = vld [vmem:[#allocation7 + $0x104] sm:$0xf]  ;;  %v5610_v62 = vld [vmem:[#allocation7 + $0x110] sm:$0xf0] }
 0x540   :  { %6652 = vtanh.f32 %v1325_v45  ;;  %v1336_v18 = vmul.f32 0.5, %v1326_v50  ;;  %v6403_v45 = vld [vmem:[#allocation7 + $0x10c] sm:$0xf0]  ;;  %1983 = vmatpush.bf16.msra.mxu3 %v7598_v9  ;;  %v7605_v4 = vor.u32 %v6401_v51, %v5610_v62 }
 0x541   :  { %v6649_v36 = vpop.eup %6648  ;;  %v7603_v50 = vor.u32 %v6403_v45, %v5608_v57 }
 0x542   :  { %v6651_v6 = vpop.eup %6650  ;;  %v1329_v7 = vmul.f32 0.5, %v6649_v36  ;;  %6654 = vtanh.f32 %v1336_v18  ;;  %1958 = vmatpush.bf16.msra.mxu1 %v7605_v4 }
 0x543   :  { %v1333_v47 = vmul.f32 0.5, %v6651_v6  ;;  %1945 = vmatpush.bf16.msra.mxu0 %v7603_v50 }
 0x544   :  { %v1330_v28 = vadd.f32 0.5, %v1329_v7  ;;  %1984 = vmatpush.bf16.msra.mxu3 %v7615_v42 }
 0x545   :  { %v1334_v34 = vadd.f32 0.5, %v1333_v47  ;;  %v1308_v40 = vpop.f32.mrf.mxu2  ;;  %v1321_v32 = vpop.f32.mrf.mxu3 }
 0x546   :  { %v6653_v55 = vpop.eup %6652  ;;  %v7591_v43 = vpop.f32.mrf.mxu0  ;;  %2038 = vmatpush.bf16.msrb.mxu1 %v7506_v48 }
 0x547   :  { %v7593_v21 = vpop.f32.mrf.mxu1  ;;  %v1341_v33 = vmul.f32 %v1334_v34, %v7495_v5  ;;  %v1342_v49 = vmul.f32 %v6653_v55, %v1330_v28  ;;  %v5616_v5 = vld [vmem:[#allocation7 + $0x108] sm:$0xf]  ;;  %2025 = vmatpush.bf16.msrb.mxu0 %v7504_v61  ;;  %v7636_v28 = vperm.slane %v5461_v60, 1 }
 0x548   :  { %v6655_v2 = vpop.eup %6654  ;;  %v7608_v18 = vor.u32 %v6404_v10, %v5616_v5  ;;  %2064 = vmatpush.bf16.msrb.mxu3 %v7511_v44 }
 0x549   :  { %v1343_v58 = vadd.f32 %v1342_v49, %v1341_v33  ;;  %v1338_v14 = vmul.f32 0.5, %v6655_v2  ;;  %v7656_v49 = vperm.slane %v5461_v60, 2  ;;  %v7658_v2 = vperm.slane %v5461_v60, 3 }
 0x54a   :  { %1971 = vmatpush.bf16.msra.mxu2 %v7608_v18  ;;  %2039 = vmatpush.bf16.msrb.mxu1 %v7524_v52 }
 0x54b   :  { %6656 = vtanh.f32 %v1343_v58  ;;  %v1339_v6 = vadd.f32 0.5, %v1338_v14  ;;  %2026 = vmatpush.bf16.msrb.mxu0 %v7522_v41 }
 0x54c   :  { %2065 = vmatpush.bf16.msrb.mxu3 %v7531_v0 }
 0x54d   :  { %v7610_v26 = vpop.f32.mrf.mxu2  ;;  %v7612_v36 = vpop.f32.mrf.mxu3 }
 0x54e   :  { %v7618_v46 = vpop.f32.mrf.mxu0  ;;  %2051 = vmatpush.bf16.msrb.mxu2 %v7508_v39  ;;  %2040 = vmatpush.bf16.msrb.mxu1 %v7538_v53 }
 0x54f   :  { %v7620_v59 = vpop.f32.mrf.mxu1  ;;  %2027 = vmatpush.bf16.msrb.mxu0 %v7536_v30 }
 0x550   :  { %2066 = vmatpush.bf16.msrb.mxu3 %v7543_v8 }
 0x551   :  { %v6657_v7 = vpop.eup %6656 }
 0x552   :  { %v1345_v17 = vmul.f32 %v6657_v7, %v1339_v6  ;;  %2052 = vmatpush.bf16.msrb.mxu2 %v7526_v56  ;;  %2041 = vmatpush.bf16.msrb.mxu1 %v7549_v27 }
 0x553   :  { %2028 = vmatpush.bf16.msrb.mxu0 %v7547_v23 }
 0x554   :  { %v1348_v47 = vpack.c.bf16 %v1345_v17, %v1345_v17  ;;  %2067 = vmatpush.bf16.msrb.mxu3 %v7554_v1 }
 0x555   :  { %v7638_v34 = vpop.f32.mrf.mxu2  ;;  %v7640_v40 = vpop.f32.mrf.mxu3 }
 0x556   :  { %5460 = vst [vmem:[%s9038_s4 + $0x1c] sm:$0xf] %v1348_v47  ;;  %v1634_v32 = vpop.f32.mrf.mxu0  ;;  %2053 = vmatpush.bf16.msrb.mxu2 %v7540_v54  ;;  %2042 = vmatpush.bf16.msrb.mxu1 %v7563_v20 }
 0x557   :  { %v1663_v55 = vpop.f32.mrf.mxu1  ;;  %v1635_v22 = vadd.f32 %v1634_v32, %v7634_v15  ;;  %2029 = vmatpush.bf16.msrb.mxu0 %v7559_v11 }
 0x558   :  { %v1664_v31 = vadd.f32 %v1663_v55, %v7636_v28  ;;  %2068 = vmatpush.bf16.msrb.mxu3 %v7568_v63 }
 0x55a   :  { %v7651_v33 = vpack.c.bf16 %v1664_v31, %v1635_v22  ;;  %2054 = vmatpush.bf16.msrb.mxu2 %v7552_v29  ;;  %2043 = vmatpush.bf16.msrb.mxu1 %v7575_v37 }
 0x55b   :  { %2030 = vmatpush.bf16.msrb.mxu0 %v7571_v24 }
 0x55c   :  { %2069 = vmatpush.bf16.msrb.mxu3 %v7580_v12 }
 0x55d   :  { %v1692_v58 = vpop.f32.mrf.mxu2  ;;  %v1721_v57 = vpop.f32.mrf.mxu3  ;;  %v6436_v45 = vld [vmem:[%s9038_s4 + $0x18] sm:$0xff] }
 0x55e   :  { %v1693_v51 = vadd.f32 %v1692_v58, %v7656_v49  ;;  %v1722_v62 = vadd.f32 %v1721_v57, %v7658_v2  ;;  %v7667_v5 = vpop.f32.mrf.mxu0  ;;  %1643 = vmatmul.bf16.gmra.mxu0 %v6436_v45  ;;  %1672 = vmatmul.bf16.gmra.mxu1 %v6436_v45  ;;  %v9081_v58 = vmov 0.0|0.0  }
 0x55f   :  { %9075 = vst [vmem:[#allocation11_spill] sm:$0xff] %v7667_v5  ;;  %v7669_v10 = vpop.f32.mrf.mxu1  ;;  %1701 = vmatmul.bf16.gmra.mxu2 %v6436_v45  ;;  %1730 = vmatmul.bf16.gmra.mxu3 %v6436_v45 }
 0x560   :  { %9076 = vst [vmem:[#allocation12_spill] sm:$0xff] %v7669_v10  ;;  %v7672_v13 = vpack.c.bf16 %v1722_v62, %v1693_v51  ;;  %2055 = vmatpush.bf16.msrb.mxu2 %v7565_v3  ;;  %2031 = vmatpush.bf16.msrb.mxu0 %v7583_v35 }
 0x561   :  { %2044 = vmatpush.bf16.msrb.mxu1 %v7587_v16  ;;  %2070 = vmatpush.bf16.msrb.mxu3 %v7598_v9 }
 0x562   :  { %9077 = vst [vmem:[#allocation13_spill] sm:$0xff] %v7672_v13 }
 0x564   :  { %2056 = vmatpush.bf16.msrb.mxu2 %v7577_v38  ;;  %2032 = vmatpush.bf16.msrb.mxu0 %v7603_v50 }
 0x565   :  { %v7678_v14 = vpop.f32.mrf.mxu2  ;;  %v7680_v25 = vpop.f32.mrf.mxu3  ;;  %2045 = vmatpush.bf16.msrb.mxu1 %v7605_v4  ;;  %2071 = vmatpush.bf16.msrb.mxu3 %v7615_v42 }
 0x566   :  { %9078 = vst [vmem:[#allocation14_spill] sm:$0xff] %v7678_v14  ;;  %v1639_v6 = vpop.f32.mrf.mxu0 }
 0x567   :  { %9079 = vst [vmem:[#allocation15_spill] sm:$0xff] %v7680_v25  ;;  %v1668_v7 = vpop.f32.mrf.mxu1  ;;  %v1640_v17 = vadd.f32 %v1639_v6, %v7634_v15 }
 0x568   :  { %v1669_v60 = vadd.f32 %v1668_v7, %v7636_v28  ;;  %2057 = vmatpush.bf16.msrb.mxu2 %v7589_v19 }
 0x56a   :  { %v7688_v47 = vpack.c.bf16 %v1669_v60, %v1640_v17 }
 0x56c   :  { %9080 = vst [vmem:[#allocation16_spill] sm:$0xff] %v7688_v47  ;;  %2058 = vmatpush.bf16.msrb.mxu2 %v7608_v18 }
 0x56d   :  { %v1697_v32 = vpop.f32.mrf.mxu2  ;;  %v1726_v55 = vpop.f32.mrf.mxu3 }
 0x56e   :  { %v1698_v22 = vadd.f32 %v1697_v32, %v7656_v49  ;;  %v1727_v31 = vadd.f32 %v1726_v55, %v7658_v2  ;;  %1946 = vmatmul.bf16.vlgmr.msra.gmra.mxu0 %v9081_v58  ;;  %1959 = vmatmul.bf16.vlgmr.msra.gmra.mxu1 %v9081_v58  ;;  %v7736_v45 = vpop.f32.mrf.mxu0 }
 0x56f   :  { %1972 = vmatmul.bf16.vlgmr.msra.gmra.mxu2 %v9081_v58  ;;  %1985 = vmatmul.bf16.vlgmr.msra.gmra.mxu3 %v9081_v58  ;;  %9083 = vst [vmem:[#allocation18_spill] sm:$0xff] %v7736_v45  ;;  %v7738_v51 = vpop.f32.mrf.mxu1 }
 0x570   :  { %v7700_v57 = vpack.c.bf16 %v1727_v31, %v1698_v22  ;;  %2112 = vmatpush.bf16.msra.mxu0 %v7504_v61  ;;  %2125 = vmatpush.bf16.msra.mxu1 %v7506_v48  ;;  %9084 = vst [vmem:[#allocation19_spill] sm:$0xff] %v7738_v51  ;;  %v1630_v22 = vadd.f32 %v7591_v43, %v7634_v15 }
 0x571   :  { %2138 = vmatpush.bf16.msra.mxu2 %v7508_v39  ;;  %2151 = vmatpush.bf16.msra.mxu3 %v7511_v44  ;;  %v1659_v31 = vadd.f32 %v7593_v21, %v7636_v28  ;;  %v1717_v43 = vadd.f32 %v7612_v36, %v7658_v2 }
 0x572   :  { %9082 = vst [vmem:[#allocation17_spill] sm:$0xff] %v7700_v57 }
 0x574   :  { %2113 = vmatpush.bf16.msra.mxu0 %v7522_v41  ;;  %2126 = vmatpush.bf16.msra.mxu1 %v7524_v52 }
 0x575   :  { %2139 = vmatpush.bf16.msra.mxu2 %v7526_v56  ;;  %2152 = vmatpush.bf16.msra.mxu3 %v7531_v0  ;;  %v7740_v62 = vpop.f32.mrf.mxu2  ;;  %v7742_v6 = vpop.f32.mrf.mxu3 }
 0x576   :  { %9085 = vst [vmem:[#allocation20_spill] sm:$0xff] %v7740_v62 }
 0x577   :  { %9086 = vst [vmem:[#allocation21_spill] sm:$0xff] %v7742_v6 }
 0x578   :  { %2114 = vmatpush.bf16.msra.mxu0 %v7536_v30  ;;  %2127 = vmatpush.bf16.msra.mxu1 %v7538_v53 }
 0x579   :  { %2140 = vmatpush.bf16.msra.mxu2 %v7540_v54  ;;  %2153 = vmatpush.bf16.msra.mxu3 %v7543_v8 }
 0x57c   :  { %2115 = vmatpush.bf16.msra.mxu0 %v7547_v23  ;;  %2128 = vmatpush.bf16.msra.mxu1 %v7549_v27 }
 0x57d   :  { %2141 = vmatpush.bf16.msra.mxu2 %v7552_v29  ;;  %2154 = vmatpush.bf16.msra.mxu3 %v7554_v1 }
 0x580   :  { %2116 = vmatpush.bf16.msra.mxu0 %v7559_v11  ;;  %2129 = vmatpush.bf16.msra.mxu1 %v7563_v20 }
 0x581   :  { %2142 = vmatpush.bf16.msra.mxu2 %v7565_v3  ;;  %2155 = vmatpush.bf16.msra.mxu3 %v7568_v63 }
 0x584   :  { %2117 = vmatpush.bf16.msra.mxu0 %v7571_v24  ;;  %2130 = vmatpush.bf16.msra.mxu1 %v7575_v37 }
 0x585   :  { %2143 = vmatpush.bf16.msra.mxu2 %v7577_v38  ;;  %2156 = vmatpush.bf16.msra.mxu3 %v7580_v12 }
 0x588   :  { %2118 = vmatpush.bf16.msra.mxu0 %v7583_v35  ;;  %2131 = vmatpush.bf16.msra.mxu1 %v7587_v16 }
 0x589   :  { %2144 = vmatpush.bf16.msra.mxu2 %v7589_v19  ;;  %2157 = vmatpush.bf16.msra.mxu3 %v7598_v9 }
 0x58c   :  { %2119 = vmatpush.bf16.msra.mxu0 %v7603_v50  ;;  %2132 = vmatpush.bf16.msra.mxu1 %v7605_v4 }
 0x58d   :  { %2145 = vmatpush.bf16.msra.mxu2 %v7608_v18  ;;  %2158 = vmatpush.bf16.msra.mxu3 %v7615_v42 }
 0x5db   :  { %v1644_v7 = vpop.f32.mrf.mxu0  ;;  %v1673_v17 = vpop.f32.mrf.mxu1 }
 0x5dc   :  { %v1645_v60 = vadd.f32 %v1644_v7, %v7634_v15  ;;  %v1674_v32 = vadd.f32 %v1673_v17, %v7636_v28  ;;  %v1736_v17 = vpack.c.bf16 %v1659_v31, %v1630_v22 }
 0x5de   :  { %v7746_v55 = vpack.c.bf16 %v1674_v32, %v1645_v60  ;;  %v1688_v60 = vadd.f32 %v7610_v26, %v7656_v49 }
 0x5e0   :  { %9087 = vst [vmem:[#allocation22_spill] sm:$0xff] %v7746_v55  ;;  %v1773_v55 = vunpack.c.h.bf16 %v1736_v17 }
 0x5e2   :  { %v1702_v58 = vpop.f32.mrf.mxu2  ;;  %v1731_v51 = vpop.f32.mrf.mxu3 }
 0x5e3   :  { %v1703_v62 = vadd.f32 %v1702_v58, %v7656_v49  ;;  %v1732_v6 = vadd.f32 %v1731_v51, %v7658_v2  ;;  %v7754_v45 = vpop.f32.mrf.mxu0  ;;  %v7756_v57 = vpop.f32.mrf.mxu1  ;;  %v1772_v58 = vunpack.c.l.bf16 %v1736_v17 }
 0x5e4   :  { %9088 = vst [vmem:[#allocation23_spill] sm:$0xff] %v7754_v45 }
 0x5e5   :  { %9089 = vst [vmem:[#allocation24_spill] sm:$0xff] %v7756_v57  ;;  %v7758_v7 = vpack.c.bf16 %v1732_v6, %v1703_v62  ;;  %v1737_v57 = vpack.c.bf16 %v1717_v43, %v1688_v60 }
 0x5e7   :  { %9090 = vst [vmem:[#allocation25_spill] sm:$0xff] %v7758_v7  ;;  %v1774_v22 = vunpack.c.l.bf16 %v1737_v57  ;;  %v1775_v26 = vunpack.c.h.bf16 %v1737_v57 }
 0x5ea   :  { %v7764_v21 = vpop.f32.mrf.mxu2  ;;  %v7766_v32 = vpop.f32.mrf.mxu3 }
 0x5eb   :  { %9091 = vst [vmem:[#allocation26_spill] sm:$0xff] %v7764_v21  ;;  %v1947_v51 = vpop.f32.mrf.mxu0  ;;  %v1960_v47 = vpop.f32.mrf.mxu1 }
 0x5ec   :  { %9092 = vst [vmem:[#allocation27_spill] sm:$0xff] %v7766_v32  ;;  %v1990_v45 = vadd.f32 %v1947_v51, %v1772_v58  ;;  %v1991_v25 = vadd.f32 %v1960_v47, %v1773_v55 }
 0x5ee   :  { %v1994_v62 = vmul.f32 0.5, %v1990_v45  ;;  %v1998_v6 = vmul.f32 0.5, %v1991_v25 }
 0x5f0   :  { %6658 = vtanh.f32 %v1994_v62 }
 0x5f1   :  { %6660 = vtanh.f32 %v1998_v6 }
 0x5f2   :  { %v1973_v31 = vpop.f32.mrf.mxu2  ;;  %v1986_v7 = vpop.f32.mrf.mxu3 }
 0x5f3   :  { %v1992_v36 = vadd.f32 %v1973_v31, %v1774_v22  ;;  %v1993_v14 = vadd.f32 %v1986_v7, %v1775_v26  ;;  %v1949_v21 = vpop.f32.mrf.mxu0  ;;  %v1962_v10 = vpop.f32.mrf.mxu1  ;;  %v1690_v22 = vadd.f32 %v7638_v34, %v7656_v49  ;;  %v1719_v26 = vadd.f32 %v7640_v40, %v7658_v2 }
 0x5f5   :  { %6662 = vtanh.f32 %v1992_v36  ;;  %v2003_v32 = vmul.f32 0.5, %v1993_v14 }
 0x5f6   :  { %v6659_v17 = vpop.eup %6658 }
 0x5f7   :  { %v6661_v5 = vpop.eup %6660  ;;  %v1996_v13 = vmul.f32 0.5, %v6659_v17  ;;  %6664 = vtanh.f32 %v2003_v32 }
 0x5f8   :  { %v2000_v58 = vmul.f32 0.5, %v6661_v5  ;;  %v1632_v5 = vadd.f32 %v7618_v46, %v7634_v15 }
 0x5f9   :  { %v1997_v47 = vadd.f32 0.5, %v1996_v13  ;;  %v1661_v13 = vadd.f32 %v7620_v59, %v7636_v28 }
 0x5fa   :  { %v2001_v45 = vadd.f32 0.5, %v2000_v58  ;;  %v1975_v25 = vpop.f32.mrf.mxu2  ;;  %v1988_v55 = vpop.f32.mrf.mxu3 }
 0x5fb   :  { %v6663_v60 = vpop.eup %6662  ;;  %v1738_v32 = vpack.c.bf16 %v1661_v13, %v1632_v5  ;;  %v1739_v25 = vpack.c.bf16 %v1719_v26, %v1690_v22 }
 0x5fc   :  { %v2008_v43 = vmul.f32 0.0, %v2001_v45  ;;  %v2009_v57 = vmul.f32 %v6663_v60, %v1997_v47 }
 0x5fd   :  { %v6665_v51 = vpop.eup %6664  ;;  %v2019_v31 = vunpack.c.l.bf16 %v1738_v32  ;;  %v2020_v36 = vunpack.c.h.bf16 %v1738_v32  ;;  %v2021_v46 = vunpack.c.l.bf16 %v1739_v25  ;;  %v2022_v59 = vunpack.c.h.bf16 %v1739_v25 }
 0x5fe   :  { %v7768_v62 = vadd.f32 %v2009_v57, %v2008_v43  ;;  %v2005_v10 = vmul.f32 0.5, %v6665_v51 }
 0x600   :  { %6666 = vtanh.f32 %v7768_v62  ;;  %v2006_v7 = vadd.f32 0.5, %v2005_v10 }
 0x606   :  { %v6667_v14 = vpop.eup %6666 }
 0x607   :  { %v2012_v21 = vmul.f32 %v6667_v14, %v2006_v7 }
 0x609   :  { %v2015_v6 = vpack.c.bf16 %v2012_v21, %v2012_v21 }
 0x60b   :  { %2016 = vst [vmem:[%s9038_s4] sm:$0xf] %v2015_v6  ;;  %2033 = vmatmul.bf16.vlgmr.msrb.gmra.mxu0 %v2015_v6  ;;  %2046 = vmatmul.bf16.vlgmr.msrb.gmra.mxu1 %v2015_v6 }
 0x60c   :  { %2059 = vmatmul.bf16.vlgmr.msrb.gmra.mxu2 %v2015_v6  ;;  %2072 = vmatmul.bf16.vlgmr.msrb.gmra.mxu3 %v2015_v6 }
 0x60d   :  { %2199 = vmatpush.bf16.msrb.mxu0 %v7504_v61  ;;  %2212 = vmatpush.bf16.msrb.mxu1 %v7506_v48 }
 0x60e   :  { %2225 = vmatpush.bf16.msrb.mxu2 %v7508_v39  ;;  %2238 = vmatpush.bf16.msrb.mxu3 %v7511_v44 }
 0x611   :  { %2200 = vmatpush.bf16.msrb.mxu0 %v7522_v41  ;;  %2213 = vmatpush.bf16.msrb.mxu1 %v7524_v52 }
 0x612   :  { %2226 = vmatpush.bf16.msrb.mxu2 %v7526_v56  ;;  %2239 = vmatpush.bf16.msrb.mxu3 %v7531_v0 }
 0x615   :  { %2201 = vmatpush.bf16.msrb.mxu0 %v7536_v30  ;;  %2214 = vmatpush.bf16.msrb.mxu1 %v7538_v53 }
 0x616   :  { %2227 = vmatpush.bf16.msrb.mxu2 %v7540_v54  ;;  %2240 = vmatpush.bf16.msrb.mxu3 %v7543_v8 }
 0x619   :  { %2202 = vmatpush.bf16.msrb.mxu0 %v7547_v23  ;;  %2215 = vmatpush.bf16.msrb.mxu1 %v7549_v27 }
 0x61a   :  { %2228 = vmatpush.bf16.msrb.mxu2 %v7552_v29  ;;  %2241 = vmatpush.bf16.msrb.mxu3 %v7554_v1 }
 0x61d   :  { %2203 = vmatpush.bf16.msrb.mxu0 %v7559_v11  ;;  %2216 = vmatpush.bf16.msrb.mxu1 %v7563_v20 }
 0x61e   :  { %2229 = vmatpush.bf16.msrb.mxu2 %v7565_v3  ;;  %2242 = vmatpush.bf16.msrb.mxu3 %v7568_v63 }
 0x621   :  { %2204 = vmatpush.bf16.msrb.mxu0 %v7571_v24  ;;  %2217 = vmatpush.bf16.msrb.mxu1 %v7575_v37 }
 0x622   :  { %2230 = vmatpush.bf16.msrb.mxu2 %v7577_v38  ;;  %2243 = vmatpush.bf16.msrb.mxu3 %v7580_v12 }
 0x625   :  { %2205 = vmatpush.bf16.msrb.mxu0 %v7583_v35  ;;  %2218 = vmatpush.bf16.msrb.mxu1 %v7587_v16 }
 0x626   :  { %2231 = vmatpush.bf16.msrb.mxu2 %v7589_v19  ;;  %2244 = vmatpush.bf16.msrb.mxu3 %v7598_v9 }
 0x629   :  { %2206 = vmatpush.bf16.msrb.mxu0 %v7603_v50  ;;  %2219 = vmatpush.bf16.msrb.mxu1 %v7605_v4 }
 0x62a   :  { %2232 = vmatpush.bf16.msrb.mxu2 %v7608_v18  ;;  %2245 = vmatpush.bf16.msrb.mxu3 %v7615_v42 }
 0x688   :  { %v2034_v17 = vpop.f32.mrf.mxu0  ;;  %v2047_v58 = vpop.f32.mrf.mxu1 }
 0x689   :  { %v2077_v47 = vadd.f32 %v2034_v17, %v2019_v31  ;;  %v2078_v45 = vadd.f32 %v2047_v58, %v2020_v36 }
 0x68b   :  { %v2081_v55 = vmul.f32 0.5, %v2077_v47  ;;  %v2085_v60 = vmul.f32 0.5, %v2078_v45 }
 0x68d   :  { %6668 = vtanh.f32 %v2081_v55 }
 0x68e   :  { %6670 = vtanh.f32 %v2085_v60 }
 0x68f   :  { %v2060_v43 = vpop.f32.mrf.mxu2  ;;  %v2073_v57 = vpop.f32.mrf.mxu3 }
 0x690   :  { %v2079_v51 = vadd.f32 %v2060_v43, %v2021_v46  ;;  %v2080_v34 = vadd.f32 %v2073_v57, %v2022_v59  ;;  %v2036_v10 = vpop.f32.mrf.mxu0  ;;  %v2049_v7 = vpop.f32.mrf.mxu1  ;;  %v2107_v59 = vunpack.c.h.bf16 %v7651_v33 }
 0x692   :  { %6672 = vtanh.f32 %v2079_v51  ;;  %v2090_v40 = vmul.f32 0.5, %v2080_v34 }
 0x693   :  { %v6669_v14 = vpop.eup %6668 }
 0x694   :  { %v6671_v21 = vpop.eup %6670  ;;  %v2083_v6 = vmul.f32 0.5, %v6669_v14  ;;  %6674 = vtanh.f32 %v2090_v40  ;;  %v9093_v40 = vld [vmem:[#allocation13_spill] sm:$0xff] }
 0x695   :  { %v2087_v5 = vmul.f32 0.5, %v6671_v21  ;;  %v2108_v14 = vunpack.c.l.bf16 %v9093_v40  ;;  %v2109_v21 = vunpack.c.h.bf16 %v9093_v40 }
 0x696   :  { %v2084_v13 = vadd.f32 0.5, %v2083_v6 }
 0x697   :  { %v2088_v32 = vadd.f32 0.5, %v2087_v5  ;;  %v2062_v22 = vpop.f32.mrf.mxu2  ;;  %v2075_v26 = vpop.f32.mrf.mxu3 }
 0x698   :  { %v6673_v31 = vpop.eup %6672 }
 0x699   :  { %v2095_v36 = vmul.f32 %v2088_v32, %v7768_v62  ;;  %v2096_v17 = vmul.f32 %v6673_v31, %v2084_v13  ;;  %v2106_v62 = vunpack.c.l.bf16 %v7651_v33 }
 0x69a   :  { %v6675_v58 = vpop.eup %6674 }
 0x69b   :  { %v7815_v47 = vadd.f32 %v2096_v17, %v2095_v36  ;;  %v2092_v45 = vmul.f32 0.5, %v6675_v58 }
 0x69d   :  { %6676 = vtanh.f32 %v7815_v47  ;;  %v2093_v25 = vadd.f32 0.5, %v2092_v45 }
 0x6a3   :  { %v6677_v55 = vpop.eup %6676 }
 0x6a4   :  { %v2099_v60 = vmul.f32 %v6677_v55, %v2093_v25 }
 0x6a6   :  { %v2102_v46 = vpack.c.bf16 %v2099_v60, %v2099_v60 }
 0x6a8   :  { %5734 = vst [vmem:[%s9038_s4 + $0x4] sm:$0xf] %v2102_v46  ;;  %2120 = vmatmul.bf16.vlgmr.msra.gmra.mxu0 %v2102_v46  ;;  %2133 = vmatmul.bf16.vlgmr.msra.gmra.mxu1 %v2102_v46 }
 0x6a9   :  { %2146 = vmatmul.bf16.vlgmr.msra.gmra.mxu2 %v2102_v46  ;;  %2159 = vmatmul.bf16.vlgmr.msra.gmra.mxu3 %v2102_v46 }
 0x6aa   :  { %2286 = vmatpush.bf16.msra.mxu0 %v7504_v61  ;;  %2299 = vmatpush.bf16.msra.mxu1 %v7506_v48 }
 0x6ab   :  { %2312 = vmatpush.bf16.msra.mxu2 %v7508_v39  ;;  %2325 = vmatpush.bf16.msra.mxu3 %v7511_v44 }
 0x6ae   :  { %2287 = vmatpush.bf16.msra.mxu0 %v7522_v41  ;;  %2300 = vmatpush.bf16.msra.mxu1 %v7524_v52 }
 0x6af   :  { %2313 = vmatpush.bf16.msra.mxu2 %v7526_v56  ;;  %2326 = vmatpush.bf16.msra.mxu3 %v7531_v0 }
 0x6b2   :  { %2288 = vmatpush.bf16.msra.mxu0 %v7536_v30  ;;  %2301 = vmatpush.bf16.msra.mxu1 %v7538_v53 }
 0x6b3   :  { %2314 = vmatpush.bf16.msra.mxu2 %v7540_v54  ;;  %2327 = vmatpush.bf16.msra.mxu3 %v7543_v8 }
 0x6b6   :  { %2289 = vmatpush.bf16.msra.mxu0 %v7547_v23  ;;  %2302 = vmatpush.bf16.msra.mxu1 %v7549_v27 }
 0x6b7   :  { %2315 = vmatpush.bf16.msra.mxu2 %v7552_v29  ;;  %2328 = vmatpush.bf16.msra.mxu3 %v7554_v1 }
 0x6ba   :  { %2290 = vmatpush.bf16.msra.mxu0 %v7559_v11  ;;  %2303 = vmatpush.bf16.msra.mxu1 %v7563_v20 }
 0x6bb   :  { %2316 = vmatpush.bf16.msra.mxu2 %v7565_v3  ;;  %2329 = vmatpush.bf16.msra.mxu3 %v7568_v63 }
 0x6be   :  { %2291 = vmatpush.bf16.msra.mxu0 %v7571_v24  ;;  %2304 = vmatpush.bf16.msra.mxu1 %v7575_v37 }
 0x6bf   :  { %2317 = vmatpush.bf16.msra.mxu2 %v7577_v38  ;;  %2330 = vmatpush.bf16.msra.mxu3 %v7580_v12 }
 0x6c2   :  { %2292 = vmatpush.bf16.msra.mxu0 %v7583_v35  ;;  %2305 = vmatpush.bf16.msra.mxu1 %v7587_v16 }
 0x6c3   :  { %2318 = vmatpush.bf16.msra.mxu2 %v7589_v19  ;;  %2331 = vmatpush.bf16.msra.mxu3 %v7598_v9 }
 0x6c6   :  { %2293 = vmatpush.bf16.msra.mxu0 %v7603_v50  ;;  %2306 = vmatpush.bf16.msra.mxu1 %v7605_v4 }
 0x6c7   :  { %2319 = vmatpush.bf16.msra.mxu2 %v7608_v18  ;;  %2332 = vmatpush.bf16.msra.mxu3 %v7615_v42 }
 0x725   :  { %v2121_v43 = vpop.f32.mrf.mxu0  ;;  %v2134_v57 = vpop.f32.mrf.mxu1 }
 0x726   :  { %v2164_v51 = vadd.f32 %v2121_v43, %v2106_v62  ;;  %v2165_v34 = vadd.f32 %v2134_v57, %v2107_v59 }
 0x728   :  { %v2168_v10 = vmul.f32 0.5, %v2164_v51  ;;  %v2172_v7 = vmul.f32 0.5, %v2165_v34 }
 0x72a   :  { %6678 = vtanh.f32 %v2168_v10 }
 0x72b   :  { %6680 = vtanh.f32 %v2172_v7 }
 0x72c   :  { %v2147_v6 = vpop.f32.mrf.mxu2  ;;  %v2160_v5 = vpop.f32.mrf.mxu3 }
 0x72d   :  { %v2166_v13 = vadd.f32 %v2147_v6, %v2108_v14  ;;  %v2167_v32 = vadd.f32 %v2160_v5, %v2109_v21  ;;  %v2123_v22 = vpop.f32.mrf.mxu0  ;;  %v2136_v26 = vpop.f32.mrf.mxu1  ;;  %v9095_v21 = vld [vmem:[#allocation12_spill] sm:$0xff] }
 0x72e   :  { %v1666_v6 = vadd.f32 %v9095_v21, %v7636_v28  ;;  %v9097_v22 = vld [vmem:[#allocation15_spill] sm:$0xff] }
 0x72f   :  { %6682 = vtanh.f32 %v2166_v13  ;;  %v2177_v33 = vmul.f32 0.5, %v2167_v32  ;;  %v9096_v13 = vld [vmem:[#allocation14_spill] sm:$0xff]  ;;  %v1724_v26 = vadd.f32 %v9097_v22, %v7658_v2 }
 0x730   :  { %v6679_v31 = vpop.eup %6678  ;;  %v1695_v32 = vadd.f32 %v9096_v13, %v7656_v49 }
 0x731   :  { %v6681_v36 = vpop.eup %6680  ;;  %v2170_v17 = vmul.f32 0.5, %v6679_v31  ;;  %6684 = vtanh.f32 %v2177_v33 }
 0x732   :  { %v2174_v58 = vmul.f32 0.5, %v6681_v36 }
 0x733   :  { %v2171_v45 = vadd.f32 0.5, %v2170_v17 }
 0x734   :  { %v2175_v25 = vadd.f32 0.5, %v2174_v58  ;;  %v2149_v55 = vpop.f32.mrf.mxu2  ;;  %v2162_v60 = vpop.f32.mrf.mxu3 }
 0x735   :  { %v6683_v46 = vpop.eup %6682 }
 0x736   :  { %v2182_v62 = vmul.f32 %v2175_v25, %v7815_v47  ;;  %v2183_v59 = vmul.f32 %v6683_v46, %v2171_v45  ;;  %v9094_v47 = vld [vmem:[#allocation11_spill] sm:$0xff]  ;;  %v1743_v25 = vpack.c.bf16 %v1724_v26, %v1695_v32 }
 0x737   :  { %v6685_v43 = vpop.eup %6684  ;;  %v1637_v14 = vadd.f32 %v9094_v47, %v7634_v15 }
 0x738   :  { %v7858_v57 = vadd.f32 %v2183_v59, %v2182_v62  ;;  %v2179_v51 = vmul.f32 0.5, %v6685_v43  ;;  %v2195_v46 = vunpack.c.l.bf16 %v1743_v25  ;;  %v2196_v62 = vunpack.c.h.bf16 %v1743_v25 }
 0x739   :  { %v1742_v5 = vpack.c.bf16 %v1666_v6, %v1637_v14 }
 0x73a   :  { %6686 = vtanh.f32 %v7858_v57  ;;  %v2180_v34 = vadd.f32 0.5, %v2179_v51 }
 0x73b   :  { %v2193_v33 = vunpack.c.l.bf16 %v1742_v5  ;;  %v2194_v31 = vunpack.c.h.bf16 %v1742_v5 }
 0x740   :  { %v6687_v10 = vpop.eup %6686 }
 0x741   :  { %v2186_v7 = vmul.f32 %v6687_v10, %v2180_v34 }
 0x743   :  { %v2189_v40 = vpack.c.bf16 %v2186_v7, %v2186_v7 }
 0x745   :  { %5735 = vst [vmem:[%s9038_s4 + $0x8] sm:$0xf] %v2189_v40  ;;  %2207 = vmatmul.bf16.vlgmr.msrb.gmra.mxu0 %v2189_v40  ;;  %2220 = vmatmul.bf16.vlgmr.msrb.gmra.mxu1 %v2189_v40 }
 0x746   :  { %2233 = vmatmul.bf16.vlgmr.msrb.gmra.mxu2 %v2189_v40  ;;  %2246 = vmatmul.bf16.vlgmr.msrb.gmra.mxu3 %v2189_v40 }
 0x747   :  { %2373 = vmatpush.bf16.msrb.mxu0 %v7504_v61  ;;  %2386 = vmatpush.bf16.msrb.mxu1 %v7506_v48 }
 0x748   :  { %2399 = vmatpush.bf16.msrb.mxu2 %v7508_v39  ;;  %2412 = vmatpush.bf16.msrb.mxu3 %v7511_v44 }
 0x74b   :  { %2374 = vmatpush.bf16.msrb.mxu0 %v7522_v41  ;;  %2387 = vmatpush.bf16.msrb.mxu1 %v7524_v52 }
 0x74c   :  { %2400 = vmatpush.bf16.msrb.mxu2 %v7526_v56  ;;  %2413 = vmatpush.bf16.msrb.mxu3 %v7531_v0 }
 0x74f   :  { %2375 = vmatpush.bf16.msrb.mxu0 %v7536_v30  ;;  %2388 = vmatpush.bf16.msrb.mxu1 %v7538_v53 }
 0x750   :  { %2401 = vmatpush.bf16.msrb.mxu2 %v7540_v54  ;;  %2414 = vmatpush.bf16.msrb.mxu3 %v7543_v8 }
 0x753   :  { %2376 = vmatpush.bf16.msrb.mxu0 %v7547_v23  ;;  %2389 = vmatpush.bf16.msrb.mxu1 %v7549_v27 }
 0x754   :  { %2402 = vmatpush.bf16.msrb.mxu2 %v7552_v29  ;;  %2415 = vmatpush.bf16.msrb.mxu3 %v7554_v1 }
 0x757   :  { %2377 = vmatpush.bf16.msrb.mxu0 %v7559_v11  ;;  %2390 = vmatpush.bf16.msrb.mxu1 %v7563_v20 }
 0x758   :  { %2403 = vmatpush.bf16.msrb.mxu2 %v7565_v3  ;;  %2416 = vmatpush.bf16.msrb.mxu3 %v7568_v63 }
 0x75b   :  { %2378 = vmatpush.bf16.msrb.mxu0 %v7571_v24  ;;  %2391 = vmatpush.bf16.msrb.mxu1 %v7575_v37 }
 0x75c   :  { %2404 = vmatpush.bf16.msrb.mxu2 %v7577_v38  ;;  %2417 = vmatpush.bf16.msrb.mxu3 %v7580_v12 }
 0x75f   :  { %2379 = vmatpush.bf16.msrb.mxu0 %v7583_v35  ;;  %2392 = vmatpush.bf16.msrb.mxu1 %v7587_v16 }
 0x760   :  { %2405 = vmatpush.bf16.msrb.mxu2 %v7589_v19  ;;  %2418 = vmatpush.bf16.msrb.mxu3 %v7598_v9 }
 0x763   :  { %2380 = vmatpush.bf16.msrb.mxu0 %v7603_v50  ;;  %2393 = vmatpush.bf16.msrb.mxu1 %v7605_v4 }
 0x764   :  { %2406 = vmatpush.bf16.msrb.mxu2 %v7608_v18  ;;  %2419 = vmatpush.bf16.msrb.mxu3 %v7615_v42 }
 0x7c2   :  { %v2208_v36 = vpop.f32.mrf.mxu0  ;;  %v2221_v17 = vpop.f32.mrf.mxu1 }
 0x7c3   :  { %v2251_v58 = vadd.f32 %v2208_v36, %v2193_v33  ;;  %v2252_v45 = vadd.f32 %v2221_v17, %v2194_v31 }
 0x7c5   :  { %v2255_v55 = vmul.f32 0.5, %v2251_v58  ;;  %v2259_v60 = vmul.f32 0.5, %v2252_v45 }
 0x7c7   :  { %6688 = vtanh.f32 %v2255_v55 }
 0x7c8   :  { %6690 = vtanh.f32 %v2259_v60 }
 0x7c9   :  { %v2234_v59 = vpop.f32.mrf.mxu2  ;;  %v2247_v43 = vpop.f32.mrf.mxu3 }
 0x7ca   :  { %v2253_v51 = vadd.f32 %v2234_v59, %v2195_v46  ;;  %v2254_v34 = vadd.f32 %v2247_v43, %v2196_v62  ;;  %v2210_v10 = vpop.f32.mrf.mxu0  ;;  %v2223_v7 = vpop.f32.mrf.mxu1 }
 0x7cc   :  { %6692 = vtanh.f32 %v2253_v51  ;;  %v2264_v40 = vmul.f32 0.5, %v2254_v34 }
 0x7cd   :  { %v6689_v47 = vpop.eup %6688 }
 0x7ce   :  { %v6691_v14 = vpop.eup %6690  ;;  %v2257_v21 = vmul.f32 0.5, %v6689_v47  ;;  %6694 = vtanh.f32 %v2264_v40  ;;  %v9099_v40 = vld [vmem:[#allocation17_spill] sm:$0xff] }
 0x7cf   :  { %v2261_v6 = vmul.f32 0.5, %v6691_v14  ;;  %v2282_v47 = vunpack.c.l.bf16 %v9099_v40  ;;  %v2283_v14 = vunpack.c.h.bf16 %v9099_v40 }
 0x7d0   :  { %v2258_v5 = vadd.f32 0.5, %v2257_v21 }
 0x7d1   :  { %v2262_v13 = vadd.f32 0.5, %v2261_v6  ;;  %v2236_v32 = vpop.f32.mrf.mxu2  ;;  %v2249_v22 = vpop.f32.mrf.mxu3 }
 0x7d2   :  { %v6693_v26 = vpop.eup %6692 }
 0x7d3   :  { %v2269_v33 = vmul.f32 %v2262_v13, %v7858_v57  ;;  %v2270_v31 = vmul.f32 %v6693_v26, %v2258_v5  ;;  %v9098_v57 = vld [vmem:[#allocation16_spill] sm:$0xff] }
 0x7d4   :  { %v6695_v36 = vpop.eup %6694  ;;  %v2280_v46 = vunpack.c.l.bf16 %v9098_v57  ;;  %v2281_v62 = vunpack.c.h.bf16 %v9098_v57 }
 0x7d5   :  { %v7905_v17 = vadd.f32 %v2270_v31, %v2269_v33  ;;  %v2266_v58 = vmul.f32 0.5, %v6695_v36 }
 0x7d7   :  { %6696 = vtanh.f32 %v7905_v17  ;;  %v2267_v45 = vadd.f32 0.5, %v2266_v58 }
 0x7dd   :  { %v6697_v25 = vpop.eup %6696 }
 0x7de   :  { %v2273_v55 = vmul.f32 %v6697_v25, %v2267_v45 }
 0x7e0   :  { %v2276_v60 = vpack.c.bf16 %v2273_v55, %v2273_v55 }
 0x7e2   :  { %5736 = vst [vmem:[%s9038_s4 + $0xc] sm:$0xf] %v2276_v60  ;;  %2294 = vmatmul.bf16.vlgmr.msra.gmra.mxu0 %v2276_v60  ;;  %2307 = vmatmul.bf16.vlgmr.msra.gmra.mxu1 %v2276_v60 }
 0x7e3   :  { %2320 = vmatmul.bf16.vlgmr.msra.gmra.mxu2 %v2276_v60  ;;  %2333 = vmatmul.bf16.vlgmr.msra.gmra.mxu3 %v2276_v60 }
 0x7e4   :  { %2460 = vmatpush.bf16.msra.mxu0 %v7504_v61  ;;  %2473 = vmatpush.bf16.msra.mxu1 %v7506_v48 }
 0x7e5   :  { %2486 = vmatpush.bf16.msra.mxu2 %v7508_v39  ;;  %2499 = vmatpush.bf16.msra.mxu3 %v7511_v44 }
 0x7e8   :  { %2461 = vmatpush.bf16.msra.mxu0 %v7522_v41  ;;  %2474 = vmatpush.bf16.msra.mxu1 %v7524_v52 }
 0x7e9   :  { %2487 = vmatpush.bf16.msra.mxu2 %v7526_v56  ;;  %2500 = vmatpush.bf16.msra.mxu3 %v7531_v0 }
 0x7ec   :  { %2462 = vmatpush.bf16.msra.mxu0 %v7536_v30  ;;  %2475 = vmatpush.bf16.msra.mxu1 %v7538_v53 }
 0x7ed   :  { %2488 = vmatpush.bf16.msra.mxu2 %v7540_v54  ;;  %2501 = vmatpush.bf16.msra.mxu3 %v7543_v8 }
 0x7f0   :  { %2463 = vmatpush.bf16.msra.mxu0 %v7547_v23  ;;  %2476 = vmatpush.bf16.msra.mxu1 %v7549_v27 }
 0x7f1   :  { %2489 = vmatpush.bf16.msra.mxu2 %v7552_v29  ;;  %2502 = vmatpush.bf16.msra.mxu3 %v7554_v1 }
 0x7f4   :  { %2464 = vmatpush.bf16.msra.mxu0 %v7559_v11  ;;  %2477 = vmatpush.bf16.msra.mxu1 %v7563_v20 }
 0x7f5   :  { %2490 = vmatpush.bf16.msra.mxu2 %v7565_v3  ;;  %2503 = vmatpush.bf16.msra.mxu3 %v7568_v63 }
 0x7f8   :  { %2465 = vmatpush.bf16.msra.mxu0 %v7571_v24  ;;  %2478 = vmatpush.bf16.msra.mxu1 %v7575_v37 }
 0x7f9   :  { %2491 = vmatpush.bf16.msra.mxu2 %v7577_v38  ;;  %2504 = vmatpush.bf16.msra.mxu3 %v7580_v12 }
 0x7fc   :  { %2466 = vmatpush.bf16.msra.mxu0 %v7583_v35  ;;  %2479 = vmatpush.bf16.msra.mxu1 %v7587_v16 }
 0x7fd   :  { %2492 = vmatpush.bf16.msra.mxu2 %v7589_v19  ;;  %2505 = vmatpush.bf16.msra.mxu3 %v7598_v9 }
 0x800   :  { %2467 = vmatpush.bf16.msra.mxu0 %v7603_v50  ;;  %2480 = vmatpush.bf16.msra.mxu1 %v7605_v4 }
 0x801   :  { %2493 = vmatpush.bf16.msra.mxu2 %v7608_v18  ;;  %2506 = vmatpush.bf16.msra.mxu3 %v7615_v42 }
 0x85f   :  { %v2295_v59 = vpop.f32.mrf.mxu0  ;;  %v2308_v43 = vpop.f32.mrf.mxu1 }
 0x860   :  { %v2338_v51 = vadd.f32 %v2295_v59, %v2280_v46  ;;  %v2339_v34 = vadd.f32 %v2308_v43, %v2281_v62 }
 0x862   :  { %v2342_v10 = vmul.f32 0.5, %v2338_v51  ;;  %v2346_v7 = vmul.f32 0.5, %v2339_v34 }
 0x864   :  { %6698 = vtanh.f32 %v2342_v10 }
 0x865   :  { %6700 = vtanh.f32 %v2346_v7 }
 0x866   :  { %v2321_v21 = vpop.f32.mrf.mxu2  ;;  %v2334_v6 = vpop.f32.mrf.mxu3 }
 0x867   :  { %v2340_v5 = vadd.f32 %v2321_v21, %v2282_v47  ;;  %v2341_v13 = vadd.f32 %v2334_v6, %v2283_v14  ;;  %v2297_v32 = vpop.f32.mrf.mxu0  ;;  %v2310_v22 = vpop.f32.mrf.mxu1 }
 0x869   :  { %6702 = vtanh.f32 %v2340_v5  ;;  %v2351_v26 = vmul.f32 0.5, %v2341_v13 }
 0x86a   :  { %v6699_v33 = vpop.eup %6698 }
 0x86b   :  { %v6701_v31 = vpop.eup %6700  ;;  %v2344_v36 = vmul.f32 0.5, %v6699_v33  ;;  %6704 = vtanh.f32 %v2351_v26 }
 0x86c   :  { %v2348_v58 = vmul.f32 0.5, %v6701_v31 }
 0x86d   :  { %v2345_v45 = vadd.f32 0.5, %v2344_v36 }
 0x86e   :  { %v2349_v25 = vadd.f32 0.5, %v2348_v58  ;;  %v2323_v55 = vpop.f32.mrf.mxu2  ;;  %v2336_v60 = vpop.f32.mrf.mxu3  ;;  %v5872_v58 = vld [vmem:[#allocation5 + $0x2e0] sm:$0xf] }
 0x86f   :  { %v6703_v57 = vpop.eup %6702  ;;  %v5874_v60 = vld [vmem:[#allocation5 + $0x2f0] sm:$0xf0] }
 0x870   :  { %v2356_v46 = vmul.f32 %v2349_v25, %v7905_v17  ;;  %v2357_v62 = vmul.f32 %v6703_v57, %v2345_v45  ;;  %v6467_v45 = vld [vmem:[#allocation5 + $0x2ec] sm:$0xf0]  ;;  %v6465_v25 = vld [vmem:[#allocation5 + $0x2e4] sm:$0xf]  ;;  %v5880_v57 = vld [vmem:[#allocation5 + $0x2e8] sm:$0xf] }
 0x871   :  { %v6705_v59 = vpop.eup %6704  ;;  %v5873_v55 = vor.u32 %v6467_v45, %v5872_v58  ;;  %v6452_v58 = vld [vmem:[#allocation5 + $0x274] sm:$0xf0] }
 0x872   :  { %v7948_v43 = vadd.f32 %v2357_v62, %v2356_v46  ;;  %v2353_v51 = vmul.f32 0.5, %v6705_v59  ;;  %v6468_v46 = vld [vmem:[#allocation5 + $0x2f4] sm:$0xf0]  ;;  %v5877_v62 = vor.u32 %v6465_v25, %v5874_v60 }
 0x873   :  { %v5881_v59 = vor.u32 %v6468_v46, %v5880_v57  ;;  %v6450_v57 = vld [vmem:[#allocation5 + $0x26c] sm:$0xf]  ;;  %v5818_v46 = vld [vmem:[#allocation5 + $0x278] sm:$0xf0] }
 0x874   :  { %6706 = vtanh.f32 %v7948_v43  ;;  %v2354_v34 = vadd.f32 0.5, %v2353_v51  ;;  %v5882_v51 = vld [vmem:[#allocation5 + $0x2f8] sm:$0xf0] }
 0x87a   :  { %v6707_v10 = vpop.eup %6706 }
 0x87b   :  { %v2360_v7 = vmul.f32 %v6707_v10, %v2354_v34  ;;  %v5856_v10 = vld [vmem:[#allocation5 + $0x2c0] sm:$0xf] }
 0x87d   :  { %v2363_v40 = vpack.c.bf16 %v2360_v7, %v2360_v7  ;;  %v6463_v7 = vld [vmem:[#allocation5 + $0x2cc] sm:$0xf0] }
 0x87f   :  { %5737 = vst [vmem:[%s9038_s4 + $0x10] sm:$0xf] %v2363_v40  ;;  %2381 = vmatmul.bf16.vlgmr.msrb.gmra.mxu0 %v2363_v40  ;;  %2394 = vmatmul.bf16.vlgmr.msrb.gmra.mxu1 %v2363_v40 }
 0x880   :  { %2407 = vmatmul.bf16.vlgmr.msrb.gmra.mxu2 %v2363_v40  ;;  %2420 = vmatmul.bf16.vlgmr.msrb.gmra.mxu3 %v2363_v40  ;;  %v6461_v40 = vld [vmem:[#allocation5 + $0x2c4] sm:$0xf] }
 0x881   :  { %2547 = vmatpush.bf16.msrb.mxu0 %v7504_v61  ;;  %2560 = vmatpush.bf16.msrb.mxu1 %v7506_v48  ;;  %v9100_v61 = vld [vmem:[#allocation18_spill] sm:$0xff] }
 0x882   :  { %2573 = vmatpush.bf16.msrb.mxu2 %v7508_v39  ;;  %2586 = vmatpush.bf16.msrb.mxu3 %v7511_v44  ;;  %v1642_v48 = vadd.f32 %v9100_v61, %v7634_v15  ;;  %v9101_v39 = vld [vmem:[#allocation19_spill] sm:$0xff]  ;;  %v5857_v61 = vor.u32 %v6463_v7, %v5856_v10 }
 0x883   :  { %v1671_v44 = vadd.f32 %v9101_v39, %v7636_v28  ;;  %v5864_v39 = vld [vmem:[#allocation5 + $0x2c8] sm:$0xf] }
 0x885   :  { %2548 = vmatpush.bf16.msrb.mxu0 %v7522_v41  ;;  %2561 = vmatpush.bf16.msrb.mxu1 %v7524_v52  ;;  %v1746_v41 = vpack.c.bf16 %v1671_v44, %v1642_v48  ;;  %v9102_v52 = vld [vmem:[#allocation20_spill] sm:$0xff]  ;;  %v5858_v48 = vld [vmem:[#allocation5 + $0x2d0] sm:$0xf0]  ;;  %v6464_v44 = vld [vmem:[#allocation5 + $0x2d4] sm:$0xf0] }
 0x886   :  { %2574 = vmatpush.bf16.msrb.mxu2 %v7526_v56  ;;  %2587 = vmatpush.bf16.msrb.mxu3 %v7531_v0  ;;  %v1700_v56 = vadd.f32 %v9102_v52, %v7656_v49  ;;  %v9103_v0 = vld [vmem:[#allocation21_spill] sm:$0xff]  ;;  %v5865_v52 = vor.u32 %v6464_v44, %v5864_v39  ;;  %v6448_v39 = vld [vmem:[#allocation5 + $0x254] sm:$0xf0] }
 0x889   :  { %2549 = vmatpush.bf16.msrb.mxu0 %v7536_v30  ;;  %2562 = vmatpush.bf16.msrb.mxu1 %v7538_v53  ;;  %v1729_v30 = vadd.f32 %v9103_v0, %v7658_v2  ;;  %v2367_v53 = vunpack.c.l.bf16 %v1746_v41  ;;  %v5866_v0 = vld [vmem:[#allocation5 + $0x2d8] sm:$0xf0] }
 0x88a   :  { %2575 = vmatpush.bf16.msrb.mxu2 %v7540_v54  ;;  %2588 = vmatpush.bf16.msrb.mxu3 %v7543_v8  ;;  %v2368_v54 = vunpack.c.h.bf16 %v1746_v41  ;;  %v5861_v41 = vor.u32 %v6461_v40, %v5858_v48  ;;  %v5800_v48 = vld [vmem:[#allocation5 + $0x248] sm:$0xf] }
 0x88b   :  { %v5801_v44 = vor.u32 %v6448_v39, %v5800_v48  ;;  %v6499_v48 = vld [vmem:[#allocation7 + $0x2ec] sm:$0xf0]  ;;  %v6497_v39 = vld [vmem:[#allocation7 + $0x2e4] sm:$0xf] }
 0x88d   :  { %2550 = vmatpush.bf16.msrb.mxu0 %v7547_v23  ;;  %2563 = vmatpush.bf16.msrb.mxu1 %v7549_v27 }
 0x88e   :  { %2576 = vmatpush.bf16.msrb.mxu2 %v7552_v29  ;;  %2589 = vmatpush.bf16.msrb.mxu3 %v7554_v1  ;;  %v1747_v1 = vpack.c.bf16 %v1729_v30, %v1700_v56  ;;  %v6462_v56 = vld [vmem:[#allocation5 + $0x2cc] sm:$0xf] }
 0x88f   :  { %v5869_v30 = vor.u32 %v6462_v56, %v5866_v0  ;;  %v5776_v56 = vld [vmem:[#allocation5 + $0x220] sm:$0xf] }
 0x891   :  { %2551 = vmatpush.bf16.msrb.mxu0 %v7559_v11  ;;  %2564 = vmatpush.bf16.msrb.mxu1 %v7563_v20 }
 0x892   :  { %2577 = vmatpush.bf16.msrb.mxu2 %v7565_v3  ;;  %2590 = vmatpush.bf16.msrb.mxu3 %v7568_v63  ;;  %v2369_v3 = vunpack.c.l.bf16 %v1747_v1  ;;  %v2370_v63 = vunpack.c.h.bf16 %v1747_v1  ;;  %v6460_v1 = vld [vmem:[#allocation5 + $0x2b4] sm:$0xf0] }
 0x895   :  { %2552 = vmatpush.bf16.msrb.mxu0 %v7571_v24  ;;  %2565 = vmatpush.bf16.msrb.mxu1 %v7575_v37 }
 0x896   :  { %2578 = vmatpush.bf16.msrb.mxu2 %v7577_v38  ;;  %2591 = vmatpush.bf16.msrb.mxu3 %v7580_v12 }
 0x899   :  { %2553 = vmatpush.bf16.msrb.mxu0 %v7583_v35  ;;  %2566 = vmatpush.bf16.msrb.mxu1 %v7587_v16 }
 0x89a   :  { %2579 = vmatpush.bf16.msrb.mxu2 %v7589_v19  ;;  %2592 = vmatpush.bf16.msrb.mxu3 %v7598_v9 }
 0x89d   :  { %2554 = vmatpush.bf16.msrb.mxu0 %v7603_v50  ;;  %2567 = vmatpush.bf16.msrb.mxu1 %v7605_v4 }
 0x89e   :  { %2580 = vmatpush.bf16.msrb.mxu2 %v7608_v18  ;;  %2593 = vmatpush.bf16.msrb.mxu3 %v7615_v42 }
 0x8fc   :  { %v2382_v8 = vpop.f32.mrf.mxu0  ;;  %v2395_v23 = vpop.f32.mrf.mxu1 }
 0x8fd   :  { %v2425_v27 = vadd.f32 %v2382_v8, %v2367_v53  ;;  %v2426_v29 = vadd.f32 %v2395_v23, %v2368_v54  ;;  %v5840_v53 = vld [vmem:[#allocation5 + $0x2a0] sm:$0xf]  ;;  %v6459_v54 = vld [vmem:[#allocation5 + $0x2ac] sm:$0xf0]  ;;  %v6457_v8 = vld [vmem:[#allocation5 + $0x2a4] sm:$0xf] }
 0x8fe   :  { %v5841_v23 = vor.u32 %v6459_v54, %v5840_v53  ;;  %v6441_v53 = vld [vmem:[#allocation5 + $0x224] sm:$0xf]  ;;  %v5778_v54 = vld [vmem:[#allocation5 + $0x230] sm:$0xf0] }
 0x8ff   :  { %v2429_v11 = vmul.f32 0.5, %v2425_v27  ;;  %v2433_v20 = vmul.f32 0.5, %v2426_v29  ;;  %v5842_v27 = vld [vmem:[#allocation5 + $0x2b0] sm:$0xf0]  ;;  %v5848_v29 = vld [vmem:[#allocation5 + $0x2a8] sm:$0xf] }
 0x901   :  { %6708 = vtanh.f32 %v2429_v11  ;;  %v5845_v11 = vor.u32 %v6457_v8, %v5842_v27  ;;  %v9105_v8 = vld [vmem:[#allocation25_spill] sm:$0xff] }
 0x902   :  { %6710 = vtanh.f32 %v2433_v20  ;;  %v5849_v20 = vor.u32 %v6460_v1, %v5848_v29  ;;  %v2457_v27 = vunpack.c.h.bf16 %v9105_v8  ;;  %v5784_v1 = vld [vmem:[#allocation5 + $0x228] sm:$0xf] }
 0x903   :  { %v2408_v24 = vpop.f32.mrf.mxu2  ;;  %v2421_v37 = vpop.f32.mrf.mxu3 }
 0x904   :  { %v2427_v38 = vadd.f32 %v2408_v24, %v2369_v3  ;;  %v2428_v12 = vadd.f32 %v2421_v37, %v2370_v63  ;;  %v2384_v35 = vpop.f32.mrf.mxu0  ;;  %v2397_v16 = vpop.f32.mrf.mxu1  ;;  %v6458_v3 = vld [vmem:[#allocation5 + $0x2ac] sm:$0xf]  ;;  %v5850_v63 = vld [vmem:[#allocation5 + $0x2b8] sm:$0xf0]  ;;  %v5824_v37 = vld [vmem:[#allocation5 + $0x280] sm:$0xf] }
 0x905   :  { %v5853_v24 = vor.u32 %v6458_v3, %v5850_v63  ;;  %v5826_v16 = vld [vmem:[#allocation5 + $0x290] sm:$0xf0] }
 0x906   :  { %6712 = vtanh.f32 %v2427_v38  ;;  %v2438_v19 = vmul.f32 0.5, %v2428_v12  ;;  %v6455_v38 = vld [vmem:[#allocation5 + $0x28c] sm:$0xf0]  ;;  %v6453_v12 = vld [vmem:[#allocation5 + $0x284] sm:$0xf] }
 0x907   :  { %v6709_v9 = vpop.eup %6708  ;;  %v5825_v35 = vor.u32 %v6455_v38, %v5824_v37  ;;  %v5786_v38 = vld [vmem:[#allocation5 + $0x238] sm:$0xf0] }
 0x908   :  { %v6711_v50 = vpop.eup %6710  ;;  %v2431_v4 = vmul.f32 0.5, %v6709_v9  ;;  %6714 = vtanh.f32 %v2438_v19  ;;  %v5832_v19 = vld [vmem:[#allocation5 + $0x288] sm:$0xf]  ;;  %v6456_v9 = vld [vmem:[#allocation5 + $0x294] sm:$0xf0] }
 0x909   :  { %v2435_v18 = vmul.f32 0.5, %v6711_v50  ;;  %v5829_v50 = vor.u32 %v6453_v12, %v5826_v16  ;;  %v5760_v12 = vld [vmem:[#allocation5 + $0x200] sm:$0xf] }
 0x90a   :  { %v2432_v42 = vadd.f32 0.5, %v2431_v4  ;;  %v5833_v4 = vor.u32 %v6456_v9, %v5832_v19 }
 0x90b   :  { %v2436_v17 = vadd.f32 0.5, %v2435_v18  ;;  %v2410_v47 = vpop.f32.mrf.mxu2  ;;  %v2423_v14 = vpop.f32.mrf.mxu3  ;;  %v6454_v18 = vld [vmem:[#allocation5 + $0x28c] sm:$0xf] }
 0x90c   :  { %v6713_v21 = vpop.eup %6712  ;;  %v9104_v47 = vld [vmem:[#allocation22_spill] sm:$0xff] }
 0x90d   :  { %v2443_v6 = vmul.f32 %v2436_v17, %v7948_v43  ;;  %v2444_v5 = vmul.f32 %v6713_v21, %v2432_v42  ;;  %v6466_v43 = vld [vmem:[#allocation5 + $0x2ec] sm:$0xf]  ;;  %v5834_v42 = vld [vmem:[#allocation5 + $0x298] sm:$0xf0]  ;;  %v2454_v14 = vunpack.c.l.bf16 %v9104_v47  ;;  %v2455_v21 = vunpack.c.h.bf16 %v9104_v47  ;;  %v6440_v47 = vld [vmem:[#allocation5 + $0x214] sm:$0xf0] }
 0x90e   :  { %v6715_v13 = vpop.eup %6714  ;;  %v5885_v34 = vor.u32 %v6466_v43, %v5882_v51  ;;  %v5837_v17 = vor.u32 %v6454_v18, %v5834_v42  ;;  %v6447_v43 = vld [vmem:[#allocation5 + $0x24c] sm:$0xf0]  ;;  %v6445_v51 = vld [vmem:[#allocation5 + $0x244] sm:$0xf]  ;;  %v5762_v42 = vld [vmem:[#allocation5 + $0x210] sm:$0xf0] }
 0x90f   :  { %v7995_v32 = vadd.f32 %v2444_v5, %v2443_v6  ;;  %v2440_v22 = vmul.f32 0.5, %v6715_v13  ;;  %v5808_v6 = vld [vmem:[#allocation5 + $0x260] sm:$0xf]  ;;  %v6451_v5 = vld [vmem:[#allocation5 + $0x26c] sm:$0xf0] }
 0x910   :  { %v6449_v13 = vld [vmem:[#allocation5 + $0x264] sm:$0xf] }
 0x911   :  { %6716 = vtanh.f32 %v7995_v32  ;;  %v2441_v26 = vadd.f32 0.5, %v2440_v22  ;;  %v6437_v18 = vld [vmem:[#allocation5 + $0x204] sm:$0xf] }
 0x917   :  { %v6717_v33 = vpop.eup %6716 }
 0x918   :  { %v2447_v31 = vmul.f32 %v6717_v33, %v2441_v26  ;;  %v5809_v33 = vor.u32 %v6451_v5, %v5808_v6 }
 0x91a   :  { %v2450_v36 = vpack.c.bf16 %v2447_v31, %v2447_v31  ;;  %v5810_v31 = vld [vmem:[#allocation5 + $0x270] sm:$0xf0] }
 0x91c   :  { %5738 = vst [vmem:[%s9038_s4 + $0x14] sm:$0xf] %v2450_v36  ;;  %2468 = vmatmul.bf16.vlgmr.msra.gmra.mxu0 %v2450_v36  ;;  %2481 = vmatmul.bf16.vlgmr.msra.gmra.mxu1 %v2450_v36 }
 0x91d   :  { %2494 = vmatmul.bf16.vlgmr.msra.gmra.mxu2 %v2450_v36  ;;  %2507 = vmatmul.bf16.vlgmr.msra.gmra.mxu3 %v2450_v36  ;;  %v5816_v36 = vld [vmem:[#allocation5 + $0x268] sm:$0xf] }
 0x91e   :  { %2895 = vmatpush.bf16.msra.mxu0 %v5873_v55  ;;  %2924 = vmatpush.bf16.msra.mxu1 %v5877_v62  ;;  %v5813_v55 = vor.u32 %v6449_v13, %v5810_v31  ;;  %v5817_v60 = vor.u32 %v6452_v58, %v5816_v36  ;;  %v5792_v62 = vld [vmem:[#allocation5 + $0x240] sm:$0xf] }
 0x91f   :  { %2953 = vmatpush.bf16.msra.mxu2 %v5881_v59  ;;  %2982 = vmatpush.bf16.msra.mxu3 %v5885_v34  ;;  %v5821_v59 = vor.u32 %v6450_v57, %v5818_v46  ;;  %v5794_v34 = vld [vmem:[#allocation5 + $0x250] sm:$0xf0]  ;;  %v5793_v40 = vor.u32 %v6447_v43, %v5792_v62 }
 0x922   :  { %2896 = vmatpush.bf16.msra.mxu0 %v5857_v61  ;;  %2925 = vmatpush.bf16.msra.mxu1 %v5861_v41  ;;  %v5797_v61 = vor.u32 %v6445_v51, %v5794_v34  ;;  %v6446_v41 = vld [vmem:[#allocation5 + $0x24c] sm:$0xf] }
 0x923   :  { %2954 = vmatpush.bf16.msra.mxu2 %v5865_v52  ;;  %2983 = vmatpush.bf16.msra.mxu3 %v5869_v30  ;;  %v5802_v52 = vld [vmem:[#allocation5 + $0x258] sm:$0xf0]  ;;  %v6443_v30 = vld [vmem:[#allocation5 + $0x22c] sm:$0xf0] }
 0x924   :  { %v5805_v0 = vor.u32 %v6446_v41, %v5802_v52  ;;  %v5777_v29 = vor.u32 %v6443_v30, %v5776_v56  ;;  %v6002_v41 = vld [vmem:[#allocation7 + $0x2f0] sm:$0xf0]  ;;  %v6008_v52 = vld [vmem:[#allocation7 + $0x2e8] sm:$0xf]  ;;  %v6500_v56 = vld [vmem:[#allocation7 + $0x2f4] sm:$0xf0] }
 0x925   :  { %v8019_v30 = vor.u32 %v6500_v56, %v6008_v52  ;;  %v5936_v52 = vld [vmem:[#allocation7 + $0x260] sm:$0xf] }
 0x926   :  { %2897 = vmatpush.bf16.msra.mxu0 %v5841_v23  ;;  %2926 = vmatpush.bf16.msra.mxu1 %v5845_v11  ;;  %v2456_v23 = vunpack.c.l.bf16 %v9105_v8  ;;  %v6444_v11 = vld [vmem:[#allocation5 + $0x234] sm:$0xf0] }
 0x927   :  { %2955 = vmatpush.bf16.msra.mxu2 %v5849_v20  ;;  %2984 = vmatpush.bf16.msra.mxu3 %v5853_v24  ;;  %v6442_v20 = vld [vmem:[#allocation5 + $0x22c] sm:$0xf]  ;;  %v5781_v24 = vor.u32 %v6441_v53, %v5778_v54  ;;  %v5785_v37 = vor.u32 %v6444_v11, %v5784_v1  ;;  %v6010_v54 = vld [vmem:[#allocation7 + $0x2f8] sm:$0xf0]  ;;  %v6495_v1 = vld [vmem:[#allocation7 + $0x2cc] sm:$0xf0] }
 0x928   :  { %v6498_v53 = vld [vmem:[#allocation7 + $0x2ec] sm:$0xf]  ;;  %v6493_v11 = vld [vmem:[#allocation7 + $0x2c4] sm:$0xf] }
 0x929   :  { %v8022_v8 = vor.u32 %v6498_v53, %v6010_v54  ;;  %v6483_v53 = vld [vmem:[#allocation7 + $0x26c] sm:$0xf0]  ;;  %v6481_v54 = vld [vmem:[#allocation7 + $0x264] sm:$0xf] }
 0x92a   :  { %2898 = vmatpush.bf16.msra.mxu0 %v5825_v35  ;;  %2927 = vmatpush.bf16.msra.mxu1 %v5829_v50  ;;  %v6439_v35 = vld [vmem:[#allocation5 + $0x20c] sm:$0xf0] }
 0x92b   :  { %2956 = vmatpush.bf16.msra.mxu2 %v5833_v4  ;;  %2985 = vmatpush.bf16.msra.mxu3 %v5837_v17  ;;  %v5789_v4 = vor.u32 %v6442_v20, %v5786_v38  ;;  %v5768_v17 = vld [vmem:[#allocation5 + $0x208] sm:$0xf]  ;;  %v5761_v5 = vor.u32 %v6439_v35, %v5760_v12  ;;  %v9106_v12 = vld [vmem:[#allocation23_spill] sm:$0xff] }
 0x92c   :  { %v1647_v35 = vadd.f32 %v9106_v12, %v7634_v15  ;;  %v6491_v15 = vld [vmem:[#allocation7 + $0x2ac] sm:$0xf0] }
 0x92e   :  { %2899 = vmatpush.bf16.msra.mxu0 %v5809_v33  ;;  %2928 = vmatpush.bf16.msra.mxu1 %v5813_v55 }
 0x92f   :  { %2957 = vmatpush.bf16.msra.mxu2 %v5817_v60  ;;  %2986 = vmatpush.bf16.msra.mxu3 %v5821_v59 }
 0x932   :  { %2900 = vmatpush.bf16.msra.mxu0 %v5793_v40  ;;  %2929 = vmatpush.bf16.msra.mxu1 %v5797_v61  ;;  %v6000_v61 = vld [vmem:[#allocation7 + $0x2e0] sm:$0xf] }
 0x933   :  { %2958 = vmatpush.bf16.msra.mxu2 %v5801_v44  ;;  %2987 = vmatpush.bf16.msra.mxu3 %v5805_v0  ;;  %v8015_v44 = vor.u32 %v6499_v48, %v6000_v61  ;;  %v8017_v0 = vor.u32 %v6497_v39, %v6002_v41  ;;  %v6488_v61 = vld [vmem:[#allocation7 + $0x294] sm:$0xf0]  ;;  %v6486_v39 = vld [vmem:[#allocation7 + $0x28c] sm:$0xf]  ;;  %v5962_v41 = vld [vmem:[#allocation7 + $0x298] sm:$0xf0] }
 0x934   :  { %v8071_v56 = vor.u32 %v6486_v39, %v5962_v41 }
 0x936   :  { %2901 = vmatpush.bf16.msra.mxu0 %v5777_v29  ;;  %2930 = vmatpush.bf16.msra.mxu1 %v5781_v24  ;;  %v5984_v29 = vld [vmem:[#allocation7 + $0x2c0] sm:$0xf]  ;;  %v6496_v24 = vld [vmem:[#allocation7 + $0x2d4] sm:$0xf0] }
 0x937   :  { %2959 = vmatpush.bf16.msra.mxu2 %v5785_v37  ;;  %2988 = vmatpush.bf16.msra.mxu3 %v5789_v4  ;;  %v8033_v20 = vor.u32 %v6495_v1, %v5984_v29  ;;  %v5994_v4 = vld [vmem:[#allocation7 + $0x2d8] sm:$0xf0]  ;;  %v8074_v1 = vor.u32 %v6483_v53, %v5936_v52 }
 0x93a   :  { %2902 = vmatpush.bf16.msra.mxu0 %v5761_v5  ;;  %v5968_v5 = vld [vmem:[#allocation7 + $0x2a0] sm:$0xf] }
 0x999   :  { %v2469_v22 = vpop.f32.mrf.mxu0  ;;  %v2482_v26 = vpop.f32.mrf.mxu1 }
 0x99a   :  { %v2512_v45 = vadd.f32 %v2469_v22, %v2454_v14  ;;  %v2513_v25 = vadd.f32 %v2482_v26, %v2455_v21  ;;  %v6438_v14 = vld [vmem:[#allocation5 + $0x20c] sm:$0xf]  ;;  %v5770_v21 = vld [vmem:[#allocation5 + $0x218] sm:$0xf0]  ;;  %v5765_v22 = vor.u32 %v6437_v18, %v5762_v42  ;;  %v5769_v26 = vor.u32 %v6440_v47, %v5768_v17  ;;  %v9109_v47 = vld [vmem:[#allocation27_spill] sm:$0xff] }
 0x99b   :  { %v5773_v36 = vor.u32 %v6438_v14, %v5770_v21  ;;  %v9108_v42 = vld [vmem:[#allocation26_spill] sm:$0xff]  ;;  %v1734_v14 = vadd.f32 %v9109_v47, %v7658_v2  ;;  %v6490_v2 = vld [vmem:[#allocation7 + $0x2ac] sm:$0xf] }
 0x99c   :  { %v2516_v10 = vmul.f32 0.5, %v2512_v45  ;;  %v2520_v7 = vmul.f32 0.5, %v2513_v25  ;;  %2931 = vmatpush.bf16.msra.mxu1 %v5765_v22  ;;  %2960 = vmatpush.bf16.msra.mxu2 %v5769_v26  ;;  %v1705_v17 = vadd.f32 %v9108_v42, %v7656_v49  ;;  %v8053_v26 = vor.u32 %v6491_v15, %v5968_v5  ;;  %v5928_v5 = vld [vmem:[#allocation7 + $0x248] sm:$0xf]  ;;  %v6480_v15 = vld [vmem:[#allocation7 + $0x254] sm:$0xf0] }
 0x99d   :  { %2989 = vmatpush.bf16.msra.mxu3 %v5773_v36  ;;  %v6492_v36 = vld [vmem:[#allocation7 + $0x2b4] sm:$0xf0] }
 0x99e   :  { %6718 = vtanh.f32 %v2516_v10 }
 0x99f   :  { %6720 = vtanh.f32 %v2520_v7 }
 0x9a0   :  { %v2495_v3 = vpop.f32.mrf.mxu2  ;;  %v2508_v63 = vpop.f32.mrf.mxu3 }
 0x9a1   :  { %v2514_v16 = vadd.f32 %v2495_v3, %v2456_v23  ;;  %v2515_v19 = vadd.f32 %v2508_v63, %v2457_v27  ;;  %v2471_v9 = vpop.f32.mrf.mxu0  ;;  %v2484_v50 = vpop.f32.mrf.mxu1  ;;  %v6502_v23 = vld [vmem:[%s9038_s4 + $0x8] sm:$0xff]  ;;  %v6503_v27 = vld [vmem:[%s9038_s4 + $0x10] sm:$0xff] }
 0x9a2   :  { %v5986_v3 = vld [vmem:[#allocation7 + $0x2d0] sm:$0xf0]  ;;  %v5992_v63 = vld [vmem:[#allocation7 + $0x2c8] sm:$0xf]  ;;  %v6494_v50 = vld [vmem:[#allocation7 + $0x2cc] sm:$0xf] }
 0x9a3   :  { %6722 = vtanh.f32 %v2514_v16  ;;  %v2525_v6 = vmul.f32 0.5, %v2515_v19  ;;  %v8035_v37 = vor.u32 %v6493_v11, %v5986_v3  ;;  %v8037_v38 = vor.u32 %v6496_v24, %v5992_v63  ;;  %v9107_v16 = vld [vmem:[#allocation24_spill] sm:$0xff]  ;;  %v6484_v3 = vld [vmem:[#allocation7 + $0x274] sm:$0xf0] }
 0x9a4   :  { %v6719_v13 = vpop.eup %6718  ;;  %v1676_v19 = vadd.f32 %v9107_v16, %v7636_v28  ;;  %v8046_v18 = vor.u32 %v6494_v50, %v5994_v4  ;;  %v5944_v11 = vld [vmem:[#allocation7 + $0x268] sm:$0xf]  ;;  %v6482_v63 = vld [vmem:[#allocation7 + $0x26c] sm:$0xf]  ;;  %v6479_v50 = vld [vmem:[#allocation7 + $0x24c] sm:$0xf0] }
 0x9a5   :  { %v6721_v33 = vpop.eup %6720  ;;  %v2518_v31 = vmul.f32 0.5, %v6719_v13  ;;  %6724 = vtanh.f32 %v2525_v6  ;;  %v6489_v13 = vld [vmem:[#allocation7 + $0x2a4] sm:$0xf]  ;;  %v8080_v16 = vor.u32 %v6484_v3, %v5944_v11  ;;  %v6474_v11 = vld [vmem:[#allocation7 + $0x22c] sm:$0xf] }
 0x9a6   :  { %v2522_v58 = vmul.f32 0.5, %v6721_v33  ;;  %v1750_v9 = vpack.c.bf16 %v1676_v19, %v1647_v35  ;;  %v5970_v33 = vld [vmem:[#allocation7 + $0x2b0] sm:$0xf0]  ;;  %v5946_v19 = vld [vmem:[#allocation7 + $0x278] sm:$0xf0] }
 0x9a7   :  { %v2519_v45 = vadd.f32 0.5, %v2518_v31  ;;  %v5976_v31 = vld [vmem:[#allocation7 + $0x2a8] sm:$0xf]  ;;  %v8055_v49 = vor.u32 %v6489_v13, %v5970_v33  ;;  %v5930_v33 = vld [vmem:[#allocation7 + $0x258] sm:$0xf0] }
 0x9a8   :  { %v2523_v25 = vadd.f32 0.5, %v2522_v58  ;;  %v2497_v55 = vpop.f32.mrf.mxu2  ;;  %v2510_v60 = vpop.f32.mrf.mxu3  ;;  %v2541_v21 = vunpack.c.l.bf16 %v1750_v9  ;;  %v2542_v6 = vunpack.c.h.bf16 %v1750_v9  ;;  %v5920_v9 = vld [vmem:[#allocation7 + $0x240] sm:$0xf]  ;;  %v5914_v3 = vld [vmem:[#allocation7 + $0x238] sm:$0xf0] }
 0x9a9   :  { %v6723_v57 = vpop.eup %6722  ;;  %v5978_v55 = vld [vmem:[#allocation7 + $0x2b8] sm:$0xf0]  ;;  %v5952_v60 = vld [vmem:[#allocation7 + $0x280] sm:$0xf] }
 0x9aa   :  { %v2530_v46 = vmul.f32 %v2523_v25, %v7995_v32  ;;  %v2531_v62 = vmul.f32 %v6723_v57, %v2519_v45  ;;  %v6501_v32 = vld [vmem:[%s9038_s4] sm:$0xff]  ;;  %v8057_v25 = vor.u32 %v6492_v36, %v5976_v31  ;;  %v1751_v57 = vpack.c.bf16 %v1734_v14, %v1705_v17 }
 0x9ab   :  { %v6725_v59 = vpop.eup %6724  ;;  %v8083_v14 = vor.u32 %v6482_v63, %v5946_v19 }
 0x9ac   :  { %v8006_v43 = vadd.f32 %v2531_v62, %v2530_v46  ;;  %v2527_v51 = vmul.f32 0.5, %v6725_v59  ;;  %v8060_v46 = vor.u32 %v6490_v2, %v5978_v55  ;;  %v6487_v62 = vld [vmem:[#allocation7 + $0x28c] sm:$0xf0]  ;;  %v6485_v59 = vld [vmem:[#allocation7 + $0x284] sm:$0xf]  ;;  %v2544_v29 = vunpack.c.h.bf16 %v1751_v57 }
 0x9ad   :  { %v6475_v2 = vld [vmem:[#allocation7 + $0x22c] sm:$0xf0]  ;;  %v6473_v55 = vld [vmem:[#allocation7 + $0x224] sm:$0xf] }
 0x9ae   :  { %6726 = vtanh.f32 %v8006_v43  ;;  %v2528_v34 = vadd.f32 0.5, %v2527_v51  ;;  %v5954_v51 = vld [vmem:[#allocation7 + $0x290] sm:$0xf0] }
 0x9b4   :  { %v6727_v10 = vpop.eup %6726 }
 0x9b5   :  { %v2534_v7 = vmul.f32 %v6727_v10, %v2528_v34 }
 0x9b7   :  { %v2537_v40 = vpack.c.bf16 %v2534_v7, %v2534_v7  ;;  %v8064_v7 = vor.u32 %v6487_v62, %v5952_v60 }
 0x9b9   :  { %5739 = vst [vmem:[%s9038_s4 + $0x18] sm:$0xf] %v2537_v40  ;;  %2555 = vmatmul.bf16.vlgmr.msrb.gmra.mxu0 %v2537_v40  ;;  %2568 = vmatmul.bf16.vlgmr.msrb.gmra.mxu1 %v2537_v40 }
 0x9ba   :  { %2581 = vmatmul.bf16.vlgmr.msrb.gmra.mxu2 %v2537_v40  ;;  %2594 = vmatmul.bf16.vlgmr.msrb.gmra.mxu3 %v2537_v40  ;;  %v8066_v40 = vor.u32 %v6485_v59, %v5954_v51  ;;  %v5906_v59 = vld [vmem:[#allocation7 + $0x230] sm:$0xf0]  ;;  %v5912_v51 = vld [vmem:[#allocation7 + $0x228] sm:$0xf] }
 0x9bb   :  { %3213 = vmatpush.bf16.msrb.mxu0 %v8015_v44  ;;  %3226 = vmatpush.bf16.msrb.mxu1 %v8017_v0  ;;  %v8102_v53 = vor.u32 %v6473_v55, %v5906_v59 }
 0x9bc   :  { %3239 = vmatpush.bf16.msrb.mxu2 %v8019_v30  ;;  %3252 = vmatpush.bf16.msrb.mxu3 %v8022_v8 }
 0x9bf   :  { %3214 = vmatpush.bf16.msrb.mxu0 %v8033_v20  ;;  %3227 = vmatpush.bf16.msrb.mxu1 %v8035_v37 }
 0x9c0   :  { %3240 = vmatpush.bf16.msrb.mxu2 %v8037_v38  ;;  %3253 = vmatpush.bf16.msrb.mxu3 %v8046_v18 }
 0x9c3   :  { %3215 = vmatpush.bf16.msrb.mxu0 %v8053_v26  ;;  %3228 = vmatpush.bf16.msrb.mxu1 %v8055_v49 }
 0x9c4   :  { %3241 = vmatpush.bf16.msrb.mxu2 %v8057_v25  ;;  %3254 = vmatpush.bf16.msrb.mxu3 %v8060_v46 }
 0x9c7   :  { %3216 = vmatpush.bf16.msrb.mxu0 %v8064_v7  ;;  %3229 = vmatpush.bf16.msrb.mxu1 %v8066_v40 }
 0x9c8   :  { %3255 = vmatpush.bf16.msrb.mxu3 %v8071_v56 }
 0x9c9   :  { %2903 = vmatmul.bf16.vlgmr.msra.gmra.mxu0 %v6501_v32  ;;  %2932 = vmatmul.bf16.vlgmr.msra.gmra.mxu1 %v6501_v32 }
 0x9ca   :  { %2961 = vmatmul.bf16.vlgmr.msra.gmra.mxu2 %v6501_v32  ;;  %2990 = vmatmul.bf16.vlgmr.msra.gmra.mxu3 %v6501_v32  ;;  %v5960_v32 = vld [vmem:[#allocation7 + $0x288] sm:$0xf] }
 0x9cb   :  { %v8069_v48 = vor.u32 %v6488_v61, %v5960_v32  ;;  %3217 = vmatpush.bf16.msrb.mxu0 %v8074_v1 }
 0x9cc   :  { %3256 = vmatpush.bf16.msrb.mxu3 %v8083_v14 }
 0x9cd   :  { %3242 = vmatpush.bf16.msrb.mxu2 %v8069_v48 }
 0x9d1   :  { %3243 = vmatpush.bf16.msrb.mxu2 %v8080_v16 }
 0x9d9   :  { %2908 = vmatmul.bf16.gmra.mxu0 %v6502_v23  ;;  %2937 = vmatmul.bf16.gmra.mxu1 %v6502_v23 }
 0x9da   :  { %2966 = vmatmul.bf16.gmra.mxu2 %v6502_v23  ;;  %2995 = vmatmul.bf16.gmra.mxu3 %v6502_v23  ;;  %v5938_v23 = vld [vmem:[#allocation7 + $0x270] sm:$0xf0] }
 0x9db   :  { %v8078_v35 = vor.u32 %v6481_v54, %v5938_v23 }
 0x9dd   :  { %3230 = vmatpush.bf16.msrb.mxu1 %v8078_v35 }
 0x9e9   :  { %2913 = vmatmul.bf16.gmra.mxu0 %v6503_v27  ;;  %2942 = vmatmul.bf16.gmra.mxu1 %v6503_v27 }
 0x9ea   :  { %2971 = vmatmul.bf16.gmra.mxu2 %v6503_v27  ;;  %3000 = vmatmul.bf16.gmra.mxu3 %v6503_v27  ;;  %v2543_v27 = vunpack.c.l.bf16 %v1751_v57 }
 0xa36   :  { %v2556_v22 = vpop.f32.mrf.mxu0  ;;  %v2569_v28 = vpop.f32.mrf.mxu1 }
 0xa37   :  { %v2599_v58 = vadd.f32 %v2556_v22, %v2541_v21  ;;  %v2600_v45 = vadd.f32 %v2569_v28, %v2542_v6  ;;  %v6477_v21 = vld [vmem:[#allocation7 + $0x244] sm:$0xf]  ;;  %v5922_v6 = vld [vmem:[#allocation7 + $0x250] sm:$0xf0]  ;;  %v8086_v22 = vor.u32 %v6479_v50, %v5920_v9  ;;  %v6478_v28 = vld [vmem:[#allocation7 + $0x24c] sm:$0xf] }
 0xa38   :  { %v8090_v36 = vor.u32 %v6477_v21, %v5922_v6  ;;  %v8095_v62 = vor.u32 %v6478_v28, %v5930_v33  ;;  %v5888_v50 = vld [vmem:[#allocation7 + $0x200] sm:$0xf]  ;;  %v6472_v6 = vld [vmem:[#allocation7 + $0x214] sm:$0xf0]  ;;  %v5898_v28 = vld [vmem:[#allocation7 + $0x218] sm:$0xf0] }
 0xa39   :  { %v2603_v34 = vmul.f32 0.5, %v2599_v58  ;;  %v2607_v10 = vmul.f32 0.5, %v2600_v45  ;;  %v8092_v58 = vor.u32 %v6480_v15, %v5928_v5  ;;  %v5904_v45 = vld [vmem:[#allocation7 + $0x220] sm:$0xf]  ;;  %3218 = vmatpush.bf16.msrb.mxu0 %v8086_v22  ;;  %v6470_v5 = vld [vmem:[#allocation7 + $0x20c] sm:$0xf] }
 0xa3a   :  { %v8098_v61 = vor.u32 %v6475_v2, %v5904_v45  ;;  %3231 = vmatpush.bf16.msrb.mxu1 %v8090_v36  ;;  %3257 = vmatpush.bf16.msrb.mxu3 %v8095_v62  ;;  %v8130_v45 = vor.u32 %v6470_v5, %v5898_v28 }
 0xa3b   :  { %6728 = vtanh.f32 %v2603_v34  ;;  %3244 = vmatpush.bf16.msrb.mxu2 %v8092_v58 }
 0xa3c   :  { %6730 = vtanh.f32 %v2607_v10  ;;  %v6476_v10 = vld [vmem:[#allocation7 + $0x234] sm:$0xf0] }
 0xa3d   :  { %v2582_v24 = vpop.f32.mrf.mxu2  ;;  %v2595_v12 = vpop.f32.mrf.mxu3  ;;  %v8104_v54 = vor.u32 %v6476_v10, %v5912_v51  ;;  %3219 = vmatpush.bf16.msrb.mxu0 %v8098_v61  ;;  %v5741_v51 = vld [vmem:[%s9037_s3 + $0x8] sm:$0xf] }
 0xa3e   :  { %v2601_v4 = vadd.f32 %v2582_v24, %v2543_v27  ;;  %v2602_v42 = vadd.f32 %v2595_v12, %v2544_v29  ;;  %v2558_v17 = vpop.f32.mrf.mxu0  ;;  %v2571_v47 = vpop.f32.mrf.mxu1  ;;  %v8113_v12 = vor.u32 %v6474_v11, %v5914_v3  ;;  %3232 = vmatpush.bf16.msrb.mxu1 %v8102_v53  ;;  %v8149_v10 = vperm.slane %v5741_v51, 0 }
 0xa3f   :  { %3245 = vmatpush.bf16.msrb.mxu2 %v8104_v54  ;;  %v6469_v17 = vld [vmem:[#allocation7 + $0x204] sm:$0xf]  ;;  %v5890_v47 = vld [vmem:[#allocation7 + $0x210] sm:$0xf0] }
 0xa40   :  { %6732 = vtanh.f32 %v2601_v4  ;;  %v2612_v13 = vmul.f32 0.5, %v2602_v42  ;;  %v6471_v4 = vld [vmem:[#allocation7 + $0x20c] sm:$0xf0]  ;;  %3258 = vmatpush.bf16.msrb.mxu3 %v8113_v12  ;;  %v8120_v21 = vor.u32 %v6469_v17, %v5890_v47 }
 0xa41   :  { %v6729_v31 = vpop.eup %6728  ;;  %v8118_v42 = vor.u32 %v6471_v4, %v5888_v50 }
 0xa42   :  { %v6731_v60 = vpop.eup %6730  ;;  %v2605_v57 = vmul.f32 0.5, %v6729_v31  ;;  %6734 = vtanh.f32 %v2612_v13  ;;  %3233 = vmatpush.bf16.msrb.mxu1 %v8120_v21 }
 0xa43   :  { %v2609_v34 = vmul.f32 0.5, %v6731_v60  ;;  %3220 = vmatpush.bf16.msrb.mxu0 %v8118_v42 }
 0xa44   :  { %v2606_v32 = vadd.f32 0.5, %v2605_v57  ;;  %3259 = vmatpush.bf16.msrb.mxu3 %v8130_v45 }
 0xa45   :  { %v2610_v39 = vadd.f32 0.5, %v2609_v34  ;;  %v2584_v41 = vpop.f32.mrf.mxu2  ;;  %v2597_v52 = vpop.f32.mrf.mxu3 }
 0xa46   :  { %v6733_v23 = vpop.eup %6732  ;;  %v8106_v27 = vpop.f32.mrf.mxu0  ;;  %3313 = vmatpush.bf16.msra.mxu1 %v8017_v0 }
 0xa47   :  { %v8108_v29 = vpop.f32.mrf.mxu1  ;;  %v2617_v63 = vmul.f32 %v2610_v39, %v8006_v43  ;;  %v2618_v24 = vmul.f32 %v6733_v23, %v2606_v32  ;;  %v5896_v43 = vld [vmem:[#allocation7 + $0x208] sm:$0xf]  ;;  %3300 = vmatpush.bf16.msra.mxu0 %v8015_v44  ;;  %v8151_v32 = vperm.slane %v5741_v51, 1 }
 0xa48   :  { %v6735_v19 = vpop.eup %6734  ;;  %v8123_v13 = vor.u32 %v6472_v6, %v5896_v43  ;;  %3339 = vmatpush.bf16.msra.mxu3 %v8022_v8 }
 0xa49   :  { %v2619_v9 = vadd.f32 %v2618_v24, %v2617_v63  ;;  %v2614_v15 = vmul.f32 0.5, %v6735_v19  ;;  %v8171_v24 = vperm.slane %v5741_v51, 2  ;;  %v8173_v19 = vperm.slane %v5741_v51, 3 }
 0xa4a   :  { %3246 = vmatpush.bf16.msrb.mxu2 %v8123_v13  ;;  %3314 = vmatpush.bf16.msra.mxu1 %v8035_v37 }
 0xa4b   :  { %6736 = vtanh.f32 %v2619_v9  ;;  %v2615_v60 = vadd.f32 0.5, %v2614_v15  ;;  %3301 = vmatpush.bf16.msra.mxu0 %v8033_v20 }
 0xa4c   :  { %3340 = vmatpush.bf16.msra.mxu3 %v8046_v18 }
 0xa4d   :  { %v8125_v33 = vpop.f32.mrf.mxu2  ;;  %v8127_v31 = vpop.f32.mrf.mxu3 }
 0xa4e   :  { %v8133_v2 = vpop.f32.mrf.mxu0  ;;  %3326 = vmatpush.bf16.msra.mxu2 %v8019_v30  ;;  %3315 = vmatpush.bf16.msra.mxu1 %v8055_v49 }
 0xa4f   :  { %v8135_v55 = vpop.f32.mrf.mxu1  ;;  %3302 = vmatpush.bf16.msra.mxu0 %v8053_v26 }
 0xa50   :  { %3341 = vmatpush.bf16.msra.mxu3 %v8060_v46 }
 0xa51   :  { %v6737_v57 = vpop.eup %6736 }
 0xa52   :  { %v2621_v59 = vmul.f32 %v6737_v57, %v2615_v60  ;;  %3327 = vmatpush.bf16.msra.mxu2 %v8037_v38  ;;  %3316 = vmatpush.bf16.msra.mxu1 %v8066_v40 }
 0xa53   :  { %3303 = vmatpush.bf16.msra.mxu0 %v8064_v7 }
 0xa54   :  { %v2624_v34 = vpack.c.bf16 %v2621_v59, %v2621_v59  ;;  %3342 = vmatpush.bf16.msra.mxu3 %v8071_v56 }
 0xa55   :  { %v8153_v39 = vpop.f32.mrf.mxu2  ;;  %v8155_v41 = vpop.f32.mrf.mxu3 }
 0xa56   :  { %5740 = vst [vmem:[%s9038_s4 + $0x1c] sm:$0xf] %v2624_v34  ;;  %v2909_v52 = vpop.f32.mrf.mxu0  ;;  %3328 = vmatpush.bf16.msra.mxu2 %v8057_v25  ;;  %3317 = vmatpush.bf16.msra.mxu1 %v8078_v35 }
 0xa57   :  { %v2938_v23 = vpop.f32.mrf.mxu1  ;;  %v2910_v11 = vadd.f32 %v2909_v52, %v8149_v10  ;;  %3304 = vmatpush.bf16.msra.mxu0 %v8074_v1 }
 0xa58   :  { %v2939_v3 = vadd.f32 %v2938_v23, %v8151_v32  ;;  %3343 = vmatpush.bf16.msra.mxu3 %v8083_v14 }
 0xa5a   :  { %v8166_v63 = vpack.c.bf16 %v2939_v3, %v2910_v11  ;;  %3329 = vmatpush.bf16.msra.mxu2 %v8069_v48  ;;  %3318 = vmatpush.bf16.msra.mxu1 %v8090_v36 }
 0xa5b   :  { %3305 = vmatpush.bf16.msra.mxu0 %v8086_v22 }
 0xa5c   :  { %3344 = vmatpush.bf16.msra.mxu3 %v8095_v62 }
 0xa5d   :  { %v2967_v9 = vpop.f32.mrf.mxu2  ;;  %v2996_v50 = vpop.f32.mrf.mxu3  ;;  %v6504_v4 = vld [vmem:[%s9038_s4 + $0x18] sm:$0xff] }
 0xa5e   :  { %v2968_v17 = vadd.f32 %v2967_v9, %v8171_v24  ;;  %v2997_v47 = vadd.f32 %v2996_v50, %v8173_v19  ;;  %v8182_v43 = vpop.f32.mrf.mxu0  ;;  %2918 = vmatmul.bf16.gmra.mxu0 %v6504_v4  ;;  %2947 = vmatmul.bf16.gmra.mxu1 %v6504_v4  ;;  %v9116_v9 = vmov 0.0|0.0  }
 0xa5f   :  { %9110 = vst [vmem:[#allocation13_spill] sm:$0xff] %v8182_v43  ;;  %v8184_v6 = vpop.f32.mrf.mxu1  ;;  %2976 = vmatmul.bf16.gmra.mxu2 %v6504_v4  ;;  %3005 = vmatmul.bf16.gmra.mxu3 %v6504_v4 }
 0xa60   :  { %9111 = vst [vmem:[#allocation11_spill] sm:$0xff] %v8184_v6  ;;  %v8187_v5 = vpack.c.bf16 %v2997_v47, %v2968_v17  ;;  %3330 = vmatpush.bf16.msra.mxu2 %v8080_v16  ;;  %3306 = vmatpush.bf16.msra.mxu0 %v8098_v61 }
 0xa61   :  { %3319 = vmatpush.bf16.msra.mxu1 %v8102_v53  ;;  %3345 = vmatpush.bf16.msra.mxu3 %v8113_v12 }
 0xa62   :  { %9112 = vst [vmem:[#allocation12_spill] sm:$0xff] %v8187_v5 }
 0xa64   :  { %3331 = vmatpush.bf16.msra.mxu2 %v8092_v58  ;;  %3307 = vmatpush.bf16.msra.mxu0 %v8118_v42 }
 0xa65   :  { %v8193_v15 = vpop.f32.mrf.mxu2  ;;  %v8195_v28 = vpop.f32.mrf.mxu3  ;;  %3320 = vmatpush.bf16.msra.mxu1 %v8120_v21  ;;  %3346 = vmatpush.bf16.msra.mxu3 %v8130_v45 }
 0xa66   :  { %9113 = vst [vmem:[#allocation14_spill] sm:$0xff] %v8193_v15  ;;  %v2914_v60 = vpop.f32.mrf.mxu0 }
 0xa67   :  { %9114 = vst [vmem:[#allocation15_spill] sm:$0xff] %v8195_v28  ;;  %v2943_v57 = vpop.f32.mrf.mxu1  ;;  %v2915_v59 = vadd.f32 %v2914_v60, %v8149_v10 }
 0xa68   :  { %v2944_v51 = vadd.f32 %v2943_v57, %v8151_v32  ;;  %3332 = vmatpush.bf16.msra.mxu2 %v8104_v54 }
 0xa6a   :  { %v8203_v34 = vpack.c.bf16 %v2944_v51, %v2915_v59 }
 0xa6c   :  { %9115 = vst [vmem:[#allocation16_spill] sm:$0xff] %v8203_v34  ;;  %3333 = vmatpush.bf16.msra.mxu2 %v8123_v13 }
 0xa6d   :  { %v2972_v52 = vpop.f32.mrf.mxu2  ;;  %v3001_v23 = vpop.f32.mrf.mxu3 }
 0xa6e   :  { %v2973_v11 = vadd.f32 %v2972_v52, %v8171_v24  ;;  %v3002_v3 = vadd.f32 %v3001_v23, %v8173_v19  ;;  %3221 = vmatmul.bf16.vlgmr.msrb.gmra.mxu0 %v9116_v9  ;;  %3234 = vmatmul.bf16.vlgmr.msrb.gmra.mxu1 %v9116_v9  ;;  %v8251_v4 = vpop.f32.mrf.mxu0 }
 0xa6f   :  { %3247 = vmatmul.bf16.vlgmr.msrb.gmra.mxu2 %v9116_v9  ;;  %3260 = vmatmul.bf16.vlgmr.msrb.gmra.mxu3 %v9116_v9  ;;  %9118 = vst [vmem:[#allocation18_spill] sm:$0xff] %v8251_v4  ;;  %v8253_v17 = vpop.f32.mrf.mxu1 }
 0xa70   :  { %v8215_v50 = vpack.c.bf16 %v3002_v3, %v2973_v11  ;;  %3387 = vmatpush.bf16.msrb.mxu0 %v8015_v44  ;;  %3400 = vmatpush.bf16.msrb.mxu1 %v8017_v0  ;;  %9119 = vst [vmem:[#allocation19_spill] sm:$0xff] %v8253_v17  ;;  %v2905_v11 = vadd.f32 %v8106_v27, %v8149_v10 }
 0xa71   :  { %3413 = vmatpush.bf16.msrb.mxu2 %v8019_v30  ;;  %3426 = vmatpush.bf16.msrb.mxu3 %v8022_v8  ;;  %v2934_v3 = vadd.f32 %v8108_v29, %v8151_v32  ;;  %v2992_v27 = vadd.f32 %v8127_v31, %v8173_v19 }
 0xa72   :  { %9117 = vst [vmem:[#allocation17_spill] sm:$0xff] %v8215_v50 }
 0xa74   :  { %3388 = vmatpush.bf16.msrb.mxu0 %v8033_v20  ;;  %3401 = vmatpush.bf16.msrb.mxu1 %v8035_v37 }
 0xa75   :  { %3414 = vmatpush.bf16.msrb.mxu2 %v8037_v38  ;;  %3427 = vmatpush.bf16.msrb.mxu3 %v8046_v18  ;;  %v8255_v47 = vpop.f32.mrf.mxu2  ;;  %v8257_v60 = vpop.f32.mrf.mxu3 }
 0xa76   :  { %9120 = vst [vmem:[#allocation20_spill] sm:$0xff] %v8255_v47 }
 0xa77   :  { %9121 = vst [vmem:[#allocation21_spill] sm:$0xff] %v8257_v60 }
 0xa78   :  { %3389 = vmatpush.bf16.msrb.mxu0 %v8053_v26  ;;  %3402 = vmatpush.bf16.msrb.mxu1 %v8055_v49 }
 0xa79   :  { %3415 = vmatpush.bf16.msrb.mxu2 %v8057_v25  ;;  %3428 = vmatpush.bf16.msrb.mxu3 %v8060_v46 }
 0xa7c   :  { %3390 = vmatpush.bf16.msrb.mxu0 %v8064_v7  ;;  %3403 = vmatpush.bf16.msrb.mxu1 %v8066_v40 }
 0xa7d   :  { %3416 = vmatpush.bf16.msrb.mxu2 %v8069_v48  ;;  %3429 = vmatpush.bf16.msrb.mxu3 %v8071_v56 }
 0xa80   :  { %3391 = vmatpush.bf16.msrb.mxu0 %v8074_v1  ;;  %3404 = vmatpush.bf16.msrb.mxu1 %v8078_v35 }
 0xa81   :  { %3417 = vmatpush.bf16.msrb.mxu2 %v8080_v16  ;;  %3430 = vmatpush.bf16.msrb.mxu3 %v8083_v14 }
 0xa84   :  { %3392 = vmatpush.bf16.msrb.mxu0 %v8086_v22  ;;  %3405 = vmatpush.bf16.msrb.mxu1 %v8090_v36 }
 0xa85   :  { %3418 = vmatpush.bf16.msrb.mxu2 %v8092_v58  ;;  %3431 = vmatpush.bf16.msrb.mxu3 %v8095_v62 }
 0xa88   :  { %3393 = vmatpush.bf16.msrb.mxu0 %v8098_v61  ;;  %3406 = vmatpush.bf16.msrb.mxu1 %v8102_v53 }
 0xa89   :  { %3419 = vmatpush.bf16.msrb.mxu2 %v8104_v54  ;;  %3432 = vmatpush.bf16.msrb.mxu3 %v8113_v12 }
 0xa8c   :  { %3394 = vmatpush.bf16.msrb.mxu0 %v8118_v42  ;;  %3407 = vmatpush.bf16.msrb.mxu1 %v8120_v21 }
 0xa8d   :  { %3420 = vmatpush.bf16.msrb.mxu2 %v8123_v13  ;;  %3433 = vmatpush.bf16.msrb.mxu3 %v8130_v45 }
 0xadb   :  { %v2919_v57 = vpop.f32.mrf.mxu0  ;;  %v2948_v59 = vpop.f32.mrf.mxu1 }
 0xadc   :  { %v2920_v51 = vadd.f32 %v2919_v57, %v8149_v10  ;;  %v2949_v52 = vadd.f32 %v2948_v59, %v8151_v32  ;;  %v3011_v59 = vpack.c.bf16 %v2934_v3, %v2905_v11 }
 0xade   :  { %v8261_v23 = vpack.c.bf16 %v2949_v52, %v2920_v51  ;;  %v2963_v51 = vadd.f32 %v8125_v33, %v8171_v24 }
 0xae0   :  { %9122 = vst [vmem:[#allocation22_spill] sm:$0xff] %v8261_v23  ;;  %v3048_v23 = vunpack.c.h.bf16 %v3011_v59 }
 0xae2   :  { %v2977_v9 = vpop.f32.mrf.mxu2  ;;  %v3006_v17 = vpop.f32.mrf.mxu3 }
 0xae3   :  { %v2978_v47 = vadd.f32 %v2977_v9, %v8171_v24  ;;  %v3007_v60 = vadd.f32 %v3006_v17, %v8173_v19  ;;  %v8269_v4 = vpop.f32.mrf.mxu0  ;;  %v8271_v50 = vpop.f32.mrf.mxu1  ;;  %v3047_v9 = vunpack.c.l.bf16 %v3011_v59 }
 0xae4   :  { %9123 = vst [vmem:[#allocation25_spill] sm:$0xff] %v8269_v4 }
 0xae5   :  { %9124 = vst [vmem:[#allocation23_spill] sm:$0xff] %v8271_v50  ;;  %v8273_v57 = vpack.c.bf16 %v3007_v60, %v2978_v47  ;;  %v3012_v50 = vpack.c.bf16 %v2992_v27, %v2963_v51 }
 0xae7   :  { %9125 = vst [vmem:[#allocation24_spill] sm:$0xff] %v8273_v57  ;;  %v3049_v11 = vunpack.c.l.bf16 %v3012_v50  ;;  %v3050_v33 = vunpack.c.h.bf16 %v3012_v50 }
 0xaea   :  { %v8279_v29 = vpop.f32.mrf.mxu2  ;;  %v8281_v52 = vpop.f32.mrf.mxu3 }
 0xaeb   :  { %9126 = vst [vmem:[#allocation26_spill] sm:$0xff] %v8279_v29  ;;  %v3222_v17 = vpop.f32.mrf.mxu0  ;;  %v3235_v34 = vpop.f32.mrf.mxu1 }
 0xaec   :  { %9127 = vst [vmem:[#allocation27_spill] sm:$0xff] %v8281_v52  ;;  %v3265_v4 = vadd.f32 %v3222_v17, %v3047_v9  ;;  %v3266_v28 = vadd.f32 %v3235_v34, %v3048_v23 }
 0xaee   :  { %v3269_v47 = vmul.f32 0.5, %v3265_v4  ;;  %v3273_v60 = vmul.f32 0.5, %v3266_v28 }
 0xaf0   :  { %6738 = vtanh.f32 %v3269_v47 }
 0xaf1   :  { %6740 = vtanh.f32 %v3273_v60 }
 0xaf2   :  { %v3248_v3 = vpop.f32.mrf.mxu2  ;;  %v3261_v57 = vpop.f32.mrf.mxu3 }
 0xaf3   :  { %v3267_v31 = vadd.f32 %v3248_v3, %v3049_v11  ;;  %v3268_v15 = vadd.f32 %v3261_v57, %v3050_v33  ;;  %v3224_v29 = vpop.f32.mrf.mxu0  ;;  %v3237_v6 = vpop.f32.mrf.mxu1  ;;  %v2965_v11 = vadd.f32 %v8153_v39, %v8171_v24  ;;  %v2994_v33 = vadd.f32 %v8155_v41, %v8173_v19 }
 0xaf5   :  { %6742 = vtanh.f32 %v3267_v31  ;;  %v3278_v52 = vmul.f32 0.5, %v3268_v15 }
 0xaf6   :  { %v6739_v59 = vpop.eup %6738 }
 0xaf7   :  { %v6741_v43 = vpop.eup %6740  ;;  %v3271_v5 = vmul.f32 0.5, %v6739_v59  ;;  %6744 = vtanh.f32 %v3278_v52 }
 0xaf8   :  { %v3275_v9 = vmul.f32 0.5, %v6741_v43  ;;  %v2907_v43 = vadd.f32 %v8133_v2, %v8149_v10 }
 0xaf9   :  { %v3272_v34 = vadd.f32 0.5, %v3271_v5  ;;  %v2936_v5 = vadd.f32 %v8135_v55, %v8151_v32 }
 0xafa   :  { %v3276_v4 = vadd.f32 0.5, %v3275_v9  ;;  %v3250_v28 = vpop.f32.mrf.mxu2  ;;  %v3263_v23 = vpop.f32.mrf.mxu3 }
 0xafb   :  { %v6743_v51 = vpop.eup %6742  ;;  %v3013_v52 = vpack.c.bf16 %v2936_v5, %v2907_v43  ;;  %v3014_v28 = vpack.c.bf16 %v2994_v33, %v2965_v11 }
 0xafc   :  { %v3283_v27 = vmul.f32 0.0, %v3276_v4  ;;  %v3284_v50 = vmul.f32 %v6743_v51, %v3272_v34 }
 0xafd   :  { %v6745_v17 = vpop.eup %6744  ;;  %v3294_v3 = vunpack.c.l.bf16 %v3013_v52  ;;  %v3295_v31 = vunpack.c.h.bf16 %v3013_v52  ;;  %v3296_v2 = vunpack.c.l.bf16 %v3014_v28  ;;  %v3297_v55 = vunpack.c.h.bf16 %v3014_v28 }
 0xafe   :  { %v8283_v47 = vadd.f32 %v3284_v50, %v3283_v27  ;;  %v3280_v6 = vmul.f32 0.5, %v6745_v17 }
 0xb00   :  { %6746 = vtanh.f32 %v8283_v47  ;;  %v3281_v57 = vadd.f32 0.5, %v3280_v6 }
 0xb06   :  { %v6747_v15 = vpop.eup %6746 }
 0xb07   :  { %v3287_v29 = vmul.f32 %v6747_v15, %v3281_v57 }
 0xb09   :  { %v3290_v60 = vpack.c.bf16 %v3287_v29, %v3287_v29 }
 0xb0b   :  { %3291 = vst [vmem:[%s9038_s4] sm:$0xf] %v3290_v60  ;;  %3308 = vmatmul.bf16.vlgmr.msra.gmra.mxu0 %v3290_v60  ;;  %3321 = vmatmul.bf16.vlgmr.msra.gmra.mxu1 %v3290_v60 }
 0xb0c   :  { %3334 = vmatmul.bf16.vlgmr.msra.gmra.mxu2 %v3290_v60  ;;  %3347 = vmatmul.bf16.vlgmr.msra.gmra.mxu3 %v3290_v60 }
 0xb0d   :  { %3474 = vmatpush.bf16.msra.mxu0 %v8015_v44  ;;  %3487 = vmatpush.bf16.msra.mxu1 %v8017_v0 }
 0xb0e   :  { %3500 = vmatpush.bf16.msra.mxu2 %v8019_v30  ;;  %3513 = vmatpush.bf16.msra.mxu3 %v8022_v8 }
 0xb11   :  { %3475 = vmatpush.bf16.msra.mxu0 %v8033_v20  ;;  %3488 = vmatpush.bf16.msra.mxu1 %v8035_v37 }
 0xb12   :  { %3501 = vmatpush.bf16.msra.mxu2 %v8037_v38  ;;  %3514 = vmatpush.bf16.msra.mxu3 %v8046_v18 }
 0xb15   :  { %3476 = vmatpush.bf16.msra.mxu0 %v8053_v26  ;;  %3489 = vmatpush.bf16.msra.mxu1 %v8055_v49 }
 0xb16   :  { %3502 = vmatpush.bf16.msra.mxu2 %v8057_v25  ;;  %3515 = vmatpush.bf16.msra.mxu3 %v8060_v46 }
 0xb19   :  { %3477 = vmatpush.bf16.msra.mxu0 %v8064_v7  ;;  %3490 = vmatpush.bf16.msra.mxu1 %v8066_v40 }
 0xb1a   :  { %3503 = vmatpush.bf16.msra.mxu2 %v8069_v48  ;;  %3516 = vmatpush.bf16.msra.mxu3 %v8071_v56 }
 0xb1d   :  { %3478 = vmatpush.bf16.msra.mxu0 %v8074_v1  ;;  %3491 = vmatpush.bf16.msra.mxu1 %v8078_v35 }
 0xb1e   :  { %3504 = vmatpush.bf16.msra.mxu2 %v8080_v16  ;;  %3517 = vmatpush.bf16.msra.mxu3 %v8083_v14 }
 0xb21   :  { %3479 = vmatpush.bf16.msra.mxu0 %v8086_v22  ;;  %3492 = vmatpush.bf16.msra.mxu1 %v8090_v36 }
 0xb22   :  { %3505 = vmatpush.bf16.msra.mxu2 %v8092_v58  ;;  %3518 = vmatpush.bf16.msra.mxu3 %v8095_v62 }
 0xb25   :  { %3480 = vmatpush.bf16.msra.mxu0 %v8098_v61  ;;  %3493 = vmatpush.bf16.msra.mxu1 %v8102_v53 }
 0xb26   :  { %3506 = vmatpush.bf16.msra.mxu2 %v8104_v54  ;;  %3519 = vmatpush.bf16.msra.mxu3 %v8113_v12 }
 0xb29   :  { %3481 = vmatpush.bf16.msra.mxu0 %v8118_v42  ;;  %3494 = vmatpush.bf16.msra.mxu1 %v8120_v21 }
 0xb2a   :  { %3507 = vmatpush.bf16.msra.mxu2 %v8123_v13  ;;  %3520 = vmatpush.bf16.msra.mxu3 %v8130_v45 }
 0xb88   :  { %v3309_v59 = vpop.f32.mrf.mxu0  ;;  %v3322_v9 = vpop.f32.mrf.mxu1 }
 0xb89   :  { %v3352_v34 = vadd.f32 %v3309_v59, %v3294_v3  ;;  %v3353_v4 = vadd.f32 %v3322_v9, %v3295_v31 }
 0xb8b   :  { %v3356_v23 = vmul.f32 0.5, %v3352_v34  ;;  %v3360_v51 = vmul.f32 0.5, %v3353_v4 }
 0xb8d   :  { %6748 = vtanh.f32 %v3356_v23 }
 0xb8e   :  { %6750 = vtanh.f32 %v3360_v51 }
 0xb8f   :  { %v3335_v27 = vpop.f32.mrf.mxu2  ;;  %v3348_v50 = vpop.f32.mrf.mxu3 }
 0xb90   :  { %v3354_v17 = vadd.f32 %v3335_v27, %v3296_v2  ;;  %v3355_v39 = vadd.f32 %v3348_v50, %v3297_v55  ;;  %v3311_v6 = vpop.f32.mrf.mxu0  ;;  %v3324_v57 = vpop.f32.mrf.mxu1  ;;  %v3382_v55 = vunpack.c.h.bf16 %v8166_v63 }
 0xb92   :  { %6752 = vtanh.f32 %v3354_v17  ;;  %v3365_v41 = vmul.f32 0.5, %v3355_v39 }
 0xb93   :  { %v6749_v15 = vpop.eup %6748 }
 0xb94   :  { %v6751_v29 = vpop.eup %6750  ;;  %v3358_v60 = vmul.f32 0.5, %v6749_v15  ;;  %6754 = vtanh.f32 %v3365_v41  ;;  %v9128_v41 = vld [vmem:[#allocation12_spill] sm:$0xff] }
 0xb95   :  { %v3362_v43 = vmul.f32 0.5, %v6751_v29  ;;  %v3383_v15 = vunpack.c.l.bf16 %v9128_v41  ;;  %v3384_v29 = vunpack.c.h.bf16 %v9128_v41 }
 0xb96   :  { %v3359_v5 = vadd.f32 0.5, %v3358_v60 }
 0xb97   :  { %v3363_v52 = vadd.f32 0.5, %v3362_v43  ;;  %v3337_v11 = vpop.f32.mrf.mxu2  ;;  %v3350_v33 = vpop.f32.mrf.mxu3 }
 0xb98   :  { %v6753_v3 = vpop.eup %6752 }
 0xb99   :  { %v3370_v31 = vmul.f32 %v3363_v52, %v8283_v47  ;;  %v3371_v59 = vmul.f32 %v6753_v3, %v3359_v5  ;;  %v3381_v47 = vunpack.c.l.bf16 %v8166_v63 }
 0xb9a   :  { %v6755_v9 = vpop.eup %6754 }
 0xb9b   :  { %v8330_v34 = vadd.f32 %v3371_v59, %v3370_v31  ;;  %v3367_v4 = vmul.f32 0.5, %v6755_v9 }
 0xb9d   :  { %6756 = vtanh.f32 %v8330_v34  ;;  %v3368_v28 = vadd.f32 0.5, %v3367_v4 }
 0xba3   :  { %v6757_v23 = vpop.eup %6756 }
 0xba4   :  { %v3374_v51 = vmul.f32 %v6757_v23, %v3368_v28 }
 0xba6   :  { %v3377_v2 = vpack.c.bf16 %v3374_v51, %v3374_v51 }
 0xba8   :  { %6014 = vst [vmem:[%s9038_s4 + $0x4] sm:$0xf] %v3377_v2  ;;  %3395 = vmatmul.bf16.vlgmr.msrb.gmra.mxu0 %v3377_v2  ;;  %3408 = vmatmul.bf16.vlgmr.msrb.gmra.mxu1 %v3377_v2 }
 0xba9   :  { %3421 = vmatmul.bf16.vlgmr.msrb.gmra.mxu2 %v3377_v2  ;;  %3434 = vmatmul.bf16.vlgmr.msrb.gmra.mxu3 %v3377_v2 }
 0xbaa   :  { %3561 = vmatpush.bf16.msrb.mxu0 %v8015_v44  ;;  %3574 = vmatpush.bf16.msrb.mxu1 %v8017_v0 }
 0xbab   :  { %3587 = vmatpush.bf16.msrb.mxu2 %v8019_v30  ;;  %3600 = vmatpush.bf16.msrb.mxu3 %v8022_v8 }
 0xbae   :  { %3562 = vmatpush.bf16.msrb.mxu0 %v8033_v20  ;;  %3575 = vmatpush.bf16.msrb.mxu1 %v8035_v37 }
 0xbaf   :  { %3588 = vmatpush.bf16.msrb.mxu2 %v8037_v38  ;;  %3601 = vmatpush.bf16.msrb.mxu3 %v8046_v18 }
 0xbb2   :  { %3563 = vmatpush.bf16.msrb.mxu0 %v8053_v26  ;;  %3576 = vmatpush.bf16.msrb.mxu1 %v8055_v49 }
 0xbb3   :  { %3589 = vmatpush.bf16.msrb.mxu2 %v8057_v25  ;;  %3602 = vmatpush.bf16.msrb.mxu3 %v8060_v46 }
 0xbb6   :  { %3564 = vmatpush.bf16.msrb.mxu0 %v8064_v7  ;;  %3577 = vmatpush.bf16.msrb.mxu1 %v8066_v40 }
 0xbb7   :  { %3590 = vmatpush.bf16.msrb.mxu2 %v8069_v48  ;;  %3603 = vmatpush.bf16.msrb.mxu3 %v8071_v56 }
 0xbba   :  { %3565 = vmatpush.bf16.msrb.mxu0 %v8074_v1  ;;  %3578 = vmatpush.bf16.msrb.mxu1 %v8078_v35 }
 0xbbb   :  { %3591 = vmatpush.bf16.msrb.mxu2 %v8080_v16  ;;  %3604 = vmatpush.bf16.msrb.mxu3 %v8083_v14 }
 0xbbe   :  { %3566 = vmatpush.bf16.msrb.mxu0 %v8086_v22  ;;  %3579 = vmatpush.bf16.msrb.mxu1 %v8090_v36 }
 0xbbf   :  { %3592 = vmatpush.bf16.msrb.mxu2 %v8092_v58  ;;  %3605 = vmatpush.bf16.msrb.mxu3 %v8095_v62 }
 0xbc2   :  { %3567 = vmatpush.bf16.msrb.mxu0 %v8098_v61  ;;  %3580 = vmatpush.bf16.msrb.mxu1 %v8102_v53 }
 0xbc3   :  { %3593 = vmatpush.bf16.msrb.mxu2 %v8104_v54  ;;  %3606 = vmatpush.bf16.msrb.mxu3 %v8113_v12 }
 0xbc6   :  { %3568 = vmatpush.bf16.msrb.mxu0 %v8118_v42  ;;  %3581 = vmatpush.bf16.msrb.mxu1 %v8120_v21 }
 0xbc7   :  { %3594 = vmatpush.bf16.msrb.mxu2 %v8123_v13  ;;  %3607 = vmatpush.bf16.msrb.mxu3 %v8130_v45 }
 0xc25   :  { %v3396_v27 = vpop.f32.mrf.mxu0  ;;  %v3409_v50 = vpop.f32.mrf.mxu1 }
 0xc26   :  { %v3439_v17 = vadd.f32 %v3396_v27, %v3381_v47  ;;  %v3440_v39 = vadd.f32 %v3409_v50, %v3382_v55 }
 0xc28   :  { %v3443_v6 = vmul.f32 0.5, %v3439_v17  ;;  %v3447_v57 = vmul.f32 0.5, %v3440_v39 }
 0xc2a   :  { %6758 = vtanh.f32 %v3443_v6 }
 0xc2b   :  { %6760 = vtanh.f32 %v3447_v57 }
 0xc2c   :  { %v3422_v60 = vpop.f32.mrf.mxu2  ;;  %v3435_v43 = vpop.f32.mrf.mxu3 }
 0xc2d   :  { %v3441_v5 = vadd.f32 %v3422_v60, %v3383_v15  ;;  %v3442_v52 = vadd.f32 %v3435_v43, %v3384_v29  ;;  %v3398_v11 = vpop.f32.mrf.mxu0  ;;  %v3411_v33 = vpop.f32.mrf.mxu1  ;;  %v9130_v29 = vld [vmem:[#allocation11_spill] sm:$0xff] }
 0xc2e   :  { %v2941_v60 = vadd.f32 %v9130_v29, %v8151_v32  ;;  %v9132_v11 = vld [vmem:[#allocation15_spill] sm:$0xff] }
 0xc2f   :  { %6762 = vtanh.f32 %v3441_v5  ;;  %v3452_v63 = vmul.f32 0.5, %v3442_v52  ;;  %v9131_v5 = vld [vmem:[#allocation14_spill] sm:$0xff]  ;;  %v2999_v33 = vadd.f32 %v9132_v11, %v8173_v19 }
 0xc30   :  { %v6759_v3 = vpop.eup %6758  ;;  %v2970_v52 = vadd.f32 %v9131_v5, %v8171_v24 }
 0xc31   :  { %v6761_v31 = vpop.eup %6760  ;;  %v3445_v59 = vmul.f32 0.5, %v6759_v3  ;;  %6764 = vtanh.f32 %v3452_v63 }
 0xc32   :  { %v3449_v9 = vmul.f32 0.5, %v6761_v31 }
 0xc33   :  { %v3446_v4 = vadd.f32 0.5, %v3445_v59 }
 0xc34   :  { %v3450_v28 = vadd.f32 0.5, %v3449_v9  ;;  %v3424_v23 = vpop.f32.mrf.mxu2  ;;  %v3437_v51 = vpop.f32.mrf.mxu3 }
 0xc35   :  { %v6763_v2 = vpop.eup %6762 }
 0xc36   :  { %v3457_v47 = vmul.f32 %v3450_v28, %v8330_v34  ;;  %v3458_v55 = vmul.f32 %v6763_v2, %v3446_v4  ;;  %v9129_v34 = vld [vmem:[#allocation13_spill] sm:$0xff]  ;;  %v3018_v28 = vpack.c.bf16 %v2999_v33, %v2970_v52 }
 0xc37   :  { %v6765_v27 = vpop.eup %6764  ;;  %v2912_v15 = vadd.f32 %v9129_v34, %v8149_v10 }
 0xc38   :  { %v8373_v50 = vadd.f32 %v3458_v55, %v3457_v47  ;;  %v3454_v17 = vmul.f32 0.5, %v6765_v27  ;;  %v3470_v2 = vunpack.c.l.bf16 %v3018_v28  ;;  %v3471_v47 = vunpack.c.h.bf16 %v3018_v28 }
 0xc39   :  { %v3017_v43 = vpack.c.bf16 %v2941_v60, %v2912_v15 }
 0xc3a   :  { %6766 = vtanh.f32 %v8373_v50  ;;  %v3455_v39 = vadd.f32 0.5, %v3454_v17 }
 0xc3b   :  { %v3468_v63 = vunpack.c.l.bf16 %v3017_v43  ;;  %v3469_v3 = vunpack.c.h.bf16 %v3017_v43 }
 0xc40   :  { %v6767_v6 = vpop.eup %6766 }
 0xc41   :  { %v3461_v57 = vmul.f32 %v6767_v6, %v3455_v39 }
 0xc43   :  { %v3464_v41 = vpack.c.bf16 %v3461_v57, %v3461_v57 }
 0xc45   :  { %6015 = vst [vmem:[%s9038_s4 + $0x8] sm:$0xf] %v3464_v41  ;;  %3482 = vmatmul.bf16.vlgmr.msra.gmra.mxu0 %v3464_v41  ;;  %3495 = vmatmul.bf16.vlgmr.msra.gmra.mxu1 %v3464_v41 }
 0xc46   :  { %3508 = vmatmul.bf16.vlgmr.msra.gmra.mxu2 %v3464_v41  ;;  %3521 = vmatmul.bf16.vlgmr.msra.gmra.mxu3 %v3464_v41 }
 0xc47   :  { %3648 = vmatpush.bf16.msra.mxu0 %v8015_v44  ;;  %3661 = vmatpush.bf16.msra.mxu1 %v8017_v0 }
 0xc48   :  { %3674 = vmatpush.bf16.msra.mxu2 %v8019_v30  ;;  %3687 = vmatpush.bf16.msra.mxu3 %v8022_v8 }
 0xc4b   :  { %3649 = vmatpush.bf16.msra.mxu0 %v8033_v20  ;;  %3662 = vmatpush.bf16.msra.mxu1 %v8035_v37 }
 0xc4c   :  { %3675 = vmatpush.bf16.msra.mxu2 %v8037_v38  ;;  %3688 = vmatpush.bf16.msra.mxu3 %v8046_v18 }
 0xc4f   :  { %3650 = vmatpush.bf16.msra.mxu0 %v8053_v26  ;;  %3663 = vmatpush.bf16.msra.mxu1 %v8055_v49 }
 0xc50   :  { %3676 = vmatpush.bf16.msra.mxu2 %v8057_v25  ;;  %3689 = vmatpush.bf16.msra.mxu3 %v8060_v46 }
 0xc53   :  { %3651 = vmatpush.bf16.msra.mxu0 %v8064_v7  ;;  %3664 = vmatpush.bf16.msra.mxu1 %v8066_v40 }
 0xc54   :  { %3677 = vmatpush.bf16.msra.mxu2 %v8069_v48  ;;  %3690 = vmatpush.bf16.msra.mxu3 %v8071_v56 }
 0xc57   :  { %3652 = vmatpush.bf16.msra.mxu0 %v8074_v1  ;;  %3665 = vmatpush.bf16.msra.mxu1 %v8078_v35 }
 0xc58   :  { %3678 = vmatpush.bf16.msra.mxu2 %v8080_v16  ;;  %3691 = vmatpush.bf16.msra.mxu3 %v8083_v14 }
 0xc5b   :  { %3653 = vmatpush.bf16.msra.mxu0 %v8086_v22  ;;  %3666 = vmatpush.bf16.msra.mxu1 %v8090_v36 }
 0xc5c   :  { %3679 = vmatpush.bf16.msra.mxu2 %v8092_v58  ;;  %3692 = vmatpush.bf16.msra.mxu3 %v8095_v62 }
 0xc5f   :  { %3654 = vmatpush.bf16.msra.mxu0 %v8098_v61  ;;  %3667 = vmatpush.bf16.msra.mxu1 %v8102_v53 }
 0xc60   :  { %3680 = vmatpush.bf16.msra.mxu2 %v8104_v54  ;;  %3693 = vmatpush.bf16.msra.mxu3 %v8113_v12 }
 0xc63   :  { %3655 = vmatpush.bf16.msra.mxu0 %v8118_v42  ;;  %3668 = vmatpush.bf16.msra.mxu1 %v8120_v21 }
 0xc64   :  { %3681 = vmatpush.bf16.msra.mxu2 %v8123_v13  ;;  %3694 = vmatpush.bf16.msra.mxu3 %v8130_v45 }
 0xcc2   :  { %v3483_v31 = vpop.f32.mrf.mxu0  ;;  %v3496_v59 = vpop.f32.mrf.mxu1 }
 0xcc3   :  { %v3526_v9 = vadd.f32 %v3483_v31, %v3468_v63  ;;  %v3527_v4 = vadd.f32 %v3496_v59, %v3469_v3 }
 0xcc5   :  { %v3530_v23 = vmul.f32 0.5, %v3526_v9  ;;  %v3534_v51 = vmul.f32 0.5, %v3527_v4 }
 0xcc7   :  { %6768 = vtanh.f32 %v3530_v23 }
 0xcc8   :  { %6770 = vtanh.f32 %v3534_v51 }
 0xcc9   :  { %v3509_v55 = vpop.f32.mrf.mxu2  ;;  %v3522_v27 = vpop.f32.mrf.mxu3 }
 0xcca   :  { %v3528_v17 = vadd.f32 %v3509_v55, %v3470_v2  ;;  %v3529_v39 = vadd.f32 %v3522_v27, %v3471_v47  ;;  %v3485_v6 = vpop.f32.mrf.mxu0  ;;  %v3498_v57 = vpop.f32.mrf.mxu1 }
 0xccc   :  { %6772 = vtanh.f32 %v3528_v17  ;;  %v3539_v41 = vmul.f32 0.5, %v3529_v39 }
 0xccd   :  { %v6769_v34 = vpop.eup %6768 }
 0xcce   :  { %v6771_v15 = vpop.eup %6770  ;;  %v3532_v29 = vmul.f32 0.5, %v6769_v34  ;;  %6774 = vtanh.f32 %v3539_v41  ;;  %v9134_v41 = vld [vmem:[#allocation17_spill] sm:$0xff] }
 0xccf   :  { %v3536_v60 = vmul.f32 0.5, %v6771_v15  ;;  %v3557_v34 = vunpack.c.l.bf16 %v9134_v41  ;;  %v3558_v15 = vunpack.c.h.bf16 %v9134_v41 }
 0xcd0   :  { %v3533_v43 = vadd.f32 0.5, %v3532_v29 }
 0xcd1   :  { %v3537_v5 = vadd.f32 0.5, %v3536_v60  ;;  %v3511_v52 = vpop.f32.mrf.mxu2  ;;  %v3524_v11 = vpop.f32.mrf.mxu3 }
 0xcd2   :  { %v6773_v33 = vpop.eup %6772 }
 0xcd3   :  { %v3544_v63 = vmul.f32 %v3537_v5, %v8373_v50  ;;  %v3545_v3 = vmul.f32 %v6773_v33, %v3533_v43  ;;  %v9133_v50 = vld [vmem:[#allocation16_spill] sm:$0xff] }
 0xcd4   :  { %v6775_v31 = vpop.eup %6774  ;;  %v3555_v2 = vunpack.c.l.bf16 %v9133_v50  ;;  %v3556_v47 = vunpack.c.h.bf16 %v9133_v50 }
 0xcd5   :  { %v8420_v59 = vadd.f32 %v3545_v3, %v3544_v63  ;;  %v3541_v9 = vmul.f32 0.5, %v6775_v31 }
 0xcd7   :  { %6776 = vtanh.f32 %v8420_v59  ;;  %v3542_v4 = vadd.f32 0.5, %v3541_v9 }
 0xcdd   :  { %v6777_v28 = vpop.eup %6776 }
 0xcde   :  { %v3548_v23 = vmul.f32 %v6777_v28, %v3542_v4 }
 0xce0   :  { %v3551_v51 = vpack.c.bf16 %v3548_v23, %v3548_v23 }
 0xce2   :  { %6016 = vst [vmem:[%s9038_s4 + $0xc] sm:$0xf] %v3551_v51  ;;  %3569 = vmatmul.bf16.vlgmr.msrb.gmra.mxu0 %v3551_v51  ;;  %3582 = vmatmul.bf16.vlgmr.msrb.gmra.mxu1 %v3551_v51 }
 0xce3   :  { %3595 = vmatmul.bf16.vlgmr.msrb.gmra.mxu2 %v3551_v51  ;;  %3608 = vmatmul.bf16.vlgmr.msrb.gmra.mxu3 %v3551_v51 }
 0xce4   :  { %3735 = vmatpush.bf16.msrb.mxu0 %v8015_v44  ;;  %3748 = vmatpush.bf16.msrb.mxu1 %v8017_v0 }
 0xce5   :  { %3761 = vmatpush.bf16.msrb.mxu2 %v8019_v30  ;;  %3774 = vmatpush.bf16.msrb.mxu3 %v8022_v8 }
 0xce8   :  { %3736 = vmatpush.bf16.msrb.mxu0 %v8033_v20  ;;  %3749 = vmatpush.bf16.msrb.mxu1 %v8035_v37 }
 0xce9   :  { %3762 = vmatpush.bf16.msrb.mxu2 %v8037_v38  ;;  %3775 = vmatpush.bf16.msrb.mxu3 %v8046_v18 }
 0xcec   :  { %3737 = vmatpush.bf16.msrb.mxu0 %v8053_v26  ;;  %3750 = vmatpush.bf16.msrb.mxu1 %v8055_v49 }
 0xced   :  { %3763 = vmatpush.bf16.msrb.mxu2 %v8057_v25  ;;  %3776 = vmatpush.bf16.msrb.mxu3 %v8060_v46 }
 0xcf0   :  { %3738 = vmatpush.bf16.msrb.mxu0 %v8064_v7  ;;  %3751 = vmatpush.bf16.msrb.mxu1 %v8066_v40 }
 0xcf1   :  { %3764 = vmatpush.bf16.msrb.mxu2 %v8069_v48  ;;  %3777 = vmatpush.bf16.msrb.mxu3 %v8071_v56 }
 0xcf4   :  { %3739 = vmatpush.bf16.msrb.mxu0 %v8074_v1  ;;  %3752 = vmatpush.bf16.msrb.mxu1 %v8078_v35 }
 0xcf5   :  { %3765 = vmatpush.bf16.msrb.mxu2 %v8080_v16  ;;  %3778 = vmatpush.bf16.msrb.mxu3 %v8083_v14 }
 0xcf8   :  { %3740 = vmatpush.bf16.msrb.mxu0 %v8086_v22  ;;  %3753 = vmatpush.bf16.msrb.mxu1 %v8090_v36 }
 0xcf9   :  { %3766 = vmatpush.bf16.msrb.mxu2 %v8092_v58  ;;  %3779 = vmatpush.bf16.msrb.mxu3 %v8095_v62 }
 0xcfc   :  { %3741 = vmatpush.bf16.msrb.mxu0 %v8098_v61  ;;  %3754 = vmatpush.bf16.msrb.mxu1 %v8102_v53 }
 0xcfd   :  { %3767 = vmatpush.bf16.msrb.mxu2 %v8104_v54  ;;  %3780 = vmatpush.bf16.msrb.mxu3 %v8113_v12 }
 0xd00   :  { %3742 = vmatpush.bf16.msrb.mxu0 %v8118_v42  ;;  %3755 = vmatpush.bf16.msrb.mxu1 %v8120_v21 }
 0xd01   :  { %3768 = vmatpush.bf16.msrb.mxu2 %v8123_v13  ;;  %3781 = vmatpush.bf16.msrb.mxu3 %v8130_v45 }
 0xd5f   :  { %v3570_v55 = vpop.f32.mrf.mxu0  ;;  %v3583_v27 = vpop.f32.mrf.mxu1 }
 0xd60   :  { %v3613_v17 = vadd.f32 %v3570_v55, %v3555_v2  ;;  %v3614_v39 = vadd.f32 %v3583_v27, %v3556_v47 }
 0xd62   :  { %v3617_v6 = vmul.f32 0.5, %v3613_v17  ;;  %v3621_v57 = vmul.f32 0.5, %v3614_v39 }
 0xd64   :  { %6778 = vtanh.f32 %v3617_v6 }
 0xd65   :  { %6780 = vtanh.f32 %v3621_v57 }
 0xd66   :  { %v3596_v29 = vpop.f32.mrf.mxu2  ;;  %v3609_v60 = vpop.f32.mrf.mxu3 }
 0xd67   :  { %v3615_v43 = vadd.f32 %v3596_v29, %v3557_v34  ;;  %v3616_v5 = vadd.f32 %v3609_v60, %v3558_v15  ;;  %v3572_v52 = vpop.f32.mrf.mxu0  ;;  %v3585_v11 = vpop.f32.mrf.mxu1 }
 0xd69   :  { %6782 = vtanh.f32 %v3615_v43  ;;  %v3626_v33 = vmul.f32 0.5, %v3616_v5 }
 0xd6a   :  { %v6779_v63 = vpop.eup %6778 }
 0xd6b   :  { %v6781_v3 = vpop.eup %6780  ;;  %v3619_v31 = vmul.f32 0.5, %v6779_v63  ;;  %6784 = vtanh.f32 %v3626_v33 }
 0xd6c   :  { %v3623_v9 = vmul.f32 0.5, %v6781_v3 }
 0xd6d   :  { %v3620_v4 = vadd.f32 0.5, %v3619_v31 }
 0xd6e   :  { %v3624_v28 = vadd.f32 0.5, %v3623_v9  ;;  %v3598_v23 = vpop.f32.mrf.mxu2  ;;  %v3611_v51 = vpop.f32.mrf.mxu3  ;;  %v6152_v9 = vld [vmem:[#allocation5 + $0x3e0] sm:$0xf] }
 0xd6f   :  { %v6783_v50 = vpop.eup %6782  ;;  %v6154_v51 = vld [vmem:[#allocation5 + $0x3f0] sm:$0xf0] }
 0xd70   :  { %v3631_v2 = vmul.f32 %v3624_v28, %v8420_v59  ;;  %v3632_v47 = vmul.f32 %v6783_v50, %v3620_v4  ;;  %v6535_v4 = vld [vmem:[#allocation5 + $0x3ec] sm:$0xf0]  ;;  %v6533_v28 = vld [vmem:[#allocation5 + $0x3e4] sm:$0xf]  ;;  %v6160_v50 = vld [vmem:[#allocation5 + $0x3e8] sm:$0xf] }
 0xd71   :  { %v6785_v55 = vpop.eup %6784  ;;  %v6153_v23 = vor.u32 %v6535_v4, %v6152_v9  ;;  %v6520_v9 = vld [vmem:[#allocation5 + $0x374] sm:$0xf0] }
 0xd72   :  { %v8463_v27 = vadd.f32 %v3632_v47, %v3631_v2  ;;  %v3628_v17 = vmul.f32 0.5, %v6785_v55  ;;  %v6536_v2 = vld [vmem:[#allocation5 + $0x3f4] sm:$0xf0]  ;;  %v6157_v47 = vor.u32 %v6533_v28, %v6154_v51 }
 0xd73   :  { %v6161_v55 = vor.u32 %v6536_v2, %v6160_v50  ;;  %v6518_v50 = vld [vmem:[#allocation5 + $0x36c] sm:$0xf]  ;;  %v6098_v2 = vld [vmem:[#allocation5 + $0x378] sm:$0xf0] }
 0xd74   :  { %6786 = vtanh.f32 %v8463_v27  ;;  %v3629_v39 = vadd.f32 0.5, %v3628_v17  ;;  %v6162_v17 = vld [vmem:[#allocation5 + $0x3f8] sm:$0xf0] }
 0xd7a   :  { %v6787_v6 = vpop.eup %6786 }
 0xd7b   :  { %v3635_v57 = vmul.f32 %v6787_v6, %v3629_v39  ;;  %v6136_v6 = vld [vmem:[#allocation5 + $0x3c0] sm:$0xf] }
 0xd7d   :  { %v3638_v41 = vpack.c.bf16 %v3635_v57, %v3635_v57  ;;  %v6531_v57 = vld [vmem:[#allocation5 + $0x3cc] sm:$0xf0] }
 0xd7f   :  { %6017 = vst [vmem:[%s9038_s4 + $0x10] sm:$0xf] %v3638_v41  ;;  %3656 = vmatmul.bf16.vlgmr.msra.gmra.mxu0 %v3638_v41  ;;  %3669 = vmatmul.bf16.vlgmr.msra.gmra.mxu1 %v3638_v41 }
 0xd80   :  { %3682 = vmatmul.bf16.vlgmr.msra.gmra.mxu2 %v3638_v41  ;;  %3695 = vmatmul.bf16.vlgmr.msra.gmra.mxu3 %v3638_v41  ;;  %v6529_v41 = vld [vmem:[#allocation5 + $0x3c4] sm:$0xf] }
 0xd81   :  { %3822 = vmatpush.bf16.msra.mxu0 %v8015_v44  ;;  %3835 = vmatpush.bf16.msra.mxu1 %v8017_v0  ;;  %v9135_v44 = vld [vmem:[#allocation18_spill] sm:$0xff] }
 0xd82   :  { %3848 = vmatpush.bf16.msra.mxu2 %v8019_v30  ;;  %3861 = vmatpush.bf16.msra.mxu3 %v8022_v8  ;;  %v2917_v0 = vadd.f32 %v9135_v44, %v8149_v10  ;;  %v9136_v30 = vld [vmem:[#allocation19_spill] sm:$0xff]  ;;  %v6137_v44 = vor.u32 %v6531_v57, %v6136_v6 }
 0xd83   :  { %v2946_v8 = vadd.f32 %v9136_v30, %v8151_v32  ;;  %v6144_v30 = vld [vmem:[#allocation5 + $0x3c8] sm:$0xf] }
 0xd85   :  { %3823 = vmatpush.bf16.msra.mxu0 %v8033_v20  ;;  %3836 = vmatpush.bf16.msra.mxu1 %v8035_v37  ;;  %v3021_v20 = vpack.c.bf16 %v2946_v8, %v2917_v0  ;;  %v9137_v37 = vld [vmem:[#allocation20_spill] sm:$0xff]  ;;  %v6138_v0 = vld [vmem:[#allocation5 + $0x3d0] sm:$0xf0]  ;;  %v6532_v8 = vld [vmem:[#allocation5 + $0x3d4] sm:$0xf0] }
 0xd86   :  { %3849 = vmatpush.bf16.msra.mxu2 %v8037_v38  ;;  %3862 = vmatpush.bf16.msra.mxu3 %v8046_v18  ;;  %v2975_v38 = vadd.f32 %v9137_v37, %v8171_v24  ;;  %v9138_v18 = vld [vmem:[#allocation21_spill] sm:$0xff]  ;;  %v6145_v37 = vor.u32 %v6532_v8, %v6144_v30  ;;  %v6516_v30 = vld [vmem:[#allocation5 + $0x354] sm:$0xf0] }
 0xd89   :  { %3824 = vmatpush.bf16.msra.mxu0 %v8053_v26  ;;  %3837 = vmatpush.bf16.msra.mxu1 %v8055_v49  ;;  %v3004_v26 = vadd.f32 %v9138_v18, %v8173_v19  ;;  %v3642_v49 = vunpack.c.l.bf16 %v3021_v20  ;;  %v6146_v18 = vld [vmem:[#allocation5 + $0x3d8] sm:$0xf0] }
 0xd8a   :  { %3850 = vmatpush.bf16.msra.mxu2 %v8057_v25  ;;  %3863 = vmatpush.bf16.msra.mxu3 %v8060_v46  ;;  %v3643_v25 = vunpack.c.h.bf16 %v3021_v20  ;;  %v6141_v20 = vor.u32 %v6529_v41, %v6138_v0  ;;  %v6080_v0 = vld [vmem:[#allocation5 + $0x348] sm:$0xf] }
 0xd8b   :  { %v6081_v8 = vor.u32 %v6516_v30, %v6080_v0  ;;  %v6567_v0 = vld [vmem:[#allocation7 + $0x3ec] sm:$0xf0]  ;;  %v6565_v30 = vld [vmem:[#allocation7 + $0x3e4] sm:$0xf] }
 0xd8d   :  { %3825 = vmatpush.bf16.msra.mxu0 %v8064_v7  ;;  %3838 = vmatpush.bf16.msra.mxu1 %v8066_v40 }
 0xd8e   :  { %3851 = vmatpush.bf16.msra.mxu2 %v8069_v48  ;;  %3864 = vmatpush.bf16.msra.mxu3 %v8071_v56  ;;  %v3022_v56 = vpack.c.bf16 %v3004_v26, %v2975_v38  ;;  %v6530_v38 = vld [vmem:[#allocation5 + $0x3cc] sm:$0xf] }
 0xd8f   :  { %v6149_v26 = vor.u32 %v6530_v38, %v6146_v18  ;;  %v6056_v38 = vld [vmem:[#allocation5 + $0x320] sm:$0xf] }
 0xd91   :  { %3826 = vmatpush.bf16.msra.mxu0 %v8074_v1  ;;  %3839 = vmatpush.bf16.msra.mxu1 %v8078_v35 }
 0xd92   :  { %3852 = vmatpush.bf16.msra.mxu2 %v8080_v16  ;;  %3865 = vmatpush.bf16.msra.mxu3 %v8083_v14  ;;  %v3644_v16 = vunpack.c.l.bf16 %v3022_v56  ;;  %v3645_v14 = vunpack.c.h.bf16 %v3022_v56  ;;  %v6528_v56 = vld [vmem:[#allocation5 + $0x3b4] sm:$0xf0] }
 0xd95   :  { %3827 = vmatpush.bf16.msra.mxu0 %v8086_v22  ;;  %3840 = vmatpush.bf16.msra.mxu1 %v8090_v36 }
 0xd96   :  { %3853 = vmatpush.bf16.msra.mxu2 %v8092_v58  ;;  %3866 = vmatpush.bf16.msra.mxu3 %v8095_v62 }
 0xd99   :  { %3828 = vmatpush.bf16.msra.mxu0 %v8098_v61  ;;  %3841 = vmatpush.bf16.msra.mxu1 %v8102_v53 }
 0xd9a   :  { %3854 = vmatpush.bf16.msra.mxu2 %v8104_v54  ;;  %3867 = vmatpush.bf16.msra.mxu3 %v8113_v12 }
 0xd9d   :  { %3829 = vmatpush.bf16.msra.mxu0 %v8118_v42  ;;  %3842 = vmatpush.bf16.msra.mxu1 %v8120_v21 }
 0xd9e   :  { %3855 = vmatpush.bf16.msra.mxu2 %v8123_v13  ;;  %3868 = vmatpush.bf16.msra.mxu3 %v8130_v45 }
 0xdfc   :  { %v3657_v46 = vpop.f32.mrf.mxu0  ;;  %v3670_v7 = vpop.f32.mrf.mxu1 }
 0xdfd   :  { %v3700_v40 = vadd.f32 %v3657_v46, %v3642_v49  ;;  %v3701_v48 = vadd.f32 %v3670_v7, %v3643_v25  ;;  %v6120_v49 = vld [vmem:[#allocation5 + $0x3a0] sm:$0xf]  ;;  %v6527_v25 = vld [vmem:[#allocation5 + $0x3ac] sm:$0xf0]  ;;  %v6525_v46 = vld [vmem:[#allocation5 + $0x3a4] sm:$0xf] }
 0xdfe   :  { %v6121_v7 = vor.u32 %v6527_v25, %v6120_v49  ;;  %v6509_v49 = vld [vmem:[#allocation5 + $0x324] sm:$0xf]  ;;  %v6058_v25 = vld [vmem:[#allocation5 + $0x330] sm:$0xf0] }
 0xdff   :  { %v3704_v1 = vmul.f32 0.5, %v3700_v40  ;;  %v3708_v35 = vmul.f32 0.5, %v3701_v48  ;;  %v6122_v40 = vld [vmem:[#allocation5 + $0x3b0] sm:$0xf0]  ;;  %v6128_v48 = vld [vmem:[#allocation5 + $0x3a8] sm:$0xf] }
 0xe01   :  { %6788 = vtanh.f32 %v3704_v1  ;;  %v6125_v1 = vor.u32 %v6525_v46, %v6122_v40  ;;  %v9140_v46 = vld [vmem:[#allocation24_spill] sm:$0xff] }
 0xe02   :  { %6790 = vtanh.f32 %v3708_v35  ;;  %v6129_v35 = vor.u32 %v6528_v56, %v6128_v48  ;;  %v3732_v40 = vunpack.c.h.bf16 %v9140_v46  ;;  %v6064_v56 = vld [vmem:[#allocation5 + $0x328] sm:$0xf] }
 0xe03   :  { %v3683_v22 = vpop.f32.mrf.mxu2  ;;  %v3696_v36 = vpop.f32.mrf.mxu3 }
 0xe04   :  { %v3702_v58 = vadd.f32 %v3683_v22, %v3644_v16  ;;  %v3703_v62 = vadd.f32 %v3696_v36, %v3645_v14  ;;  %v3659_v61 = vpop.f32.mrf.mxu0  ;;  %v3672_v53 = vpop.f32.mrf.mxu1  ;;  %v6526_v16 = vld [vmem:[#allocation5 + $0x3ac] sm:$0xf]  ;;  %v6130_v14 = vld [vmem:[#allocation5 + $0x3b8] sm:$0xf0]  ;;  %v6104_v36 = vld [vmem:[#allocation5 + $0x380] sm:$0xf] }
 0xe05   :  { %v6133_v22 = vor.u32 %v6526_v16, %v6130_v14  ;;  %v6106_v53 = vld [vmem:[#allocation5 + $0x390] sm:$0xf0] }
 0xe06   :  { %6792 = vtanh.f32 %v3702_v58  ;;  %v3713_v54 = vmul.f32 0.5, %v3703_v62  ;;  %v6523_v58 = vld [vmem:[#allocation5 + $0x38c] sm:$0xf0]  ;;  %v6521_v62 = vld [vmem:[#allocation5 + $0x384] sm:$0xf] }
 0xe07   :  { %v6789_v12 = vpop.eup %6788  ;;  %v6105_v61 = vor.u32 %v6523_v58, %v6104_v36  ;;  %v6066_v58 = vld [vmem:[#allocation5 + $0x338] sm:$0xf0] }
 0xe08   :  { %v6791_v42 = vpop.eup %6790  ;;  %v3706_v21 = vmul.f32 0.5, %v6789_v12  ;;  %6794 = vtanh.f32 %v3713_v54  ;;  %v6112_v54 = vld [vmem:[#allocation5 + $0x388] sm:$0xf]  ;;  %v6524_v12 = vld [vmem:[#allocation5 + $0x394] sm:$0xf0] }
 0xe09   :  { %v3710_v13 = vmul.f32 0.5, %v6791_v42  ;;  %v6109_v42 = vor.u32 %v6521_v62, %v6106_v53  ;;  %v6040_v62 = vld [vmem:[#allocation5 + $0x300] sm:$0xf] }
 0xe0a   :  { %v3707_v45 = vadd.f32 0.5, %v3706_v21  ;;  %v6113_v21 = vor.u32 %v6524_v12, %v6112_v54 }
 0xe0b   :  { %v3711_v59 = vadd.f32 0.5, %v3710_v13  ;;  %v3685_v34 = vpop.f32.mrf.mxu2  ;;  %v3698_v15 = vpop.f32.mrf.mxu3  ;;  %v6522_v13 = vld [vmem:[#allocation5 + $0x38c] sm:$0xf] }
 0xe0c   :  { %v6793_v29 = vpop.eup %6792  ;;  %v9139_v34 = vld [vmem:[#allocation22_spill] sm:$0xff] }
 0xe0d   :  { %v3718_v60 = vmul.f32 %v3711_v59, %v8463_v27  ;;  %v3719_v43 = vmul.f32 %v6793_v29, %v3707_v45  ;;  %v6534_v27 = vld [vmem:[#allocation5 + $0x3ec] sm:$0xf]  ;;  %v6114_v45 = vld [vmem:[#allocation5 + $0x398] sm:$0xf0]  ;;  %v3729_v15 = vunpack.c.l.bf16 %v9139_v34  ;;  %v3730_v29 = vunpack.c.h.bf16 %v9139_v34  ;;  %v6508_v34 = vld [vmem:[#allocation5 + $0x314] sm:$0xf0] }
 0xe0e   :  { %v6795_v5 = vpop.eup %6794  ;;  %v6165_v39 = vor.u32 %v6534_v27, %v6162_v17  ;;  %v6117_v59 = vor.u32 %v6522_v13, %v6114_v45  ;;  %v6515_v27 = vld [vmem:[#allocation5 + $0x34c] sm:$0xf0]  ;;  %v6513_v17 = vld [vmem:[#allocation5 + $0x344] sm:$0xf]  ;;  %v6042_v45 = vld [vmem:[#allocation5 + $0x310] sm:$0xf0] }
 0xe0f   :  { %v8510_v52 = vadd.f32 %v3719_v43, %v3718_v60  ;;  %v3715_v11 = vmul.f32 0.5, %v6795_v5  ;;  %v6088_v60 = vld [vmem:[#allocation5 + $0x360] sm:$0xf]  ;;  %v6519_v43 = vld [vmem:[#allocation5 + $0x36c] sm:$0xf0] }
 0xe10   :  { %v6517_v5 = vld [vmem:[#allocation5 + $0x364] sm:$0xf] }
 0xe11   :  { %6796 = vtanh.f32 %v8510_v52  ;;  %v3716_v33 = vadd.f32 0.5, %v3715_v11  ;;  %v6505_v13 = vld [vmem:[#allocation5 + $0x304] sm:$0xf] }
 0xe17   :  { %v6797_v63 = vpop.eup %6796 }
 0xe18   :  { %v3722_v3 = vmul.f32 %v6797_v63, %v3716_v33  ;;  %v6089_v63 = vor.u32 %v6519_v43, %v6088_v60 }
 0xe1a   :  { %v3725_v31 = vpack.c.bf16 %v3722_v3, %v3722_v3  ;;  %v6090_v3 = vld [vmem:[#allocation5 + $0x370] sm:$0xf0] }
 0xe1c   :  { %6018 = vst [vmem:[%s9038_s4 + $0x14] sm:$0xf] %v3725_v31  ;;  %3743 = vmatmul.bf16.vlgmr.msrb.gmra.mxu0 %v3725_v31  ;;  %3756 = vmatmul.bf16.vlgmr.msrb.gmra.mxu1 %v3725_v31 }
 0xe1d   :  { %3769 = vmatmul.bf16.vlgmr.msrb.gmra.mxu2 %v3725_v31  ;;  %3782 = vmatmul.bf16.vlgmr.msrb.gmra.mxu3 %v3725_v31  ;;  %v6096_v31 = vld [vmem:[#allocation5 + $0x368] sm:$0xf] }
 0xe1e   :  { %4170 = vmatpush.bf16.msrb.mxu0 %v6153_v23  ;;  %4199 = vmatpush.bf16.msrb.mxu1 %v6157_v47  ;;  %v6093_v23 = vor.u32 %v6517_v5, %v6090_v3  ;;  %v6097_v51 = vor.u32 %v6520_v9, %v6096_v31  ;;  %v6072_v47 = vld [vmem:[#allocation5 + $0x340] sm:$0xf] }
 0xe1f   :  { %4228 = vmatpush.bf16.msrb.mxu2 %v6161_v55  ;;  %4257 = vmatpush.bf16.msrb.mxu3 %v6165_v39  ;;  %v6101_v55 = vor.u32 %v6518_v50, %v6098_v2  ;;  %v6074_v39 = vld [vmem:[#allocation5 + $0x350] sm:$0xf0]  ;;  %v6073_v41 = vor.u32 %v6515_v27, %v6072_v47 }
 0xe22   :  { %4171 = vmatpush.bf16.msrb.mxu0 %v6137_v44  ;;  %4200 = vmatpush.bf16.msrb.mxu1 %v6141_v20  ;;  %v6077_v44 = vor.u32 %v6513_v17, %v6074_v39  ;;  %v6514_v20 = vld [vmem:[#allocation5 + $0x34c] sm:$0xf] }
 0xe23   :  { %4229 = vmatpush.bf16.msrb.mxu2 %v6145_v37  ;;  %4258 = vmatpush.bf16.msrb.mxu3 %v6149_v26  ;;  %v6082_v37 = vld [vmem:[#allocation5 + $0x358] sm:$0xf0]  ;;  %v6511_v26 = vld [vmem:[#allocation5 + $0x32c] sm:$0xf0] }
 0xe24   :  { %v6085_v18 = vor.u32 %v6514_v20, %v6082_v37  ;;  %v6057_v48 = vor.u32 %v6511_v26, %v6056_v38  ;;  %v6282_v20 = vld [vmem:[#allocation7 + $0x3f0] sm:$0xf0]  ;;  %v6288_v37 = vld [vmem:[#allocation7 + $0x3e8] sm:$0xf]  ;;  %v6568_v38 = vld [vmem:[#allocation7 + $0x3f4] sm:$0xf0] }
 0xe25   :  { %v8534_v26 = vor.u32 %v6568_v38, %v6288_v37  ;;  %v6216_v37 = vld [vmem:[#allocation7 + $0x360] sm:$0xf] }
 0xe26   :  { %4172 = vmatpush.bf16.msrb.mxu0 %v6121_v7  ;;  %4201 = vmatpush.bf16.msrb.mxu1 %v6125_v1  ;;  %v3731_v7 = vunpack.c.l.bf16 %v9140_v46  ;;  %v6512_v1 = vld [vmem:[#allocation5 + $0x334] sm:$0xf0] }
 0xe27   :  { %4230 = vmatpush.bf16.msrb.mxu2 %v6129_v35  ;;  %4259 = vmatpush.bf16.msrb.mxu3 %v6133_v22  ;;  %v6510_v35 = vld [vmem:[#allocation5 + $0x32c] sm:$0xf]  ;;  %v6061_v22 = vor.u32 %v6509_v49, %v6058_v25  ;;  %v6065_v36 = vor.u32 %v6512_v1, %v6064_v56  ;;  %v6290_v25 = vld [vmem:[#allocation7 + $0x3f8] sm:$0xf0]  ;;  %v6563_v56 = vld [vmem:[#allocation7 + $0x3cc] sm:$0xf0] }
 0xe28   :  { %v6566_v49 = vld [vmem:[#allocation7 + $0x3ec] sm:$0xf]  ;;  %v6561_v1 = vld [vmem:[#allocation7 + $0x3c4] sm:$0xf] }
 0xe29   :  { %v8537_v46 = vor.u32 %v6566_v49, %v6290_v25  ;;  %v6551_v49 = vld [vmem:[#allocation7 + $0x36c] sm:$0xf0]  ;;  %v6549_v25 = vld [vmem:[#allocation7 + $0x364] sm:$0xf] }
 0xe2a   :  { %4173 = vmatpush.bf16.msrb.mxu0 %v6105_v61  ;;  %4202 = vmatpush.bf16.msrb.mxu1 %v6109_v42  ;;  %v6507_v61 = vld [vmem:[#allocation5 + $0x30c] sm:$0xf0] }
 0xe2b   :  { %4231 = vmatpush.bf16.msrb.mxu2 %v6113_v21  ;;  %4260 = vmatpush.bf16.msrb.mxu3 %v6117_v59  ;;  %v6069_v21 = vor.u32 %v6510_v35, %v6066_v58  ;;  %v6048_v59 = vld [vmem:[#allocation5 + $0x308] sm:$0xf]  ;;  %v6041_v43 = vor.u32 %v6507_v61, %v6040_v62  ;;  %v9141_v62 = vld [vmem:[#allocation25_spill] sm:$0xff] }
 0xe2c   :  { %v2922_v61 = vadd.f32 %v9141_v62, %v8149_v10  ;;  %v6559_v10 = vld [vmem:[#allocation7 + $0x3ac] sm:$0xf0] }
 0xe2e   :  { %4174 = vmatpush.bf16.msrb.mxu0 %v6089_v63  ;;  %4203 = vmatpush.bf16.msrb.mxu1 %v6093_v23 }
 0xe2f   :  { %4232 = vmatpush.bf16.msrb.mxu2 %v6097_v51  ;;  %4261 = vmatpush.bf16.msrb.mxu3 %v6101_v55 }
 0xe32   :  { %4175 = vmatpush.bf16.msrb.mxu0 %v6073_v41  ;;  %4204 = vmatpush.bf16.msrb.mxu1 %v6077_v44  ;;  %v6280_v44 = vld [vmem:[#allocation7 + $0x3e0] sm:$0xf] }
 0xe33   :  { %4233 = vmatpush.bf16.msrb.mxu2 %v6081_v8  ;;  %4262 = vmatpush.bf16.msrb.mxu3 %v6085_v18  ;;  %v8530_v8 = vor.u32 %v6567_v0, %v6280_v44  ;;  %v8532_v18 = vor.u32 %v6565_v30, %v6282_v20  ;;  %v6556_v44 = vld [vmem:[#allocation7 + $0x394] sm:$0xf0]  ;;  %v6554_v30 = vld [vmem:[#allocation7 + $0x38c] sm:$0xf]  ;;  %v6242_v20 = vld [vmem:[#allocation7 + $0x398] sm:$0xf0] }
 0xe34   :  { %v8586_v38 = vor.u32 %v6554_v30, %v6242_v20 }
 0xe36   :  { %4176 = vmatpush.bf16.msrb.mxu0 %v6057_v48  ;;  %4205 = vmatpush.bf16.msrb.mxu1 %v6061_v22  ;;  %v6264_v48 = vld [vmem:[#allocation7 + $0x3c0] sm:$0xf]  ;;  %v6564_v22 = vld [vmem:[#allocation7 + $0x3d4] sm:$0xf0] }
 0xe37   :  { %4234 = vmatpush.bf16.msrb.mxu2 %v6065_v36  ;;  %4263 = vmatpush.bf16.msrb.mxu3 %v6069_v21  ;;  %v8548_v35 = vor.u32 %v6563_v56, %v6264_v48  ;;  %v6274_v21 = vld [vmem:[#allocation7 + $0x3d8] sm:$0xf0]  ;;  %v8589_v56 = vor.u32 %v6551_v49, %v6216_v37 }
 0xe3a   :  { %4177 = vmatpush.bf16.msrb.mxu0 %v6041_v43  ;;  %v6248_v43 = vld [vmem:[#allocation7 + $0x3a0] sm:$0xf] }
 0xe99   :  { %v3744_v11 = vpop.f32.mrf.mxu0  ;;  %v3757_v33 = vpop.f32.mrf.mxu1 }
 0xe9a   :  { %v3787_v4 = vadd.f32 %v3744_v11, %v3729_v15  ;;  %v3788_v28 = vadd.f32 %v3757_v33, %v3730_v29  ;;  %v6506_v15 = vld [vmem:[#allocation5 + $0x30c] sm:$0xf]  ;;  %v6050_v29 = vld [vmem:[#allocation5 + $0x318] sm:$0xf0]  ;;  %v6045_v11 = vor.u32 %v6505_v13, %v6042_v45  ;;  %v6049_v33 = vor.u32 %v6508_v34, %v6048_v59  ;;  %v9144_v34 = vld [vmem:[#allocation27_spill] sm:$0xff] }
 0xe9b   :  { %v6053_v31 = vor.u32 %v6506_v15, %v6050_v29  ;;  %v9143_v45 = vld [vmem:[#allocation26_spill] sm:$0xff]  ;;  %v3009_v15 = vadd.f32 %v9144_v34, %v8173_v19  ;;  %v6558_v19 = vld [vmem:[#allocation7 + $0x3ac] sm:$0xf] }
 0xe9c   :  { %v3791_v6 = vmul.f32 0.5, %v3787_v4  ;;  %v3795_v57 = vmul.f32 0.5, %v3788_v28  ;;  %4206 = vmatpush.bf16.msrb.mxu1 %v6045_v11  ;;  %4235 = vmatpush.bf16.msrb.mxu2 %v6049_v33  ;;  %v2980_v59 = vadd.f32 %v9143_v45, %v8171_v24  ;;  %v8568_v33 = vor.u32 %v6559_v10, %v6248_v43  ;;  %v6208_v43 = vld [vmem:[#allocation7 + $0x348] sm:$0xf]  ;;  %v6548_v10 = vld [vmem:[#allocation7 + $0x354] sm:$0xf0] }
 0xe9d   :  { %4264 = vmatpush.bf16.msrb.mxu3 %v6053_v31  ;;  %v6560_v31 = vld [vmem:[#allocation7 + $0x3b4] sm:$0xf0] }
 0xe9e   :  { %6798 = vtanh.f32 %v3791_v6 }
 0xe9f   :  { %6800 = vtanh.f32 %v3795_v57 }
 0xea0   :  { %v3770_v16 = vpop.f32.mrf.mxu2  ;;  %v3783_v14 = vpop.f32.mrf.mxu3 }
 0xea1   :  { %v3789_v53 = vadd.f32 %v3770_v16, %v3731_v7  ;;  %v3790_v54 = vadd.f32 %v3783_v14, %v3732_v40  ;;  %v3746_v12 = vpop.f32.mrf.mxu0  ;;  %v3759_v42 = vpop.f32.mrf.mxu1  ;;  %v6570_v7 = vld [vmem:[%s9038_s4 + $0x8] sm:$0xff]  ;;  %v6571_v40 = vld [vmem:[%s9038_s4 + $0x10] sm:$0xff] }
 0xea2   :  { %v6266_v16 = vld [vmem:[#allocation7 + $0x3d0] sm:$0xf0]  ;;  %v6272_v14 = vld [vmem:[#allocation7 + $0x3c8] sm:$0xf]  ;;  %v6562_v42 = vld [vmem:[#allocation7 + $0x3cc] sm:$0xf] }
 0xea3   :  { %6802 = vtanh.f32 %v3789_v53  ;;  %v3800_v60 = vmul.f32 0.5, %v3790_v54  ;;  %v8550_v36 = vor.u32 %v6561_v1, %v6266_v16  ;;  %v8552_v58 = vor.u32 %v6564_v22, %v6272_v14  ;;  %v9142_v53 = vld [vmem:[#allocation23_spill] sm:$0xff]  ;;  %v6224_v1 = vld [vmem:[#allocation7 + $0x368] sm:$0xf]  ;;  %v6552_v16 = vld [vmem:[#allocation7 + $0x374] sm:$0xf0] }
 0xea4   :  { %v6799_v5 = vpop.eup %6798  ;;  %v2951_v54 = vadd.f32 %v9142_v53, %v8151_v32  ;;  %v8561_v13 = vor.u32 %v6562_v42, %v6274_v21  ;;  %v6550_v14 = vld [vmem:[#allocation7 + $0x36c] sm:$0xf]  ;;  %v8595_v53 = vor.u32 %v6552_v16, %v6224_v1  ;;  %v6547_v42 = vld [vmem:[#allocation7 + $0x34c] sm:$0xf0]  ;;  %v6194_v16 = vld [vmem:[#allocation7 + $0x338] sm:$0xf0] }
 0xea5   :  { %v6801_v63 = vpop.eup %6800  ;;  %v3793_v3 = vmul.f32 0.5, %v6799_v5  ;;  %6804 = vtanh.f32 %v3800_v60  ;;  %v6557_v5 = vld [vmem:[#allocation7 + $0x3a4] sm:$0xf]  ;;  %v6542_v1 = vld [vmem:[#allocation7 + $0x32c] sm:$0xf] }
 0xea6   :  { %v3797_v9 = vmul.f32 0.5, %v6801_v63  ;;  %v3025_v12 = vpack.c.bf16 %v2951_v54, %v2922_v61  ;;  %v6250_v63 = vld [vmem:[#allocation7 + $0x3b0] sm:$0xf0]  ;;  %v6226_v54 = vld [vmem:[#allocation7 + $0x378] sm:$0xf0] }
 0xea7   :  { %v3794_v4 = vadd.f32 0.5, %v3793_v3  ;;  %v6256_v3 = vld [vmem:[#allocation7 + $0x3a8] sm:$0xf]  ;;  %v8570_v24 = vor.u32 %v6557_v5, %v6250_v63  ;;  %v6210_v63 = vld [vmem:[#allocation7 + $0x358] sm:$0xf0] }
 0xea8   :  { %v3798_v28 = vadd.f32 0.5, %v3797_v9  ;;  %v3772_v23 = vpop.f32.mrf.mxu2  ;;  %v3785_v51 = vpop.f32.mrf.mxu3  ;;  %v3816_v29 = vunpack.c.l.bf16 %v3025_v12  ;;  %v3817_v60 = vunpack.c.h.bf16 %v3025_v12  ;;  %v6200_v12 = vld [vmem:[#allocation7 + $0x340] sm:$0xf] }
 0xea9   :  { %v6803_v50 = vpop.eup %6802  ;;  %v6258_v23 = vld [vmem:[#allocation7 + $0x3b8] sm:$0xf0]  ;;  %v6232_v51 = vld [vmem:[#allocation7 + $0x380] sm:$0xf] }
 0xeaa   :  { %v3805_v2 = vmul.f32 %v3798_v28, %v8510_v52  ;;  %v3806_v47 = vmul.f32 %v6803_v50, %v3794_v4  ;;  %v6569_v52 = vld [vmem:[%s9038_s4] sm:$0xff]  ;;  %v8572_v28 = vor.u32 %v6560_v31, %v6256_v3  ;;  %v3026_v50 = vpack.c.bf16 %v3009_v15, %v2980_v59 }
 0xeab   :  { %v6805_v55 = vpop.eup %6804  ;;  %v8598_v15 = vor.u32 %v6550_v14, %v6226_v54 }
 0xeac   :  { %v8521_v27 = vadd.f32 %v3806_v47, %v3805_v2  ;;  %v3802_v17 = vmul.f32 0.5, %v6805_v55  ;;  %v8575_v2 = vor.u32 %v6558_v19, %v6258_v23  ;;  %v6555_v47 = vld [vmem:[#allocation7 + $0x38c] sm:$0xf0]  ;;  %v6553_v55 = vld [vmem:[#allocation7 + $0x384] sm:$0xf]  ;;  %v3819_v48 = vunpack.c.h.bf16 %v3026_v50 }
 0xead   :  { %v6543_v19 = vld [vmem:[#allocation7 + $0x32c] sm:$0xf0]  ;;  %v6541_v23 = vld [vmem:[#allocation7 + $0x324] sm:$0xf] }
 0xeae   :  { %6806 = vtanh.f32 %v8521_v27  ;;  %v3803_v39 = vadd.f32 0.5, %v3802_v17  ;;  %v6234_v17 = vld [vmem:[#allocation7 + $0x390] sm:$0xf0] }
 0xeb4   :  { %v6807_v6 = vpop.eup %6806 }
 0xeb5   :  { %v3809_v57 = vmul.f32 %v6807_v6, %v3803_v39 }
 0xeb7   :  { %v3812_v41 = vpack.c.bf16 %v3809_v57, %v3809_v57  ;;  %v8579_v57 = vor.u32 %v6555_v47, %v6232_v51 }
 0xeb9   :  { %6019 = vst [vmem:[%s9038_s4 + $0x18] sm:$0xf] %v3812_v41  ;;  %3830 = vmatmul.bf16.vlgmr.msra.gmra.mxu0 %v3812_v41  ;;  %3843 = vmatmul.bf16.vlgmr.msra.gmra.mxu1 %v3812_v41 }
 0xeba   :  { %3856 = vmatmul.bf16.vlgmr.msra.gmra.mxu2 %v3812_v41  ;;  %3869 = vmatmul.bf16.vlgmr.msra.gmra.mxu3 %v3812_v41  ;;  %v8581_v41 = vor.u32 %v6553_v55, %v6234_v17  ;;  %v6186_v55 = vld [vmem:[#allocation7 + $0x330] sm:$0xf0]  ;;  %v6192_v17 = vld [vmem:[#allocation7 + $0x328] sm:$0xf] }
 0xebb   :  { %4488 = vmatpush.bf16.msra.mxu0 %v8530_v8  ;;  %4501 = vmatpush.bf16.msra.mxu1 %v8532_v18  ;;  %v8617_v49 = vor.u32 %v6541_v23, %v6186_v55 }
 0xebc   :  { %4514 = vmatpush.bf16.msra.mxu2 %v8534_v26  ;;  %4527 = vmatpush.bf16.msra.mxu3 %v8537_v46 }
 0xebf   :  { %4489 = vmatpush.bf16.msra.mxu0 %v8548_v35  ;;  %4502 = vmatpush.bf16.msra.mxu1 %v8550_v36 }
 0xec0   :  { %4515 = vmatpush.bf16.msra.mxu2 %v8552_v58  ;;  %4528 = vmatpush.bf16.msra.mxu3 %v8561_v13 }
 0xec3   :  { %4490 = vmatpush.bf16.msra.mxu0 %v8568_v33  ;;  %4503 = vmatpush.bf16.msra.mxu1 %v8570_v24 }
 0xec4   :  { %4516 = vmatpush.bf16.msra.mxu2 %v8572_v28  ;;  %4529 = vmatpush.bf16.msra.mxu3 %v8575_v2 }
 0xec7   :  { %4491 = vmatpush.bf16.msra.mxu0 %v8579_v57  ;;  %4504 = vmatpush.bf16.msra.mxu1 %v8581_v41 }
 0xec8   :  { %4530 = vmatpush.bf16.msra.mxu3 %v8586_v38 }
 0xec9   :  { %4178 = vmatmul.bf16.vlgmr.msrb.gmra.mxu0 %v6569_v52  ;;  %4207 = vmatmul.bf16.vlgmr.msrb.gmra.mxu1 %v6569_v52 }
 0xeca   :  { %4236 = vmatmul.bf16.vlgmr.msrb.gmra.mxu2 %v6569_v52  ;;  %4265 = vmatmul.bf16.vlgmr.msrb.gmra.mxu3 %v6569_v52  ;;  %v6240_v52 = vld [vmem:[#allocation7 + $0x388] sm:$0xf] }
 0xecb   :  { %v8584_v0 = vor.u32 %v6556_v44, %v6240_v52  ;;  %4492 = vmatpush.bf16.msra.mxu0 %v8589_v56 }
 0xecc   :  { %4531 = vmatpush.bf16.msra.mxu3 %v8598_v15 }
 0xecd   :  { %4517 = vmatpush.bf16.msra.mxu2 %v8584_v0 }
 0xed1   :  { %4518 = vmatpush.bf16.msra.mxu2 %v8595_v53 }
 0xed9   :  { %4183 = vmatmul.bf16.gmra.mxu0 %v6570_v7  ;;  %4212 = vmatmul.bf16.gmra.mxu1 %v6570_v7 }
 0xeda   :  { %4241 = vmatmul.bf16.gmra.mxu2 %v6570_v7  ;;  %4270 = vmatmul.bf16.gmra.mxu3 %v6570_v7  ;;  %v6218_v7 = vld [vmem:[#allocation7 + $0x370] sm:$0xf0] }
 0xedb   :  { %v8593_v61 = vor.u32 %v6549_v25, %v6218_v7 }
 0xedd   :  { %4505 = vmatpush.bf16.msra.mxu1 %v8593_v61 }
 0xee9   :  { %4188 = vmatmul.bf16.gmra.mxu0 %v6571_v40  ;;  %4217 = vmatmul.bf16.gmra.mxu1 %v6571_v40 }
 0xeea   :  { %4246 = vmatmul.bf16.gmra.mxu2 %v6571_v40  ;;  %4275 = vmatmul.bf16.gmra.mxu3 %v6571_v40  ;;  %v3818_v40 = vunpack.c.l.bf16 %v3026_v50 }
 0xf36   :  { %v3831_v11 = vpop.f32.mrf.mxu0  ;;  %v3844_v32 = vpop.f32.mrf.mxu1 }
 0xf37   :  { %v3874_v9 = vadd.f32 %v3831_v11, %v3816_v29  ;;  %v3875_v4 = vadd.f32 %v3844_v32, %v3817_v60  ;;  %v6545_v29 = vld [vmem:[#allocation7 + $0x344] sm:$0xf]  ;;  %v6202_v60 = vld [vmem:[#allocation7 + $0x350] sm:$0xf0]  ;;  %v8601_v11 = vor.u32 %v6547_v42, %v6200_v12  ;;  %v6546_v32 = vld [vmem:[#allocation7 + $0x34c] sm:$0xf] }
 0xf38   :  { %v8605_v31 = vor.u32 %v6545_v29, %v6202_v60  ;;  %v8610_v47 = vor.u32 %v6546_v32, %v6210_v63  ;;  %v6021_v42 = vld [vmem:[%s9037_s3 + $0xc] sm:$0xf]  ;;  %v6176_v29 = vld [vmem:[#allocation7 + $0x308] sm:$0xf]  ;;  %v6178_v63 = vld [vmem:[#allocation7 + $0x318] sm:$0xf0] }
 0xf39   :  { %v3878_v39 = vmul.f32 0.5, %v3874_v9  ;;  %v3882_v6 = vmul.f32 0.5, %v3875_v4  ;;  %v8607_v9 = vor.u32 %v6548_v10, %v6208_v43  ;;  %v6184_v4 = vld [vmem:[#allocation7 + $0x320] sm:$0xf]  ;;  %4493 = vmatpush.bf16.msra.mxu0 %v8601_v11  ;;  %v6540_v43 = vld [vmem:[#allocation7 + $0x314] sm:$0xf0] }
 0xf3a   :  { %v8613_v44 = vor.u32 %v6543_v19, %v6184_v4  ;;  %4506 = vmatpush.bf16.msra.mxu1 %v8605_v31  ;;  %4532 = vmatpush.bf16.msra.mxu3 %v8610_v47  ;;  %v6538_v10 = vld [vmem:[#allocation7 + $0x30c] sm:$0xf]  ;;  %v8641_v32 = vor.u32 %v6540_v43, %v6176_v29  ;;  %v8645_v4 = vperm.slane %v6021_v42, 1 }
 0xf3b   :  { %6808 = vtanh.f32 %v3878_v39  ;;  %4519 = vmatpush.bf16.msra.mxu2 %v8607_v9 }
 0xf3c   :  { %6810 = vtanh.f32 %v3882_v6  ;;  %v6544_v6 = vld [vmem:[#allocation7 + $0x334] sm:$0xf0]  ;;  %9146 = vst [vmem:[#allocation13_spill] sm:$0xff] %v8645_v4 }
 0xf3d   :  { %v3857_v22 = vpop.f32.mrf.mxu2  ;;  %v3870_v62 = vpop.f32.mrf.mxu3  ;;  %v8619_v25 = vor.u32 %v6544_v6, %v6192_v17  ;;  %4494 = vmatpush.bf16.msra.mxu0 %v8613_v44 }
 0xf3e   :  { %v3876_v21 = vadd.f32 %v3857_v22, %v3818_v40  ;;  %v3877_v45 = vadd.f32 %v3870_v62, %v3819_v48  ;;  %v3833_v59 = vpop.f32.mrf.mxu0  ;;  %v3846_v34 = vpop.f32.mrf.mxu1  ;;  %v8628_v62 = vor.u32 %v6542_v1, %v6194_v16  ;;  %4507 = vmatpush.bf16.msra.mxu1 %v8617_v49  ;;  %v8669_v1 = vperm.slane %v6021_v42, 3 }
 0xf3f   :  { %4520 = vmatpush.bf16.msra.mxu2 %v8619_v25  ;;  %v6537_v59 = vld [vmem:[#allocation7 + $0x304] sm:$0xf]  ;;  %v6170_v34 = vld [vmem:[#allocation7 + $0x310] sm:$0xf0] }
 0xf40   :  { %6812 = vtanh.f32 %v3876_v21  ;;  %v3887_v5 = vmul.f32 0.5, %v3877_v45  ;;  %v6168_v21 = vld [vmem:[#allocation7 + $0x300] sm:$0xf]  ;;  %v6539_v45 = vld [vmem:[#allocation7 + $0x30c] sm:$0xf0]  ;;  %4533 = vmatpush.bf16.msra.mxu3 %v8628_v62  ;;  %v8638_v60 = vor.u32 %v6537_v59, %v6170_v34  ;;  %9148 = vst [vmem:[#allocation14_spill] sm:$0xff] %v8669_v1 }
 0xf41   :  { %v6809_v3 = vpop.eup %6808 }
 0xf42   :  { %v6811_v51 = vpop.eup %6810  ;;  %v3880_v50 = vmul.f32 0.5, %v6809_v3  ;;  %6814 = vtanh.f32 %v3887_v5  ;;  %v8643_v3 = vperm.slane %v6021_v42, 0  ;;  %4508 = vmatpush.bf16.msra.mxu1 %v8638_v60 }
 0xf43   :  { %v3884_v39 = vmul.f32 0.5, %v6811_v51  ;;  %v8652_v51 = vor.u32 %v6538_v10, %v6178_v63  ;;  %4521 = vmatpush.bf16.msra.mxu2 %v8641_v32 }
 0xf44   :  { %v3881_v52 = vadd.f32 0.5, %v3880_v50  ;;  %9145 = vst [vmem:[#allocation12_spill] sm:$0xff] %v8643_v3 }
 0xf45   :  { %v3885_v30 = vadd.f32 0.5, %v3884_v39  ;;  %v3859_v20 = vpop.f32.mrf.mxu2  ;;  %v3872_v37 = vpop.f32.mrf.mxu3  ;;  %4534 = vmatpush.bf16.msra.mxu3 %v8652_v51 }
 0xf46   :  { %v6813_v7 = vpop.eup %6812  ;;  %v8621_v40 = vpop.f32.mrf.mxu0  ;;  %4588 = vmatpush.bf16.msrb.mxu1 %v8532_v18 }
 0xf47   :  { %v8623_v48 = vpop.f32.mrf.mxu1  ;;  %v3892_v14 = vmul.f32 %v3885_v30, %v8521_v27  ;;  %v3893_v22 = vmul.f32 %v6813_v7, %v3881_v52  ;;  %v8636_v27 = vor.u32 %v6539_v45, %v6168_v21  ;;  %4601 = vmatpush.bf16.msrb.mxu2 %v8534_v26  ;;  %v8667_v7 = vperm.slane %v6021_v42, 2 }
 0xf48   :  { %v6815_v54 = vpop.eup %6814 }
 0xf49   :  { %v3894_v12 = vadd.f32 %v3893_v22, %v3892_v14  ;;  %v3889_v5 = vmul.f32 0.5, %v6815_v54  ;;  %4495 = vmatpush.bf16.msra.mxu0 %v8636_v27  ;;  %4614 = vmatpush.bf16.msrb.mxu3 %v8537_v46  ;;  %9147 = vst [vmem:[#allocation11_spill] sm:$0xff] %v8667_v7 }
 0xf4a   :  { %4589 = vmatpush.bf16.msrb.mxu1 %v8550_v36 }
 0xf4b   :  { %6816 = vtanh.f32 %v3894_v12  ;;  %v3890_v6 = vadd.f32 0.5, %v3889_v5  ;;  %4602 = vmatpush.bf16.msrb.mxu2 %v8552_v58 }
 0xf4d   :  { %v8647_v19 = vpop.f32.mrf.mxu2  ;;  %v8649_v23 = vpop.f32.mrf.mxu3  ;;  %4575 = vmatpush.bf16.msrb.mxu0 %v8530_v8  ;;  %4615 = vmatpush.bf16.msrb.mxu3 %v8561_v13 }
 0xf4e   :  { %v4181_v50 = vpop.f32.mrf.mxu0  ;;  %4590 = vmatpush.bf16.msrb.mxu1 %v8570_v24 }
 0xf4f   :  { %v4210_v55 = vpop.f32.mrf.mxu1  ;;  %v4182_v17 = vadd.f32 %v4181_v50, %v8643_v3  ;;  %4603 = vmatpush.bf16.msrb.mxu2 %v8572_v28 }
 0xf50   :  { %v4211_v39 = vadd.f32 %v4210_v55, %v8645_v4 }
 0xf51   :  { %v6817_v52 = vpop.eup %6816  ;;  %4576 = vmatpush.bf16.msrb.mxu0 %v8548_v35  ;;  %4616 = vmatpush.bf16.msrb.mxu3 %v8575_v2 }
 0xf52   :  { %v8662_v30 = vpack.c.bf16 %v4211_v39, %v4182_v17  ;;  %v3896_v20 = vmul.f32 %v6817_v52, %v3890_v6  ;;  %4591 = vmatpush.bf16.msrb.mxu1 %v8581_v41 }
 0xf53   :  { %4604 = vmatpush.bf16.msrb.mxu2 %v8584_v0 }
 0xf54   :  { %v3899_v37 = vpack.c.bf16 %v3896_v20, %v3896_v20 }
 0xf55   :  { %v4239_v16 = vpop.f32.mrf.mxu2  ;;  %v4268_v14 = vpop.f32.mrf.mxu3  ;;  %4577 = vmatpush.bf16.msrb.mxu0 %v8568_v33  ;;  %4617 = vmatpush.bf16.msrb.mxu3 %v8586_v38 }
 0xf56   :  { %6020 = vst [vmem:[%s9038_s4 + $0x1c] sm:$0xf] %v3899_v37  ;;  %v4240_v22 = vadd.f32 %v4239_v16, %v8667_v7  ;;  %v4269_v54 = vadd.f32 %v4268_v14, %v8669_v1  ;;  %v4184_v12 = vpop.f32.mrf.mxu0  ;;  %4592 = vmatpush.bf16.msrb.mxu1 %v8593_v61 }
 0xf57   :  { %v4213_v21 = vpop.f32.mrf.mxu1  ;;  %v4185_v42 = vadd.f32 %v4184_v12, %v8643_v3  ;;  %4605 = vmatpush.bf16.msrb.mxu2 %v8595_v53 }
 0xf58   :  { %v4214_v45 = vadd.f32 %v4213_v21, %v8645_v4  ;;  %v8682_v59 = vpack.c.bf16 %v4269_v54, %v4240_v22 }
 0xf59   :  { %4578 = vmatpush.bf16.msrb.mxu0 %v8579_v57  ;;  %4618 = vmatpush.bf16.msrb.mxu3 %v8598_v15 }
 0xf5a   :  { %v8685_v34 = vpack.c.bf16 %v4214_v45, %v4185_v42  ;;  %4593 = vmatpush.bf16.msrb.mxu1 %v8605_v31 }
 0xf5b   :  { %4606 = vmatpush.bf16.msrb.mxu2 %v8607_v9 }
 0xf5d   :  { %v4242_v29 = vpop.f32.mrf.mxu2  ;;  %v4271_v43 = vpop.f32.mrf.mxu3  ;;  %v6572_v10 = vld [vmem:[%s9038_s4 + $0x18] sm:$0xff]  ;;  %4579 = vmatpush.bf16.msrb.mxu0 %v8589_v56  ;;  %4619 = vmatpush.bf16.msrb.mxu3 %v8610_v47 }
 0xf5e   :  { %v4243_v5 = vadd.f32 %v4242_v29, %v8667_v7  ;;  %v4272_v63 = vadd.f32 %v4271_v43, %v8669_v1  ;;  %v4186_v50 = vpop.f32.mrf.mxu0  ;;  %4193 = vmatmul.bf16.gmra.mxu0 %v6572_v10  ;;  %4222 = vmatmul.bf16.gmra.mxu1 %v6572_v10 }
 0xf5f   :  { %v4215_v55 = vpop.f32.mrf.mxu1  ;;  %v4187_v17 = vadd.f32 %v4186_v50, %v8643_v3  ;;  %4251 = vmatmul.bf16.gmra.mxu2 %v6572_v10  ;;  %4280 = vmatmul.bf16.gmra.mxu3 %v6572_v10 }
 0xf60   :  { %v4216_v39 = vadd.f32 %v4215_v55, %v8645_v4  ;;  %v8700_v6 = vpack.c.bf16 %v4272_v63, %v4243_v5  ;;  %4594 = vmatpush.bf16.msrb.mxu1 %v8617_v49  ;;  %4607 = vmatpush.bf16.msrb.mxu2 %v8619_v25  ;;  %v9149_v63 = vmov 0.0|0.0  }
 0xf61   :  { %4580 = vmatpush.bf16.msrb.mxu0 %v8601_v11  ;;  %4620 = vmatpush.bf16.msrb.mxu3 %v8628_v62 }
 0xf62   :  { %v8702_v52 = vpack.c.bf16 %v4216_v39, %v4187_v17 }
 0xf64   :  { %4595 = vmatpush.bf16.msrb.mxu1 %v8638_v60  ;;  %4608 = vmatpush.bf16.msrb.mxu2 %v8641_v32 }
 0xf65   :  { %v4244_v20 = vpop.f32.mrf.mxu2  ;;  %v4273_v37 = vpop.f32.mrf.mxu3  ;;  %4581 = vmatpush.bf16.msrb.mxu0 %v8613_v44  ;;  %4621 = vmatpush.bf16.msrb.mxu3 %v8652_v51 }
 0xf66   :  { %v4245_v16 = vadd.f32 %v4244_v20, %v8667_v7  ;;  %v4274_v14 = vadd.f32 %v4273_v37, %v8669_v1  ;;  %v4189_v22 = vpop.f32.mrf.mxu0 }
 0xf67   :  { %v4218_v54 = vpop.f32.mrf.mxu1  ;;  %v4190_v12 = vadd.f32 %v4189_v22, %v8643_v3 }
 0xf68   :  { %v4219_v21 = vadd.f32 %v4218_v54, %v8645_v4  ;;  %v8716_v42 = vpack.c.bf16 %v4274_v14, %v4245_v16 }
 0xf69   :  { %4582 = vmatpush.bf16.msrb.mxu0 %v8636_v27 }
 0xf6a   :  { %v8718_v45 = vpack.c.bf16 %v4219_v21, %v4190_v12  ;;  %v4180_v12 = vadd.f32 %v8621_v40, %v8643_v3  ;;  %v4209_v21 = vadd.f32 %v8623_v48, %v8645_v4  ;;  %v4238_v40 = vadd.f32 %v8647_v19, %v8667_v7 }
 0xf6b   :  { %v4267_v48 = vadd.f32 %v8649_v23, %v8669_v1 }
 0xf6d   :  { %v4247_v29 = vpop.f32.mrf.mxu2  ;;  %v4276_v43 = vpop.f32.mrf.mxu3 }
 0xf6e   :  { %v4248_v10 = vadd.f32 %v4247_v29, %v8667_v7  ;;  %v4277_v5 = vadd.f32 %v4276_v43, %v8669_v1  ;;  %4496 = vmatmul.bf16.vlgmr.msra.gmra.mxu0 %v9149_v63  ;;  %4509 = vmatmul.bf16.vlgmr.msra.gmra.mxu1 %v9149_v63  ;;  %v8766_v55 = vpop.f32.mrf.mxu0 }
 0xf6f   :  { %4522 = vmatmul.bf16.vlgmr.msra.gmra.mxu2 %v9149_v63  ;;  %4535 = vmatmul.bf16.vlgmr.msra.gmra.mxu3 %v9149_v63  ;;  %9150 = vst [vmem:[#allocation15_spill] sm:$0xff] %v8766_v55  ;;  %v8768_v17 = vpop.f32.mrf.mxu1 }
 0xf70   :  { %v8730_v50 = vpack.c.bf16 %v4277_v5, %v4248_v10  ;;  %4662 = vmatpush.bf16.msra.mxu0 %v8530_v8  ;;  %4675 = vmatpush.bf16.msra.mxu1 %v8532_v18  ;;  %9151 = vst [vmem:[#allocation16_spill] sm:$0xff] %v8768_v17 }
 0xf71   :  { %4688 = vmatpush.bf16.msra.mxu2 %v8534_v26  ;;  %4701 = vmatpush.bf16.msra.mxu3 %v8537_v46 }
 0xf74   :  { %4663 = vmatpush.bf16.msra.mxu0 %v8548_v35  ;;  %4676 = vmatpush.bf16.msra.mxu1 %v8550_v36 }
 0xf75   :  { %4689 = vmatpush.bf16.msra.mxu2 %v8552_v58  ;;  %4702 = vmatpush.bf16.msra.mxu3 %v8561_v13  ;;  %v8770_v39 = vpop.f32.mrf.mxu2  ;;  %v8772_v20 = vpop.f32.mrf.mxu3 }
 0xf76   :  { %9152 = vst [vmem:[#allocation17_spill] sm:$0xff] %v8770_v39 }
 0xf77   :  { %9153 = vst [vmem:[#allocation18_spill] sm:$0xff] %v8772_v20 }
 0xf78   :  { %4664 = vmatpush.bf16.msra.mxu0 %v8568_v33  ;;  %4677 = vmatpush.bf16.msra.mxu1 %v8570_v24 }
 0xf79   :  { %4690 = vmatpush.bf16.msra.mxu2 %v8572_v28  ;;  %4703 = vmatpush.bf16.msra.mxu3 %v8575_v2 }
 0xf7c   :  { %4665 = vmatpush.bf16.msra.mxu0 %v8579_v57  ;;  %4678 = vmatpush.bf16.msra.mxu1 %v8581_v41 }
 0xf7d   :  { %4691 = vmatpush.bf16.msra.mxu2 %v8584_v0  ;;  %4704 = vmatpush.bf16.msra.mxu3 %v8586_v38 }
 0xf80   :  { %4666 = vmatpush.bf16.msra.mxu0 %v8589_v56  ;;  %4679 = vmatpush.bf16.msra.mxu1 %v8593_v61 }
 0xf81   :  { %4692 = vmatpush.bf16.msra.mxu2 %v8595_v53  ;;  %4705 = vmatpush.bf16.msra.mxu3 %v8598_v15 }
 0xf84   :  { %4667 = vmatpush.bf16.msra.mxu0 %v8601_v11  ;;  %4680 = vmatpush.bf16.msra.mxu1 %v8605_v31 }
 0xf85   :  { %4693 = vmatpush.bf16.msra.mxu2 %v8607_v9  ;;  %4706 = vmatpush.bf16.msra.mxu3 %v8610_v47 }
 0xf88   :  { %4668 = vmatpush.bf16.msra.mxu0 %v8613_v44  ;;  %4681 = vmatpush.bf16.msra.mxu1 %v8617_v49 }
 0xf89   :  { %4694 = vmatpush.bf16.msra.mxu2 %v8619_v25  ;;  %4707 = vmatpush.bf16.msra.mxu3 %v8628_v62 }
 0xf8c   :  { %4669 = vmatpush.bf16.msra.mxu0 %v8636_v27  ;;  %4682 = vmatpush.bf16.msra.mxu1 %v8638_v60 }
 0xf8d   :  { %4695 = vmatpush.bf16.msra.mxu2 %v8641_v32  ;;  %4708 = vmatpush.bf16.msra.mxu3 %v8652_v51 }
 0xfdb   :  { %v4194_v37 = vpop.f32.mrf.mxu0  ;;  %v4223_v16 = vpop.f32.mrf.mxu1 }
 0xfdc   :  { %v4195_v14 = vadd.f32 %v4194_v37, %v8643_v3  ;;  %v4224_v22 = vadd.f32 %v4223_v16, %v8645_v4 }
 0xfde   :  { %v8776_v54 = vpack.c.bf16 %v4224_v22, %v4195_v14  ;;  %v4286_v22 = vpack.c.bf16 %v4209_v21, %v4180_v12  ;;  %v4287_v21 = vpack.c.bf16 %v4267_v48, %v4238_v40 }
 0xfe0   :  { %9154 = vst [vmem:[#allocation19_spill] sm:$0xff] %v8776_v54  ;;  %v4323_v17 = vunpack.c.h.bf16 %v4286_v22  ;;  %v4324_v23 = vunpack.c.l.bf16 %v4287_v21 }
 0xfe2   :  { %v4252_v29 = vpop.f32.mrf.mxu2  ;;  %v4281_v43 = vpop.f32.mrf.mxu3 }
 0xfe3   :  { %v4253_v10 = vadd.f32 %v4252_v29, %v8667_v7  ;;  %v4282_v5 = vadd.f32 %v4281_v43, %v8669_v1  ;;  %v4196_v63 = vpop.f32.mrf.mxu0  ;;  %v4225_v20 = vpop.f32.mrf.mxu1  ;;  %v4322_v43 = vunpack.c.l.bf16 %v4286_v22 }
 0xfe4   :  { %v4197_v37 = vadd.f32 %v4196_v63, %v8643_v3  ;;  %v4226_v16 = vadd.f32 %v4225_v20, %v8645_v4 }
 0xfe5   :  { %v8786_v14 = vpack.c.bf16 %v4282_v5, %v4253_v10 }
 0xfe6   :  { %v8788_v54 = vpack.c.bf16 %v4226_v16, %v4197_v37 }
 0xfe7   :  { %9155 = vst [vmem:[#allocation20_spill] sm:$0xff] %v8786_v14 }
 0xfe8   :  { %9156 = vst [vmem:[#allocation21_spill] sm:$0xff] %v8788_v54  ;;  %v4325_v54 = vunpack.c.h.bf16 %v4287_v21 }
 0xfea   :  { %v4254_v29 = vpop.f32.mrf.mxu2  ;;  %v4283_v39 = vpop.f32.mrf.mxu3 }
 0xfeb   :  { %v4255_v55 = vadd.f32 %v4254_v29, %v8667_v7  ;;  %v4284_v63 = vadd.f32 %v4283_v39, %v8669_v1  ;;  %v4497_v20 = vpop.f32.mrf.mxu0  ;;  %v4510_v10 = vpop.f32.mrf.mxu1 }
 0xfec   :  { %v4540_v5 = vadd.f32 %v4497_v20, %v4322_v43  ;;  %v4541_v12 = vadd.f32 %v4510_v10, %v4323_v17 }
 0xfed   :  { %v8796_v37 = vpack.c.bf16 %v4284_v63, %v4255_v55 }
 0xfee   :  { %v4544_v16 = vmul.f32 0.5, %v4540_v5  ;;  %v4548_v19 = vmul.f32 0.5, %v4541_v12 }
 0xff0   :  { %6818 = vtanh.f32 %v4544_v16 }
 0xff1   :  { %6820 = vtanh.f32 %v4548_v19  ;;  %v4570_v19 = vunpack.c.h.bf16 %v8662_v30 }
 0xff2   :  { %v4523_v14 = vpop.f32.mrf.mxu2  ;;  %v4536_v4 = vpop.f32.mrf.mxu3 }
 0xff3   :  { %v4542_v22 = vadd.f32 %v4523_v14, %v4324_v23  ;;  %v4543_v3 = vadd.f32 %v4536_v4, %v4325_v54  ;;  %v4499_v29 = vpop.f32.mrf.mxu0  ;;  %v4512_v7 = vpop.f32.mrf.mxu1 }
 0xff5   :  { %6822 = vtanh.f32 %v4542_v22  ;;  %v4553_v39 = vmul.f32 0.5, %v4543_v3 }
 0xff6   :  { %v6819_v1 = vpop.eup %6818 }
 0xff7   :  { %v6821_v43 = vpop.eup %6820  ;;  %v4546_v17 = vmul.f32 0.5, %v6819_v1  ;;  %6824 = vtanh.f32 %v4553_v39  ;;  %v4569_v1 = vunpack.c.l.bf16 %v8662_v30 }
 0xff8   :  { %v4550_v40 = vmul.f32 0.5, %v6821_v43 }
 0xff9   :  { %v4547_v55 = vadd.f32 0.5, %v4546_v17 }
 0xffa   :  { %v4551_v48 = vadd.f32 0.5, %v4550_v40  ;;  %v4525_v63 = vpop.f32.mrf.mxu2  ;;  %v4538_v20 = vpop.f32.mrf.mxu3  ;;  %v4571_v40 = vunpack.c.l.bf16 %v8682_v59 }
 0xffb   :  { %v6823_v10 = vpop.eup %6822 }
 0xffc   :  { %v4558_v5 = vmul.f32 0.0, %v4551_v48  ;;  %v4559_v12 = vmul.f32 %v6823_v10, %v4547_v55  ;;  %v4572_v55 = vunpack.c.h.bf16 %v8682_v59 }
 0xffd   :  { %v6825_v21 = vpop.eup %6824 }
 0xffe   :  { %v8798_v16 = vadd.f32 %v4559_v12, %v4558_v5  ;;  %v4555_v4 = vmul.f32 0.5, %v6825_v21 }
0x1000   :  { %6826 = vtanh.f32 %v8798_v16  ;;  %v4556_v7 = vadd.f32 0.5, %v4555_v4 }
0x1006   :  { %v6827_v3 = vpop.eup %6826 }
0x1007   :  { %v4562_v54 = vmul.f32 %v6827_v3, %v4556_v7 }
0x1009   :  { %v4565_v14 = vpack.c.bf16 %v4562_v54, %v4562_v54 }
0x100b   :  { %4566 = vst [vmem:[%s9038_s4] sm:$0xf] %v4565_v14  ;;  %4583 = vmatmul.bf16.vlgmr.msrb.gmra.mxu0 %v4565_v14  ;;  %4596 = vmatmul.bf16.vlgmr.msrb.gmra.mxu1 %v4565_v14 }
0x100c   :  { %4609 = vmatmul.bf16.vlgmr.msrb.gmra.mxu2 %v4565_v14  ;;  %4622 = vmatmul.bf16.vlgmr.msrb.gmra.mxu3 %v4565_v14 }
0x100d   :  { %4749 = vmatpush.bf16.msrb.mxu0 %v8530_v8  ;;  %4762 = vmatpush.bf16.msrb.mxu1 %v8532_v18 }
0x100e   :  { %4775 = vmatpush.bf16.msrb.mxu2 %v8534_v26  ;;  %4788 = vmatpush.bf16.msrb.mxu3 %v8537_v46 }
0x1011   :  { %4750 = vmatpush.bf16.msrb.mxu0 %v8548_v35  ;;  %4763 = vmatpush.bf16.msrb.mxu1 %v8550_v36 }
0x1012   :  { %4776 = vmatpush.bf16.msrb.mxu2 %v8552_v58  ;;  %4789 = vmatpush.bf16.msrb.mxu3 %v8561_v13 }
0x1015   :  { %4751 = vmatpush.bf16.msrb.mxu0 %v8568_v33  ;;  %4764 = vmatpush.bf16.msrb.mxu1 %v8570_v24 }
0x1016   :  { %4777 = vmatpush.bf16.msrb.mxu2 %v8572_v28  ;;  %4790 = vmatpush.bf16.msrb.mxu3 %v8575_v2 }
0x1019   :  { %4752 = vmatpush.bf16.msrb.mxu0 %v8579_v57  ;;  %4765 = vmatpush.bf16.msrb.mxu1 %v8581_v41 }
0x101a   :  { %4778 = vmatpush.bf16.msrb.mxu2 %v8584_v0  ;;  %4791 = vmatpush.bf16.msrb.mxu3 %v8586_v38 }
0x101d   :  { %4753 = vmatpush.bf16.msrb.mxu0 %v8589_v56  ;;  %4766 = vmatpush.bf16.msrb.mxu1 %v8593_v61 }
0x101e   :  { %4779 = vmatpush.bf16.msrb.mxu2 %v8595_v53  ;;  %4792 = vmatpush.bf16.msrb.mxu3 %v8598_v15 }
0x1021   :  { %4754 = vmatpush.bf16.msrb.mxu0 %v8601_v11  ;;  %4767 = vmatpush.bf16.msrb.mxu1 %v8605_v31 }
0x1022   :  { %4780 = vmatpush.bf16.msrb.mxu2 %v8607_v9  ;;  %4793 = vmatpush.bf16.msrb.mxu3 %v8610_v47 }
0x1025   :  { %4755 = vmatpush.bf16.msrb.mxu0 %v8613_v44  ;;  %4768 = vmatpush.bf16.msrb.mxu1 %v8617_v49 }
0x1026   :  { %4781 = vmatpush.bf16.msrb.mxu2 %v8619_v25  ;;  %4794 = vmatpush.bf16.msrb.mxu3 %v8628_v62 }
0x1029   :  { %4756 = vmatpush.bf16.msrb.mxu0 %v8636_v27  ;;  %4769 = vmatpush.bf16.msrb.mxu1 %v8638_v60 }
0x102a   :  { %4782 = vmatpush.bf16.msrb.mxu2 %v8641_v32  ;;  %4795 = vmatpush.bf16.msrb.mxu3 %v8652_v51 }
0x1088   :  { %v4584_v23 = vpop.f32.mrf.mxu0  ;;  %v4597_v22 = vpop.f32.mrf.mxu1 }
0x1089   :  { %v4627_v29 = vadd.f32 %v4584_v23, %v4569_v1  ;;  %v4628_v39 = vadd.f32 %v4597_v22, %v4570_v19 }
0x108b   :  { %v4631_v43 = vmul.f32 0.5, %v4627_v29  ;;  %v4635_v17 = vmul.f32 0.5, %v4628_v39 }
0x108d   :  { %6828 = vtanh.f32 %v4631_v43 }
0x108e   :  { %6830 = vtanh.f32 %v4635_v17 }
0x108f   :  { %v4610_v48 = vpop.f32.mrf.mxu2  ;;  %v4623_v63 = vpop.f32.mrf.mxu3 }
0x1090   :  { %v4629_v20 = vadd.f32 %v4610_v48, %v4571_v40  ;;  %v4630_v10 = vadd.f32 %v4623_v63, %v4572_v55  ;;  %v4586_v5 = vpop.f32.mrf.mxu0  ;;  %v4599_v12 = vpop.f32.mrf.mxu1  ;;  %v4657_v63 = vunpack.c.h.bf16 %v8685_v34 }
0x1092   :  { %6832 = vtanh.f32 %v4629_v20  ;;  %v4640_v30 = vmul.f32 0.5, %v4630_v10 }
0x1093   :  { %v6829_v21 = vpop.eup %6828 }
0x1094   :  { %v6831_v4 = vpop.eup %6830  ;;  %v4633_v7 = vmul.f32 0.5, %v6829_v21  ;;  %6834 = vtanh.f32 %v4640_v30 }
0x1095   :  { %v4637_v3 = vmul.f32 0.5, %v6831_v4  ;;  %v4658_v4 = vunpack.c.l.bf16 %v8700_v6 }
0x1096   :  { %v4634_v54 = vadd.f32 0.5, %v4633_v7  ;;  %v4659_v7 = vunpack.c.h.bf16 %v8700_v6 }
0x1097   :  { %v4638_v14 = vadd.f32 0.5, %v4637_v3  ;;  %v4612_v1 = vpop.f32.mrf.mxu2  ;;  %v4625_v19 = vpop.f32.mrf.mxu3 }
0x1098   :  { %v6833_v23 = vpop.eup %6832 }
0x1099   :  { %v4645_v59 = vmul.f32 %v4638_v14, %v8798_v16  ;;  %v4646_v22 = vmul.f32 %v6833_v23, %v4634_v54  ;;  %v4656_v16 = vunpack.c.l.bf16 %v8685_v34 }
0x109a   :  { %v6835_v29 = vpop.eup %6834 }
0x109b   :  { %v8841_v39 = vadd.f32 %v4646_v22, %v4645_v59  ;;  %v4642_v43 = vmul.f32 0.5, %v6835_v29 }
0x109d   :  { %6836 = vtanh.f32 %v8841_v39  ;;  %v4643_v17 = vadd.f32 0.5, %v4642_v43 }
0x10a3   :  { %v6837_v40 = vpop.eup %6836 }
0x10a4   :  { %v4649_v55 = vmul.f32 %v6837_v40, %v4643_v17 }
0x10a6   :  { %v4652_v48 = vpack.c.bf16 %v4649_v55, %v4649_v55 }
0x10a8   :  { %6294 = vst [vmem:[%s9038_s4 + $0x4] sm:$0xf] %v4652_v48  ;;  %4670 = vmatmul.bf16.vlgmr.msra.gmra.mxu0 %v4652_v48  ;;  %4683 = vmatmul.bf16.vlgmr.msra.gmra.mxu1 %v4652_v48 }
0x10a9   :  { %4696 = vmatmul.bf16.vlgmr.msra.gmra.mxu2 %v4652_v48  ;;  %4709 = vmatmul.bf16.vlgmr.msra.gmra.mxu3 %v4652_v48 }
0x10aa   :  { %4836 = vmatpush.bf16.msra.mxu0 %v8530_v8  ;;  %4849 = vmatpush.bf16.msra.mxu1 %v8532_v18 }
0x10ab   :  { %4862 = vmatpush.bf16.msra.mxu2 %v8534_v26  ;;  %4875 = vmatpush.bf16.msra.mxu3 %v8537_v46 }
0x10ae   :  { %4837 = vmatpush.bf16.msra.mxu0 %v8548_v35  ;;  %4850 = vmatpush.bf16.msra.mxu1 %v8550_v36 }
0x10af   :  { %4863 = vmatpush.bf16.msra.mxu2 %v8552_v58  ;;  %4876 = vmatpush.bf16.msra.mxu3 %v8561_v13 }
0x10b2   :  { %4838 = vmatpush.bf16.msra.mxu0 %v8568_v33  ;;  %4851 = vmatpush.bf16.msra.mxu1 %v8570_v24 }
0x10b3   :  { %4864 = vmatpush.bf16.msra.mxu2 %v8572_v28  ;;  %4877 = vmatpush.bf16.msra.mxu3 %v8575_v2 }
0x10b6   :  { %4839 = vmatpush.bf16.msra.mxu0 %v8579_v57  ;;  %4852 = vmatpush.bf16.msra.mxu1 %v8581_v41 }
0x10b7   :  { %4865 = vmatpush.bf16.msra.mxu2 %v8584_v0  ;;  %4878 = vmatpush.bf16.msra.mxu3 %v8586_v38 }
0x10ba   :  { %4840 = vmatpush.bf16.msra.mxu0 %v8589_v56  ;;  %4853 = vmatpush.bf16.msra.mxu1 %v8593_v61 }
0x10bb   :  { %4866 = vmatpush.bf16.msra.mxu2 %v8595_v53  ;;  %4879 = vmatpush.bf16.msra.mxu3 %v8598_v15 }
0x10be   :  { %4841 = vmatpush.bf16.msra.mxu0 %v8601_v11  ;;  %4854 = vmatpush.bf16.msra.mxu1 %v8605_v31 }
0x10bf   :  { %4867 = vmatpush.bf16.msra.mxu2 %v8607_v9  ;;  %4880 = vmatpush.bf16.msra.mxu3 %v8610_v47 }
0x10c2   :  { %4842 = vmatpush.bf16.msra.mxu0 %v8613_v44  ;;  %4855 = vmatpush.bf16.msra.mxu1 %v8617_v49 }
0x10c3   :  { %4868 = vmatpush.bf16.msra.mxu2 %v8619_v25  ;;  %4881 = vmatpush.bf16.msra.mxu3 %v8628_v62 }
0x10c6   :  { %4843 = vmatpush.bf16.msra.mxu0 %v8636_v27  ;;  %4856 = vmatpush.bf16.msra.mxu1 %v8638_v60 }
0x10c7   :  { %4869 = vmatpush.bf16.msra.mxu2 %v8641_v32  ;;  %4882 = vmatpush.bf16.msra.mxu3 %v8652_v51 }
0x1125   :  { %v4671_v20 = vpop.f32.mrf.mxu0  ;;  %v4684_v10 = vpop.f32.mrf.mxu1 }
0x1126   :  { %v4714_v5 = vadd.f32 %v4671_v20, %v4656_v16  ;;  %v4715_v12 = vadd.f32 %v4684_v10, %v4657_v63 }
0x1128   :  { %v4718_v30 = vmul.f32 0.5, %v4714_v5  ;;  %v4722_v21 = vmul.f32 0.5, %v4715_v12 }
0x112a   :  { %6838 = vtanh.f32 %v4718_v30 }
0x112b   :  { %6840 = vtanh.f32 %v4722_v21 }
0x112c   :  { %v4697_v3 = vpop.f32.mrf.mxu2  ;;  %v4710_v54 = vpop.f32.mrf.mxu3 }
0x112d   :  { %v4716_v14 = vadd.f32 %v4697_v3, %v4658_v4  ;;  %v4717_v1 = vadd.f32 %v4710_v54, %v4659_v7  ;;  %v4673_v19 = vpop.f32.mrf.mxu0  ;;  %v4686_v23 = vpop.f32.mrf.mxu1  ;;  %v4744_v7 = vunpack.c.h.bf16 %v8702_v52 }
0x112f   :  { %6842 = vtanh.f32 %v4716_v14  ;;  %v4727_v34 = vmul.f32 0.5, %v4717_v1 }
0x1130   :  { %v6839_v59 = vpop.eup %6838 }
0x1131   :  { %v6841_v22 = vpop.eup %6840  ;;  %v4720_v29 = vmul.f32 0.5, %v6839_v59  ;;  %6844 = vtanh.f32 %v4727_v34  ;;  %v4745_v34 = vunpack.c.l.bf16 %v8716_v42  ;;  %v4746_v59 = vunpack.c.h.bf16 %v8716_v42 }
0x1132   :  { %v4724_v43 = vmul.f32 0.5, %v6841_v22 }
0x1133   :  { %v4721_v17 = vadd.f32 0.5, %v4720_v29 }
0x1134   :  { %v4725_v40 = vadd.f32 0.5, %v4724_v43  ;;  %v4699_v55 = vpop.f32.mrf.mxu2  ;;  %v4712_v48 = vpop.f32.mrf.mxu3 }
0x1135   :  { %v6843_v16 = vpop.eup %6842 }
0x1136   :  { %v4732_v6 = vmul.f32 %v4725_v40, %v8841_v39  ;;  %v4733_v63 = vmul.f32 %v6843_v16, %v4721_v17  ;;  %v4743_v39 = vunpack.c.l.bf16 %v8702_v52 }
0x1137   :  { %v6845_v20 = vpop.eup %6844 }
0x1138   :  { %v8884_v10 = vadd.f32 %v4733_v63, %v4732_v6  ;;  %v4729_v5 = vmul.f32 0.5, %v6845_v20 }
0x113a   :  { %6846 = vtanh.f32 %v8884_v10  ;;  %v4730_v12 = vadd.f32 0.5, %v4729_v5 }
0x1140   :  { %v6847_v30 = vpop.eup %6846 }
0x1141   :  { %v4736_v21 = vmul.f32 %v6847_v30, %v4730_v12 }
0x1143   :  { %v4739_v4 = vpack.c.bf16 %v4736_v21, %v4736_v21 }
0x1145   :  { %6295 = vst [vmem:[%s9038_s4 + $0x8] sm:$0xf] %v4739_v4  ;;  %4757 = vmatmul.bf16.vlgmr.msrb.gmra.mxu0 %v4739_v4  ;;  %4770 = vmatmul.bf16.vlgmr.msrb.gmra.mxu1 %v4739_v4 }
0x1146   :  { %4783 = vmatmul.bf16.vlgmr.msrb.gmra.mxu2 %v4739_v4  ;;  %4796 = vmatmul.bf16.vlgmr.msrb.gmra.mxu3 %v4739_v4 }
0x1147   :  { %4923 = vmatpush.bf16.msrb.mxu0 %v8530_v8  ;;  %4936 = vmatpush.bf16.msrb.mxu1 %v8532_v18 }
0x1148   :  { %4949 = vmatpush.bf16.msrb.mxu2 %v8534_v26  ;;  %4962 = vmatpush.bf16.msrb.mxu3 %v8537_v46 }
0x114b   :  { %4924 = vmatpush.bf16.msrb.mxu0 %v8548_v35  ;;  %4937 = vmatpush.bf16.msrb.mxu1 %v8550_v36 }
0x114c   :  { %4950 = vmatpush.bf16.msrb.mxu2 %v8552_v58  ;;  %4963 = vmatpush.bf16.msrb.mxu3 %v8561_v13 }
0x114f   :  { %4925 = vmatpush.bf16.msrb.mxu0 %v8568_v33  ;;  %4938 = vmatpush.bf16.msrb.mxu1 %v8570_v24 }
0x1150   :  { %4951 = vmatpush.bf16.msrb.mxu2 %v8572_v28  ;;  %4964 = vmatpush.bf16.msrb.mxu3 %v8575_v2 }
0x1153   :  { %4926 = vmatpush.bf16.msrb.mxu0 %v8579_v57  ;;  %4939 = vmatpush.bf16.msrb.mxu1 %v8581_v41 }
0x1154   :  { %4952 = vmatpush.bf16.msrb.mxu2 %v8584_v0  ;;  %4965 = vmatpush.bf16.msrb.mxu3 %v8586_v38 }
0x1157   :  { %4927 = vmatpush.bf16.msrb.mxu0 %v8589_v56  ;;  %4940 = vmatpush.bf16.msrb.mxu1 %v8593_v61 }
0x1158   :  { %4953 = vmatpush.bf16.msrb.mxu2 %v8595_v53  ;;  %4966 = vmatpush.bf16.msrb.mxu3 %v8598_v15 }
0x115b   :  { %4928 = vmatpush.bf16.msrb.mxu0 %v8601_v11  ;;  %4941 = vmatpush.bf16.msrb.mxu1 %v8605_v31 }
0x115c   :  { %4954 = vmatpush.bf16.msrb.mxu2 %v8607_v9  ;;  %4967 = vmatpush.bf16.msrb.mxu3 %v8610_v47 }
0x115f   :  { %4929 = vmatpush.bf16.msrb.mxu0 %v8613_v44  ;;  %4942 = vmatpush.bf16.msrb.mxu1 %v8617_v49 }
0x1160   :  { %4955 = vmatpush.bf16.msrb.mxu2 %v8619_v25  ;;  %4968 = vmatpush.bf16.msrb.mxu3 %v8628_v62 }
0x1163   :  { %4930 = vmatpush.bf16.msrb.mxu0 %v8636_v27  ;;  %4943 = vmatpush.bf16.msrb.mxu1 %v8638_v60 }
0x1164   :  { %4956 = vmatpush.bf16.msrb.mxu2 %v8641_v32  ;;  %4969 = vmatpush.bf16.msrb.mxu3 %v8652_v51 }
0x11c2   :  { %v4758_v3 = vpop.f32.mrf.mxu0  ;;  %v4771_v54 = vpop.f32.mrf.mxu1 }
0x11c3   :  { %v4801_v14 = vadd.f32 %v4758_v3, %v4743_v39  ;;  %v4802_v1 = vadd.f32 %v4771_v54, %v4744_v7 }
0x11c5   :  { %v4805_v19 = vmul.f32 0.5, %v4801_v14  ;;  %v4809_v23 = vmul.f32 0.5, %v4802_v1 }
0x11c7   :  { %6848 = vtanh.f32 %v4805_v19 }
0x11c8   :  { %6850 = vtanh.f32 %v4809_v23  ;;  %v4831_v23 = vunpack.c.h.bf16 %v8718_v45 }
0x11c9   :  { %v4784_v22 = vpop.f32.mrf.mxu2  ;;  %v4797_v29 = vpop.f32.mrf.mxu3 }
0x11ca   :  { %v4803_v43 = vadd.f32 %v4784_v22, %v4745_v34  ;;  %v4804_v17 = vadd.f32 %v4797_v29, %v4746_v59  ;;  %v4760_v40 = vpop.f32.mrf.mxu0  ;;  %v4773_v55 = vpop.f32.mrf.mxu1 }
0x11cb   :  { %v4832_v40 = vunpack.c.l.bf16 %v8730_v50  ;;  %v4833_v55 = vunpack.c.h.bf16 %v8730_v50 }
0x11cc   :  { %6852 = vtanh.f32 %v4803_v43  ;;  %v4814_v52 = vmul.f32 0.5, %v4804_v17 }
0x11cd   :  { %v6849_v48 = vpop.eup %6848 }
0x11ce   :  { %v6851_v16 = vpop.eup %6850  ;;  %v4807_v6 = vmul.f32 0.5, %v6849_v48  ;;  %6854 = vtanh.f32 %v4814_v52 }
0x11cf   :  { %v4811_v63 = vmul.f32 0.5, %v6851_v16 }
0x11d0   :  { %v4808_v20 = vadd.f32 0.5, %v4807_v6 }
0x11d1   :  { %v4812_v5 = vadd.f32 0.5, %v4811_v63  ;;  %v4786_v12 = vpop.f32.mrf.mxu2  ;;  %v4799_v30 = vpop.f32.mrf.mxu3 }
0x11d2   :  { %v6853_v21 = vpop.eup %6852 }
0x11d3   :  { %v4819_v42 = vmul.f32 %v4812_v5, %v8884_v10  ;;  %v4820_v4 = vmul.f32 %v6853_v21, %v4808_v20  ;;  %v4830_v10 = vunpack.c.l.bf16 %v8718_v45 }
0x11d4   :  { %v6855_v39 = vpop.eup %6854 }
0x11d5   :  { %v8927_v7 = vadd.f32 %v4820_v4, %v4819_v42  ;;  %v4816_v3 = vmul.f32 0.5, %v6855_v39 }
0x11d7   :  { %6856 = vtanh.f32 %v8927_v7  ;;  %v4817_v54 = vadd.f32 0.5, %v4816_v3 }
0x11dd   :  { %v6857_v14 = vpop.eup %6856 }
0x11de   :  { %v4823_v1 = vmul.f32 %v6857_v14, %v4817_v54 }
0x11e0   :  { %v4826_v19 = vpack.c.bf16 %v4823_v1, %v4823_v1 }
0x11e2   :  { %6296 = vst [vmem:[%s9038_s4 + $0xc] sm:$0xf] %v4826_v19  ;;  %4844 = vmatmul.bf16.vlgmr.msra.gmra.mxu0 %v4826_v19  ;;  %4857 = vmatmul.bf16.vlgmr.msra.gmra.mxu1 %v4826_v19 }
0x11e3   :  { %4870 = vmatmul.bf16.vlgmr.msra.gmra.mxu2 %v4826_v19  ;;  %4883 = vmatmul.bf16.vlgmr.msra.gmra.mxu3 %v4826_v19 }
0x11e4   :  { %5010 = vmatpush.bf16.msra.mxu0 %v8530_v8  ;;  %5023 = vmatpush.bf16.msra.mxu1 %v8532_v18 }
0x11e5   :  { %5036 = vmatpush.bf16.msra.mxu2 %v8534_v26  ;;  %5049 = vmatpush.bf16.msra.mxu3 %v8537_v46 }
0x11e8   :  { %5011 = vmatpush.bf16.msra.mxu0 %v8548_v35  ;;  %5024 = vmatpush.bf16.msra.mxu1 %v8550_v36 }
0x11e9   :  { %5037 = vmatpush.bf16.msra.mxu2 %v8552_v58  ;;  %5050 = vmatpush.bf16.msra.mxu3 %v8561_v13 }
0x11ec   :  { %5012 = vmatpush.bf16.msra.mxu0 %v8568_v33  ;;  %5025 = vmatpush.bf16.msra.mxu1 %v8570_v24 }
0x11ed   :  { %5038 = vmatpush.bf16.msra.mxu2 %v8572_v28  ;;  %5051 = vmatpush.bf16.msra.mxu3 %v8575_v2 }
0x11f0   :  { %5013 = vmatpush.bf16.msra.mxu0 %v8579_v57  ;;  %5026 = vmatpush.bf16.msra.mxu1 %v8581_v41 }
0x11f1   :  { %5039 = vmatpush.bf16.msra.mxu2 %v8584_v0  ;;  %5052 = vmatpush.bf16.msra.mxu3 %v8586_v38 }
0x11f4   :  { %5014 = vmatpush.bf16.msra.mxu0 %v8589_v56  ;;  %5027 = vmatpush.bf16.msra.mxu1 %v8593_v61 }
0x11f5   :  { %5040 = vmatpush.bf16.msra.mxu2 %v8595_v53  ;;  %5053 = vmatpush.bf16.msra.mxu3 %v8598_v15 }
0x11f8   :  { %5015 = vmatpush.bf16.msra.mxu0 %v8601_v11  ;;  %5028 = vmatpush.bf16.msra.mxu1 %v8605_v31 }
0x11f9   :  { %5041 = vmatpush.bf16.msra.mxu2 %v8607_v9  ;;  %5054 = vmatpush.bf16.msra.mxu3 %v8610_v47 }
0x11fc   :  { %5016 = vmatpush.bf16.msra.mxu0 %v8613_v44  ;;  %5029 = vmatpush.bf16.msra.mxu1 %v8617_v49 }
0x11fd   :  { %5042 = vmatpush.bf16.msra.mxu2 %v8619_v25  ;;  %5055 = vmatpush.bf16.msra.mxu3 %v8628_v62 }
0x1200   :  { %5017 = vmatpush.bf16.msra.mxu0 %v8636_v27  ;;  %5030 = vmatpush.bf16.msra.mxu1 %v8638_v60 }
0x1201   :  { %5043 = vmatpush.bf16.msra.mxu2 %v8641_v32  ;;  %5056 = vmatpush.bf16.msra.mxu3 %v8652_v51 }
0x125f   :  { %v4845_v34 = vpop.f32.mrf.mxu0  ;;  %v4858_v59 = vpop.f32.mrf.mxu1 }
0x1260   :  { %v4888_v22 = vadd.f32 %v4845_v34, %v4830_v10  ;;  %v4889_v29 = vadd.f32 %v4858_v59, %v4831_v23 }
0x1262   :  { %v4892_v43 = vmul.f32 0.5, %v4888_v22  ;;  %v4896_v17 = vmul.f32 0.5, %v4889_v29 }
0x1264   :  { %6858 = vtanh.f32 %v4892_v43 }
0x1265   :  { %6860 = vtanh.f32 %v4896_v17 }
0x1266   :  { %v4871_v52 = vpop.f32.mrf.mxu2  ;;  %v4884_v48 = vpop.f32.mrf.mxu3 }
0x1267   :  { %v4890_v16 = vadd.f32 %v4871_v52, %v4832_v40  ;;  %v4891_v6 = vadd.f32 %v4884_v48, %v4833_v55  ;;  %v4847_v63 = vpop.f32.mrf.mxu0  ;;  %v4860_v20 = vpop.f32.mrf.mxu1 }
0x1269   :  { %6862 = vtanh.f32 %v4890_v16  ;;  %v4901_v45 = vmul.f32 0.5, %v4891_v6 }
0x126a   :  { %v6859_v5 = vpop.eup %6858 }
0x126b   :  { %v6861_v12 = vpop.eup %6860  ;;  %v4894_v30 = vmul.f32 0.5, %v6859_v5  ;;  %6864 = vtanh.f32 %v4901_v45 }
0x126c   :  { %v4898_v21 = vmul.f32 0.5, %v6861_v12 }
0x126d   :  { %v4895_v42 = vadd.f32 0.5, %v4894_v30 }
0x126e   :  { %v4899_v4 = vadd.f32 0.5, %v4898_v21  ;;  %v4873_v39 = vpop.f32.mrf.mxu2  ;;  %v4886_v3 = vpop.f32.mrf.mxu3 }
0x126f   :  { %v6863_v54 = vpop.eup %6862 }
0x1270   :  { %v4906_v50 = vmul.f32 %v4899_v4, %v8927_v7  ;;  %v4907_v14 = vmul.f32 %v6863_v54, %v4895_v42  ;;  %v9165_v42 = vld [vmem:[#allocation19_spill] sm:$0xff] }
0x1271   :  { %v6865_v1 = vpop.eup %6864  ;;  %v5004_v4 = vunpack.c.l.bf16 %v9165_v42  ;;  %v5005_v39 = vunpack.c.h.bf16 %v9165_v42 }
0x1272   :  { %v8970_v19 = vadd.f32 %v4907_v14, %v4906_v50  ;;  %v4903_v10 = vmul.f32 0.5, %v6865_v1 }
0x1274   :  { %6866 = vtanh.f32 %v8970_v19  ;;  %v4904_v23 = vadd.f32 0.5, %v4903_v10  ;;  %v9166_v10 = vld [vmem:[#allocation20_spill] sm:$0xff] }
0x127a   :  { %v6867_v34 = vpop.eup %6866 }
0x127b   :  { %v4910_v59 = vmul.f32 %v6867_v34, %v4904_v23  ;;  %v5006_v23 = vunpack.c.l.bf16 %v9166_v10  ;;  %v5007_v34 = vunpack.c.h.bf16 %v9166_v10 }
0x127d   :  { %v4913_v22 = vpack.c.bf16 %v4910_v59, %v4910_v59 }
0x127f   :  { %6297 = vst [vmem:[%s9038_s4 + $0x10] sm:$0xf] %v4913_v22  ;;  %4931 = vmatmul.bf16.vlgmr.msrb.gmra.mxu0 %v4913_v22  ;;  %4944 = vmatmul.bf16.vlgmr.msrb.gmra.mxu1 %v4913_v22 }
0x1280   :  { %4957 = vmatmul.bf16.vlgmr.msrb.gmra.mxu2 %v4913_v22  ;;  %4970 = vmatmul.bf16.vlgmr.msrb.gmra.mxu3 %v4913_v22 }
0x1281   :  { %5097 = vmatpush.bf16.msrb.mxu0 %v8530_v8  ;;  %5110 = vmatpush.bf16.msrb.mxu1 %v8532_v18  ;;  %v9157_v8 = vld [vmem:[#allocation12_spill] sm:$0xff]  ;;  %v9158_v18 = vld [vmem:[#allocation15_spill] sm:$0xff] }
0x1282   :  { %5123 = vmatpush.bf16.msrb.mxu2 %v8534_v26  ;;  %5136 = vmatpush.bf16.msrb.mxu3 %v8537_v46  ;;  %v4192_v26 = vadd.f32 %v9158_v18, %v9157_v8  ;;  %v9159_v46 = vld [vmem:[#allocation13_spill] sm:$0xff] }
0x1285   :  { %5098 = vmatpush.bf16.msrb.mxu0 %v8548_v35  ;;  %5111 = vmatpush.bf16.msrb.mxu1 %v8550_v36  ;;  %v9160_v35 = vld [vmem:[#allocation16_spill] sm:$0xff] }
0x1286   :  { %5124 = vmatpush.bf16.msrb.mxu2 %v8552_v58  ;;  %5137 = vmatpush.bf16.msrb.mxu3 %v8561_v13  ;;  %v4221_v36 = vadd.f32 %v9160_v35, %v9159_v46  ;;  %v9161_v13 = vld [vmem:[#allocation11_spill] sm:$0xff] }
0x1288   :  { %v4296_v58 = vpack.c.bf16 %v4221_v36, %v4192_v26 }
0x1289   :  { %5099 = vmatpush.bf16.msrb.mxu0 %v8568_v33  ;;  %5112 = vmatpush.bf16.msrb.mxu1 %v8570_v24  ;;  %v9162_v33 = vld [vmem:[#allocation17_spill] sm:$0xff] }
0x128a   :  { %5125 = vmatpush.bf16.msrb.mxu2 %v8572_v28  ;;  %5138 = vmatpush.bf16.msrb.mxu3 %v8575_v2  ;;  %v4250_v24 = vadd.f32 %v9162_v33, %v9161_v13  ;;  %v9163_v28 = vld [vmem:[#allocation14_spill] sm:$0xff] }
0x128b   :  { %v9164_v2 = vld [vmem:[#allocation18_spill] sm:$0xff] }
0x128d   :  { %5100 = vmatpush.bf16.msrb.mxu0 %v8579_v57  ;;  %5113 = vmatpush.bf16.msrb.mxu1 %v8581_v41  ;;  %v4279_v57 = vadd.f32 %v9164_v2, %v9163_v28  ;;  %v4917_v41 = vunpack.c.l.bf16 %v4296_v58 }
0x128e   :  { %5126 = vmatpush.bf16.msrb.mxu2 %v8584_v0  ;;  %5139 = vmatpush.bf16.msrb.mxu3 %v8586_v38  ;;  %v4918_v0 = vunpack.c.h.bf16 %v4296_v58 }
0x1291   :  { %5101 = vmatpush.bf16.msrb.mxu0 %v8589_v56  ;;  %5114 = vmatpush.bf16.msrb.mxu1 %v8593_v61 }
0x1292   :  { %5127 = vmatpush.bf16.msrb.mxu2 %v8595_v53  ;;  %5140 = vmatpush.bf16.msrb.mxu3 %v8598_v15  ;;  %v4297_v15 = vpack.c.bf16 %v4279_v57, %v4250_v24 }
0x1295   :  { %5102 = vmatpush.bf16.msrb.mxu0 %v8601_v11  ;;  %5115 = vmatpush.bf16.msrb.mxu1 %v8605_v31 }
0x1296   :  { %5128 = vmatpush.bf16.msrb.mxu2 %v8607_v9  ;;  %5141 = vmatpush.bf16.msrb.mxu3 %v8610_v47  ;;  %v4919_v9 = vunpack.c.l.bf16 %v4297_v15  ;;  %v4920_v47 = vunpack.c.h.bf16 %v4297_v15 }
0x1299   :  { %5103 = vmatpush.bf16.msrb.mxu0 %v8613_v44  ;;  %5116 = vmatpush.bf16.msrb.mxu1 %v8617_v49 }
0x129a   :  { %5129 = vmatpush.bf16.msrb.mxu2 %v8619_v25  ;;  %5142 = vmatpush.bf16.msrb.mxu3 %v8628_v62 }
0x129d   :  { %5104 = vmatpush.bf16.msrb.mxu0 %v8636_v27  ;;  %5117 = vmatpush.bf16.msrb.mxu1 %v8638_v60 }
0x129e   :  { %5130 = vmatpush.bf16.msrb.mxu2 %v8641_v32  ;;  %5143 = vmatpush.bf16.msrb.mxu3 %v8652_v51 }
0x12fc   :  { %v4932_v38 = vpop.f32.mrf.mxu0  ;;  %v4945_v56 = vpop.f32.mrf.mxu1 }
0x12fd   :  { %v4975_v61 = vadd.f32 %v4932_v38, %v4917_v41  ;;  %v4976_v53 = vadd.f32 %v4945_v56, %v4918_v0 }
0x12ff   :  { %v4979_v11 = vmul.f32 0.5, %v4975_v61  ;;  %v4983_v31 = vmul.f32 0.5, %v4976_v53 }
0x1301   :  { %6868 = vtanh.f32 %v4979_v11 }
0x1302   :  { %6870 = vtanh.f32 %v4983_v31 }
0x1303   :  { %v4958_v44 = vpop.f32.mrf.mxu2  ;;  %v4971_v49 = vpop.f32.mrf.mxu3 }
0x1304   :  { %v4977_v25 = vadd.f32 %v4958_v44, %v4919_v9  ;;  %v4978_v62 = vadd.f32 %v4971_v49, %v4920_v47  ;;  %v4934_v27 = vpop.f32.mrf.mxu0  ;;  %v4947_v60 = vpop.f32.mrf.mxu1  ;;  %v9167_v47 = vld [vmem:[#allocation21_spill] sm:$0xff] }
0x1305   :  { %v5091_v44 = vunpack.c.l.bf16 %v9167_v47  ;;  %v5092_v49 = vunpack.c.h.bf16 %v9167_v47 }
0x1306   :  { %6872 = vtanh.f32 %v4977_v25  ;;  %v4988_v32 = vmul.f32 0.5, %v4978_v62 }
0x1307   :  { %v6869_v51 = vpop.eup %6868 }
0x1308   :  { %v6871_v7 = vpop.eup %6870  ;;  %v4981_v29 = vmul.f32 0.5, %v6869_v51  ;;  %6874 = vtanh.f32 %v4988_v32 }
0x1309   :  { %v4985_v43 = vmul.f32 0.5, %v6871_v7  ;;  %v5093_v7 = vunpack.c.l.bf16 %v8796_v37 }
0x130a   :  { %v4982_v17 = vadd.f32 0.5, %v4981_v29  ;;  %v5094_v29 = vunpack.c.h.bf16 %v8796_v37 }
0x130b   :  { %v4986_v40 = vadd.f32 0.5, %v4985_v43  ;;  %v4960_v55 = vpop.f32.mrf.mxu2  ;;  %v4973_v52 = vpop.f32.mrf.mxu3 }
0x130c   :  { %v6873_v48 = vpop.eup %6872 }
0x130d   :  { %v4993_v16 = vmul.f32 %v4986_v40, %v8970_v19  ;;  %v4994_v6 = vmul.f32 %v6873_v48, %v4982_v17 }
0x130e   :  { %v6875_v63 = vpop.eup %6874 }
0x130f   :  { %v4995_v20 = vadd.f32 %v4994_v6, %v4993_v16  ;;  %v4990_v45 = vmul.f32 0.5, %v6875_v63 }
0x1311   :  { %6876 = vtanh.f32 %v4995_v20  ;;  %v4991_v5 = vadd.f32 0.5, %v4990_v45 }
0x1317   :  { %v6877_v12 = vpop.eup %6876 }
0x1318   :  { %v4997_v30 = vmul.f32 %v6877_v12, %v4991_v5 }
0x131a   :  { %v5000_v21 = vpack.c.bf16 %v4997_v30, %v4997_v30 }
0x131c   :  { %6298 = vst [vmem:[%s9038_s4 + $0x14] sm:$0xf] %v5000_v21  ;;  %5018 = vmatmul.bf16.vlgmr.msra.gmra.mxu0 %v5000_v21  ;;  %5031 = vmatmul.bf16.vlgmr.msra.gmra.mxu1 %v5000_v21 }
0x131d   :  { %5044 = vmatmul.bf16.vlgmr.msra.gmra.mxu2 %v5000_v21  ;;  %5057 = vmatmul.bf16.vlgmr.msra.gmra.mxu3 %v5000_v21 }
0x1399   :  { %v5019_v3 = vpop.f32.mrf.mxu0  ;;  %v5032_v54 = vpop.f32.mrf.mxu1 }
0x139a   :  { %v5062_v50 = vadd.f32 %v5019_v3, %v5004_v4  ;;  %v5063_v14 = vadd.f32 %v5032_v54, %v5005_v39 }
0x139c   :  { %v5066_v1 = vmul.f32 0.5, %v5062_v50  ;;  %v5070_v19 = vmul.f32 0.5, %v5063_v14 }
0x139e   :  { %6878 = vtanh.f32 %v5066_v1 }
0x139f   :  { %6880 = vtanh.f32 %v5070_v19 }
0x13a0   :  { %v5045_v59 = vpop.f32.mrf.mxu2  ;;  %v5058_v22 = vpop.f32.mrf.mxu3 }
0x13a1   :  { %v5064_v8 = vadd.f32 %v5045_v59, %v5006_v23  ;;  %v5065_v18 = vadd.f32 %v5058_v22, %v5007_v34  ;;  %v5021_v26 = vpop.f32.mrf.mxu0  ;;  %v5034_v46 = vpop.f32.mrf.mxu1 }
0x13a3   :  { %6882 = vtanh.f32 %v5064_v8  ;;  %v5075_v35 = vmul.f32 0.5, %v5065_v18 }
0x13a4   :  { %v6879_v36 = vpop.eup %6878 }
0x13a5   :  { %v6881_v58 = vpop.eup %6880  ;;  %v5068_v13 = vmul.f32 0.5, %v6879_v36  ;;  %6884 = vtanh.f32 %v5075_v35 }
0x13a6   :  { %v5072_v33 = vmul.f32 0.5, %v6881_v58 }
0x13a7   :  { %v5069_v24 = vadd.f32 0.5, %v5068_v13 }
0x13a8   :  { %v5073_v28 = vadd.f32 0.5, %v5072_v33  ;;  %v5047_v2 = vpop.f32.mrf.mxu2  ;;  %v5060_v57 = vpop.f32.mrf.mxu3 }
0x13a9   :  { %v6883_v41 = vpop.eup %6882 }
0x13aa   :  { %v5080_v0 = vmul.f32 %v5073_v28, %v4995_v20  ;;  %v5081_v38 = vmul.f32 %v6883_v41, %v5069_v24 }
0x13ab   :  { %v6885_v56 = vpop.eup %6884 }
0x13ac   :  { %v5082_v61 = vadd.f32 %v5081_v38, %v5080_v0  ;;  %v5077_v53 = vmul.f32 0.5, %v6885_v56 }
0x13ae   :  { %6886 = vtanh.f32 %v5082_v61  ;;  %v5078_v15 = vadd.f32 0.5, %v5077_v53 }
0x13b4   :  { %v6887_v11 = vpop.eup %6886 }
0x13b5   :  { %v5084_v31 = vmul.f32 %v6887_v11, %v5078_v15 }
0x13b7   :  { %v5087_v9 = vpack.c.bf16 %v5084_v31, %v5084_v31 }
0x13b9   :  { %6299 = vst [vmem:[%s9038_s4 + $0x18] sm:$0xf] %v5087_v9  ;;  %5105 = vmatmul.bf16.vlgmr.msrb.gmra.mxu0 %v5087_v9  ;;  %5118 = vmatmul.bf16.vlgmr.msrb.gmra.mxu1 %v5087_v9 }
0x13ba   :  { %5131 = vmatmul.bf16.vlgmr.msrb.gmra.mxu2 %v5087_v9  ;;  %5144 = vmatmul.bf16.vlgmr.msrb.gmra.mxu3 %v5087_v9 }
0x1436   :  { %v5106_v25 = vpop.f32.mrf.mxu0  ;;  %v5119_v62 = vpop.f32.mrf.mxu1 }
0x1437   :  { %v5149_v27 = vadd.f32 %v5106_v25, %v5091_v44  ;;  %v5150_v60 = vadd.f32 %v5119_v62, %v5092_v49 }
0x1439   :  { %v5153_v32 = vmul.f32 0.5, %v5149_v27  ;;  %v5157_v51 = vmul.f32 0.5, %v5150_v60 }
0x143b   :  { %6888 = vtanh.f32 %v5153_v32 }
0x143c   :  { %6890 = vtanh.f32 %v5157_v51 }
0x143d   :  { %v5132_v43 = vpop.f32.mrf.mxu2  ;;  %v5145_v17 = vpop.f32.mrf.mxu3 }
0x143e   :  { %v5151_v40 = vadd.f32 %v5132_v43, %v5093_v7  ;;  %v5152_v55 = vadd.f32 %v5145_v17, %v5094_v29  ;;  %v5108_v52 = vpop.f32.mrf.mxu0  ;;  %v5121_v48 = vpop.f32.mrf.mxu1 }
0x1440   :  { %6892 = vtanh.f32 %v5151_v40  ;;  %v5162_v16 = vmul.f32 0.5, %v5152_v55 }
0x1441   :  { %v6889_v6 = vpop.eup %6888 }
0x1442   :  { %v6891_v63 = vpop.eup %6890  ;;  %v5155_v20 = vmul.f32 0.5, %v6889_v6  ;;  %6894 = vtanh.f32 %v5162_v16 }
0x1443   :  { %v5159_v45 = vmul.f32 0.5, %v6891_v63 }
0x1444   :  { %v5156_v5 = vadd.f32 0.5, %v5155_v20 }
0x1445   :  { %v5160_v12 = vadd.f32 0.5, %v5159_v45  ;;  %v5134_v30 = vpop.f32.mrf.mxu2  ;;  %v5147_v21 = vpop.f32.mrf.mxu3 }
0x1446   :  { %v6893_v42 = vpop.eup %6892 }
0x1447   :  { %v5167_v4 = vmul.f32 %v5160_v12, %v5082_v61  ;;  %v5168_v37 = vmul.f32 %v6893_v42, %v5156_v5 }
0x1448   :  { %v6895_v39 = vpop.eup %6894 }
0x1449   :  { %v5169_v3 = vadd.f32 %v5168_v37, %v5167_v4  ;;  %v5164_v54 = vmul.f32 0.5, %v6895_v39 }
0x144b   :  { %6896 = vtanh.f32 %v5169_v3  ;;  %v5165_v50 = vadd.f32 0.5, %v5164_v54 }
0x1451   :  { %v6897_v14 = vpop.eup %6896 }
0x1452   :  { %v5171_v1 = vmul.f32 %v6897_v14, %v5165_v50 }
0x1454   :  { %v5174_v19 = vpack.c.bf16 %v5171_v1, %v5171_v1 }
0x1456   :  { %6300 = vst [vmem:[%s9038_s4 + $0x1c] sm:$0xf] %v5174_v19 }
0x1457   :  { %5180 = vsyncpa [#allocation6], 1 }
0x1458   :  { %5181 = vsyncpa [#allocation8], 1 }

</bundles_post_ra>
